<compile_context>
chip_gen: v5e
topology: v5e:2x2
jax: 0.10.0
libtpu: 0.0.40
codegen_flags: <defaults>
</compile_context>

<pallas_src>
import functools

import jax
import jax.numpy as jnp
import numpy as np
from jax.experimental import pallas as pl
from jax.experimental.pallas import tpu as pltpu


_CHANNELS = [(3, 16), (16, 32), (32, 48), (48, 64), (64, 96),
             (96, 96), (96, 96), (96, 96), (96, 96), (96, 10)]
_IMG = 32                                          # CIFAR10 spatial size
_SPATIAL = [_IMG // (2 ** i) for i in range(5)]    # H=W at the input of conv1..5
_CHUNK0 = 256                                      # M-chunk for conv1 (im2col)
_K0 = 32                                           # conv1 im2col K (27 padded)


def _fused_net_kernel(*refs, batch_block):
    B = batch_block
    nl = len(_CHANNELS)
    i = 0
    x_ref = refs[i]; i += 1                    # (B*1024, 32) bf16 im2col patches
    w_refs = refs[i:i + nl]; i += nl           # w0:(32,16); w1..4:(3,3,Ci,Co); w5..9:(96,Co)
    b_refs = refs[i:i + nl]; i += nl           # (1, Cout) f32
    o_ref = refs[i]; i += 1                    # (1, B, 10) f32
    ap_refs = refs[i:i + 4]; i += 4            # zero-haloed inputs of conv2..conv5 (bf16)
    vs_refs = refs[i:i + 5]; i += 5            # vertically pooled rows, conv1..conv5 (f32)
    tail_ref = refs[i]; i += 1                 # (B, 96) bf16, conv5 pooled -> tail input

    # ---- zero ONLY the halo rows of the staged activation buffers ----------
    # Body rows are fully overwritten every grid step, halos are never written.
    for l in range(1, 5):
        H = _SPATIAL[l]; HW = H * H; pad = H + 1; L = HW + 2 * pad
        cin = _CHANNELS[l][0]
        ap = ap_refs[l - 1]
        zpad = jnp.zeros((pad, cin), jnp.bfloat16)
        for b in range(B):
            ap[b * L:b * L + pad, :] = zpad
            ap[b * L + pad + HW:(b + 1) * L, :] = zpad

    # ---- conv1: im2col K=32 matmul, fused bias + ReLU + 2x2 maxpool ---------
    W0 = _IMG; HW0 = W0 * W0; HW0_2 = HW0 // 2; HW0_4 = HW0 // 4
    nchunks0 = HW0 // _CHUNK0
    nvr0 = _CHUNK0 // (2 * W0)
    H1 = _SPATIAL[1]; L1 = H1 * H1 + 2 * (H1 + 1); pad1 = H1 + 1
    vs0 = vs_refs[0]
    w0 = w_refs[0][...]                                          # (32, 16) bf16
    bias0 = jnp.broadcast_to(b_refs[0][...], (_CHUNK0, _CHANNELS[0][1]))
    for b in range(B):
        for c in range(nchunks0):
            cs = c * _CHUNK0
            z = jnp.dot(x_ref[b * HW0 + cs:b * HW0 + cs + _CHUNK0, :], w0,
                        preferred_element_type=jnp.float32)
            z = jnp.maximum(z + bias0, 0.0)                      # (256, 16) f32
            # vertical half of the 2x2 pool, straight from registers
            for r in range(nvr0):
                top = z[(2 * r) * W0:(2 * r + 1) * W0, :]
                bot = z[(2 * r + 1) * W0:(2 * r + 2) * W0, :]
                vrow = c * nvr0 + r
                vs0[b * HW0_2 + vrow * W0:b * HW0_2 + (vrow + 1) * W0, :] = \
                    jnp.maximum(top, bot)
        # horizontal half: one stride-2 sublane read pair
        pooled = jnp.maximum(vs0[pl.ds(b * HW0_2, HW0_4, stride=2), :],
                             vs0[pl.ds(b * HW0_2 + 1, HW0_4, stride=2), :])
        ap_refs[0][b * L1 + pad1:b * L1 + pad1 + HW0_4, :] = \
            pooled.astype(jnp.bfloat16)

    # ---- conv2..conv5: 9-tap matmuls (whole image = one <=256-row M chunk),
    #      fused bias + ReLU + 2x2 maxpool ------------------------------------
    for l in range(1, 5):
        H = _SPATIAL[l]; W = H; HW = H * H; pad = W + 1; L = HW + 2 * pad
        cin, cout = _CHANNELS[l]
        HW2 = HW // 2; HW4 = HW // 4
        ap, vs = ap_refs[l - 1], vs_refs[l]
        w_ref = w_refs[l]
        bias_full = jnp.broadcast_to(b_refs[l][...], (HW, cout))
        # edge masks, materialized once per layer at full (HW, Cin)
        col = jax.lax.broadcasted_iota(jnp.int32, (HW, 1), 0) % W
        m_left = jnp.broadcast_to(col != 0, (HW, cin)).astype(jnp.bfloat16)
        m_right = jnp.broadcast_to(col != W - 1, (HW, cin)).astype(jnp.bfloat16)
        nvr = HW // (2 * W)
        for b in range(B):
            base = b * L + pad
            # 9 taps -> 9 (HW, Cin) x (Cin, Cout) bf16 MXU matmuls, one f32 chain
            acc = jnp.zeros((HW, cout), jnp.float32)
            for dy in range(3):
                for dx in range(3):
                    off = base + (dy - 1) * W + (dx - 1)
                    t = ap[off:off + HW, :]
                    if dx == 0:
                        t = t * m_left
                    elif dx == 2:
                        t = t * m_right
                    acc = acc + jnp.dot(t, w_ref[dy, dx],
                                        preferred_element_type=jnp.float32)
            z = jnp.maximum(acc + bias_full, 0.0)                # (HW, Cout) f32
            for r in range(nvr):
                top = z[(2 * r) * W:(2 * r + 1) * W, :]
                bot = z[(2 * r + 1) * W:(2 * r + 2) * W, :]
                vs[b * HW2 + r * W:b * HW2 + (r + 1) * W, :] = jnp.maximum(top, bot)
            pooled = jnp.maximum(vs[pl.ds(b * HW2, HW4, stride=2), :],
                                 vs[pl.ds(b * HW2 + 1, HW4, stride=2), :])
            if l < 4:
                Hn = _SPATIAL[l + 1]; Ln = Hn * Hn + 2 * (Hn + 1); padn = Hn + 1
                ap_refs[l][b * Ln + padn:b * Ln + padn + HW4, :] = \
                    pooled.astype(jnp.bfloat16)
            else:
                tail_ref[b:b + 1, :] = pooled.astype(jnp.bfloat16)   # (1, 96)

    # ---- layers 6..10: 1x1 spatial -> batched (B, 96) x (96, Cout) matmuls --
    v = tail_ref[...]                                            # (B, 96) bf16
    z = None
    for l in range(5, nl):
        z = jnp.dot(v, w_refs[l][...], preferred_element_type=jnp.float32)
        z = jnp.maximum(z + b_refs[l][...], 0.0)
        v = z.astype(jnp.bfloat16)
    o_ref[0] = z                                                 # (B, 10) f32


def _pick_batch_block(n, max_b=8):
    """Largest divisor of n that is <= max_b while keeping the grid >= 2 steps
    (so the 'parallel' batch axis still shards across v7x's two TensorCores)."""
    best = 1
    for b in range(1, min(max_b, n) + 1):
        if n % b == 0 and (n // b >= 2 or n == 1):
            best = b
    return best


def net_forward(x_nchw, params, *, batch_block=None):
    """x_nchw: (N, 3, 32, 32); params: list of (w(3,3,Cin,Cout), b(Cout,))."""
    N = x_nchw.shape[0]
    B = _pick_batch_block(N) if batch_block is None else batch_block
    assert N % B == 0
    G = N // B

    # --- conv1 im2col in the wrapper: (N, 1024, 27) patches, K padded to 32 --
    x = jnp.transpose(x_nchw, (0, 2, 3, 1)).astype(jnp.bfloat16)     # NHWC
    xp = jnp.pad(x, ((0, 0), (1, 1), (1, 1), (0, 0)))
    taps = [xp[:, dy:dy + _IMG, dx:dx + _IMG, :]
            for dy in range(3) for dx in range(3)]
    pat = jnp.concatenate(taps, axis=-1).reshape(N, _IMG * _IMG, 27)
    pat = jnp.pad(pat, ((0, 0), (0, 0), (0, _K0 - 27)))
    pat = pat.reshape(N * _IMG * _IMG, _K0)                          # lane-dense

    # --- weights: conv1 as (32,16) im2col matrix; conv6..10 as center tap ----
    ws = []
    w0 = params[0][0].reshape(27, _CHANNELS[0][1])                   # (dy,dx,c) order
    ws.append(jnp.pad(w0, ((0, _K0 - 27), (0, 0))).astype(jnp.bfloat16))
    for l in range(1, 5):
        ws.append(params[l][0].astype(jnp.bfloat16))
    for l in range(5, 10):
        ws.append(params[l][0][1, 1].astype(jnp.bfloat16))           # only tap used at 1x1
    bs = [b.reshape(1, -1).astype(jnp.float32) for _, b in params]

    def const_spec(shape):
        zeros = (0,) * len(shape)
        return pl.BlockSpec(shape, lambda g, z=zeros: z)

    in_specs = [pl.BlockSpec((B * _IMG * _IMG, _K0), lambda g: (g, 0))]
    in_specs += [const_spec(w.shape) for w in ws]
    in_specs += [const_spec(b.shape) for b in bs]

    scratch = []
    for l in range(1, 5):                       # zero-haloed inputs of conv2..5
        H = _SPATIAL[l]
        scratch.append(pltpu.VMEM((B * (H * H + 2 * (H + 1)), _CHANNELS[l][0]),
                                  jnp.bfloat16))
    for l in range(5):                          # vertically pooled rows
        H = _SPATIAL[l]
        scratch.append(pltpu.VMEM((B * (H * H // 2), _CHANNELS[l][1]),
                                  jnp.float32))
    scratch.append(pltpu.VMEM((B, _CHANNELS[4][1]), jnp.bfloat16))   # tail input

    kern = functools.partial(_fused_net_kernel, batch_block=B)
    out = pl.pallas_call(
        kern,
        out_shape=jax.ShapeDtypeStruct((G, B, 10), jnp.float32),
        grid=(G,),
        in_specs=in_specs,
        out_specs=pl.BlockSpec((1, B, 10), lambda g: (g, 0, 0)),
        scratch_shapes=scratch,
        compiler_params=pltpu.CompilerParams(
            dimension_semantics=("parallel",)),
    )(pat, *ws, *bs)
    return out.reshape(N, 10)


def init_params(key):
    """PyTorch-style uniform(-1/sqrt(fan_in), +1/sqrt(fan_in)) init, HWIO layout."""
    params = []
    for i, (cin, cout) in enumerate(_CHANNELS):
        kw, kb = jax.random.split(jax.random.fold_in(key, i))
        bound = 1.0 / np.sqrt(cin * 3 * 3)
        w = jax.random.uniform(kw, (3, 3, cin, cout), jnp.float32, -bound, bound)
        b = jax.random.uniform(kb, (cout,), jnp.float32, -bound, bound)
        params.append((w, b))
    return params


# Pure-JAX reference (correctness check only).
def reference_forward(x_nchw, params):
    x = x_nchw.astype(jnp.float32)
    for i, (w, b) in enumerate(params):
        y = jax.lax.conv_general_dilated(
            x, w, window_strides=(1, 1), padding=((1, 1), (1, 1)),
            dimension_numbers=("NCHW", "HWIO", "NCHW"))
        x = jnp.maximum(y + b.reshape(1, -1, 1, 1), 0.0)
        if i < 5:
            x = jax.lax.reduce_window(x, -jnp.inf, jax.lax.max,
                                      (1, 1, 2, 2), (1, 1, 2, 2), "VALID")
    return x.reshape(-1, 10)


if __name__ == "__main__":
    key = jax.random.PRNGKey(0)
    params = init_params(jax.random.fold_in(key, 123))
    # CIFAR10-shaped input: batch=2, 3 channels, 32x32 spatial.
    x = jax.random.normal(jax.random.fold_in(key, 7), (2, 3, 32, 32), jnp.float32)

    out = jax.block_until_ready(jax.jit(net_forward)(x, params))
    assert out.shape == (2, 10), out.shape

    ref = jax.block_until_ready(reference_forward(x, params))
    # bf16 MXU matmuls (f32 accumulate) vs f32 reference.
    np.testing.assert_allclose(np.asarray(out), np.asarray(ref),
                               rtol=2e-2, atol=2e-2)
    print("KERNEL_OK")
</pallas_src>

<mosaic_0001>
module attributes {stable_mosaic.version = 11 : i64} {
  func.func @_fused_net_kernel(%arg0: i32, %arg1: memref<1024x32xbf16, #tpu.memory_space<vmem>>, %arg2: memref<32x16xbf16, #tpu.memory_space<vmem>>, %arg3: memref<3x3x16x32xbf16, #tpu.memory_space<vmem>>, %arg4: memref<3x3x32x48xbf16, #tpu.memory_space<vmem>>, %arg5: memref<3x3x48x64xbf16, #tpu.memory_space<vmem>>, %arg6: memref<3x3x64x96xbf16, #tpu.memory_space<vmem>>, %arg7: memref<96x96xbf16, #tpu.memory_space<vmem>>, %arg8: memref<96x96xbf16, #tpu.memory_space<vmem>>, %arg9: memref<96x96xbf16, #tpu.memory_space<vmem>>, %arg10: memref<96x96xbf16, #tpu.memory_space<vmem>>, %arg11: memref<96x10xbf16, #tpu.memory_space<vmem>>, %arg12: memref<1x16xf32, #tpu.memory_space<vmem>>, %arg13: memref<1x32xf32, #tpu.memory_space<vmem>>, %arg14: memref<1x48xf32, #tpu.memory_space<vmem>>, %arg15: memref<1x64xf32, #tpu.memory_space<vmem>>, %arg16: memref<1x96xf32, #tpu.memory_space<vmem>>, %arg17: memref<1x96xf32, #tpu.memory_space<vmem>>, %arg18: memref<1x96xf32, #tpu.memory_space<vmem>>, %arg19: memref<1x96xf32, #tpu.memory_space<vmem>>, %arg20: memref<1x96xf32, #tpu.memory_space<vmem>>, %arg21: memref<1x10xf32, #tpu.memory_space<vmem>>, %arg22: memref<1x1x10xf32, #tpu.memory_space<vmem>>, %arg23: memref<290x16xbf16, #tpu.memory_space<vmem>>, %arg24: memref<82x32xbf16, #tpu.memory_space<vmem>>, %arg25: memref<26x48xbf16, #tpu.memory_space<vmem>>, %arg26: memref<10x64xbf16, #tpu.memory_space<vmem>>, %arg27: memref<512x16xf32, #tpu.memory_space<vmem>>, %arg28: memref<128x32xf32, #tpu.memory_space<vmem>>, %arg29: memref<32x48xf32, #tpu.memory_space<vmem>>, %arg30: memref<8x64xf32, #tpu.memory_space<vmem>>, %arg31: memref<2x96xf32, #tpu.memory_space<vmem>>, %arg32: memref<1x96xbf16, #tpu.memory_space<vmem>>) attributes {dimension_semantics = [#tpu.dimension_semantics<parallel>], iteration_bounds = array<i64: 2>, scalar_prefetch = 0 : i64, scratch_operands = 10 : i64, tpu.core_type = #tpu.core_type<tc>, window_params = [{transform_indices = @transform_0, window_bounds = array<i64: 1024, 32>}, {pipeline_mode = #tpu.pipeline_mode<synchronous>, transform_indices = @transform_1, window_bounds = array<i64: 32, 16>}, {pipeline_mode = #tpu.pipeline_mode<synchronous>, transform_indices = @transform_2, window_bounds = array<i64: 3, 3, 16, 32>}, {pipeline_mode = #tpu.pipeline_mode<synchronous>, transform_indices = @transform_3, window_bounds = array<i64: 3, 3, 32, 48>}, {pipeline_mode = #tpu.pipeline_mode<synchronous>, transform_indices = @transform_4, window_bounds = array<i64: 3, 3, 48, 64>}, {pipeline_mode = #tpu.pipeline_mode<synchronous>, transform_indices = @transform_5, window_bounds = array<i64: 3, 3, 64, 96>}, {pipeline_mode = #tpu.pipeline_mode<synchronous>, transform_indices = @transform_6, window_bounds = array<i64: 96, 96>}, {pipeline_mode = #tpu.pipeline_mode<synchronous>, transform_indices = @transform_7, window_bounds = array<i64: 96, 96>}, {pipeline_mode = #tpu.pipeline_mode<synchronous>, transform_indices = @transform_8, window_bounds = array<i64: 96, 96>}, {pipeline_mode = #tpu.pipeline_mode<synchronous>, transform_indices = @transform_9, window_bounds = array<i64: 96, 96>}, {pipeline_mode = #tpu.pipeline_mode<synchronous>, transform_indices = @transform_10, window_bounds = array<i64: 96, 10>}, {pipeline_mode = #tpu.pipeline_mode<synchronous>, transform_indices = @transform_11, window_bounds = array<i64: 1, 16>}, {pipeline_mode = #tpu.pipeline_mode<synchronous>, transform_indices = @transform_12, window_bounds = array<i64: 1, 32>}, {pipeline_mode = #tpu.pipeline_mode<synchronous>, transform_indices = @transform_13, window_bounds = array<i64: 1, 48>}, {pipeline_mode = #tpu.pipeline_mode<synchronous>, transform_indices = @transform_14, window_bounds = array<i64: 1, 64>}, {pipeline_mode = #tpu.pipeline_mode<synchronous>, transform_indices = @transform_15, window_bounds = array<i64: 1, 96>}, {pipeline_mode = #tpu.pipeline_mode<synchronous>, transform_indices = @transform_16, window_bounds = array<i64: 1, 96>}, {pipeline_mode = #tpu.pipeline_mode<synchronous>, transform_indices = @transform_17, window_bounds = array<i64: 1, 96>}, {pipeline_mode = #tpu.pipeline_mode<synchronous>, transform_indices = @transform_18, window_bounds = array<i64: 1, 96>}, {pipeline_mode = #tpu.pipeline_mode<synchronous>, transform_indices = @transform_19, window_bounds = array<i64: 1, 96>}, {pipeline_mode = #tpu.pipeline_mode<synchronous>, transform_indices = @transform_20, window_bounds = array<i64: 1, 10>}, {transform_indices = @transform_21, window_bounds = array<i64: 1, 1, 10>}]} {
    %cst = arith.constant 0.000000e+00 : bf16
    %0 = vector.broadcast %cst : bf16 to vector<17x16xbf16>
    %c0 = arith.constant 0 : index
    %c0_0 = arith.constant 0 : index
    %1 = vector.load %arg23[%c0, %c0_0] : memref<290x16xbf16, #tpu.memory_space<vmem>>, vector<17x16xbf16>
    tpu.vector_store %arg23[%c0, %c0_0], %0 {strides = array<i32>} : memref<290x16xbf16, #tpu.memory_space<vmem>>, vector<17x16xbf16>,
    %c273 = arith.constant 273 : index
    %c0_1 = arith.constant 0 : index
    %2 = vector.load %arg23[%c273, %c0_1] : memref<290x16xbf16, #tpu.memory_space<vmem>>, vector<17x16xbf16>
    tpu.vector_store %arg23[%c273, %c0_1], %0 {strides = array<i32>} : memref<290x16xbf16, #tpu.memory_space<vmem>>, vector<17x16xbf16>,
    %cst_2 = arith.constant 0.000000e+00 : bf16
    %3 = vector.broadcast %cst_2 : bf16 to vector<9x32xbf16>
    %c0_3 = arith.constant 0 : index
    %c0_4 = arith.constant 0 : index
    %4 = vector.load %arg24[%c0_3, %c0_4] : memref<82x32xbf16, #tpu.memory_space<vmem>>, vector<9x32xbf16>
    tpu.vector_store %arg24[%c0_3, %c0_4], %3 {strides = array<i32>} : memref<82x32xbf16, #tpu.memory_space<vmem>>, vector<9x32xbf16>,
    %c73 = arith.constant 73 : index
    %c0_5 = arith.constant 0 : index
    %5 = vector.load %arg24[%c73, %c0_5] : memref<82x32xbf16, #tpu.memory_space<vmem>>, vector<9x32xbf16>
    tpu.vector_store %arg24[%c73, %c0_5], %3 {strides = array<i32>} : memref<82x32xbf16, #tpu.memory_space<vmem>>, vector<9x32xbf16>,
    %cst_6 = arith.constant 0.000000e+00 : bf16
    %6 = vector.broadcast %cst_6 : bf16 to vector<5x48xbf16>
    %c0_7 = arith.constant 0 : index
    %c0_8 = arith.constant 0 : index
    %7 = vector.load %arg25[%c0_7, %c0_8] : memref<26x48xbf16, #tpu.memory_space<vmem>>, vector<5x48xbf16>
    tpu.vector_store %arg25[%c0_7, %c0_8], %6 {strides = array<i32>} : memref<26x48xbf16, #tpu.memory_space<vmem>>, vector<5x48xbf16>,
    %c21 = arith.constant 21 : index
    %c0_9 = arith.constant 0 : index
    %8 = vector.load %arg25[%c21, %c0_9] : memref<26x48xbf16, #tpu.memory_space<vmem>>, vector<5x48xbf16>
    tpu.vector_store %arg25[%c21, %c0_9], %6 {strides = array<i32>} : memref<26x48xbf16, #tpu.memory_space<vmem>>, vector<5x48xbf16>,
    %cst_10 = arith.constant 0.000000e+00 : bf16
    %9 = vector.broadcast %cst_10 : bf16 to vector<3x64xbf16>
    %c0_11 = arith.constant 0 : index
    %c0_12 = arith.constant 0 : index
    %10 = vector.load %arg26[%c0_11, %c0_12] : memref<10x64xbf16, #tpu.memory_space<vmem>>, vector<3x64xbf16>
    tpu.vector_store %arg26[%c0_11, %c0_12], %9 {strides = array<i32>} : memref<10x64xbf16, #tpu.memory_space<vmem>>, vector<3x64xbf16>,
    %c7 = arith.constant 7 : index
    %c0_13 = arith.constant 0 : index
    %11 = vector.load %arg26[%c7, %c0_13] : memref<10x64xbf16, #tpu.memory_space<vmem>>, vector<3x64xbf16>
    tpu.vector_store %arg26[%c7, %c0_13], %9 {strides = array<i32>} : memref<10x64xbf16, #tpu.memory_space<vmem>>, vector<3x64xbf16>,
    %c0_14 = arith.constant 0 : index
    %c0_15 = arith.constant 0 : index
    %12 = vector.load %arg2[%c0_14, %c0_15] : memref<32x16xbf16, #tpu.memory_space<vmem>>, vector<32x16xbf16>
    %c0_16 = arith.constant 0 : index
    %c0_17 = arith.constant 0 : index
    %13 = vector.load %arg12[%c0_16, %c0_17] : memref<1x16xf32, #tpu.memory_space<vmem>>, vector<1x16xf32>
    %14 = vector.shape_cast %13 : vector<1x16xf32> to vector<1x16xf32>
    %15 = vector.broadcast %14 : vector<1x16xf32> to vector<256x16xf32>
    %c0_18 = arith.constant 0 : index
    %c0_19 = arith.constant 0 : index
    %16 = vector.load %arg1[%c0_18, %c0_19] : memref<1024x32xbf16, #tpu.memory_space<vmem>>, vector<256x32xbf16>
    %cst_20 = arith.constant dense<0.000000e+00> : vector<256x16xf32>
    %17 = tpu.matmul %16, %12, %cst_20 {dimension_numbers = #tpu.dot_dimension_numbers<[1], [0], [0], [1], [0, 0, 1, 1], [], []>} : vector<256x32xbf16>, vector<32x16xbf16>, vector<256x16xf32> -> vector<256x16xf32>
    %18 = arith.addf %17, %15 : vector<256x16xf32>
    %cst_21 = arith.constant 0.000000e+00 : f32
    %19 = vector.broadcast %cst_21 : f32 to vector<256x16xf32>
    %20 = arith.maximumf %18, %19 : vector<256x16xf32>
    %21 = vector.extract_strided_slice %20 {offsets = [0, 0], sizes = [32, 16], strides = [1, 1]} : vector<256x16xf32> to vector<32x16xf32>
    %22 = vector.extract_strided_slice %20 {offsets = [32, 0], sizes = [32, 16], strides = [1, 1]} : vector<256x16xf32> to vector<32x16xf32>
    %23 = arith.maximumf %21, %22 : vector<32x16xf32>
    %c0_22 = arith.constant 0 : index
    %c0_23 = arith.constant 0 : index
    %24 = vector.load %arg27[%c0_22, %c0_23] : memref<512x16xf32, #tpu.memory_space<vmem>>, vector<32x16xf32>
    tpu.vector_store %arg27[%c0_22, %c0_23], %23 {strides = array<i32>} : memref<512x16xf32, #tpu.memory_space<vmem>>, vector<32x16xf32>,
    %25 = vector.extract_strided_slice %20 {offsets = [64, 0], sizes = [32, 16], strides = [1, 1]} : vector<256x16xf32> to vector<32x16xf32>
    %26 = vector.extract_strided_slice %20 {offsets = [96, 0], sizes = [32, 16], strides = [1, 1]} : vector<256x16xf32> to vector<32x16xf32>
    %27 = arith.maximumf %25, %26 : vector<32x16xf32>
    %c32 = arith.constant 32 : index
    %c0_24 = arith.constant 0 : index
    %28 = vector.load %arg27[%c32, %c0_24] : memref<512x16xf32, #tpu.memory_space<vmem>>, vector<32x16xf32>
    tpu.vector_store %arg27[%c32, %c0_24], %27 {strides = array<i32>} : memref<512x16xf32, #tpu.memory_space<vmem>>, vector<32x16xf32>,
    %29 = vector.extract_strided_slice %20 {offsets = [128, 0], sizes = [32, 16], strides = [1, 1]} : vector<256x16xf32> to vector<32x16xf32>
    %30 = vector.extract_strided_slice %20 {offsets = [160, 0], sizes = [32, 16], strides = [1, 1]} : vector<256x16xf32> to vector<32x16xf32>
    %31 = arith.maximumf %29, %30 : vector<32x16xf32>
    %c64 = arith.constant 64 : index
    %c0_25 = arith.constant 0 : index
    %32 = vector.load %arg27[%c64, %c0_25] : memref<512x16xf32, #tpu.memory_space<vmem>>, vector<32x16xf32>
    tpu.vector_store %arg27[%c64, %c0_25], %31 {strides = array<i32>} : memref<512x16xf32, #tpu.memory_space<vmem>>, vector<32x16xf32>,
    %33 = vector.extract_strided_slice %20 {offsets = [192, 0], sizes = [32, 16], strides = [1, 1]} : vector<256x16xf32> to vector<32x16xf32>
    %34 = vector.extract_strided_slice %20 {offsets = [224, 0], sizes = [32, 16], strides = [1, 1]} : vector<256x16xf32> to vector<32x16xf32>
    %35 = arith.maximumf %33, %34 : vector<32x16xf32>
    %c96 = arith.constant 96 : index
    %c0_26 = arith.constant 0 : index
    %36 = vector.load %arg27[%c96, %c0_26] : memref<512x16xf32, #tpu.memory_space<vmem>>, vector<32x16xf32>
    tpu.vector_store %arg27[%c96, %c0_26], %35 {strides = array<i32>} : memref<512x16xf32, #tpu.memory_space<vmem>>, vector<32x16xf32>,
    %c256 = arith.constant 256 : index
    %c0_27 = arith.constant 0 : index
    %37 = vector.load %arg1[%c256, %c0_27] : memref<1024x32xbf16, #tpu.memory_space<vmem>>, vector<256x32xbf16>
    %cst_28 = arith.constant dense<0.000000e+00> : vector<256x16xf32>
    %38 = tpu.matmul %37, %12, %cst_28 {dimension_numbers = #tpu.dot_dimension_numbers<[1], [0], [0], [1], [0, 0, 1, 1], [], []>} : vector<256x32xbf16>, vector<32x16xbf16>, vector<256x16xf32> -> vector<256x16xf32>
    %39 = arith.addf %38, %15 : vector<256x16xf32>
    %cst_29 = arith.constant 0.000000e+00 : f32
    %40 = vector.broadcast %cst_29 : f32 to vector<256x16xf32>
    %41 = arith.maximumf %39, %40 : vector<256x16xf32>
    %42 = vector.extract_strided_slice %41 {offsets = [0, 0], sizes = [32, 16], strides = [1, 1]} : vector<256x16xf32> to vector<32x16xf32>
    %43 = vector.extract_strided_slice %41 {offsets = [32, 0], sizes = [32, 16], strides = [1, 1]} : vector<256x16xf32> to vector<32x16xf32>
    %44 = arith.maximumf %42, %43 : vector<32x16xf32>
    %c128 = arith.constant 128 : index
    %c0_30 = arith.constant 0 : index
    %45 = vector.load %arg27[%c128, %c0_30] : memref<512x16xf32, #tpu.memory_space<vmem>>, vector<32x16xf32>
    tpu.vector_store %arg27[%c128, %c0_30], %44 {strides = array<i32>} : memref<512x16xf32, #tpu.memory_space<vmem>>, vector<32x16xf32>,
    %46 = vector.extract_strided_slice %41 {offsets = [64, 0], sizes = [32, 16], strides = [1, 1]} : vector<256x16xf32> to vector<32x16xf32>
    %47 = vector.extract_strided_slice %41 {offsets = [96, 0], sizes = [32, 16], strides = [1, 1]} : vector<256x16xf32> to vector<32x16xf32>
    %48 = arith.maximumf %46, %47 : vector<32x16xf32>
    %c160 = arith.constant 160 : index
    %c0_31 = arith.constant 0 : index
    %49 = vector.load %arg27[%c160, %c0_31] : memref<512x16xf32, #tpu.memory_space<vmem>>, vector<32x16xf32>
    tpu.vector_store %arg27[%c160, %c0_31], %48 {strides = array<i32>} : memref<512x16xf32, #tpu.memory_space<vmem>>, vector<32x16xf32>,
    %50 = vector.extract_strided_slice %41 {offsets = [128, 0], sizes = [32, 16], strides = [1, 1]} : vector<256x16xf32> to vector<32x16xf32>
    %51 = vector.extract_strided_slice %41 {offsets = [160, 0], sizes = [32, 16], strides = [1, 1]} : vector<256x16xf32> to vector<32x16xf32>
    %52 = arith.maximumf %50, %51 : vector<32x16xf32>
    %c192 = arith.constant 192 : index
    %c0_32 = arith.constant 0 : index
    %53 = vector.load %arg27[%c192, %c0_32] : memref<512x16xf32, #tpu.memory_space<vmem>>, vector<32x16xf32>
    tpu.vector_store %arg27[%c192, %c0_32], %52 {strides = array<i32>} : memref<512x16xf32, #tpu.memory_space<vmem>>, vector<32x16xf32>,
    %54 = vector.extract_strided_slice %41 {offsets = [192, 0], sizes = [32, 16], strides = [1, 1]} : vector<256x16xf32> to vector<32x16xf32>
    %55 = vector.extract_strided_slice %41 {offsets = [224, 0], sizes = [32, 16], strides = [1, 1]} : vector<256x16xf32> to vector<32x16xf32>
    %56 = arith.maximumf %54, %55 : vector<32x16xf32>
    %c224 = arith.constant 224 : index
    %c0_33 = arith.constant 0 : index
    %57 = vector.load %arg27[%c224, %c0_33] : memref<512x16xf32, #tpu.memory_space<vmem>>, vector<32x16xf32>
    tpu.vector_store %arg27[%c224, %c0_33], %56 {strides = array<i32>} : memref<512x16xf32, #tpu.memory_space<vmem>>, vector<32x16xf32>,
    %c512 = arith.constant 512 : index
    %c0_34 = arith.constant 0 : index
    %58 = vector.load %arg1[%c512, %c0_34] : memref<1024x32xbf16, #tpu.memory_space<vmem>>, vector<256x32xbf16>
    %cst_35 = arith.constant dense<0.000000e+00> : vector<256x16xf32>
    %59 = tpu.matmul %58, %12, %cst_35 {dimension_numbers = #tpu.dot_dimension_numbers<[1], [0], [0], [1], [0, 0, 1, 1], [], []>} : vector<256x32xbf16>, vector<32x16xbf16>, vector<256x16xf32> -> vector<256x16xf32>
    %60 = arith.addf %59, %15 : vector<256x16xf32>
    %cst_36 = arith.constant 0.000000e+00 : f32
    %61 = vector.broadcast %cst_36 : f32 to vector<256x16xf32>
    %62 = arith.maximumf %60, %61 : vector<256x16xf32>
    %63 = vector.extract_strided_slice %62 {offsets = [0, 0], sizes = [32, 16], strides = [1, 1]} : vector<256x16xf32> to vector<32x16xf32>
    %64 = vector.extract_strided_slice %62 {offsets = [32, 0], sizes = [32, 16], strides = [1, 1]} : vector<256x16xf32> to vector<32x16xf32>
    %65 = arith.maximumf %63, %64 : vector<32x16xf32>
    %c256_37 = arith.constant 256 : index
    %c0_38 = arith.constant 0 : index
    %66 = vector.load %arg27[%c256_37, %c0_38] : memref<512x16xf32, #tpu.memory_space<vmem>>, vector<32x16xf32>
    tpu.vector_store %arg27[%c256_37, %c0_38], %65 {strides = array<i32>} : memref<512x16xf32, #tpu.memory_space<vmem>>, vector<32x16xf32>,
    %67 = vector.extract_strided_slice %62 {offsets = [64, 0], sizes = [32, 16], strides = [1, 1]} : vector<256x16xf32> to vector<32x16xf32>
    %68 = vector.extract_strided_slice %62 {offsets = [96, 0], sizes = [32, 16], strides = [1, 1]} : vector<256x16xf32> to vector<32x16xf32>
    %69 = arith.maximumf %67, %68 : vector<32x16xf32>
    %c288 = arith.constant 288 : index
    %c0_39 = arith.constant 0 : index
    %70 = vector.load %arg27[%c288, %c0_39] : memref<512x16xf32, #tpu.memory_space<vmem>>, vector<32x16xf32>
    tpu.vector_store %arg27[%c288, %c0_39], %69 {strides = array<i32>} : memref<512x16xf32, #tpu.memory_space<vmem>>, vector<32x16xf32>,
    %71 = vector.extract_strided_slice %62 {offsets = [128, 0], sizes = [32, 16], strides = [1, 1]} : vector<256x16xf32> to vector<32x16xf32>
    %72 = vector.extract_strided_slice %62 {offsets = [160, 0], sizes = [32, 16], strides = [1, 1]} : vector<256x16xf32> to vector<32x16xf32>
    %73 = arith.maximumf %71, %72 : vector<32x16xf32>
    %c320 = arith.constant 320 : index
    %c0_40 = arith.constant 0 : index
    %74 = vector.load %arg27[%c320, %c0_40] : memref<512x16xf32, #tpu.memory_space<vmem>>, vector<32x16xf32>
    tpu.vector_store %arg27[%c320, %c0_40], %73 {strides = array<i32>} : memref<512x16xf32, #tpu.memory_space<vmem>>, vector<32x16xf32>,
    %75 = vector.extract_strided_slice %62 {offsets = [192, 0], sizes = [32, 16], strides = [1, 1]} : vector<256x16xf32> to vector<32x16xf32>
    %76 = vector.extract_strided_slice %62 {offsets = [224, 0], sizes = [32, 16], strides = [1, 1]} : vector<256x16xf32> to vector<32x16xf32>
    %77 = arith.maximumf %75, %76 : vector<32x16xf32>
    %c352 = arith.constant 352 : index
    %c0_41 = arith.constant 0 : index
    %78 = vector.load %arg27[%c352, %c0_41] : memref<512x16xf32, #tpu.memory_space<vmem>>, vector<32x16xf32>
    tpu.vector_store %arg27[%c352, %c0_41], %77 {strides = array<i32>} : memref<512x16xf32, #tpu.memory_space<vmem>>, vector<32x16xf32>,
    %c768 = arith.constant 768 : index
    %c0_42 = arith.constant 0 : index
    %79 = vector.load %arg1[%c768, %c0_42] : memref<1024x32xbf16, #tpu.memory_space<vmem>>, vector<256x32xbf16>
    %cst_43 = arith.constant dense<0.000000e+00> : vector<256x16xf32>
    %80 = tpu.matmul %79, %12, %cst_43 {dimension_numbers = #tpu.dot_dimension_numbers<[1], [0], [0], [1], [0, 0, 1, 1], [], []>} : vector<256x32xbf16>, vector<32x16xbf16>, vector<256x16xf32> -> vector<256x16xf32>
    %81 = arith.addf %80, %15 : vector<256x16xf32>
    %cst_44 = arith.constant 0.000000e+00 : f32
    %82 = vector.broadcast %cst_44 : f32 to vector<256x16xf32>
    %83 = arith.maximumf %81, %82 : vector<256x16xf32>
    %84 = vector.extract_strided_slice %83 {offsets = [0, 0], sizes = [32, 16], strides = [1, 1]} : vector<256x16xf32> to vector<32x16xf32>
    %85 = vector.extract_strided_slice %83 {offsets = [32, 0], sizes = [32, 16], strides = [1, 1]} : vector<256x16xf32> to vector<32x16xf32>
    %86 = arith.maximumf %84, %85 : vector<32x16xf32>
    %c384 = arith.constant 384 : index
    %c0_45 = arith.constant 0 : index
    %87 = vector.load %arg27[%c384, %c0_45] : memref<512x16xf32, #tpu.memory_space<vmem>>, vector<32x16xf32>
    tpu.vector_store %arg27[%c384, %c0_45], %86 {strides = array<i32>} : memref<512x16xf32, #tpu.memory_space<vmem>>, vector<32x16xf32>,
    %88 = vector.extract_strided_slice %83 {offsets = [64, 0], sizes = [32, 16], strides = [1, 1]} : vector<256x16xf32> to vector<32x16xf32>
    %89 = vector.extract_strided_slice %83 {offsets = [96, 0], sizes = [32, 16], strides = [1, 1]} : vector<256x16xf32> to vector<32x16xf32>
    %90 = arith.maximumf %88, %89 : vector<32x16xf32>
    %c416 = arith.constant 416 : index
    %c0_46 = arith.constant 0 : index
    %91 = vector.load %arg27[%c416, %c0_46] : memref<512x16xf32, #tpu.memory_space<vmem>>, vector<32x16xf32>
    tpu.vector_store %arg27[%c416, %c0_46], %90 {strides = array<i32>} : memref<512x16xf32, #tpu.memory_space<vmem>>, vector<32x16xf32>,
    %92 = vector.extract_strided_slice %83 {offsets = [128, 0], sizes = [32, 16], strides = [1, 1]} : vector<256x16xf32> to vector<32x16xf32>
    %93 = vector.extract_strided_slice %83 {offsets = [160, 0], sizes = [32, 16], strides = [1, 1]} : vector<256x16xf32> to vector<32x16xf32>
    %94 = arith.maximumf %92, %93 : vector<32x16xf32>
    %c448 = arith.constant 448 : index
    %c0_47 = arith.constant 0 : index
    %95 = vector.load %arg27[%c448, %c0_47] : memref<512x16xf32, #tpu.memory_space<vmem>>, vector<32x16xf32>
    tpu.vector_store %arg27[%c448, %c0_47], %94 {strides = array<i32>} : memref<512x16xf32, #tpu.memory_space<vmem>>, vector<32x16xf32>,
    %96 = vector.extract_strided_slice %83 {offsets = [192, 0], sizes = [32, 16], strides = [1, 1]} : vector<256x16xf32> to vector<32x16xf32>
    %97 = vector.extract_strided_slice %83 {offsets = [224, 0], sizes = [32, 16], strides = [1, 1]} : vector<256x16xf32> to vector<32x16xf32>
    %98 = arith.maximumf %96, %97 : vector<32x16xf32>
    %c480 = arith.constant 480 : index
    %c0_48 = arith.constant 0 : index
    %99 = vector.load %arg27[%c480, %c0_48] : memref<512x16xf32, #tpu.memory_space<vmem>>, vector<32x16xf32>
    tpu.vector_store %arg27[%c480, %c0_48], %98 {strides = array<i32>} : memref<512x16xf32, #tpu.memory_space<vmem>>, vector<32x16xf32>,
    %c0_49 = arith.constant 0 : index
    %c0_50 = arith.constant 0 : index
    %100 = tpu.strided_load %arg27[%c0_49, %c0_50] {strides = array<i32: 2, 1>} : memref<512x16xf32, #tpu.memory_space<vmem>>, vector<256x16xf32>
    %c1 = arith.constant 1 : index
    %c0_51 = arith.constant 0 : index
    %101 = tpu.strided_load %arg27[%c1, %c0_51] {strides = array<i32: 2, 1>} : memref<512x16xf32, #tpu.memory_space<vmem>>, vector<256x16xf32>
    %102 = arith.maximumf %100, %101 : vector<256x16xf32>
    %103 = arith.truncf %102 : vector<256x16xf32> to vector<256x16xbf16>
    %c17 = arith.constant 17 : index
    %c0_52 = arith.constant 0 : index
    %104 = vector.load %arg23[%c17, %c0_52] : memref<290x16xbf16, #tpu.memory_space<vmem>>, vector<256x16xbf16>
    tpu.vector_store %arg23[%c17, %c0_52], %103 {strides = array<i32>} : memref<290x16xbf16, #tpu.memory_space<vmem>>, vector<256x16xbf16>,
    %c0_53 = arith.constant 0 : index
    %c0_54 = arith.constant 0 : index
    %105 = vector.load %arg13[%c0_53, %c0_54] : memref<1x32xf32, #tpu.memory_space<vmem>>, vector<1x32xf32>
    %106 = vector.shape_cast %105 : vector<1x32xf32> to vector<1x32xf32>
    %107 = vector.broadcast %106 : vector<1x32xf32> to vector<256x32xf32>
    %108 = tpu.iota {dimensions = array<i32: 0>} : vector<256x1xi32>
    %c16_i32 = arith.constant 16 : i32
    %c0_i32 = arith.constant 0 : i32
    %109 = arith.cmpi eq, %c16_i32, %c0_i32 : i32
    %c1_i32 = arith.constant 1 : i32
    %110 = arith.select %109, %c1_i32, %c16_i32 : i32
    %111 = vector.broadcast %110 : i32 to vector<256x1xi32>
    %112 = arith.remsi %108, %111 : vector<256x1xi32>
    %c0_i32_55 = arith.constant 0 : i32
    %113 = vector.broadcast %c0_i32_55 : i32 to vector<256x1xi32>
    %114 = arith.cmpi ne, %112, %113 : vector<256x1xi32>
    %c0_i32_56 = arith.constant 0 : i32
    %115 = vector.broadcast %c0_i32_56 : i32 to vector<256x1xi32>
    %116 = arith.cmpi slt, %112, %115 : vector<256x1xi32>
    %c0_i32_57 = arith.constant 0 : i32
    %117 = arith.cmpi slt, %110, %c0_i32_57 : i32
    %118 = vector.broadcast %117 : i1 to vector<256x1xi1>
    %119 = vector.broadcast %118 : vector<256x1xi1> to vector<256x1xi1>
    %120 = arith.xori %116, %119 : vector<256x1xi1>
    %121 = arith.andi %120, %114 : vector<256x1xi1>
    %122 = vector.broadcast %110 : i32 to vector<256x1xi32>
    %123 = arith.addi %112, %122 : vector<256x1xi32>
    %124 = arith.select %121, %123, %112 : vector<256x1xi1>, vector<256x1xi32>
    %c0_i32_58 = arith.constant 0 : i32
    %125 = vector.broadcast %c0_i32_58 : i32 to vector<256x1xi32>
    %126 = arith.cmpi ne, %124, %125 : vector<256x1xi32>
    %127 = vector.shape_cast %126 : vector<256x1xi1> to vector<256x1xi1>
    %128 = vector.broadcast %127 : vector<256x1xi1> to vector<256x16xi1>
    %129 = arith.extui %128 : vector<256x16xi1> to vector<256x16xi32>
    %130 = arith.sitofp %129 : vector<256x16xi32> to vector<256x16xf32>
    %131 = arith.truncf %130 : vector<256x16xf32> to vector<256x16xbf16>
    %c15_i32 = arith.constant 15 : i32
    %132 = vector.broadcast %c15_i32 : i32 to vector<256x1xi32>
    %133 = arith.cmpi ne, %124, %132 : vector<256x1xi32>
    %134 = vector.shape_cast %133 : vector<256x1xi1> to vector<256x1xi1>
    %135 = vector.broadcast %134 : vector<256x1xi1> to vector<256x16xi1>
    %136 = arith.extui %135 : vector<256x16xi1> to vector<256x16xi32>
    %137 = arith.sitofp %136 : vector<256x16xi32> to vector<256x16xf32>
    %138 = arith.truncf %137 : vector<256x16xf32> to vector<256x16xbf16>
    %cst_59 = arith.constant 0.000000e+00 : f32
    %139 = vector.broadcast %cst_59 : f32 to vector<256x32xf32>
    %c0_60 = arith.constant 0 : index
    %c0_61 = arith.constant 0 : index
    %140 = vector.load %arg23[%c0_60, %c0_61] : memref<290x16xbf16, #tpu.memory_space<vmem>>, vector<256x16xbf16>
    %141 = arith.mulf %140, %131 : vector<256x16xbf16>
    %c0_62 = arith.constant 0 : index
    %c0_63 = arith.constant 0 : index
    %c0_64 = arith.constant 0 : index
    %c0_65 = arith.constant 0 : index
    %142 = vector.load %arg3[%c0_62, %c0_63, %c0_64, %c0_65] : memref<3x3x16x32xbf16, #tpu.memory_space<vmem>>, vector<1x1x16x32xbf16>
    %143 = vector.shape_cast %142 : vector<1x1x16x32xbf16> to vector<16x32xbf16>
    %cst_66 = arith.constant dense<0.000000e+00> : vector<256x32xf32>
    %144 = tpu.matmul %141, %143, %cst_66 {dimension_numbers = #tpu.dot_dimension_numbers<[1], [0], [0], [1], [0, 0, 1, 1], [], []>} : vector<256x16xbf16>, vector<16x32xbf16>, vector<256x32xf32> -> vector<256x32xf32>
    %145 = arith.addf %139, %144 : vector<256x32xf32>
    %c1_67 = arith.constant 1 : index
    %c0_68 = arith.constant 0 : index
    %146 = vector.load %arg23[%c1_67, %c0_68] : memref<290x16xbf16, #tpu.memory_space<vmem>>, vector<256x16xbf16>
    %c0_69 = arith.constant 0 : index
    %c1_70 = arith.constant 1 : index
    %c0_71 = arith.constant 0 : index
    %c0_72 = arith.constant 0 : index
    %147 = vector.load %arg3[%c0_69, %c1_70, %c0_71, %c0_72] : memref<3x3x16x32xbf16, #tpu.memory_space<vmem>>, vector<1x1x16x32xbf16>
    %148 = vector.shape_cast %147 : vector<1x1x16x32xbf16> to vector<16x32xbf16>
    %cst_73 = arith.constant dense<0.000000e+00> : vector<256x32xf32>
    %149 = tpu.matmul %146, %148, %cst_73 {dimension_numbers = #tpu.dot_dimension_numbers<[1], [0], [0], [1], [0, 0, 1, 1], [], []>} : vector<256x16xbf16>, vector<16x32xbf16>, vector<256x32xf32> -> vector<256x32xf32>
    %150 = arith.addf %145, %149 : vector<256x32xf32>
    %c2 = arith.constant 2 : index
    %c0_74 = arith.constant 0 : index
    %151 = vector.load %arg23[%c2, %c0_74] : memref<290x16xbf16, #tpu.memory_space<vmem>>, vector<256x16xbf16>
    %152 = arith.mulf %151, %138 : vector<256x16xbf16>
    %c0_75 = arith.constant 0 : index
    %c2_76 = arith.constant 2 : index
    %c0_77 = arith.constant 0 : index
    %c0_78 = arith.constant 0 : index
    %153 = vector.load %arg3[%c0_75, %c2_76, %c0_77, %c0_78] : memref<3x3x16x32xbf16, #tpu.memory_space<vmem>>, vector<1x1x16x32xbf16>
    %154 = vector.shape_cast %153 : vector<1x1x16x32xbf16> to vector<16x32xbf16>
    %cst_79 = arith.constant dense<0.000000e+00> : vector<256x32xf32>
    %155 = tpu.matmul %152, %154, %cst_79 {dimension_numbers = #tpu.dot_dimension_numbers<[1], [0], [0], [1], [0, 0, 1, 1], [], []>} : vector<256x16xbf16>, vector<16x32xbf16>, vector<256x32xf32> -> vector<256x32xf32>
    %156 = arith.addf %150, %155 : vector<256x32xf32>
    %c16 = arith.constant 16 : index
    %c0_80 = arith.constant 0 : index
    %157 = vector.load %arg23[%c16, %c0_80] : memref<290x16xbf16, #tpu.memory_space<vmem>>, vector<256x16xbf16>
    %158 = arith.mulf %157, %131 : vector<256x16xbf16>
    %c1_81 = arith.constant 1 : index
    %c0_82 = arith.constant 0 : index
    %c0_83 = arith.constant 0 : index
    %c0_84 = arith.constant 0 : index
    %159 = vector.load %arg3[%c1_81, %c0_82, %c0_83, %c0_84] : memref<3x3x16x32xbf16, #tpu.memory_space<vmem>>, vector<1x1x16x32xbf16>
    %160 = vector.shape_cast %159 : vector<1x1x16x32xbf16> to vector<16x32xbf16>
    %cst_85 = arith.constant dense<0.000000e+00> : vector<256x32xf32>
    %161 = tpu.matmul %158, %160, %cst_85 {dimension_numbers = #tpu.dot_dimension_numbers<[1], [0], [0], [1], [0, 0, 1, 1], [], []>} : vector<256x16xbf16>, vector<16x32xbf16>, vector<256x32xf32> -> vector<256x32xf32>
    %162 = arith.addf %156, %161 : vector<256x32xf32>
    %c17_86 = arith.constant 17 : index
    %c0_87 = arith.constant 0 : index
    %163 = vector.load %arg23[%c17_86, %c0_87] : memref<290x16xbf16, #tpu.memory_space<vmem>>, vector<256x16xbf16>
    %c1_88 = arith.constant 1 : index
    %c1_89 = arith.constant 1 : index
    %c0_90 = arith.constant 0 : index
    %c0_91 = arith.constant 0 : index
    %164 = vector.load %arg3[%c1_88, %c1_89, %c0_90, %c0_91] : memref<3x3x16x32xbf16, #tpu.memory_space<vmem>>, vector<1x1x16x32xbf16>
    %165 = vector.shape_cast %164 : vector<1x1x16x32xbf16> to vector<16x32xbf16>
    %cst_92 = arith.constant dense<0.000000e+00> : vector<256x32xf32>
    %166 = tpu.matmul %163, %165, %cst_92 {dimension_numbers = #tpu.dot_dimension_numbers<[1], [0], [0], [1], [0, 0, 1, 1], [], []>} : vector<256x16xbf16>, vector<16x32xbf16>, vector<256x32xf32> -> vector<256x32xf32>
    %167 = arith.addf %162, %166 : vector<256x32xf32>
    %c18 = arith.constant 18 : index
    %c0_93 = arith.constant 0 : index
    %168 = vector.load %arg23[%c18, %c0_93] : memref<290x16xbf16, #tpu.memory_space<vmem>>, vector<256x16xbf16>
    %169 = arith.mulf %168, %138 : vector<256x16xbf16>
    %c1_94 = arith.constant 1 : index
    %c2_95 = arith.constant 2 : index
    %c0_96 = arith.constant 0 : index
    %c0_97 = arith.constant 0 : index
    %170 = vector.load %arg3[%c1_94, %c2_95, %c0_96, %c0_97] : memref<3x3x16x32xbf16, #tpu.memory_space<vmem>>, vector<1x1x16x32xbf16>
    %171 = vector.shape_cast %170 : vector<1x1x16x32xbf16> to vector<16x32xbf16>
    %cst_98 = arith.constant dense<0.000000e+00> : vector<256x32xf32>
    %172 = tpu.matmul %169, %171, %cst_98 {dimension_numbers = #tpu.dot_dimension_numbers<[1], [0], [0], [1], [0, 0, 1, 1], [], []>} : vector<256x16xbf16>, vector<16x32xbf16>, vector<256x32xf32> -> vector<256x32xf32>
    %173 = arith.addf %167, %172 : vector<256x32xf32>
    %c32_99 = arith.constant 32 : index
    %c0_100 = arith.constant 0 : index
    %174 = vector.load %arg23[%c32_99, %c0_100] : memref<290x16xbf16, #tpu.memory_space<vmem>>, vector<256x16xbf16>
    %175 = arith.mulf %174, %131 : vector<256x16xbf16>
    %c2_101 = arith.constant 2 : index
    %c0_102 = arith.constant 0 : index
    %c0_103 = arith.constant 0 : index
    %c0_104 = arith.constant 0 : index
    %176 = vector.load %arg3[%c2_101, %c0_102, %c0_103, %c0_104] : memref<3x3x16x32xbf16, #tpu.memory_space<vmem>>, vector<1x1x16x32xbf16>
    %177 = vector.shape_cast %176 : vector<1x1x16x32xbf16> to vector<16x32xbf16>
    %cst_105 = arith.constant dense<0.000000e+00> : vector<256x32xf32>
    %178 = tpu.matmul %175, %177, %cst_105 {dimension_numbers = #tpu.dot_dimension_numbers<[1], [0], [0], [1], [0, 0, 1, 1], [], []>} : vector<256x16xbf16>, vector<16x32xbf16>, vector<256x32xf32> -> vector<256x32xf32>
    %179 = arith.addf %173, %178 : vector<256x32xf32>
    %c33 = arith.constant 33 : index
    %c0_106 = arith.constant 0 : index
    %180 = vector.load %arg23[%c33, %c0_106] : memref<290x16xbf16, #tpu.memory_space<vmem>>, vector<256x16xbf16>
    %c2_107 = arith.constant 2 : index
    %c1_108 = arith.constant 1 : index
    %c0_109 = arith.constant 0 : index
    %c0_110 = arith.constant 0 : index
    %181 = vector.load %arg3[%c2_107, %c1_108, %c0_109, %c0_110] : memref<3x3x16x32xbf16, #tpu.memory_space<vmem>>, vector<1x1x16x32xbf16>
    %182 = vector.shape_cast %181 : vector<1x1x16x32xbf16> to vector<16x32xbf16>
    %cst_111 = arith.constant dense<0.000000e+00> : vector<256x32xf32>
    %183 = tpu.matmul %180, %182, %cst_111 {dimension_numbers = #tpu.dot_dimension_numbers<[1], [0], [0], [1], [0, 0, 1, 1], [], []>} : vector<256x16xbf16>, vector<16x32xbf16>, vector<256x32xf32> -> vector<256x32xf32>
    %184 = arith.addf %179, %183 : vector<256x32xf32>
    %c34 = arith.constant 34 : index
    %c0_112 = arith.constant 0 : index
    %185 = vector.load %arg23[%c34, %c0_112] : memref<290x16xbf16, #tpu.memory_space<vmem>>, vector<256x16xbf16>
    %186 = arith.mulf %185, %138 : vector<256x16xbf16>
    %c2_113 = arith.constant 2 : index
    %c2_114 = arith.constant 2 : index
    %c0_115 = arith.constant 0 : index
    %c0_116 = arith.constant 0 : index
    %187 = vector.load %arg3[%c2_113, %c2_114, %c0_115, %c0_116] : memref<3x3x16x32xbf16, #tpu.memory_space<vmem>>, vector<1x1x16x32xbf16>
    %188 = vector.shape_cast %187 : vector<1x1x16x32xbf16> to vector<16x32xbf16>
    %cst_117 = arith.constant dense<0.000000e+00> : vector<256x32xf32>
    %189 = tpu.matmul %186, %188, %cst_117 {dimension_numbers = #tpu.dot_dimension_numbers<[1], [0], [0], [1], [0, 0, 1, 1], [], []>} : vector<256x16xbf16>, vector<16x32xbf16>, vector<256x32xf32> -> vector<256x32xf32>
    %190 = arith.addf %184, %189 : vector<256x32xf32>
    %191 = arith.addf %190, %107 : vector<256x32xf32>
    %cst_118 = arith.constant 0.000000e+00 : f32
    %192 = vector.broadcast %cst_118 : f32 to vector<256x32xf32>
    %193 = arith.maximumf %191, %192 : vector<256x32xf32>
    %194 = vector.extract_strided_slice %193 {offsets = [0, 0], sizes = [16, 32], strides = [1, 1]} : vector<256x32xf32> to vector<16x32xf32>
    %195 = vector.extract_strided_slice %193 {offsets = [16, 0], sizes = [16, 32], strides = [1, 1]} : vector<256x32xf32> to vector<16x32xf32>
    %196 = arith.maximumf %194, %195 : vector<16x32xf32>
    %c0_119 = arith.constant 0 : index
    %c0_120 = arith.constant 0 : index
    %197 = vector.load %arg28[%c0_119, %c0_120] : memref<128x32xf32, #tpu.memory_space<vmem>>, vector<16x32xf32>
    tpu.vector_store %arg28[%c0_119, %c0_120], %196 {strides = array<i32>} : memref<128x32xf32, #tpu.memory_space<vmem>>, vector<16x32xf32>,
    %198 = vector.extract_strided_slice %193 {offsets = [32, 0], sizes = [16, 32], strides = [1, 1]} : vector<256x32xf32> to vector<16x32xf32>
    %199 = vector.extract_strided_slice %193 {offsets = [48, 0], sizes = [16, 32], strides = [1, 1]} : vector<256x32xf32> to vector<16x32xf32>
    %200 = arith.maximumf %198, %199 : vector<16x32xf32>
    %c16_121 = arith.constant 16 : index
    %c0_122 = arith.constant 0 : index
    %201 = vector.load %arg28[%c16_121, %c0_122] : memref<128x32xf32, #tpu.memory_space<vmem>>, vector<16x32xf32>
    tpu.vector_store %arg28[%c16_121, %c0_122], %200 {strides = array<i32>} : memref<128x32xf32, #tpu.memory_space<vmem>>, vector<16x32xf32>,
    %202 = vector.extract_strided_slice %193 {offsets = [64, 0], sizes = [16, 32], strides = [1, 1]} : vector<256x32xf32> to vector<16x32xf32>
    %203 = vector.extract_strided_slice %193 {offsets = [80, 0], sizes = [16, 32], strides = [1, 1]} : vector<256x32xf32> to vector<16x32xf32>
    %204 = arith.maximumf %202, %203 : vector<16x32xf32>
    %c32_123 = arith.constant 32 : index
    %c0_124 = arith.constant 0 : index
    %205 = vector.load %arg28[%c32_123, %c0_124] : memref<128x32xf32, #tpu.memory_space<vmem>>, vector<16x32xf32>
    tpu.vector_store %arg28[%c32_123, %c0_124], %204 {strides = array<i32>} : memref<128x32xf32, #tpu.memory_space<vmem>>, vector<16x32xf32>,
    %206 = vector.extract_strided_slice %193 {offsets = [96, 0], sizes = [16, 32], strides = [1, 1]} : vector<256x32xf32> to vector<16x32xf32>
    %207 = vector.extract_strided_slice %193 {offsets = [112, 0], sizes = [16, 32], strides = [1, 1]} : vector<256x32xf32> to vector<16x32xf32>
    %208 = arith.maximumf %206, %207 : vector<16x32xf32>
    %c48 = arith.constant 48 : index
    %c0_125 = arith.constant 0 : index
    %209 = vector.load %arg28[%c48, %c0_125] : memref<128x32xf32, #tpu.memory_space<vmem>>, vector<16x32xf32>
    tpu.vector_store %arg28[%c48, %c0_125], %208 {strides = array<i32>} : memref<128x32xf32, #tpu.memory_space<vmem>>, vector<16x32xf32>,
    %210 = vector.extract_strided_slice %193 {offsets = [128, 0], sizes = [16, 32], strides = [1, 1]} : vector<256x32xf32> to vector<16x32xf32>
    %211 = vector.extract_strided_slice %193 {offsets = [144, 0], sizes = [16, 32], strides = [1, 1]} : vector<256x32xf32> to vector<16x32xf32>
    %212 = arith.maximumf %210, %211 : vector<16x32xf32>
    %c64_126 = arith.constant 64 : index
    %c0_127 = arith.constant 0 : index
    %213 = vector.load %arg28[%c64_126, %c0_127] : memref<128x32xf32, #tpu.memory_space<vmem>>, vector<16x32xf32>
    tpu.vector_store %arg28[%c64_126, %c0_127], %212 {strides = array<i32>} : memref<128x32xf32, #tpu.memory_space<vmem>>, vector<16x32xf32>,
    %214 = vector.extract_strided_slice %193 {offsets = [160, 0], sizes = [16, 32], strides = [1, 1]} : vector<256x32xf32> to vector<16x32xf32>
    %215 = vector.extract_strided_slice %193 {offsets = [176, 0], sizes = [16, 32], strides = [1, 1]} : vector<256x32xf32> to vector<16x32xf32>
    %216 = arith.maximumf %214, %215 : vector<16x32xf32>
    %c80 = arith.constant 80 : index
    %c0_128 = arith.constant 0 : index
    %217 = vector.load %arg28[%c80, %c0_128] : memref<128x32xf32, #tpu.memory_space<vmem>>, vector<16x32xf32>
    tpu.vector_store %arg28[%c80, %c0_128], %216 {strides = array<i32>} : memref<128x32xf32, #tpu.memory_space<vmem>>, vector<16x32xf32>,
    %218 = vector.extract_strided_slice %193 {offsets = [192, 0], sizes = [16, 32], strides = [1, 1]} : vector<256x32xf32> to vector<16x32xf32>
    %219 = vector.extract_strided_slice %193 {offsets = [208, 0], sizes = [16, 32], strides = [1, 1]} : vector<256x32xf32> to vector<16x32xf32>
    %220 = arith.maximumf %218, %219 : vector<16x32xf32>
    %c96_129 = arith.constant 96 : index
    %c0_130 = arith.constant 0 : index
    %221 = vector.load %arg28[%c96_129, %c0_130] : memref<128x32xf32, #tpu.memory_space<vmem>>, vector<16x32xf32>
    tpu.vector_store %arg28[%c96_129, %c0_130], %220 {strides = array<i32>} : memref<128x32xf32, #tpu.memory_space<vmem>>, vector<16x32xf32>,
    %222 = vector.extract_strided_slice %193 {offsets = [224, 0], sizes = [16, 32], strides = [1, 1]} : vector<256x32xf32> to vector<16x32xf32>
    %223 = vector.extract_strided_slice %193 {offsets = [240, 0], sizes = [16, 32], strides = [1, 1]} : vector<256x32xf32> to vector<16x32xf32>
    %224 = arith.maximumf %222, %223 : vector<16x32xf32>
    %c112 = arith.constant 112 : index
    %c0_131 = arith.constant 0 : index
    %225 = vector.load %arg28[%c112, %c0_131] : memref<128x32xf32, #tpu.memory_space<vmem>>, vector<16x32xf32>
    tpu.vector_store %arg28[%c112, %c0_131], %224 {strides = array<i32>} : memref<128x32xf32, #tpu.memory_space<vmem>>, vector<16x32xf32>,
    %c0_132 = arith.constant 0 : index
    %c0_133 = arith.constant 0 : index
    %226 = tpu.strided_load %arg28[%c0_132, %c0_133] {strides = array<i32: 2, 1>} : memref<128x32xf32, #tpu.memory_space<vmem>>, vector<64x32xf32>
    %c1_134 = arith.constant 1 : index
    %c0_135 = arith.constant 0 : index
    %227 = tpu.strided_load %arg28[%c1_134, %c0_135] {strides = array<i32: 2, 1>} : memref<128x32xf32, #tpu.memory_space<vmem>>, vector<64x32xf32>
    %228 = arith.maximumf %226, %227 : vector<64x32xf32>
    %229 = arith.truncf %228 : vector<64x32xf32> to vector<64x32xbf16>
    %c9 = arith.constant 9 : index
    %c0_136 = arith.constant 0 : index
    %230 = vector.load %arg24[%c9, %c0_136] : memref<82x32xbf16, #tpu.memory_space<vmem>>, vector<64x32xbf16>
    tpu.vector_store %arg24[%c9, %c0_136], %229 {strides = array<i32>} : memref<82x32xbf16, #tpu.memory_space<vmem>>, vector<64x32xbf16>,
    %c0_137 = arith.constant 0 : index
    %c0_138 = arith.constant 0 : index
    %231 = vector.load %arg14[%c0_137, %c0_138] : memref<1x48xf32, #tpu.memory_space<vmem>>, vector<1x48xf32>
    %232 = vector.shape_cast %231 : vector<1x48xf32> to vector<1x48xf32>
    %233 = vector.broadcast %232 : vector<1x48xf32> to vector<64x48xf32>
    %234 = tpu.iota {dimensions = array<i32: 0>} : vector<64x1xi32>
    %c8_i32 = arith.constant 8 : i32
    %c0_i32_139 = arith.constant 0 : i32
    %235 = arith.cmpi eq, %c8_i32, %c0_i32_139 : i32
    %c1_i32_140 = arith.constant 1 : i32
    %236 = arith.select %235, %c1_i32_140, %c8_i32 : i32
    %237 = vector.broadcast %236 : i32 to vector<64x1xi32>
    %238 = arith.remsi %234, %237 : vector<64x1xi32>
    %c0_i32_141 = arith.constant 0 : i32
    %239 = vector.broadcast %c0_i32_141 : i32 to vector<64x1xi32>
    %240 = arith.cmpi ne, %238, %239 : vector<64x1xi32>
    %c0_i32_142 = arith.constant 0 : i32
    %241 = vector.broadcast %c0_i32_142 : i32 to vector<64x1xi32>
    %242 = arith.cmpi slt, %238, %241 : vector<64x1xi32>
    %c0_i32_143 = arith.constant 0 : i32
    %243 = arith.cmpi slt, %236, %c0_i32_143 : i32
    %244 = vector.broadcast %243 : i1 to vector<64x1xi1>
    %245 = vector.broadcast %244 : vector<64x1xi1> to vector<64x1xi1>
    %246 = arith.xori %242, %245 : vector<64x1xi1>
    %247 = arith.andi %246, %240 : vector<64x1xi1>
    %248 = vector.broadcast %236 : i32 to vector<64x1xi32>
    %249 = arith.addi %238, %248 : vector<64x1xi32>
    %250 = arith.select %247, %249, %238 : vector<64x1xi1>, vector<64x1xi32>
    %c0_i32_144 = arith.constant 0 : i32
    %251 = vector.broadcast %c0_i32_144 : i32 to vector<64x1xi32>
    %252 = arith.cmpi ne, %250, %251 : vector<64x1xi32>
    %253 = vector.shape_cast %252 : vector<64x1xi1> to vector<64x1xi1>
    %254 = vector.broadcast %253 : vector<64x1xi1> to vector<64x32xi1>
    %255 = arith.extui %254 : vector<64x32xi1> to vector<64x32xi32>
    %256 = arith.sitofp %255 : vector<64x32xi32> to vector<64x32xf32>
    %257 = arith.truncf %256 : vector<64x32xf32> to vector<64x32xbf16>
    %c7_i32 = arith.constant 7 : i32
    %258 = vector.broadcast %c7_i32 : i32 to vector<64x1xi32>
    %259 = arith.cmpi ne, %250, %258 : vector<64x1xi32>
    %260 = vector.shape_cast %259 : vector<64x1xi1> to vector<64x1xi1>
    %261 = vector.broadcast %260 : vector<64x1xi1> to vector<64x32xi1>
    %262 = arith.extui %261 : vector<64x32xi1> to vector<64x32xi32>
    %263 = arith.sitofp %262 : vector<64x32xi32> to vector<64x32xf32>
    %264 = arith.truncf %263 : vector<64x32xf32> to vector<64x32xbf16>
    %cst_145 = arith.constant 0.000000e+00 : f32
    %265 = vector.broadcast %cst_145 : f32 to vector<64x48xf32>
    %c0_146 = arith.constant 0 : index
    %c0_147 = arith.constant 0 : index
    %266 = vector.load %arg24[%c0_146, %c0_147] : memref<82x32xbf16, #tpu.memory_space<vmem>>, vector<64x32xbf16>
    %267 = arith.mulf %266, %257 : vector<64x32xbf16>
    %c0_148 = arith.constant 0 : index
    %c0_149 = arith.constant 0 : index
    %c0_150 = arith.constant 0 : index
    %c0_151 = arith.constant 0 : index
    %268 = vector.load %arg4[%c0_148, %c0_149, %c0_150, %c0_151] : memref<3x3x32x48xbf16, #tpu.memory_space<vmem>>, vector<1x1x32x48xbf16>
    %269 = vector.shape_cast %268 : vector<1x1x32x48xbf16> to vector<32x48xbf16>
    %cst_152 = arith.constant dense<0.000000e+00> : vector<64x48xf32>
    %270 = tpu.matmul %267, %269, %cst_152 {dimension_numbers = #tpu.dot_dimension_numbers<[1], [0], [0], [1], [0, 0, 1, 1], [], []>} : vector<64x32xbf16>, vector<32x48xbf16>, vector<64x48xf32> -> vector<64x48xf32>
    %271 = arith.addf %265, %270 : vector<64x48xf32>
    %c1_153 = arith.constant 1 : index
    %c0_154 = arith.constant 0 : index
    %272 = vector.load %arg24[%c1_153, %c0_154] : memref<82x32xbf16, #tpu.memory_space<vmem>>, vector<64x32xbf16>
    %c0_155 = arith.constant 0 : index
    %c1_156 = arith.constant 1 : index
    %c0_157 = arith.constant 0 : index
    %c0_158 = arith.constant 0 : index
    %273 = vector.load %arg4[%c0_155, %c1_156, %c0_157, %c0_158] : memref<3x3x32x48xbf16, #tpu.memory_space<vmem>>, vector<1x1x32x48xbf16>
    %274 = vector.shape_cast %273 : vector<1x1x32x48xbf16> to vector<32x48xbf16>
    %cst_159 = arith.constant dense<0.000000e+00> : vector<64x48xf32>
    %275 = tpu.matmul %272, %274, %cst_159 {dimension_numbers = #tpu.dot_dimension_numbers<[1], [0], [0], [1], [0, 0, 1, 1], [], []>} : vector<64x32xbf16>, vector<32x48xbf16>, vector<64x48xf32> -> vector<64x48xf32>
    %276 = arith.addf %271, %275 : vector<64x48xf32>
    %c2_160 = arith.constant 2 : index
    %c0_161 = arith.constant 0 : index
    %277 = vector.load %arg24[%c2_160, %c0_161] : memref<82x32xbf16, #tpu.memory_space<vmem>>, vector<64x32xbf16>
    %278 = arith.mulf %277, %264 : vector<64x32xbf16>
    %c0_162 = arith.constant 0 : index
    %c2_163 = arith.constant 2 : index
    %c0_164 = arith.constant 0 : index
    %c0_165 = arith.constant 0 : index
    %279 = vector.load %arg4[%c0_162, %c2_163, %c0_164, %c0_165] : memref<3x3x32x48xbf16, #tpu.memory_space<vmem>>, vector<1x1x32x48xbf16>
    %280 = vector.shape_cast %279 : vector<1x1x32x48xbf16> to vector<32x48xbf16>
    %cst_166 = arith.constant dense<0.000000e+00> : vector<64x48xf32>
    %281 = tpu.matmul %278, %280, %cst_166 {dimension_numbers = #tpu.dot_dimension_numbers<[1], [0], [0], [1], [0, 0, 1, 1], [], []>} : vector<64x32xbf16>, vector<32x48xbf16>, vector<64x48xf32> -> vector<64x48xf32>
    %282 = arith.addf %276, %281 : vector<64x48xf32>
    %c8 = arith.constant 8 : index
    %c0_167 = arith.constant 0 : index
    %283 = vector.load %arg24[%c8, %c0_167] : memref<82x32xbf16, #tpu.memory_space<vmem>>, vector<64x32xbf16>
    %284 = arith.mulf %283, %257 : vector<64x32xbf16>
    %c1_168 = arith.constant 1 : index
    %c0_169 = arith.constant 0 : index
    %c0_170 = arith.constant 0 : index
    %c0_171 = arith.constant 0 : index
    %285 = vector.load %arg4[%c1_168, %c0_169, %c0_170, %c0_171] : memref<3x3x32x48xbf16, #tpu.memory_space<vmem>>, vector<1x1x32x48xbf16>
    %286 = vector.shape_cast %285 : vector<1x1x32x48xbf16> to vector<32x48xbf16>
    %cst_172 = arith.constant dense<0.000000e+00> : vector<64x48xf32>
    %287 = tpu.matmul %284, %286, %cst_172 {dimension_numbers = #tpu.dot_dimension_numbers<[1], [0], [0], [1], [0, 0, 1, 1], [], []>} : vector<64x32xbf16>, vector<32x48xbf16>, vector<64x48xf32> -> vector<64x48xf32>
    %288 = arith.addf %282, %287 : vector<64x48xf32>
    %c9_173 = arith.constant 9 : index
    %c0_174 = arith.constant 0 : index
    %289 = vector.load %arg24[%c9_173, %c0_174] : memref<82x32xbf16, #tpu.memory_space<vmem>>, vector<64x32xbf16>
    %c1_175 = arith.constant 1 : index
    %c1_176 = arith.constant 1 : index
    %c0_177 = arith.constant 0 : index
    %c0_178 = arith.constant 0 : index
    %290 = vector.load %arg4[%c1_175, %c1_176, %c0_177, %c0_178] : memref<3x3x32x48xbf16, #tpu.memory_space<vmem>>, vector<1x1x32x48xbf16>
    %291 = vector.shape_cast %290 : vector<1x1x32x48xbf16> to vector<32x48xbf16>
    %cst_179 = arith.constant dense<0.000000e+00> : vector<64x48xf32>
    %292 = tpu.matmul %289, %291, %cst_179 {dimension_numbers = #tpu.dot_dimension_numbers<[1], [0], [0], [1], [0, 0, 1, 1], [], []>} : vector<64x32xbf16>, vector<32x48xbf16>, vector<64x48xf32> -> vector<64x48xf32>
    %293 = arith.addf %288, %292 : vector<64x48xf32>
    %c10 = arith.constant 10 : index
    %c0_180 = arith.constant 0 : index
    %294 = vector.load %arg24[%c10, %c0_180] : memref<82x32xbf16, #tpu.memory_space<vmem>>, vector<64x32xbf16>
    %295 = arith.mulf %294, %264 : vector<64x32xbf16>
    %c1_181 = arith.constant 1 : index
    %c2_182 = arith.constant 2 : index
    %c0_183 = arith.constant 0 : index
    %c0_184 = arith.constant 0 : index
    %296 = vector.load %arg4[%c1_181, %c2_182, %c0_183, %c0_184] : memref<3x3x32x48xbf16, #tpu.memory_space<vmem>>, vector<1x1x32x48xbf16>
    %297 = vector.shape_cast %296 : vector<1x1x32x48xbf16> to vector<32x48xbf16>
    %cst_185 = arith.constant dense<0.000000e+00> : vector<64x48xf32>
    %298 = tpu.matmul %295, %297, %cst_185 {dimension_numbers = #tpu.dot_dimension_numbers<[1], [0], [0], [1], [0, 0, 1, 1], [], []>} : vector<64x32xbf16>, vector<32x48xbf16>, vector<64x48xf32> -> vector<64x48xf32>
    %299 = arith.addf %293, %298 : vector<64x48xf32>
    %c16_186 = arith.constant 16 : index
    %c0_187 = arith.constant 0 : index
    %300 = vector.load %arg24[%c16_186, %c0_187] : memref<82x32xbf16, #tpu.memory_space<vmem>>, vector<64x32xbf16>
    %301 = arith.mulf %300, %257 : vector<64x32xbf16>
    %c2_188 = arith.constant 2 : index
    %c0_189 = arith.constant 0 : index
    %c0_190 = arith.constant 0 : index
    %c0_191 = arith.constant 0 : index
    %302 = vector.load %arg4[%c2_188, %c0_189, %c0_190, %c0_191] : memref<3x3x32x48xbf16, #tpu.memory_space<vmem>>, vector<1x1x32x48xbf16>
    %303 = vector.shape_cast %302 : vector<1x1x32x48xbf16> to vector<32x48xbf16>
    %cst_192 = arith.constant dense<0.000000e+00> : vector<64x48xf32>
    %304 = tpu.matmul %301, %303, %cst_192 {dimension_numbers = #tpu.dot_dimension_numbers<[1], [0], [0], [1], [0, 0, 1, 1], [], []>} : vector<64x32xbf16>, vector<32x48xbf16>, vector<64x48xf32> -> vector<64x48xf32>
    %305 = arith.addf %299, %304 : vector<64x48xf32>
    %c17_193 = arith.constant 17 : index
    %c0_194 = arith.constant 0 : index
    %306 = vector.load %arg24[%c17_193, %c0_194] : memref<82x32xbf16, #tpu.memory_space<vmem>>, vector<64x32xbf16>
    %c2_195 = arith.constant 2 : index
    %c1_196 = arith.constant 1 : index
    %c0_197 = arith.constant 0 : index
    %c0_198 = arith.constant 0 : index
    %307 = vector.load %arg4[%c2_195, %c1_196, %c0_197, %c0_198] : memref<3x3x32x48xbf16, #tpu.memory_space<vmem>>, vector<1x1x32x48xbf16>
    %308 = vector.shape_cast %307 : vector<1x1x32x48xbf16> to vector<32x48xbf16>
    %cst_199 = arith.constant dense<0.000000e+00> : vector<64x48xf32>
    %309 = tpu.matmul %306, %308, %cst_199 {dimension_numbers = #tpu.dot_dimension_numbers<[1], [0], [0], [1], [0, 0, 1, 1], [], []>} : vector<64x32xbf16>, vector<32x48xbf16>, vector<64x48xf32> -> vector<64x48xf32>
    %310 = arith.addf %305, %309 : vector<64x48xf32>
    %c18_200 = arith.constant 18 : index
    %c0_201 = arith.constant 0 : index
    %311 = vector.load %arg24[%c18_200, %c0_201] : memref<82x32xbf16, #tpu.memory_space<vmem>>, vector<64x32xbf16>
    %312 = arith.mulf %311, %264 : vector<64x32xbf16>
    %c2_202 = arith.constant 2 : index
    %c2_203 = arith.constant 2 : index
    %c0_204 = arith.constant 0 : index
    %c0_205 = arith.constant 0 : index
    %313 = vector.load %arg4[%c2_202, %c2_203, %c0_204, %c0_205] : memref<3x3x32x48xbf16, #tpu.memory_space<vmem>>, vector<1x1x32x48xbf16>
    %314 = vector.shape_cast %313 : vector<1x1x32x48xbf16> to vector<32x48xbf16>
    %cst_206 = arith.constant dense<0.000000e+00> : vector<64x48xf32>
    %315 = tpu.matmul %312, %314, %cst_206 {dimension_numbers = #tpu.dot_dimension_numbers<[1], [0], [0], [1], [0, 0, 1, 1], [], []>} : vector<64x32xbf16>, vector<32x48xbf16>, vector<64x48xf32> -> vector<64x48xf32>
    %316 = arith.addf %310, %315 : vector<64x48xf32>
    %317 = arith.addf %316, %233 : vector<64x48xf32>
    %cst_207 = arith.constant 0.000000e+00 : f32
    %318 = vector.broadcast %cst_207 : f32 to vector<64x48xf32>
    %319 = arith.maximumf %317, %318 : vector<64x48xf32>
    %320 = vector.extract_strided_slice %319 {offsets = [0, 0], sizes = [8, 48], strides = [1, 1]} : vector<64x48xf32> to vector<8x48xf32>
    %321 = vector.extract_strided_slice %319 {offsets = [8, 0], sizes = [8, 48], strides = [1, 1]} : vector<64x48xf32> to vector<8x48xf32>
    %322 = arith.maximumf %320, %321 : vector<8x48xf32>
    %c0_208 = arith.constant 0 : index
    %c0_209 = arith.constant 0 : index
    %323 = vector.load %arg29[%c0_208, %c0_209] : memref<32x48xf32, #tpu.memory_space<vmem>>, vector<8x48xf32>
    tpu.vector_store %arg29[%c0_208, %c0_209], %322 {strides = array<i32>} : memref<32x48xf32, #tpu.memory_space<vmem>>, vector<8x48xf32>,
    %324 = vector.extract_strided_slice %319 {offsets = [16, 0], sizes = [8, 48], strides = [1, 1]} : vector<64x48xf32> to vector<8x48xf32>
    %325 = vector.extract_strided_slice %319 {offsets = [24, 0], sizes = [8, 48], strides = [1, 1]} : vector<64x48xf32> to vector<8x48xf32>
    %326 = arith.maximumf %324, %325 : vector<8x48xf32>
    %c8_210 = arith.constant 8 : index
    %c0_211 = arith.constant 0 : index
    %327 = vector.load %arg29[%c8_210, %c0_211] : memref<32x48xf32, #tpu.memory_space<vmem>>, vector<8x48xf32>
    tpu.vector_store %arg29[%c8_210, %c0_211], %326 {strides = array<i32>} : memref<32x48xf32, #tpu.memory_space<vmem>>, vector<8x48xf32>,
    %328 = vector.extract_strided_slice %319 {offsets = [32, 0], sizes = [8, 48], strides = [1, 1]} : vector<64x48xf32> to vector<8x48xf32>
    %329 = vector.extract_strided_slice %319 {offsets = [40, 0], sizes = [8, 48], strides = [1, 1]} : vector<64x48xf32> to vector<8x48xf32>
    %330 = arith.maximumf %328, %329 : vector<8x48xf32>
    %c16_212 = arith.constant 16 : index
    %c0_213 = arith.constant 0 : index
    %331 = vector.load %arg29[%c16_212, %c0_213] : memref<32x48xf32, #tpu.memory_space<vmem>>, vector<8x48xf32>
    tpu.vector_store %arg29[%c16_212, %c0_213], %330 {strides = array<i32>} : memref<32x48xf32, #tpu.memory_space<vmem>>, vector<8x48xf32>,
    %332 = vector.extract_strided_slice %319 {offsets = [48, 0], sizes = [8, 48], strides = [1, 1]} : vector<64x48xf32> to vector<8x48xf32>
    %333 = vector.extract_strided_slice %319 {offsets = [56, 0], sizes = [8, 48], strides = [1, 1]} : vector<64x48xf32> to vector<8x48xf32>
    %334 = arith.maximumf %332, %333 : vector<8x48xf32>
    %c24 = arith.constant 24 : index
    %c0_214 = arith.constant 0 : index
    %335 = vector.load %arg29[%c24, %c0_214] : memref<32x48xf32, #tpu.memory_space<vmem>>, vector<8x48xf32>
    tpu.vector_store %arg29[%c24, %c0_214], %334 {strides = array<i32>} : memref<32x48xf32, #tpu.memory_space<vmem>>, vector<8x48xf32>,
    %c0_215 = arith.constant 0 : index
    %c0_216 = arith.constant 0 : index
    %336 = tpu.strided_load %arg29[%c0_215, %c0_216] {strides = array<i32: 2, 1>} : memref<32x48xf32, #tpu.memory_space<vmem>>, vector<16x48xf32>
    %c1_217 = arith.constant 1 : index
    %c0_218 = arith.constant 0 : index
    %337 = tpu.strided_load %arg29[%c1_217, %c0_218] {strides = array<i32: 2, 1>} : memref<32x48xf32, #tpu.memory_space<vmem>>, vector<16x48xf32>
    %338 = arith.maximumf %336, %337 : vector<16x48xf32>
    %339 = arith.truncf %338 : vector<16x48xf32> to vector<16x48xbf16>
    %c5 = arith.constant 5 : index
    %c0_219 = arith.constant 0 : index
    %340 = vector.load %arg25[%c5, %c0_219] : memref<26x48xbf16, #tpu.memory_space<vmem>>, vector<16x48xbf16>
    tpu.vector_store %arg25[%c5, %c0_219], %339 {strides = array<i32>} : memref<26x48xbf16, #tpu.memory_space<vmem>>, vector<16x48xbf16>,
    %c0_220 = arith.constant 0 : index
    %c0_221 = arith.constant 0 : index
    %341 = vector.load %arg15[%c0_220, %c0_221] : memref<1x64xf32, #tpu.memory_space<vmem>>, vector<1x64xf32>
    %342 = vector.shape_cast %341 : vector<1x64xf32> to vector<1x64xf32>
    %343 = vector.broadcast %342 : vector<1x64xf32> to vector<16x64xf32>
    %344 = tpu.iota {dimensions = array<i32: 0>} : vector<16x1xi32>
    %c4_i32 = arith.constant 4 : i32
    %c0_i32_222 = arith.constant 0 : i32
    %345 = arith.cmpi eq, %c4_i32, %c0_i32_222 : i32
    %c1_i32_223 = arith.constant 1 : i32
    %346 = arith.select %345, %c1_i32_223, %c4_i32 : i32
    %347 = vector.broadcast %346 : i32 to vector<16x1xi32>
    %348 = arith.remsi %344, %347 : vector<16x1xi32>
    %c0_i32_224 = arith.constant 0 : i32
    %349 = vector.broadcast %c0_i32_224 : i32 to vector<16x1xi32>
    %350 = arith.cmpi ne, %348, %349 : vector<16x1xi32>
    %c0_i32_225 = arith.constant 0 : i32
    %351 = vector.broadcast %c0_i32_225 : i32 to vector<16x1xi32>
    %352 = arith.cmpi slt, %348, %351 : vector<16x1xi32>
    %c0_i32_226 = arith.constant 0 : i32
    %353 = arith.cmpi slt, %346, %c0_i32_226 : i32
    %354 = vector.broadcast %353 : i1 to vector<16x1xi1>
    %355 = vector.broadcast %354 : vector<16x1xi1> to vector<16x1xi1>
    %356 = arith.xori %352, %355 : vector<16x1xi1>
    %357 = arith.andi %356, %350 : vector<16x1xi1>
    %358 = vector.broadcast %346 : i32 to vector<16x1xi32>
    %359 = arith.addi %348, %358 : vector<16x1xi32>
    %360 = arith.select %357, %359, %348 : vector<16x1xi1>, vector<16x1xi32>
    %c0_i32_227 = arith.constant 0 : i32
    %361 = vector.broadcast %c0_i32_227 : i32 to vector<16x1xi32>
    %362 = arith.cmpi ne, %360, %361 : vector<16x1xi32>
    %363 = vector.shape_cast %362 : vector<16x1xi1> to vector<16x1xi1>
    %364 = vector.broadcast %363 : vector<16x1xi1> to vector<16x48xi1>
    %365 = arith.extui %364 : vector<16x48xi1> to vector<16x48xi32>
    %366 = arith.sitofp %365 : vector<16x48xi32> to vector<16x48xf32>
    %367 = arith.truncf %366 : vector<16x48xf32> to vector<16x48xbf16>
    %c3_i32 = arith.constant 3 : i32
    %368 = vector.broadcast %c3_i32 : i32 to vector<16x1xi32>
    %369 = arith.cmpi ne, %360, %368 : vector<16x1xi32>
    %370 = vector.shape_cast %369 : vector<16x1xi1> to vector<16x1xi1>
    %371 = vector.broadcast %370 : vector<16x1xi1> to vector<16x48xi1>
    %372 = arith.extui %371 : vector<16x48xi1> to vector<16x48xi32>
    %373 = arith.sitofp %372 : vector<16x48xi32> to vector<16x48xf32>
    %374 = arith.truncf %373 : vector<16x48xf32> to vector<16x48xbf16>
    %cst_228 = arith.constant 0.000000e+00 : f32
    %375 = vector.broadcast %cst_228 : f32 to vector<16x64xf32>
    %c0_229 = arith.constant 0 : index
    %c0_230 = arith.constant 0 : index
    %376 = vector.load %arg25[%c0_229, %c0_230] : memref<26x48xbf16, #tpu.memory_space<vmem>>, vector<16x48xbf16>
    %377 = arith.mulf %376, %367 : vector<16x48xbf16>
    %c0_231 = arith.constant 0 : index
    %c0_232 = arith.constant 0 : index
    %c0_233 = arith.constant 0 : index
    %c0_234 = arith.constant 0 : index
    %378 = vector.load %arg5[%c0_231, %c0_232, %c0_233, %c0_234] : memref<3x3x48x64xbf16, #tpu.memory_space<vmem>>, vector<1x1x48x64xbf16>
    %379 = vector.shape_cast %378 : vector<1x1x48x64xbf16> to vector<48x64xbf16>
    %cst_235 = arith.constant dense<0.000000e+00> : vector<16x64xf32>
    %380 = tpu.matmul %377, %379, %cst_235 {dimension_numbers = #tpu.dot_dimension_numbers<[1], [0], [0], [1], [0, 0, 1, 1], [], []>} : vector<16x48xbf16>, vector<48x64xbf16>, vector<16x64xf32> -> vector<16x64xf32>
    %381 = arith.addf %375, %380 : vector<16x64xf32>
    %c1_236 = arith.constant 1 : index
    %c0_237 = arith.constant 0 : index
    %382 = vector.load %arg25[%c1_236, %c0_237] : memref<26x48xbf16, #tpu.memory_space<vmem>>, vector<16x48xbf16>
    %c0_238 = arith.constant 0 : index
    %c1_239 = arith.constant 1 : index
    %c0_240 = arith.constant 0 : index
    %c0_241 = arith.constant 0 : index
    %383 = vector.load %arg5[%c0_238, %c1_239, %c0_240, %c0_241] : memref<3x3x48x64xbf16, #tpu.memory_space<vmem>>, vector<1x1x48x64xbf16>
    %384 = vector.shape_cast %383 : vector<1x1x48x64xbf16> to vector<48x64xbf16>
    %cst_242 = arith.constant dense<0.000000e+00> : vector<16x64xf32>
    %385 = tpu.matmul %382, %384, %cst_242 {dimension_numbers = #tpu.dot_dimension_numbers<[1], [0], [0], [1], [0, 0, 1, 1], [], []>} : vector<16x48xbf16>, vector<48x64xbf16>, vector<16x64xf32> -> vector<16x64xf32>
    %386 = arith.addf %381, %385 : vector<16x64xf32>
    %c2_243 = arith.constant 2 : index
    %c0_244 = arith.constant 0 : index
    %387 = vector.load %arg25[%c2_243, %c0_244] : memref<26x48xbf16, #tpu.memory_space<vmem>>, vector<16x48xbf16>
    %388 = arith.mulf %387, %374 : vector<16x48xbf16>
    %c0_245 = arith.constant 0 : index
    %c2_246 = arith.constant 2 : index
    %c0_247 = arith.constant 0 : index
    %c0_248 = arith.constant 0 : index
    %389 = vector.load %arg5[%c0_245, %c2_246, %c0_247, %c0_248] : memref<3x3x48x64xbf16, #tpu.memory_space<vmem>>, vector<1x1x48x64xbf16>
    %390 = vector.shape_cast %389 : vector<1x1x48x64xbf16> to vector<48x64xbf16>
    %cst_249 = arith.constant dense<0.000000e+00> : vector<16x64xf32>
    %391 = tpu.matmul %388, %390, %cst_249 {dimension_numbers = #tpu.dot_dimension_numbers<[1], [0], [0], [1], [0, 0, 1, 1], [], []>} : vector<16x48xbf16>, vector<48x64xbf16>, vector<16x64xf32> -> vector<16x64xf32>
    %392 = arith.addf %386, %391 : vector<16x64xf32>
    %c4 = arith.constant 4 : index
    %c0_250 = arith.constant 0 : index
    %393 = vector.load %arg25[%c4, %c0_250] : memref<26x48xbf16, #tpu.memory_space<vmem>>, vector<16x48xbf16>
    %394 = arith.mulf %393, %367 : vector<16x48xbf16>
    %c1_251 = arith.constant 1 : index
    %c0_252 = arith.constant 0 : index
    %c0_253 = arith.constant 0 : index
    %c0_254 = arith.constant 0 : index
    %395 = vector.load %arg5[%c1_251, %c0_252, %c0_253, %c0_254] : memref<3x3x48x64xbf16, #tpu.memory_space<vmem>>, vector<1x1x48x64xbf16>
    %396 = vector.shape_cast %395 : vector<1x1x48x64xbf16> to vector<48x64xbf16>
    %cst_255 = arith.constant dense<0.000000e+00> : vector<16x64xf32>
    %397 = tpu.matmul %394, %396, %cst_255 {dimension_numbers = #tpu.dot_dimension_numbers<[1], [0], [0], [1], [0, 0, 1, 1], [], []>} : vector<16x48xbf16>, vector<48x64xbf16>, vector<16x64xf32> -> vector<16x64xf32>
    %398 = arith.addf %392, %397 : vector<16x64xf32>
    %c5_256 = arith.constant 5 : index
    %c0_257 = arith.constant 0 : index
    %399 = vector.load %arg25[%c5_256, %c0_257] : memref<26x48xbf16, #tpu.memory_space<vmem>>, vector<16x48xbf16>
    %c1_258 = arith.constant 1 : index
    %c1_259 = arith.constant 1 : index
    %c0_260 = arith.constant 0 : index
    %c0_261 = arith.constant 0 : index
    %400 = vector.load %arg5[%c1_258, %c1_259, %c0_260, %c0_261] : memref<3x3x48x64xbf16, #tpu.memory_space<vmem>>, vector<1x1x48x64xbf16>
    %401 = vector.shape_cast %400 : vector<1x1x48x64xbf16> to vector<48x64xbf16>
    %cst_262 = arith.constant dense<0.000000e+00> : vector<16x64xf32>
    %402 = tpu.matmul %399, %401, %cst_262 {dimension_numbers = #tpu.dot_dimension_numbers<[1], [0], [0], [1], [0, 0, 1, 1], [], []>} : vector<16x48xbf16>, vector<48x64xbf16>, vector<16x64xf32> -> vector<16x64xf32>
    %403 = arith.addf %398, %402 : vector<16x64xf32>
    %c6 = arith.constant 6 : index
    %c0_263 = arith.constant 0 : index
    %404 = vector.load %arg25[%c6, %c0_263] : memref<26x48xbf16, #tpu.memory_space<vmem>>, vector<16x48xbf16>
    %405 = arith.mulf %404, %374 : vector<16x48xbf16>
    %c1_264 = arith.constant 1 : index
    %c2_265 = arith.constant 2 : index
    %c0_266 = arith.constant 0 : index
    %c0_267 = arith.constant 0 : index
    %406 = vector.load %arg5[%c1_264, %c2_265, %c0_266, %c0_267] : memref<3x3x48x64xbf16, #tpu.memory_space<vmem>>, vector<1x1x48x64xbf16>
    %407 = vector.shape_cast %406 : vector<1x1x48x64xbf16> to vector<48x64xbf16>
    %cst_268 = arith.constant dense<0.000000e+00> : vector<16x64xf32>
    %408 = tpu.matmul %405, %407, %cst_268 {dimension_numbers = #tpu.dot_dimension_numbers<[1], [0], [0], [1], [0, 0, 1, 1], [], []>} : vector<16x48xbf16>, vector<48x64xbf16>, vector<16x64xf32> -> vector<16x64xf32>
    %409 = arith.addf %403, %408 : vector<16x64xf32>
    %c8_269 = arith.constant 8 : index
    %c0_270 = arith.constant 0 : index
    %410 = vector.load %arg25[%c8_269, %c0_270] : memref<26x48xbf16, #tpu.memory_space<vmem>>, vector<16x48xbf16>
    %411 = arith.mulf %410, %367 : vector<16x48xbf16>
    %c2_271 = arith.constant 2 : index
    %c0_272 = arith.constant 0 : index
    %c0_273 = arith.constant 0 : index
    %c0_274 = arith.constant 0 : index
    %412 = vector.load %arg5[%c2_271, %c0_272, %c0_273, %c0_274] : memref<3x3x48x64xbf16, #tpu.memory_space<vmem>>, vector<1x1x48x64xbf16>
    %413 = vector.shape_cast %412 : vector<1x1x48x64xbf16> to vector<48x64xbf16>
    %cst_275 = arith.constant dense<0.000000e+00> : vector<16x64xf32>
    %414 = tpu.matmul %411, %413, %cst_275 {dimension_numbers = #tpu.dot_dimension_numbers<[1], [0], [0], [1], [0, 0, 1, 1], [], []>} : vector<16x48xbf16>, vector<48x64xbf16>, vector<16x64xf32> -> vector<16x64xf32>
    %415 = arith.addf %409, %414 : vector<16x64xf32>
    %c9_276 = arith.constant 9 : index
    %c0_277 = arith.constant 0 : index
    %416 = vector.load %arg25[%c9_276, %c0_277] : memref<26x48xbf16, #tpu.memory_space<vmem>>, vector<16x48xbf16>
    %c2_278 = arith.constant 2 : index
    %c1_279 = arith.constant 1 : index
    %c0_280 = arith.constant 0 : index
    %c0_281 = arith.constant 0 : index
    %417 = vector.load %arg5[%c2_278, %c1_279, %c0_280, %c0_281] : memref<3x3x48x64xbf16, #tpu.memory_space<vmem>>, vector<1x1x48x64xbf16>
    %418 = vector.shape_cast %417 : vector<1x1x48x64xbf16> to vector<48x64xbf16>
    %cst_282 = arith.constant dense<0.000000e+00> : vector<16x64xf32>
    %419 = tpu.matmul %416, %418, %cst_282 {dimension_numbers = #tpu.dot_dimension_numbers<[1], [0], [0], [1], [0, 0, 1, 1], [], []>} : vector<16x48xbf16>, vector<48x64xbf16>, vector<16x64xf32> -> vector<16x64xf32>
    %420 = arith.addf %415, %419 : vector<16x64xf32>
    %c10_283 = arith.constant 10 : index
    %c0_284 = arith.constant 0 : index
    %421 = vector.load %arg25[%c10_283, %c0_284] : memref<26x48xbf16, #tpu.memory_space<vmem>>, vector<16x48xbf16>
    %422 = arith.mulf %421, %374 : vector<16x48xbf16>
    %c2_285 = arith.constant 2 : index
    %c2_286 = arith.constant 2 : index
    %c0_287 = arith.constant 0 : index
    %c0_288 = arith.constant 0 : index
    %423 = vector.load %arg5[%c2_285, %c2_286, %c0_287, %c0_288] : memref<3x3x48x64xbf16, #tpu.memory_space<vmem>>, vector<1x1x48x64xbf16>
    %424 = vector.shape_cast %423 : vector<1x1x48x64xbf16> to vector<48x64xbf16>
    %cst_289 = arith.constant dense<0.000000e+00> : vector<16x64xf32>
    %425 = tpu.matmul %422, %424, %cst_289 {dimension_numbers = #tpu.dot_dimension_numbers<[1], [0], [0], [1], [0, 0, 1, 1], [], []>} : vector<16x48xbf16>, vector<48x64xbf16>, vector<16x64xf32> -> vector<16x64xf32>
    %426 = arith.addf %420, %425 : vector<16x64xf32>
    %427 = arith.addf %426, %343 : vector<16x64xf32>
    %cst_290 = arith.constant 0.000000e+00 : f32
    %428 = vector.broadcast %cst_290 : f32 to vector<16x64xf32>
    %429 = arith.maximumf %427, %428 : vector<16x64xf32>
    %430 = vector.extract_strided_slice %429 {offsets = [0, 0], sizes = [4, 64], strides = [1, 1]} : vector<16x64xf32> to vector<4x64xf32>
    %431 = vector.extract_strided_slice %429 {offsets = [4, 0], sizes = [4, 64], strides = [1, 1]} : vector<16x64xf32> to vector<4x64xf32>
    %432 = arith.maximumf %430, %431 : vector<4x64xf32>
    %c0_291 = arith.constant 0 : index
    %c0_292 = arith.constant 0 : index
    %433 = vector.load %arg30[%c0_291, %c0_292] : memref<8x64xf32, #tpu.memory_space<vmem>>, vector<4x64xf32>
    tpu.vector_store %arg30[%c0_291, %c0_292], %432 {strides = array<i32>} : memref<8x64xf32, #tpu.memory_space<vmem>>, vector<4x64xf32>,
    %434 = vector.extract_strided_slice %429 {offsets = [8, 0], sizes = [4, 64], strides = [1, 1]} : vector<16x64xf32> to vector<4x64xf32>
    %435 = vector.extract_strided_slice %429 {offsets = [12, 0], sizes = [4, 64], strides = [1, 1]} : vector<16x64xf32> to vector<4x64xf32>
    %436 = arith.maximumf %434, %435 : vector<4x64xf32>
    %c4_293 = arith.constant 4 : index
    %c0_294 = arith.constant 0 : index
    %437 = vector.load %arg30[%c4_293, %c0_294] : memref<8x64xf32, #tpu.memory_space<vmem>>, vector<4x64xf32>
    tpu.vector_store %arg30[%c4_293, %c0_294], %436 {strides = array<i32>} : memref<8x64xf32, #tpu.memory_space<vmem>>, vector<4x64xf32>,
    %c0_295 = arith.constant 0 : index
    %c0_296 = arith.constant 0 : index
    %438 = tpu.strided_load %arg30[%c0_295, %c0_296] {strides = array<i32: 2, 1>} : memref<8x64xf32, #tpu.memory_space<vmem>>, vector<4x64xf32>
    %c1_297 = arith.constant 1 : index
    %c0_298 = arith.constant 0 : index
    %439 = tpu.strided_load %arg30[%c1_297, %c0_298] {strides = array<i32: 2, 1>} : memref<8x64xf32, #tpu.memory_space<vmem>>, vector<4x64xf32>
    %440 = arith.maximumf %438, %439 : vector<4x64xf32>
    %441 = arith.truncf %440 : vector<4x64xf32> to vector<4x64xbf16>
    %c3 = arith.constant 3 : index
    %c0_299 = arith.constant 0 : index
    %442 = vector.load %arg26[%c3, %c0_299] : memref<10x64xbf16, #tpu.memory_space<vmem>>, vector<4x64xbf16>
    tpu.vector_store %arg26[%c3, %c0_299], %441 {strides = array<i32>} : memref<10x64xbf16, #tpu.memory_space<vmem>>, vector<4x64xbf16>,
    %c0_300 = arith.constant 0 : index
    %c0_301 = arith.constant 0 : index
    %443 = vector.load %arg16[%c0_300, %c0_301] : memref<1x96xf32, #tpu.memory_space<vmem>>, vector<1x96xf32>
    %444 = vector.shape_cast %443 : vector<1x96xf32> to vector<1x96xf32>
    %445 = vector.broadcast %444 : vector<1x96xf32> to vector<4x96xf32>
    %446 = tpu.iota {dimensions = array<i32: 0>} : vector<4x1xi32>
    %c2_i32 = arith.constant 2 : i32
    %c0_i32_302 = arith.constant 0 : i32
    %447 = arith.cmpi eq, %c2_i32, %c0_i32_302 : i32
    %c1_i32_303 = arith.constant 1 : i32
    %448 = arith.select %447, %c1_i32_303, %c2_i32 : i32
    %449 = vector.broadcast %448 : i32 to vector<4x1xi32>
    %450 = arith.remsi %446, %449 : vector<4x1xi32>
    %c0_i32_304 = arith.constant 0 : i32
    %451 = vector.broadcast %c0_i32_304 : i32 to vector<4x1xi32>
    %452 = arith.cmpi ne, %450, %451 : vector<4x1xi32>
    %c0_i32_305 = arith.constant 0 : i32
    %453 = vector.broadcast %c0_i32_305 : i32 to vector<4x1xi32>
    %454 = arith.cmpi slt, %450, %453 : vector<4x1xi32>
    %c0_i32_306 = arith.constant 0 : i32
    %455 = arith.cmpi slt, %448, %c0_i32_306 : i32
    %456 = vector.broadcast %455 : i1 to vector<4x1xi1>
    %457 = vector.broadcast %456 : vector<4x1xi1> to vector<4x1xi1>
    %458 = arith.xori %454, %457 : vector<4x1xi1>
    %459 = arith.andi %458, %452 : vector<4x1xi1>
    %460 = vector.broadcast %448 : i32 to vector<4x1xi32>
    %461 = arith.addi %450, %460 : vector<4x1xi32>
    %462 = arith.select %459, %461, %450 : vector<4x1xi1>, vector<4x1xi32>
    %c0_i32_307 = arith.constant 0 : i32
    %463 = vector.broadcast %c0_i32_307 : i32 to vector<4x1xi32>
    %464 = arith.cmpi ne, %462, %463 : vector<4x1xi32>
    %465 = vector.shape_cast %464 : vector<4x1xi1> to vector<4x1xi1>
    %466 = vector.broadcast %465 : vector<4x1xi1> to vector<4x64xi1>
    %467 = arith.extui %466 : vector<4x64xi1> to vector<4x64xi32>
    %468 = arith.sitofp %467 : vector<4x64xi32> to vector<4x64xf32>
    %469 = arith.truncf %468 : vector<4x64xf32> to vector<4x64xbf16>
    %c1_i32_308 = arith.constant 1 : i32
    %470 = vector.broadcast %c1_i32_308 : i32 to vector<4x1xi32>
    %471 = arith.cmpi ne, %462, %470 : vector<4x1xi32>
    %472 = vector.shape_cast %471 : vector<4x1xi1> to vector<4x1xi1>
    %473 = vector.broadcast %472 : vector<4x1xi1> to vector<4x64xi1>
    %474 = arith.extui %473 : vector<4x64xi1> to vector<4x64xi32>
    %475 = arith.sitofp %474 : vector<4x64xi32> to vector<4x64xf32>
    %476 = arith.truncf %475 : vector<4x64xf32> to vector<4x64xbf16>
    %cst_309 = arith.constant 0.000000e+00 : f32
    %477 = vector.broadcast %cst_309 : f32 to vector<4x96xf32>
    %c0_310 = arith.constant 0 : index
    %c0_311 = arith.constant 0 : index
    %478 = vector.load %arg26[%c0_310, %c0_311] : memref<10x64xbf16, #tpu.memory_space<vmem>>, vector<4x64xbf16>
    %479 = arith.mulf %478, %469 : vector<4x64xbf16>
    %c0_312 = arith.constant 0 : index
    %c0_313 = arith.constant 0 : index
    %c0_314 = arith.constant 0 : index
    %c0_315 = arith.constant 0 : index
    %480 = vector.load %arg6[%c0_312, %c0_313, %c0_314, %c0_315] : memref<3x3x64x96xbf16, #tpu.memory_space<vmem>>, vector<1x1x64x96xbf16>
    %481 = vector.shape_cast %480 : vector<1x1x64x96xbf16> to vector<64x96xbf16>
    %cst_316 = arith.constant dense<0.000000e+00> : vector<4x96xf32>
    %482 = tpu.matmul %479, %481, %cst_316 {dimension_numbers = #tpu.dot_dimension_numbers<[1], [0], [0], [1], [0, 0, 1, 1], [], []>} : vector<4x64xbf16>, vector<64x96xbf16>, vector<4x96xf32> -> vector<4x96xf32>
    %483 = arith.addf %477, %482 : vector<4x96xf32>
    %c1_317 = arith.constant 1 : index
    %c0_318 = arith.constant 0 : index
    %484 = vector.load %arg26[%c1_317, %c0_318] : memref<10x64xbf16, #tpu.memory_space<vmem>>, vector<4x64xbf16>
    %c0_319 = arith.constant 0 : index
    %c1_320 = arith.constant 1 : index
    %c0_321 = arith.constant 0 : index
    %c0_322 = arith.constant 0 : index
    %485 = vector.load %arg6[%c0_319, %c1_320, %c0_321, %c0_322] : memref<3x3x64x96xbf16, #tpu.memory_space<vmem>>, vector<1x1x64x96xbf16>
    %486 = vector.shape_cast %485 : vector<1x1x64x96xbf16> to vector<64x96xbf16>
    %cst_323 = arith.constant dense<0.000000e+00> : vector<4x96xf32>
    %487 = tpu.matmul %484, %486, %cst_323 {dimension_numbers = #tpu.dot_dimension_numbers<[1], [0], [0], [1], [0, 0, 1, 1], [], []>} : vector<4x64xbf16>, vector<64x96xbf16>, vector<4x96xf32> -> vector<4x96xf32>
    %488 = arith.addf %483, %487 : vector<4x96xf32>
    %c2_324 = arith.constant 2 : index
    %c0_325 = arith.constant 0 : index
    %489 = vector.load %arg26[%c2_324, %c0_325] : memref<10x64xbf16, #tpu.memory_space<vmem>>, vector<4x64xbf16>
    %490 = arith.mulf %489, %476 : vector<4x64xbf16>
    %c0_326 = arith.constant 0 : index
    %c2_327 = arith.constant 2 : index
    %c0_328 = arith.constant 0 : index
    %c0_329 = arith.constant 0 : index
    %491 = vector.load %arg6[%c0_326, %c2_327, %c0_328, %c0_329] : memref<3x3x64x96xbf16, #tpu.memory_space<vmem>>, vector<1x1x64x96xbf16>
    %492 = vector.shape_cast %491 : vector<1x1x64x96xbf16> to vector<64x96xbf16>
    %cst_330 = arith.constant dense<0.000000e+00> : vector<4x96xf32>
    %493 = tpu.matmul %490, %492, %cst_330 {dimension_numbers = #tpu.dot_dimension_numbers<[1], [0], [0], [1], [0, 0, 1, 1], [], []>} : vector<4x64xbf16>, vector<64x96xbf16>, vector<4x96xf32> -> vector<4x96xf32>
    %494 = arith.addf %488, %493 : vector<4x96xf32>
    %c2_331 = arith.constant 2 : index
    %c0_332 = arith.constant 0 : index
    %495 = vector.load %arg26[%c2_331, %c0_332] : memref<10x64xbf16, #tpu.memory_space<vmem>>, vector<4x64xbf16>
    %496 = arith.mulf %495, %469 : vector<4x64xbf16>
    %c1_333 = arith.constant 1 : index
    %c0_334 = arith.constant 0 : index
    %c0_335 = arith.constant 0 : index
    %c0_336 = arith.constant 0 : index
    %497 = vector.load %arg6[%c1_333, %c0_334, %c0_335, %c0_336] : memref<3x3x64x96xbf16, #tpu.memory_space<vmem>>, vector<1x1x64x96xbf16>
    %498 = vector.shape_cast %497 : vector<1x1x64x96xbf16> to vector<64x96xbf16>
    %cst_337 = arith.constant dense<0.000000e+00> : vector<4x96xf32>
    %499 = tpu.matmul %496, %498, %cst_337 {dimension_numbers = #tpu.dot_dimension_numbers<[1], [0], [0], [1], [0, 0, 1, 1], [], []>} : vector<4x64xbf16>, vector<64x96xbf16>, vector<4x96xf32> -> vector<4x96xf32>
    %500 = arith.addf %494, %499 : vector<4x96xf32>
    %c3_338 = arith.constant 3 : index
    %c0_339 = arith.constant 0 : index
    %501 = vector.load %arg26[%c3_338, %c0_339] : memref<10x64xbf16, #tpu.memory_space<vmem>>, vector<4x64xbf16>
    %c1_340 = arith.constant 1 : index
    %c1_341 = arith.constant 1 : index
    %c0_342 = arith.constant 0 : index
    %c0_343 = arith.constant 0 : index
    %502 = vector.load %arg6[%c1_340, %c1_341, %c0_342, %c0_343] : memref<3x3x64x96xbf16, #tpu.memory_space<vmem>>, vector<1x1x64x96xbf16>
    %503 = vector.shape_cast %502 : vector<1x1x64x96xbf16> to vector<64x96xbf16>
    %cst_344 = arith.constant dense<0.000000e+00> : vector<4x96xf32>
    %504 = tpu.matmul %501, %503, %cst_344 {dimension_numbers = #tpu.dot_dimension_numbers<[1], [0], [0], [1], [0, 0, 1, 1], [], []>} : vector<4x64xbf16>, vector<64x96xbf16>, vector<4x96xf32> -> vector<4x96xf32>
    %505 = arith.addf %500, %504 : vector<4x96xf32>
    %c4_345 = arith.constant 4 : index
    %c0_346 = arith.constant 0 : index
    %506 = vector.load %arg26[%c4_345, %c0_346] : memref<10x64xbf16, #tpu.memory_space<vmem>>, vector<4x64xbf16>
    %507 = arith.mulf %506, %476 : vector<4x64xbf16>
    %c1_347 = arith.constant 1 : index
    %c2_348 = arith.constant 2 : index
    %c0_349 = arith.constant 0 : index
    %c0_350 = arith.constant 0 : index
    %508 = vector.load %arg6[%c1_347, %c2_348, %c0_349, %c0_350] : memref<3x3x64x96xbf16, #tpu.memory_space<vmem>>, vector<1x1x64x96xbf16>
    %509 = vector.shape_cast %508 : vector<1x1x64x96xbf16> to vector<64x96xbf16>
    %cst_351 = arith.constant dense<0.000000e+00> : vector<4x96xf32>
    %510 = tpu.matmul %507, %509, %cst_351 {dimension_numbers = #tpu.dot_dimension_numbers<[1], [0], [0], [1], [0, 0, 1, 1], [], []>} : vector<4x64xbf16>, vector<64x96xbf16>, vector<4x96xf32> -> vector<4x96xf32>
    %511 = arith.addf %505, %510 : vector<4x96xf32>
    %c4_352 = arith.constant 4 : index
    %c0_353 = arith.constant 0 : index
    %512 = vector.load %arg26[%c4_352, %c0_353] : memref<10x64xbf16, #tpu.memory_space<vmem>>, vector<4x64xbf16>
    %513 = arith.mulf %512, %469 : vector<4x64xbf16>
    %c2_354 = arith.constant 2 : index
    %c0_355 = arith.constant 0 : index
    %c0_356 = arith.constant 0 : index
    %c0_357 = arith.constant 0 : index
    %514 = vector.load %arg6[%c2_354, %c0_355, %c0_356, %c0_357] : memref<3x3x64x96xbf16, #tpu.memory_space<vmem>>, vector<1x1x64x96xbf16>
    %515 = vector.shape_cast %514 : vector<1x1x64x96xbf16> to vector<64x96xbf16>
    %cst_358 = arith.constant dense<0.000000e+00> : vector<4x96xf32>
    %516 = tpu.matmul %513, %515, %cst_358 {dimension_numbers = #tpu.dot_dimension_numbers<[1], [0], [0], [1], [0, 0, 1, 1], [], []>} : vector<4x64xbf16>, vector<64x96xbf16>, vector<4x96xf32> -> vector<4x96xf32>
    %517 = arith.addf %511, %516 : vector<4x96xf32>
    %c5_359 = arith.constant 5 : index
    %c0_360 = arith.constant 0 : index
    %518 = vector.load %arg26[%c5_359, %c0_360] : memref<10x64xbf16, #tpu.memory_space<vmem>>, vector<4x64xbf16>
    %c2_361 = arith.constant 2 : index
    %c1_362 = arith.constant 1 : index
    %c0_363 = arith.constant 0 : index
    %c0_364 = arith.constant 0 : index
    %519 = vector.load %arg6[%c2_361, %c1_362, %c0_363, %c0_364] : memref<3x3x64x96xbf16, #tpu.memory_space<vmem>>, vector<1x1x64x96xbf16>
    %520 = vector.shape_cast %519 : vector<1x1x64x96xbf16> to vector<64x96xbf16>
    %cst_365 = arith.constant dense<0.000000e+00> : vector<4x96xf32>
    %521 = tpu.matmul %518, %520, %cst_365 {dimension_numbers = #tpu.dot_dimension_numbers<[1], [0], [0], [1], [0, 0, 1, 1], [], []>} : vector<4x64xbf16>, vector<64x96xbf16>, vector<4x96xf32> -> vector<4x96xf32>
    %522 = arith.addf %517, %521 : vector<4x96xf32>
    %c6_366 = arith.constant 6 : index
    %c0_367 = arith.constant 0 : index
    %523 = vector.load %arg26[%c6_366, %c0_367] : memref<10x64xbf16, #tpu.memory_space<vmem>>, vector<4x64xbf16>
    %524 = arith.mulf %523, %476 : vector<4x64xbf16>
    %c2_368 = arith.constant 2 : index
    %c2_369 = arith.constant 2 : index
    %c0_370 = arith.constant 0 : index
    %c0_371 = arith.constant 0 : index
    %525 = vector.load %arg6[%c2_368, %c2_369, %c0_370, %c0_371] : memref<3x3x64x96xbf16, #tpu.memory_space<vmem>>, vector<1x1x64x96xbf16>
    %526 = vector.shape_cast %525 : vector<1x1x64x96xbf16> to vector<64x96xbf16>
    %cst_372 = arith.constant dense<0.000000e+00> : vector<4x96xf32>
    %527 = tpu.matmul %524, %526, %cst_372 {dimension_numbers = #tpu.dot_dimension_numbers<[1], [0], [0], [1], [0, 0, 1, 1], [], []>} : vector<4x64xbf16>, vector<64x96xbf16>, vector<4x96xf32> -> vector<4x96xf32>
    %528 = arith.addf %522, %527 : vector<4x96xf32>
    %529 = arith.addf %528, %445 : vector<4x96xf32>
    %cst_373 = arith.constant 0.000000e+00 : f32
    %530 = vector.broadcast %cst_373 : f32 to vector<4x96xf32>
    %531 = arith.maximumf %529, %530 : vector<4x96xf32>
    %532 = vector.extract_strided_slice %531 {offsets = [0, 0], sizes = [2, 96], strides = [1, 1]} : vector<4x96xf32> to vector<2x96xf32>
    %533 = vector.extract_strided_slice %531 {offsets = [2, 0], sizes = [2, 96], strides = [1, 1]} : vector<4x96xf32> to vector<2x96xf32>
    %534 = arith.maximumf %532, %533 : vector<2x96xf32>
    %c0_374 = arith.constant 0 : index
    %c0_375 = arith.constant 0 : index
    %535 = vector.load %arg31[%c0_374, %c0_375] : memref<2x96xf32, #tpu.memory_space<vmem>>, vector<2x96xf32>
    tpu.vector_store %arg31[%c0_374, %c0_375], %534 {strides = array<i32>} : memref<2x96xf32, #tpu.memory_space<vmem>>, vector<2x96xf32>,
    %c0_376 = arith.constant 0 : index
    %c0_377 = arith.constant 0 : index
    %536 = tpu.strided_load %arg31[%c0_376, %c0_377] {strides = array<i32: 2, 1>} : memref<2x96xf32, #tpu.memory_space<vmem>>, vector<1x96xf32>
    %c1_378 = arith.constant 1 : index
    %c0_379 = arith.constant 0 : index
    %537 = tpu.strided_load %arg31[%c1_378, %c0_379] {strides = array<i32: 2, 1>} : memref<2x96xf32, #tpu.memory_space<vmem>>, vector<1x96xf32>
    %538 = arith.maximumf %536, %537 : vector<1x96xf32>
    %539 = arith.truncf %538 : vector<1x96xf32> to vector<1x96xbf16>
    %c0_380 = arith.constant 0 : index
    %c0_381 = arith.constant 0 : index
    %540 = vector.load %arg32[%c0_380, %c0_381] : memref<1x96xbf16, #tpu.memory_space<vmem>>, vector<1x96xbf16>
    tpu.vector_store %arg32[%c0_380, %c0_381], %539 {strides = array<i32>} : memref<1x96xbf16, #tpu.memory_space<vmem>>, vector<1x96xbf16>,
    %c0_382 = arith.constant 0 : index
    %c0_383 = arith.constant 0 : index
    %541 = vector.load %arg32[%c0_382, %c0_383] : memref<1x96xbf16, #tpu.memory_space<vmem>>, vector<1x96xbf16>
    %c0_384 = arith.constant 0 : index
    %c0_385 = arith.constant 0 : index
    %542 = vector.load %arg7[%c0_384, %c0_385] : memref<96x96xbf16, #tpu.memory_space<vmem>>, vector<96x96xbf16>
    %cst_386 = arith.constant dense<0.000000e+00> : vector<1x96xf32>
    %543 = tpu.matmul %541, %542, %cst_386 {dimension_numbers = #tpu.dot_dimension_numbers<[1], [0], [0], [1], [0, 0, 1, 1], [], []>} : vector<1x96xbf16>, vector<96x96xbf16>, vector<1x96xf32> -> vector<1x96xf32>
    %c0_387 = arith.constant 0 : index
    %c0_388 = arith.constant 0 : index
    %544 = vector.load %arg17[%c0_387, %c0_388] : memref<1x96xf32, #tpu.memory_space<vmem>>, vector<1x96xf32>
    %545 = arith.addf %543, %544 : vector<1x96xf32>
    %cst_389 = arith.constant 0.000000e+00 : f32
    %546 = vector.broadcast %cst_389 : f32 to vector<1x96xf32>
    %547 = arith.maximumf %545, %546 : vector<1x96xf32>
    %548 = arith.truncf %547 : vector<1x96xf32> to vector<1x96xbf16>
    %c0_390 = arith.constant 0 : index
    %c0_391 = arith.constant 0 : index
    %549 = vector.load %arg8[%c0_390, %c0_391] : memref<96x96xbf16, #tpu.memory_space<vmem>>, vector<96x96xbf16>
    %cst_392 = arith.constant dense<0.000000e+00> : vector<1x96xf32>
    %550 = tpu.matmul %548, %549, %cst_392 {dimension_numbers = #tpu.dot_dimension_numbers<[1], [0], [0], [1], [0, 0, 1, 1], [], []>} : vector<1x96xbf16>, vector<96x96xbf16>, vector<1x96xf32> -> vector<1x96xf32>
    %c0_393 = arith.constant 0 : index
    %c0_394 = arith.constant 0 : index
    %551 = vector.load %arg18[%c0_393, %c0_394] : memref<1x96xf32, #tpu.memory_space<vmem>>, vector<1x96xf32>
    %552 = arith.addf %550, %551 : vector<1x96xf32>
    %cst_395 = arith.constant 0.000000e+00 : f32
    %553 = vector.broadcast %cst_395 : f32 to vector<1x96xf32>
    %554 = arith.maximumf %552, %553 : vector<1x96xf32>
    %555 = arith.truncf %554 : vector<1x96xf32> to vector<1x96xbf16>
    %c0_396 = arith.constant 0 : index
    %c0_397 = arith.constant 0 : index
    %556 = vector.load %arg9[%c0_396, %c0_397] : memref<96x96xbf16, #tpu.memory_space<vmem>>, vector<96x96xbf16>
    %cst_398 = arith.constant dense<0.000000e+00> : vector<1x96xf32>
    %557 = tpu.matmul %555, %556, %cst_398 {dimension_numbers = #tpu.dot_dimension_numbers<[1], [0], [0], [1], [0, 0, 1, 1], [], []>} : vector<1x96xbf16>, vector<96x96xbf16>, vector<1x96xf32> -> vector<1x96xf32>
    %c0_399 = arith.constant 0 : index
    %c0_400 = arith.constant 0 : index
    %558 = vector.load %arg19[%c0_399, %c0_400] : memref<1x96xf32, #tpu.memory_space<vmem>>, vector<1x96xf32>
    %559 = arith.addf %557, %558 : vector<1x96xf32>
    %cst_401 = arith.constant 0.000000e+00 : f32
    %560 = vector.broadcast %cst_401 : f32 to vector<1x96xf32>
    %561 = arith.maximumf %559, %560 : vector<1x96xf32>
    %562 = arith.truncf %561 : vector<1x96xf32> to vector<1x96xbf16>
    %c0_402 = arith.constant 0 : index
    %c0_403 = arith.constant 0 : index
    %563 = vector.load %arg10[%c0_402, %c0_403] : memref<96x96xbf16, #tpu.memory_space<vmem>>, vector<96x96xbf16>
    %cst_404 = arith.constant dense<0.000000e+00> : vector<1x96xf32>
    %564 = tpu.matmul %562, %563, %cst_404 {dimension_numbers = #tpu.dot_dimension_numbers<[1], [0], [0], [1], [0, 0, 1, 1], [], []>} : vector<1x96xbf16>, vector<96x96xbf16>, vector<1x96xf32> -> vector<1x96xf32>
    %c0_405 = arith.constant 0 : index
    %c0_406 = arith.constant 0 : index
    %565 = vector.load %arg20[%c0_405, %c0_406] : memref<1x96xf32, #tpu.memory_space<vmem>>, vector<1x96xf32>
    %566 = arith.addf %564, %565 : vector<1x96xf32>
    %cst_407 = arith.constant 0.000000e+00 : f32
    %567 = vector.broadcast %cst_407 : f32 to vector<1x96xf32>
    %568 = arith.maximumf %566, %567 : vector<1x96xf32>
    %569 = arith.truncf %568 : vector<1x96xf32> to vector<1x96xbf16>
    %c0_408 = arith.constant 0 : index
    %c0_409 = arith.constant 0 : index
    %570 = vector.load %arg11[%c0_408, %c0_409] : memref<96x10xbf16, #tpu.memory_space<vmem>>, vector<96x10xbf16>
    %cst_410 = arith.constant dense<0.000000e+00> : vector<1x10xf32>
    %571 = tpu.matmul %569, %570, %cst_410 {dimension_numbers = #tpu.dot_dimension_numbers<[1], [0], [0], [1], [0, 0, 1, 1], [], []>} : vector<1x96xbf16>, vector<96x10xbf16>, vector<1x10xf32> -> vector<1x10xf32>
    %c0_411 = arith.constant 0 : index
    %c0_412 = arith.constant 0 : index
    %572 = vector.load %arg21[%c0_411, %c0_412] : memref<1x10xf32, #tpu.memory_space<vmem>>, vector<1x10xf32>
    %573 = arith.addf %571, %572 : vector<1x10xf32>
    %cst_413 = arith.constant 0.000000e+00 : f32
    %574 = vector.broadcast %cst_413 : f32 to vector<1x10xf32>
    %575 = arith.maximumf %573, %574 : vector<1x10xf32>
    %c0_414 = arith.constant 0 : index
    %c0_415 = arith.constant 0 : index
    %c0_416 = arith.constant 0 : index
    %576 = vector.load %arg22[%c0_414, %c0_415, %c0_416] : memref<1x1x10xf32, #tpu.memory_space<vmem>>, vector<1x1x10xf32>
    %577 = vector.shape_cast %576 : vector<1x1x10xf32> to vector<1x10xf32>
    %578 = vector.shape_cast %575 : vector<1x10xf32> to vector<1x1x10xf32>
    tpu.vector_store %arg22[%c0_414, %c0_415, %c0_416], %578 {strides = array<i32>} : memref<1x1x10xf32, #tpu.memory_space<vmem>>, vector<1x1x10xf32>,
    return
  }
  func.func @transform_0(%arg0: i32) -> (i32, i32) {
    %c0_i32 = arith.constant 0 : i32
    %c0_i32_0 = arith.constant 0 : i32
    return %arg0, %c0_i32 : i32, i32
  }
  func.func @transform_1(%arg0: i32) -> (i32, i32) {
    %c0_i32 = arith.constant 0 : i32
    %c0_i32_0 = arith.constant 0 : i32
    %c0_i32_1 = arith.constant 0 : i32
    return %c0_i32, %c0_i32_0 : i32, i32
  }
  func.func @transform_2(%arg0: i32) -> (i32, i32, i32, i32) {
    %c0_i32 = arith.constant 0 : i32
    %c0_i32_0 = arith.constant 0 : i32
    %c0_i32_1 = arith.constant 0 : i32
    %c0_i32_2 = arith.constant 0 : i32
    %c0_i32_3 = arith.constant 0 : i32
    return %c0_i32, %c0_i32_0, %c0_i32_1, %c0_i32_2 : i32, i32, i32, i32
  }
  func.func @transform_3(%arg0: i32) -> (i32, i32, i32, i32) {
    %c0_i32 = arith.constant 0 : i32
    %c0_i32_0 = arith.constant 0 : i32
    %c0_i32_1 = arith.constant 0 : i32
    %c0_i32_2 = arith.constant 0 : i32
    %c0_i32_3 = arith.constant 0 : i32
    return %c0_i32, %c0_i32_0, %c0_i32_1, %c0_i32_2 : i32, i32, i32, i32
  }
  func.func @transform_4(%arg0: i32) -> (i32, i32, i32, i32) {
    %c0_i32 = arith.constant 0 : i32
    %c0_i32_0 = arith.constant 0 : i32
    %c0_i32_1 = arith.constant 0 : i32
    %c0_i32_2 = arith.constant 0 : i32
    %c0_i32_3 = arith.constant 0 : i32
    return %c0_i32, %c0_i32_0, %c0_i32_1, %c0_i32_2 : i32, i32, i32, i32
  }
  func.func @transform_5(%arg0: i32) -> (i32, i32, i32, i32) {
    %c0_i32 = arith.constant 0 : i32
    %c0_i32_0 = arith.constant 0 : i32
    %c0_i32_1 = arith.constant 0 : i32
    %c0_i32_2 = arith.constant 0 : i32
    %c0_i32_3 = arith.constant 0 : i32
    return %c0_i32, %c0_i32_0, %c0_i32_1, %c0_i32_2 : i32, i32, i32, i32
  }
  func.func @transform_6(%arg0: i32) -> (i32, i32) {
    %c0_i32 = arith.constant 0 : i32
    %c0_i32_0 = arith.constant 0 : i32
    %c0_i32_1 = arith.constant 0 : i32
    return %c0_i32, %c0_i32_0 : i32, i32
  }
  func.func @transform_7(%arg0: i32) -> (i32, i32) {
    %c0_i32 = arith.constant 0 : i32
    %c0_i32_0 = arith.constant 0 : i32
    %c0_i32_1 = arith.constant 0 : i32
    return %c0_i32, %c0_i32_0 : i32, i32
  }
  func.func @transform_8(%arg0: i32) -> (i32, i32) {
    %c0_i32 = arith.constant 0 : i32
    %c0_i32_0 = arith.constant 0 : i32
    %c0_i32_1 = arith.constant 0 : i32
    return %c0_i32, %c0_i32_0 : i32, i32
  }
  func.func @transform_9(%arg0: i32) -> (i32, i32) {
    %c0_i32 = arith.constant 0 : i32
    %c0_i32_0 = arith.constant 0 : i32
    %c0_i32_1 = arith.constant 0 : i32
    return %c0_i32, %c0_i32_0 : i32, i32
  }
  func.func @transform_10(%arg0: i32) -> (i32, i32) {
    %c0_i32 = arith.constant 0 : i32
    %c0_i32_0 = arith.constant 0 : i32
    %c0_i32_1 = arith.constant 0 : i32
    return %c0_i32, %c0_i32_0 : i32, i32
  }
  func.func @transform_11(%arg0: i32) -> (i32, i32) {
    %c0_i32 = arith.constant 0 : i32
    %c0_i32_0 = arith.constant 0 : i32
    %c0_i32_1 = arith.constant 0 : i32
    return %c0_i32, %c0_i32_0 : i32, i32
  }
  func.func @transform_12(%arg0: i32) -> (i32, i32) {
    %c0_i32 = arith.constant 0 : i32
    %c0_i32_0 = arith.constant 0 : i32
    %c0_i32_1 = arith.constant 0 : i32
    return %c0_i32, %c0_i32_0 : i32, i32
  }
  func.func @transform_13(%arg0: i32) -> (i32, i32) {
    %c0_i32 = arith.constant 0 : i32
    %c0_i32_0 = arith.constant 0 : i32
    %c0_i32_1 = arith.constant 0 : i32
    return %c0_i32, %c0_i32_0 : i32, i32
  }
  func.func @transform_14(%arg0: i32) -> (i32, i32) {
    %c0_i32 = arith.constant 0 : i32
    %c0_i32_0 = arith.constant 0 : i32
    %c0_i32_1 = arith.constant 0 : i32
    return %c0_i32, %c0_i32_0 : i32, i32
  }
  func.func @transform_15(%arg0: i32) -> (i32, i32) {
    %c0_i32 = arith.constant 0 : i32
    %c0_i32_0 = arith.constant 0 : i32
    %c0_i32_1 = arith.constant 0 : i32
    return %c0_i32, %c0_i32_0 : i32, i32
  }
  func.func @transform_16(%arg0: i32) -> (i32, i32) {
    %c0_i32 = arith.constant 0 : i32
    %c0_i32_0 = arith.constant 0 : i32
    %c0_i32_1 = arith.constant 0 : i32
    return %c0_i32, %c0_i32_0 : i32, i32
  }
  func.func @transform_17(%arg0: i32) -> (i32, i32) {
    %c0_i32 = arith.constant 0 : i32
    %c0_i32_0 = arith.constant 0 : i32
    %c0_i32_1 = arith.constant 0 : i32
    return %c0_i32, %c0_i32_0 : i32, i32
  }
  func.func @transform_18(%arg0: i32) -> (i32, i32) {
    %c0_i32 = arith.constant 0 : i32
    %c0_i32_0 = arith.constant 0 : i32
    %c0_i32_1 = arith.constant 0 : i32
    return %c0_i32, %c0_i32_0 : i32, i32
  }
  func.func @transform_19(%arg0: i32) -> (i32, i32) {
    %c0_i32 = arith.constant 0 : i32
    %c0_i32_0 = arith.constant 0 : i32
    %c0_i32_1 = arith.constant 0 : i32
    return %c0_i32, %c0_i32_0 : i32, i32
  }
  func.func @transform_20(%arg0: i32) -> (i32, i32) {
    %c0_i32 = arith.constant 0 : i32
    %c0_i32_0 = arith.constant 0 : i32
    %c0_i32_1 = arith.constant 0 : i32
    return %c0_i32, %c0_i32_0 : i32, i32
  }
  func.func @transform_21(%arg0: i32) -> (i32, i32, i32) {
    %c0_i32 = arith.constant 0 : i32
    %c0_i32_0 = arith.constant 0 : i32
    %c0_i32_1 = arith.constant 0 : i32
    return %arg0, %c0_i32, %c0_i32_0 : i32, i32, i32
  }
}

</mosaic_0001>

<bundles_post_ra>
// kernel: net_forward.1
= control target key start
LH: loop header
LB: loop body
LE: loop exit
PB: predicated region body
PF: predicated region fallthrough
CT: control target
= control target key end

     0   :  { %s15107_s0 = inlined_call_operand.vmem [shape: bf16[2048,32], index: 0, kind: input, shape index: {}]   ;;  %s15108_s1 = inlined_call_operand.vmem [shape: bf16[32,16], index: 1, kind: input, shape index: {}]   ;;  %s15109_s2 = inlined_call_operand.vmem [shape: bf16[3,3,16,32], index: 2, kind: input, shape index: {}]   ;;  %s15110_s3 = inlined_call_operand.vmem [shape: bf16[3,3,32,48], index: 3, kind: input, shape index: {}]   ;;  %s15111_s4 = inlined_call_operand.vmem [shape: bf16[3,3,48,64], index: 4, kind: input, shape index: {}]   ;;  %s15112_s5 = inlined_call_operand.vmem [shape: bf16[3,3,64,96], index: 5, kind: input, shape index: {}]   ;;  %s15113_s6 = inlined_call_operand.vmem [shape: bf16[96,96], index: 6, kind: input, shape index: {}]   ;;  %s15114_s7 = inlined_call_operand.vmem [shape: bf16[96,96], index: 7, kind: input, shape index: {}]   ;;  %s15115_s8 = inlined_call_operand.vmem [shape: bf16[96,96], index: 8, kind: input, shape index: {}]   ;;  %s15116_s9 = inlined_call_operand.vmem [shape: bf16[96,96], index: 9, kind: input, shape index: {}]   ;;  %s15117_s10 = inlined_call_operand.vmem [shape: bf16[96,10], index: 10, kind: input, shape index: {}]   ;;  %s15118_s11 = inlined_call_operand.vmem [shape: f32[1,16], index: 11, kind: input, shape index: {}]   ;;  %s15119_s12 = inlined_call_operand.vmem [shape: f32[1,32], index: 12, kind: input, shape index: {}]   ;;  %s15120_s13 = inlined_call_operand.vmem [shape: f32[1,48], index: 13, kind: input, shape index: {}]   ;;  %s15121_s14 = inlined_call_operand.vmem [shape: f32[1,64], index: 14, kind: input, shape index: {}]   ;;  %s15122_s15 = inlined_call_operand.vmem [shape: f32[1,96], index: 15, kind: input, shape index: {}]   ;;  %s15123_s16 = inlined_call_operand.vmem [shape: f32[1,96], index: 16, kind: input, shape index: {}]   ;;  %s15124_s17 = inlined_call_operand.vmem [shape: f32[1,96], index: 17, kind: input, shape index: {}]   ;;  %s15125_s18 = inlined_call_operand.vmem [shape: f32[1,96], index: 18, kind: input, shape index: {}]   ;;  %s15126_s19 = inlined_call_operand.vmem [shape: f32[1,96], index: 19, kind: input, shape index: {}]   ;;  %s15127_s20 = inlined_call_operand.vmem [shape: f32[1,10], index: 20, kind: input, shape index: {}]   ;;  %s15128_s21 = inlined_call_operand.hbm [shape: f32[2,1,10], index: 21, kind: output, shape index: {}]  }
   0x1   :  { %15222 = sst [smem:[#allocation104_spill]] %s15107_s0 }
   0x2   :  { %15223 = sst [smem:[#allocation105_spill]] %s15108_s1 }
   0x3   :  { %15224 = sst [smem:[#allocation106_spill]] %s15109_s2 }
   0x4   :  { %15225 = sst [smem:[#allocation107_spill]] %s15110_s3 }
   0x5   :  { %15226 = sst [smem:[#allocation108_spill]] %s15111_s4 }
   0x6   :  { %15227 = sst [smem:[#allocation109_spill]] %s15112_s5 }
   0x7   :  { %15228 = sst [smem:[#allocation110_spill]] %s15113_s6 }
   0x8   :  { %15229 = sst [smem:[#allocation111_spill]] %s15118_s11 }
   0x9   :  { %15230 = sst [smem:[#allocation112_spill]] %s15119_s12 }
   0xa   :  { %15231 = sst [smem:[#allocation113_spill]] %s15120_s13 }
   0xb   :  { %26 = vsyncpa [#allocation13], 0 }
   0xc   :  { %28 = vsyncpa [#allocation13 + $0x1], 0  ;;  %s11739_s2 = smov 0   ;;  %s11741_s25 = smov 0  }
   0xd   :  { %s11743_s26 = smov 0   ;;  %s11745_s27 = smov 0  }
   0xe LB: > { %15232 = sst [smem:[#allocation15_spill]] %s11620_s26  ;;  %s11760_s3 = sadd.s32 4294967295, %s11624_s27   ;;  %s11624_s27 = sphi %s11745_s27, %s15516_s27   ;;  %s11620_s26 = sphi %s11743_s26, %s15518_s26   ;;  %s11616_s25 = sphi %s11741_s25, %s15520_s25   ;;  %s11612_s2 = sphi %s11739_s2, %s15519_s2  }
   0xf   : > { %s9608_s28 = sadd.s32 4294967294, %s11624_s27   ;;  %s11764_s29 = sadd.s32 1, %s11624_s27  }
  0x10   : > { %15233 = sst [smem:[#allocation16_spill]] %s11764_s29  ;;  %s487_s0 = sadd.s32 1, %s11620_s26 }
  0x11   : > { %s484_s4 = ssub.s32 %s11624_s27, %s11764_s29  ;;  %p497_p0 = scmp.ne.s32.totalorder %s11620_s26, %s11616_s25 }
  0x12   : > { %p485_p1 = scmp.eq.s32.totalorder %s484_s4, 0  ;;  %p498_p2 = scmp.eq.s32.totalorder %s11760_s3, 1 }
  0x13   : > { %p503_p3 = scmp.ne.s32.totalorder %s11616_s25, %s11612_s2  ;;  %p504_p4 = scmp.eq.s32.totalorder %s9608_s28, 1 }
  0x14   : > { %s11775_s30 = scalar_select %p485_p1, %s11620_s26, %s487_s0  }
  0x15   : > { %p11777_p5 = por %p498_p2, %p497_p0  ;;  %p11781_p6 = por %p504_p4, %p503_p3 }
  0x16   : > { %15234 = sst [smem:[#allocation17_spill]] %s11775_s30  ;;  %p9611_p7 = scmp.ge.s32.totalorder %s11624_s27, 1 }
  0x17   : > { %s15236_s22 = scalar_select %p11781_p6, 1, 0 }
  0x18   : > { %p591_p8 = scmp.lt.s32.totalorder %s11624_s27, 3 }
  0x19   : > { %15237 = sst [smem:[#allocation18_spill]] %s15236_s22 }
  0x1a   : > { %p592_p9 = pnand %p9611_p7, %p591_p8 }
  0x1c   : > { %595 = sbr.rel (%p592_p9) target bundleno = 2759 (0xac7), region = 104 }
  0x21   : > { %s15238_s24 = sld [smem:[#allocation105_spill]]  ;;  %s9612_s28 = sshll.u32 %s11760_s3, 7  ;;  %vm849_vm0 = vcmask 261120   ;;  %vm660_vm1 = vcmask 122880   ;;  %vm661_vm2 = vsmask.f32 256 }
  0x22   : > { %p651_p10 = scmp.lt.s32.totalorder %s9612_s28, 255  ;;  %s15239_s22 = sld [smem:[#allocation104_spill]]  ;;  %v663_v49 = vld [vmem:[#allocation2 + $0x8] sm:$0x1]  ;;  %vm11888_vm3 = vmand %vm660_vm1, %vm661_vm2  ;;  %vm1023_vm4 = vcmask 130048   ;;  %vm657_vm5 = vcmask 125952  }
  0x23   : > { %v664_v55 = vsel %vm11888_vm3, 0, %v663_v49  ;;  %s15243_s11 = sld [smem:[#allocation111_spill]]  ;;  %vm667_vm6 = vsmask.f32 7938  ;;  %vm2182_vm8 = vsmask.f32 4368 }
  0x24   : > { %s15522_s28 = smov (!%p651_p10, %s9612_s28), 255  ;;  %665 = vst [vmem:[#allocation2 + $0x8] sm:$0x1] %v664_v55  ;;  %vm11991_vm7 = vmand %vm657_vm5, %vm667_vm6  ;;  %vm4065_vm13 = vcmask 1041408   ;;  %vm3579_vm14 = vsmask.f32 7424 }
  0x25   : > { %s9613_s30 = sshll.u32 %s15522_s28, 2  ;;  %vm12057_vm9 = vmor %vm661_vm2, %vm2182_vm8  ;;  %vm4232_vm15 = vcmask 1046528   ;;  %s15431_s29 = sld [smem:[#allocation107_spill]] }
  0x26   : > { %s15458_s12 = sld [smem:[#allocation112_spill]] }
  0x27   : > { %v11090_v0 = vld [vmem:[%s15238_s24 + $0x8] sm:$0xff]  ;;  %v11089_v1 = vld [vmem:[%s15238_s24] sm:$0xff]  ;;  %s15508_s13 = sld [smem:[#allocation113_spill]] }
  0x28   : > { %904 = vmatpush.bf16.msra.mxu0 %v11090_v0  ;;  %1218 = vmatpush.bf16.msra.mxu1 %v11090_v0  ;;  %s11797_s23 = scalar_lea.vmem %s15239_s22, %s9613_s30  ;;  %s15240_s30 = sld [smem:[#allocation106_spill]] }
  0x29   : > { %1531 = vmatpush.bf16.msra.mxu2 %v11090_v0  ;;  %1844 = vmatpush.bf16.msra.mxu3 %v11090_v0  ;;  %v11091_v2 = vld [vmem:[%s11797_s23] sm:$0xff]  ;;  %v11092_v6 = vld [vmem:[%s11797_s23 + $0x8] sm:$0xff]  ;;  %v11093_v10 = vld [vmem:[%s11797_s23 + $0x10] sm:$0xff]  ;;  %s15509_s22 = sld [smem:[#allocation108_spill]] }
  0x2a   : > { %v11107_v3 = vld [vmem:[%s11797_s23 + $0x80] sm:$0xff]  ;;  %v11108_v7 = vld [vmem:[%s11797_s23 + $0x88] sm:$0xff]  ;;  %v11109_v11 = vld [vmem:[%s11797_s23 + $0x90] sm:$0xff]  ;;  %s15514_s6 = sld [smem:[#allocation110_spill]] }
  0x2b   : > { %v11123_v4 = vld [vmem:[%s11797_s23 + $0x100] sm:$0xff]  ;;  %v11124_v8 = vld [vmem:[%s11797_s23 + $0x108] sm:$0xff]  ;;  %v11125_v12 = vld [vmem:[%s11797_s23 + $0x110] sm:$0xff] }
  0x2c   : > { %905 = vmatpush.bf16.msra.mxu0 %v11089_v1  ;;  %1219 = vmatpush.bf16.msra.mxu1 %v11089_v1  ;;  %v11139_v5 = vld [vmem:[%s11797_s23 + $0x180] sm:$0xff]  ;;  %v11140_v9 = vld [vmem:[%s11797_s23 + $0x188] sm:$0xff]  ;;  %v11141_v13 = vld [vmem:[%s11797_s23 + $0x190] sm:$0xff] }
  0x2d   : > { %1532 = vmatpush.bf16.msra.mxu2 %v11089_v1  ;;  %1845 = vmatpush.bf16.msra.mxu3 %v11089_v1  ;;  %v11094_v14 = vld [vmem:[%s11797_s23 + $0x18] sm:$0xff]  ;;  %v11095_v18 = vld [vmem:[%s11797_s23 + $0x20] sm:$0xff]  ;;  %v11096_v23 = vld [vmem:[%s11797_s23 + $0x28] sm:$0xff] }
  0x2e   : > { %v11110_v15 = vld [vmem:[%s11797_s23 + $0x98] sm:$0xff]  ;;  %v11111_v19 = vld [vmem:[%s11797_s23 + $0xa0] sm:$0xff]  ;;  %v11172_v22 = vld [vmem:[%s15240_s30 + $0x8] sm:$0xff] }
  0x2f   : > { %9686 = vmatmul.msk.bf16.vlgmr.msra.gmra.mxu0 %vm849_vm0, %v11091_v2  ;;  %9766 = vmatmul.msk.bf16.vlgmr.msra.gmra.mxu1 %vm849_vm0, %v11107_v3  ;;  %v11126_v16 = vld [vmem:[%s11797_s23 + $0x118] sm:$0xff]  ;;  %v11127_v20 = vld [vmem:[%s11797_s23 + $0x120] sm:$0xff]  ;;  %v11112_v24 = vld [vmem:[%s11797_s23 + $0xa8] sm:$0xff] }
  0x30   : > { %9846 = vmatmul.msk.bf16.vlgmr.msra.gmra.mxu2 %vm849_vm0, %v11123_v4  ;;  %9926 = vmatmul.msk.bf16.vlgmr.msra.gmra.mxu3 %vm849_vm0, %v11139_v5  ;;  %v11142_v17 = vld [vmem:[%s11797_s23 + $0x198] sm:$0xff]  ;;  %v11143_v21 = vld [vmem:[%s11797_s23 + $0x1a0] sm:$0xff]  ;;  %v11128_v25 = vld [vmem:[%s11797_s23 + $0x128] sm:$0xff] }
  0x31   : > { %3773 = vmatpush.bf16.msrb.mxu0 %v11172_v22  ;;  %v11144_v26 = vld [vmem:[%s11797_s23 + $0x1a8] sm:$0xff]  ;;  %v11097_v27 = vld [vmem:[%s11797_s23 + $0x30] sm:$0xff]  ;;  %v11098_v31 = vld [vmem:[%s11797_s23 + $0x38] sm:$0xff] }
  0x32   : > { %v11113_v28 = vld [vmem:[%s11797_s23 + $0xb0] sm:$0xff]  ;;  %v11114_v32 = vld [vmem:[%s11797_s23 + $0xb8] sm:$0xff]  ;;  %v11099_v35 = vld [vmem:[%s11797_s23 + $0x40] sm:$0xff] }
  0x33   : > { %v11129_v29 = vld [vmem:[%s11797_s23 + $0x130] sm:$0xff]  ;;  %v11130_v33 = vld [vmem:[%s11797_s23 + $0x138] sm:$0xff]  ;;  %v11115_v36 = vld [vmem:[%s11797_s23 + $0xc0] sm:$0xff] }
  0x34   : > { %v11145_v30 = vld [vmem:[%s11797_s23 + $0x1b0] sm:$0xff]  ;;  %v11146_v34 = vld [vmem:[%s11797_s23 + $0x1b8] sm:$0xff]  ;;  %v11131_v39 = vld [vmem:[%s11797_s23 + $0x140] sm:$0xff] }
  0x35   : > { %v11147_v40 = vld [vmem:[%s11797_s23 + $0x1c0] sm:$0xff]  ;;  %v11100_v45 = vld [vmem:[%s11797_s23 + $0x48] sm:$0xff]  ;;  %v11101_v1 = vld [vmem:[%s11797_s23 + $0x50] sm:$0xff] }
  0x36   : > { %v11116_v48 = vld [vmem:[%s11797_s23 + $0xc8] sm:$0xff]  ;;  %v11909_v60 = vld [vmem:[%s15243_s11] ss:$0 sm:$0xff]  ;;  %v11117_v2 = vld [vmem:[%s11797_s23 + $0xd0] sm:$0xff] }
  0x37   : > { %v11132_v52 = vld [vmem:[%s11797_s23 + $0x148] sm:$0xff]  ;;  %v11133_v5 = vld [vmem:[%s11797_s23 + $0x150] sm:$0xff]  ;;  %v11134_v55 = vld [vmem:[%s11797_s23 + $0x158] sm:$0xff] }
  0x38   : > { %v11148_v53 = vld [vmem:[%s11797_s23 + $0x1c8] sm:$0xff] }
  0x3f   : > { %9687 = vmatmul.msk.bf16.gmra.mxu0 %vm849_vm0, %v11092_v6  ;;  %9767 = vmatmul.msk.bf16.gmra.mxu1 %vm849_vm0, %v11108_v7  ;;  %v11149_v6 = vld [vmem:[%s11797_s23 + $0x1d0] sm:$0xff] }
  0x40   : > { %9847 = vmatmul.msk.bf16.gmra.mxu2 %vm849_vm0, %v11124_v8  ;;  %9927 = vmatmul.msk.bf16.gmra.mxu3 %vm849_vm0, %v11140_v9 }
  0x4f   : > { %9688 = vmatmul.msk.bf16.gmra.mxu0 %vm849_vm0, %v11093_v10  ;;  %9768 = vmatmul.msk.bf16.gmra.mxu1 %vm849_vm0, %v11109_v11 }
  0x50   : > { %9848 = vmatmul.msk.bf16.gmra.mxu2 %vm849_vm0, %v11125_v12  ;;  %9928 = vmatmul.msk.bf16.gmra.mxu3 %vm849_vm0, %v11141_v13 }
  0x5f   : > { %9689 = vmatmul.msk.bf16.gmra.mxu0 %vm849_vm0, %v11094_v14  ;;  %9769 = vmatmul.msk.bf16.gmra.mxu1 %vm849_vm0, %v11110_v15 }
  0x60   : > { %9849 = vmatmul.msk.bf16.gmra.mxu2 %vm849_vm0, %v11126_v16  ;;  %9929 = vmatmul.msk.bf16.gmra.mxu3 %vm849_vm0, %v11142_v17 }
  0x6f   : > { %9690 = vmatmul.msk.bf16.gmra.mxu0 %vm849_vm0, %v11095_v18  ;;  %9770 = vmatmul.msk.bf16.gmra.mxu1 %vm849_vm0, %v11111_v19 }
  0x70   : > { %9850 = vmatmul.msk.bf16.gmra.mxu2 %vm849_vm0, %v11127_v20  ;;  %9930 = vmatmul.msk.bf16.gmra.mxu3 %vm849_vm0, %v11143_v21 }
  0x7f   : > { %9691 = vmatmul.msk.bf16.gmra.mxu0 %vm849_vm0, %v11096_v23  ;;  %9771 = vmatmul.msk.bf16.gmra.mxu1 %vm849_vm0, %v11112_v24 }
  0x80   : > { %9851 = vmatmul.msk.bf16.gmra.mxu2 %vm849_vm0, %v11128_v25  ;;  %9931 = vmatmul.msk.bf16.gmra.mxu3 %vm849_vm0, %v11144_v26 }
  0x8f   : > { %9692 = vmatmul.msk.bf16.gmra.mxu0 %vm849_vm0, %v11097_v27  ;;  %9772 = vmatmul.msk.bf16.gmra.mxu1 %vm849_vm0, %v11113_v28 }
  0x90   : > { %9852 = vmatmul.msk.bf16.gmra.mxu2 %vm849_vm0, %v11129_v29  ;;  %9932 = vmatmul.msk.bf16.gmra.mxu3 %vm849_vm0, %v11145_v30 }
  0x9f   : > { %9693 = vmatmul.msk.bf16.gmra.mxu0 %vm849_vm0, %v11098_v31  ;;  %9773 = vmatmul.msk.bf16.gmra.mxu1 %vm849_vm0, %v11114_v32 }
  0xa0   : > { %9853 = vmatmul.msk.bf16.gmra.mxu2 %vm849_vm0, %v11130_v33  ;;  %9933 = vmatmul.msk.bf16.gmra.mxu3 %vm849_vm0, %v11146_v34 }
  0xac   : > { %v907_v37 = vpop.f32.mrf.mxu0  ;;  %v1221_v38 = vpop.f32.mrf.mxu1 }
  0xad   : > { %v1222_v61 = vadd.f32 %v11909_v60, %v1221_v38  ;;  %v908_v62 = vadd.f32 %v11909_v60, %v907_v37 }
  0xaf   : > { %9694 = vmatmul.msk.bf16.gmra.mxu0 %vm849_vm0, %v11099_v35  ;;  %9774 = vmatmul.msk.bf16.gmra.mxu1 %vm849_vm0, %v11115_v36  ;;  %v1301_v7 = vmax.f32 %v1222_v61, 0.0  ;;  %v987_v10 = vmax.f32 %v908_v62, 0.0  ;;  %v11150_v61 = vld [vmem:[%s11797_s23 + $0x1d8] sm:$0xff] }
  0xb0   : > { %9854 = vmatmul.msk.bf16.gmra.mxu2 %vm849_vm0, %v11131_v39  ;;  %9934 = vmatmul.msk.bf16.gmra.mxu3 %vm849_vm0, %v11147_v40 }
  0xb3   : > { %v1534_v41 = vpop.f32.mrf.mxu2  ;;  %v1847_v42 = vpop.f32.mrf.mxu3 }
  0xb4   : > { %v909_v43 = vpop.f32.mrf.mxu0  ;;  %v1223_v44 = vpop.f32.mrf.mxu1  ;;  %v1535_v13 = vadd.f32 %v11909_v60, %v1534_v41  ;;  %v1848_v14 = vadd.f32 %v11909_v60, %v1847_v42 }
  0xb5   : > { %v1224_v15 = vadd.f32 %v11909_v60, %v1223_v44  ;;  %v910_v18 = vadd.f32 %v11909_v60, %v909_v43 }
  0xb6   : > { %v1614_v21 = vmax.f32 %v1535_v13, 0.0  ;;  %v1927_v22 = vmax.f32 %v1848_v14, 0.0 }
  0xb7   : > { %v1302_v27 = vmax.f32 %v1224_v15, 0.0  ;;  %v988_v32 = vmax.f32 %v910_v18, 0.0 }
  0xbb   : > { %v11875_v46 = vpop.f32.mrf.mxu2  ;;  %v11877_v47 = vpop.f32.mrf.mxu3 }
  0xbc   : > { %v11880_v50 = vpop.f32.mrf.mxu0  ;;  %v11882_v51 = vpop.f32.mrf.mxu1  ;;  %v1537_v35 = vadd.f32 %v11909_v60, %v11875_v46  ;;  %v1850_v36 = vadd.f32 %v11909_v60, %v11877_v47  ;;  %v11118_v46 = vld [vmem:[%s11797_s23 + $0xd8] sm:$0xff] }
  0xbd   : > { %v1227_v39 = vadd.f32 %v11909_v60, %v11882_v51  ;;  %v913_v42 = vadd.f32 %v11909_v60, %v11880_v50 }
  0xbe   : > { %v1615_v47 = vmax.f32 %v1537_v35, 0.0 }
  0xbf   : > { %9695 = vmatmul.msk.bf16.gmra.mxu0 %vm849_vm0, %v11100_v45  ;;  %9775 = vmatmul.msk.bf16.gmra.mxu1 %vm849_vm0, %v11116_v48  ;;  %v11102_v45 = vld [vmem:[%s11797_s23 + $0x58] sm:$0xff]  ;;  %v1928_v48 = vmax.f32 %v1850_v36, 0.0  ;;  %v1303_v50 = vmax.f32 %v1227_v39, 0.0 }
  0xc0   : > { %9855 = vmatmul.msk.bf16.gmra.mxu2 %vm849_vm0, %v11132_v52  ;;  %9935 = vmatmul.msk.bf16.gmra.mxu3 %vm849_vm0, %v11148_v53 }
  0xc3   : > { %v11898_v56 = vpop.f32.mrf.mxu2  ;;  %v11900_v57 = vpop.f32.mrf.mxu3 }
  0xc4   : > { %v11902_v58 = vpop.f32.mrf.mxu0  ;;  %v11904_v59 = vpop.f32.mrf.mxu1 }
  0xcb   : > { %v11913_v63 = vpop.f32.mrf.mxu2  ;;  %v11915_v0 = vpop.f32.mrf.mxu3 }
  0xcc   : > { %v917_v3 = vpop.f32.mrf.mxu0  ;;  %v1231_v4 = vpop.f32.mrf.mxu1 }
  0xcd   : > { %v918_v8 = vadd.f32 %v11909_v60, %v917_v3  ;;  %v1232_v9 = vadd.f32 %v11909_v60, %v1231_v4  ;;  %v15138_v4 = vmov 0  }
  0xce   : > { %658 = vst.msk [vmem:[#allocation2] sm:$0xf] %vm657_vm5, %v15138_v4 }
  0xcf   : > { %v991_v11 = vmax.f32 %v918_v8, 0.0  ;;  %v1305_v12 = vmax.f32 %v1232_v9, 0.0  ;;  %9696 = vmatmul.msk.bf16.gmra.mxu0 %vm849_vm0, %v11101_v1  ;;  %9776 = vmatmul.msk.bf16.gmra.mxu1 %vm849_vm0, %v11117_v2  ;;  %v1853_v9 = vadd.f32 %v11909_v60, %v11900_v57  ;;  %659 = vst.msk [vmem:[#allocation2 + $0x4] sm:$0xf] %vm657_vm5, %v15138_v4  ;;  %v915_v57 = vadd.f32 %v11909_v60, %v11902_v58 }
  0xd0   : > { %9856 = vmatmul.msk.bf16.gmra.mxu2 %vm849_vm0, %v11133_v5  ;;  %9936 = vmatmul.msk.bf16.gmra.mxu3 %vm849_vm0, %v11149_v6  ;;  %v989_v5 = vmax.f32 %v913_v42, 0.0  ;;  %v1540_v6 = vadd.f32 %v11909_v60, %v11898_v56  ;;  %v1229_v56 = vadd.f32 %v11909_v60, %v11904_v59  ;;  %672 = vst.msk [vmem:[#allocation2 + $0x8c] sm:$0xf] %vm657_vm5, %v15138_v4 }
  0xd1   : > { %v1019_v16 = vmax.f32 %v987_v10, %v991_v11  ;;  %v1333_v17 = vmax.f32 %v1301_v7, %v1305_v12  ;;  %674 = vst.msk [vmem:[#allocation2 + $0x90] sm:$0x1] %vm660_vm1, %v15138_v4 }
  0xd2   : > { %v1616_v14 = vmax.f32 %v1540_v6, 0.0  ;;  %v11135_v6 = vld [vmem:[%s11797_s23 + $0x160] sm:$0xff] }
  0xd3   : > { %1024 = vst.msk [vmem:[#allocation6] sm:$0xff] %vm1023_vm4, %v1019_v16  ;;  %v1544_v19 = vpop.f32.mrf.mxu2  ;;  %v1857_v20 = vpop.f32.mrf.mxu3 }
  0xd4   : > { %1337 = vst.msk [vmem:[#allocation6 + $0x80] sm:$0xff] %vm1023_vm4, %v1333_v17  ;;  %v1545_v23 = vadd.f32 %v11909_v60, %v1544_v19  ;;  %v1858_v24 = vadd.f32 %v11909_v60, %v1857_v20  ;;  %v919_v25 = vpop.f32.mrf.mxu0  ;;  %v1233_v26 = vpop.f32.mrf.mxu1  ;;  %v1929_v19 = vmax.f32 %v1853_v9, 0.0 }
  0xd5   : > { %v920_v28 = vadd.f32 %v11909_v60, %v919_v25  ;;  %v1234_v29 = vadd.f32 %v11909_v60, %v1233_v26  ;;  %v1304_v25 = vmax.f32 %v1229_v56, 0.0 }
  0xd6   : > { %v1618_v30 = vmax.f32 %v1545_v23, 0.0  ;;  %v1931_v31 = vmax.f32 %v1858_v24, 0.0 }
  0xd7   : > { %v992_v33 = vmax.f32 %v920_v28, 0.0  ;;  %v1306_v34 = vmax.f32 %v1234_v29, 0.0  ;;  %v990_v29 = vmax.f32 %v915_v57, 0.0 }
  0xd8   : > { %v1646_v37 = vmax.f32 %v1614_v21, %v1618_v30  ;;  %v1959_v38 = vmax.f32 %v1927_v22, %v1931_v31 }
  0xd9   : > { %v1020_v40 = vmax.f32 %v988_v32, %v992_v33  ;;  %v1334_v41 = vmax.f32 %v1302_v27, %v1306_v34  ;;  %v1542_v33 = vadd.f32 %v11909_v60, %v11913_v63 }
  0xda   : > { %1650 = vst.msk [vmem:[#allocation6 + $0x100] sm:$0xff] %vm1023_vm4, %v1646_v37  ;;  %v1855_v37 = vadd.f32 %v11909_v60, %v11915_v0 }
  0xdb   : > { %1963 = vst.msk [vmem:[#allocation6 + $0x180] sm:$0xff] %vm1023_vm4, %v1959_v38  ;;  %v1546_v43 = vpop.f32.mrf.mxu2  ;;  %v1859_v44 = vpop.f32.mrf.mxu3 }
  0xdc   : > { %1025 = vst.msk [vmem:[#allocation6 + $0x8] sm:$0xff] %vm1023_vm4, %v1020_v40  ;;  %v1547_v49 = vadd.f32 %v11909_v60, %v1546_v43  ;;  %v1860_v51 = vadd.f32 %v11909_v60, %v1859_v44  ;;  %v922_v52 = vpop.f32.mrf.mxu0  ;;  %v1236_v53 = vpop.f32.mrf.mxu1 }
  0xdd   : > { %1338 = vst.msk [vmem:[#allocation6 + $0x88] sm:$0xff] %vm1023_vm4, %v1334_v41  ;;  %v923_v62 = vadd.f32 %v11909_v60, %v922_v52  ;;  %v1237_v1 = vadd.f32 %v11909_v60, %v1236_v53 }
  0xde   : > { %v1619_v2 = vmax.f32 %v1547_v49, 0.0  ;;  %v1932_v3 = vmax.f32 %v1860_v51, 0.0  ;;  %v2504_v49 = vld [vmem:[#allocation2 + $0x8] sm:$0xf] }
  0xdf   : > { %v993_v7 = vmax.f32 %v923_v62, 0.0  ;;  %v1307_v8 = vmax.f32 %v1237_v1, 0.0  ;;  %9697 = vmatmul.msk.bf16.gmra.mxu0 %vm849_vm0, %v11102_v45  ;;  %9777 = vmatmul.msk.bf16.gmra.mxu1 %vm849_vm0, %v11118_v46 }
  0xe0   : > { %v1647_v10 = vmax.f32 %v1615_v47, %v1619_v2  ;;  %v1960_v11 = vmax.f32 %v1928_v48, %v1932_v3  ;;  %9857 = vmatmul.msk.bf16.gmra.mxu2 %vm849_vm0, %v11134_v55  ;;  %9937 = vmatmul.msk.bf16.gmra.mxu3 %vm849_vm0, %v11150_v61  ;;  %v11103_v55 = vld [vmem:[%s11797_s23 + $0x60] sm:$0xff] }
  0xe1   : > { %v1021_v12 = vmax.f32 %v989_v5, %v993_v7  ;;  %v1335_v13 = vmax.f32 %v1303_v50, %v1307_v8  ;;  %v11119_v61 = vld [vmem:[%s11797_s23 + $0xe0] sm:$0xff]  ;;  %v1617_v50 = vmax.f32 %v1542_v33, 0.0  ;;  %v1930_v8 = vmax.f32 %v1855_v37, 0.0  ;;  %v11120_v37 = vld [vmem:[%s11797_s23 + $0xe8] sm:$0xff] }
  0xe2   : > { %1651 = vst.msk [vmem:[#allocation6 + $0x108] sm:$0xff] %vm1023_vm4, %v1647_v10  ;;  %v11151_v7 = vld [vmem:[%s11797_s23 + $0x1e0] sm:$0xff] }
  0xe3   : > { %v1991_v15 = vld [vmem:[#allocation6] ss:$2 sm:$0xff]  ;;  %v2055_v16 = vld [vmem:[#allocation6 + $0x1] ss:$2 sm:$0xff]  ;;  %1964 = vst.msk [vmem:[#allocation6 + $0x188] sm:$0xff] %vm1023_vm4, %v1960_v11  ;;  %v1549_v17 = vpop.f32.mrf.mxu2  ;;  %v1862_v18 = vpop.f32.mrf.mxu3 }
  0xe4   : > { %v2118_v59 = vmax.f32 %v1991_v15, %v2055_v16  ;;  %v2007_v20 = vld [vmem:[#allocation6 + $0x80] ss:$2 sm:$0xff]  ;;  %v2071_v21 = vld [vmem:[#allocation6 + $0x81] ss:$2 sm:$0xff]  ;;  %1026 = vst.msk [vmem:[#allocation6 + $0x10] sm:$0xff] %vm1023_vm4, %v1021_v12  ;;  %v1550_v22 = vadd.f32 %v11909_v60, %v1549_v17  ;;  %v1863_v58 = vadd.f32 %v11909_v60, %v1862_v18  ;;  %v924_v23 = vpop.f32.mrf.mxu0  ;;  %v1238_v24 = vpop.f32.mrf.mxu1 }
  0xe5   : > { %v2126_v26 = vmax.f32 %v2007_v20, %v2071_v21  ;;  %1339 = vst.msk [vmem:[#allocation6 + $0x90] sm:$0xff] %vm1023_vm4, %v1335_v13  ;;  %v925_v27 = vadd.f32 %v11909_v60, %v924_v23  ;;  %v1239_v28 = vadd.f32 %v11909_v60, %v1238_v24 }
  0xe6   : > { %v2150_v30 = vpack.c.bf16 %v2118_v59, %v2118_v59  ;;  %v1620_v31 = vmax.f32 %v1550_v22, 0.0  ;;  %v1933_v32 = vmax.f32 %v1863_v58, 0.0 }
  0xe7   : > { %v2158_v34 = vpack.c.bf16 %v2126_v26, %v2126_v26  ;;  %v994_v35 = vmax.f32 %v925_v27, 0.0  ;;  %v1308_v36 = vmax.f32 %v1239_v28, 0.0 }
  0xe8   : > { %v2185_v38 = vshrl.u32 %v2150_v30, 16  ;;  %v1648_v39 = vmax.f32 %v1616_v14, %v1620_v31  ;;  %v1961_v40 = vmax.f32 %v1929_v19, %v1933_v32  ;;  %v2188_v0 = vshll.u32 %v2150_v30, 16 }
  0xe9   : > { %v2256_v41 = vshrl.u32 %v2158_v34, 16  ;;  %v2259_v42 = vshll.u32 %v2158_v34, 16  ;;  %v2023_v43 = vld [vmem:[#allocation6 + $0x100] ss:$2 sm:$0xff]  ;;  %v2087_v44 = vld [vmem:[#allocation6 + $0x101] ss:$2 sm:$0xff]  ;;  %v1022_v45 = vmax.f32 %v990_v29, %v994_v35  ;;  %v1336_v46 = vmax.f32 %v1304_v25, %v1308_v36 }
  0xea   : > { %v11995_v47 = vrot.slane %v2185_v38, 7  ;;  %v2134_v48 = vmax.f32 %v2023_v43, %v2087_v44  ;;  %1652 = vst.msk [vmem:[#allocation6 + $0x110] sm:$0xff] %vm1023_vm4, %v1648_v39  ;;  %v11104_v36 = vld [vmem:[%s11797_s23 + $0x68] sm:$0xff]  ;;  %v2545_v38 = vlaneseq  ;;  %v15246_v44 = vmov 0 }
  0xeb   : > { %v11998_v51 = vrot.slane %v2256_v41, 7  ;;  %1965 = vst.msk [vmem:[#allocation6 + $0x190] sm:$0xff] %vm1023_vm4, %v1961_v40  ;;  %v1551_v52 = vpop.f32.mrf.mxu2  ;;  %v1864_v53 = vpop.f32.mrf.mxu3  ;;  %v11152_v43 = vld [vmem:[%s11797_s23 + $0x1e8] sm:$0xff]  ;;  %v15247_v44 = vsel %vm12057_vm9, 4294967295, %v15246_v44 }
  0xec   : > { %v2190_v62 = vor.u32 %v2188_v0, %v11995_v47  ;;  %v2166_v1 = vpack.c.bf16 %v2134_v48, %v2134_v48  ;;  %1027 = vst.msk [vmem:[#allocation6 + $0x18] sm:$0xff] %vm1023_vm4, %v1022_v45  ;;  %v1552_v2 = vadd.f32 %v11909_v60, %v1551_v52  ;;  %v12006_v3 = vpop.f32.mrf.mxu0  ;;  %v12008_v5 = vpop.f32.mrf.mxu1  ;;  %v1865_v10 = vadd.f32 %v11909_v60, %v1864_v53 }
  0xed   : > { %v12013_v9 = vor.u32 %v2259_v42, %v11998_v51  ;;  %1340 = vst.msk [vmem:[#allocation6 + $0x98] sm:$0xff] %vm1023_vm4, %v1336_v46  ;;  %v11136_v42 = vld [vmem:[%s11797_s23 + $0x168] sm:$0xff]  ;;  %v2191_v45 = vrot.slane %v11995_v47, 4  ;;  %v2263_v46 = vrot.slane %v11998_v51, 4  ;;  %v12066_v48 = vshrl.u32 %v2545_v38, 7 }
  0xee   : > { %v2505_v11 = vsel %vm11991_vm7, %v2190_v62, %v2504_v49  ;;  %v2328_v56 = vshrl.u32 %v2166_v1, 16  ;;  %v2331_v12 = vshll.u32 %v2166_v1, 16  ;;  %v1621_v13 = vmax.f32 %v1552_v2, 0.0  ;;  %15248 = vst [vmem:[#allocation19_spill] sm:$0xff] %v15247_v44  ;;  %v12090_v2 = vld [vmem:[#allocation2] sm:$0xff] }
  0xef   : > { %2506 = vst [vmem:[#allocation2 + $0x8] sm:$0xf] %v2505_v11  ;;  %v1934_v57 = vmax.f32 %v1865_v10, 0.0  ;;  %9698 = vmatmul.msk.bf16.gmra.mxu0 %vm849_vm0, %v11103_v55  ;;  %9778 = vmatmul.msk.bf16.gmra.mxu1 %vm849_vm0, %v11119_v61  ;;  %v12078_v52 = vadd.s32 8, %v12066_v48  ;;  %v3998_v10 = vld [vmem:[#allocation2] sm:$0xe] }
  0xf0   : > { %v12021_v14 = vrot.slane %v2328_v56, 7  ;;  %v1649_v15 = vmax.f32 %v1617_v50, %v1621_v13  ;;  %9858 = vmatmul.msk.bf16.gmra.mxu2 %vm849_vm0, %v11135_v6  ;;  %9938 = vmatmul.msk.bf16.gmra.mxu3 %vm849_vm0, %v11151_v7  ;;  %15249 = vst [vmem:[#allocation20_spill] sm:$0xff] %v12066_v48  ;;  %v11627_v50 = vmov 1.0|1.0   ;;  %v12093_v6 = vadd.s32 24, %v12066_v48  ;;  %v11121_v13 = vld [vmem:[%s11797_s23 + $0xf0] sm:$0xff] }
  0xf1   : > { %v1962_v16 = vmax.f32 %v1930_v8, %v1934_v57  ;;  %15250 = vst [vmem:[#allocation21_spill] sm:$0xff] %v12078_v52  ;;  %v12087_v62 = vunpack.c.l.bf16 %v11627_v50  ;;  %v2589_v1 = vand.u32 15, %v12078_v52  ;;  %v1242_v7 = vadd.f32 %v11909_v60, %v12008_v5  ;;  %v11137_v57 = vld [vmem:[%s11797_s23 + $0x170] sm:$0xff] }
  0xf2   : > { %v12026_v17 = vor.u32 %v2331_v12, %v12021_v14  ;;  %1653 = vst.msk [vmem:[#allocation6 + $0x118] sm:$0xff] %vm1023_vm4, %v1649_v15  ;;  %v928_v8 = vadd.f32 %v11909_v60, %v12006_v3  ;;  %v11105_v12 = vld [vmem:[%s11797_s23 + $0x70] sm:$0xff]  ;;  %v12106_v15 = vld [vmem:[#allocation2] sm:$0xff]  }
  0xf3   : > { %v1993_v18 = vld [vmem:[#allocation6 + $0x10] ss:$2 sm:$0xff]  ;;  %v2057_v19 = vld [vmem:[#allocation6 + $0x11] ss:$2 sm:$0xff]  ;;  %1966 = vst.msk [vmem:[#allocation6 + $0x198] sm:$0xff] %vm1023_vm4, %v1962_v16  ;;  %v12030_v59 = vpop.f32.mrf.mxu2  ;;  %v12032_v20 = vpop.f32.mrf.mxu3  ;;  %vm12108_vm10 = vcmp.ne.s32.totalorder %v2589_v1, 15  ;;  %v3379_v50 = vunpack.c.h.bf16 %v12106_v15 }
  0xf4   : > { %v2119_v21 = vmax.f32 %v1993_v18, %v2057_v19  ;;  %v2009_v22 = vld [vmem:[#allocation6 + $0x90] ss:$2 sm:$0xff]  ;;  %v2073_v58 = vld [vmem:[#allocation6 + $0x91] ss:$2 sm:$0xff]  ;;  %v12034_v23 = vpop.f32.mrf.mxu0  ;;  %v12036_v24 = vpop.f32.mrf.mxu1  ;;  %15251 = vst [vmem:[#allocation22_spill] sm:$0xff] %v12093_v6  ;;  %v12113_v18 = vrot.slane %v12087_v62, 6  ;;  %v1555_v38 = vadd.f32 %v11909_v60, %v12030_v59 }
  0xf5   : > { %v2127_v25 = vmax.f32 %v2009_v22, %v2073_v58  ;;  %v11153_v3 = vld [vmem:[%s11797_s23 + $0x1f0] sm:$0xff]  ;;  %v3583_v58 = vshll.u32 %v12090_v2, 16 }
  0xf6   : > { %v2151_v26 = vpack.c.bf16 %v2119_v21, %v2119_v21  ;;  %15254 = vst [vmem:[#allocation23_spill] sm:$0xff] %v12113_v18  ;;  %v11171_v21 = vld [vmem:[%s15240_s30] sm:$0xff]  ;;  %v11173_v22 = vld [vmem:[%s15240_s30 + $0x10] sm:$0xff] }
  0xf7   : > { %v2159_v27 = vpack.c.bf16 %v2127_v25, %v2127_v25  ;;  %v2582_v25 = vand.u32 15, %v12066_v48  ;;  %3916 = vmatpush.bf16.msrb.mxu1 %v11171_v21  ;;  %4327 = vmatpush.bf16.msrb.mxu2 %v11173_v22 }
  0xf8   : > { %v2193_v28 = vshrl.u32 %v2151_v26, 16  ;;  %v2196_v31 = vshll.u32 %v2151_v26, 16  ;;  %v2603_v26 = vand.u32 15, %v12093_v6 }
  0xf9   : > { %v2265_v29 = vshrl.u32 %v2159_v27, 16  ;;  %v2268_v33 = vshll.u32 %v2159_v27, 16  ;;  %v2025_v27 = vld [vmem:[#allocation6 + $0x110] ss:$2 sm:$0xff]  ;;  %vm12156_vm12 = vcmp.ne.s32.totalorder %v2582_v25, 0 }
  0xfa   : > { %v12038_v30 = vrot.slane %v2193_v28, 7  ;;  %v2089_v28 = vld [vmem:[#allocation6 + $0x111] ss:$2 sm:$0xff]  ;;  %vm12147_vm11 = vcmp.ne.s32.totalorder %v2603_v26, 15 }
  0xfb   : > { %v12040_v32 = vrot.slane %v2265_v29, 7  ;;  %v12042_v34 = vpop.f32.mrf.mxu2  ;;  %v12044_v35 = vpop.f32.mrf.mxu3  ;;  %v1309_v29 = vmax.f32 %v1242_v7, 0.0  ;;  %v2135_v59 = vmax.f32 %v2025_v27, %v2089_v28  ;;  %v12151_v7 = vrot.slane %v3583_v58, 1 }
  0xfc   : > { %v2198_v39 = vor.u32 %v2196_v31, %v12038_v30  ;;  %v12049_v40 = vpop.f32.mrf.mxu0  ;;  %v12051_v41 = vpop.f32.mrf.mxu1  ;;  %v12173_v22 = vadd.f32 %v11909_v60, %v12042_v34  ;;  %v12180_v28 = vadd.f32 %v11909_v60, %v12044_v35 }
  0xfd   : > { %v2270_v0 = vor.u32 %v2268_v33, %v12040_v32 }
  0xfe   : > { %v2199_v49 = vsel %vm12057_vm9, %v2191_v45, %v2198_v39  ;;  %v15142_v39 = vmov 0.0   ;;  %v1868_v45 = vadd.f32 %v11909_v60, %v12032_v20 }
  0xff   : > { %9699 = vmatmul.msk.bf16.gmra.mxu0 %vm849_vm0, %v11104_v36  ;;  %9779 = vmatmul.msk.bf16.gmra.mxu1 %vm849_vm0, %v11120_v37  ;;  %2507 = vst.msk [vmem:[#allocation2 + $0xc] sm:$0xf] %vm657_vm5, %v2199_v49  ;;  %v2271_v53 = vsel %vm12057_vm9, %v2263_v46, %v2270_v0  ;;  %v11174_v36 = vld [vmem:[%s15240_s30 + $0x18] sm:$0xff]  ;;  %v995_v37 = vmax.f32 %v928_v8, 0.0  ;;  %v1244_v46 = vadd.f32 %v11909_v60, %v12036_v24  ;;  %v12167_v21 = vsel %vm12147_vm11, 1.0, %v15142_v39 }
 0x100   : > { %9859 = vmatmul.msk.bf16.gmra.mxu2 %vm849_vm0, %v11136_v42  ;;  %9939 = vmatmul.msk.bf16.gmra.mxu3 %vm849_vm0, %v11152_v43  ;;  %2515 = vst.msk [vmem:[#allocation2 + $0x2c] sm:$0xf] %vm657_vm5, %v2271_v53  ;;  %v12135_v42 = vsel %vm12108_vm10, 1.0, %v15142_v39  ;;  %v3999_v43 = vunpack.c.l.bf16 %v3998_v10  ;;  %v3581_v53 = vshrl.u32 %v12090_v2, 16  ;;  %v930_v10 = vadd.f32 %v11909_v60, %v12034_v23 }
 0x101   : > { %4617 = vmatpush.bf16.msrb.mxu3 %v11174_v36  ;;  %v4067_v8 = vrot.slane %v12135_v42, 6  ;;  %v1935_v16 = vmax.f32 %v1868_v45, 0.0  ;;  %v12169_v23 = vpack.c.bf16 %v2135_v59, %v2135_v59  ;;  %v12194_v36 = vadd.f32 %v11909_v60, %v12051_v41 }
 0x102   : > { %v996_v35 = vmax.f32 %v930_v10, 0.0  ;;  %v15140_v45 = vrot.slane %v12167_v21, 6  ;;  %v2200_v41 = vrot.slane %v12038_v30, 4  ;;  %v1936_v10 = vmax.f32 %v12180_v28, 0.0 }
 0x103   : > { %v12073_v47 = vpop.f32.mrf.mxu2  ;;  %v12075_v51 = vpop.f32.mrf.mxu3  ;;  %v12186_v34 = vsel %vm4065_vm13, %v12113_v18, %v4067_v8  ;;  %v2337_v59 = vshrl.u32 %v12169_v23, 16 }
 0x104   : > { %v12082_v55 = vpop.f32.mrf.mxu0  ;;  %v12084_v61 = vpop.f32.mrf.mxu1  ;;  %15259 = vst [vmem:[#allocation24_spill] sm:$0xff] %v12186_v34 }
 0x10b   : > { %v12099_v11 = vpop.f32.mrf.mxu2  ;;  %v12101_v56 = vpop.f32.mrf.mxu3 }
 0x10c   : > { %v937_v5 = vpop.f32.mrf.mxu0  ;;  %v1251_v19 = vpop.f32.mrf.mxu1 }
 0x10d   : > { %v938_v31 = vadd.f32 %v11909_v60, %v937_v5  ;;  %v1252_v33 = vadd.f32 %v11909_v60, %v1251_v19  ;;  %v1310_v5 = vmax.f32 %v1244_v46, 0.0 }
 0x10f   : > { %v999_v0 = vmax.f32 %v938_v31, 0.0  ;;  %v1313_v49 = vmax.f32 %v1252_v33, 0.0  ;;  %9700 = vmatmul.msk.bf16.gmra.mxu0 %vm849_vm0, %v11105_v12  ;;  %9780 = vmatmul.msk.bf16.gmra.mxu1 %vm849_vm0, %v11121_v13  ;;  %v12161_v13 = vmul.f32 %v12113_v18, %v3999_v43  ;;  %v12190_v33 = vadd.f32 %v11909_v60, %v12049_v40 }
 0x110   : > { %9860 = vmatmul.msk.bf16.gmra.mxu2 %vm849_vm0, %v11137_v57  ;;  %9940 = vmatmul.msk.bf16.gmra.mxu3 %vm849_vm0, %v11153_v3  ;;  %v1622_v57 = vmax.f32 %v1555_v38, 0.0  ;;  %v4163_v40 = vmul.f32 %v12186_v34, %v3379_v50 }
 0x111   : > { %v1028_v24 = vmax.f32 %v995_v37, %v999_v0  ;;  %v1341_v1 = vmax.f32 %v1309_v29, %v1313_v49  ;;  %v12200_v49 = vsel %vm12156_vm12, 1.0, %v15142_v39  ;;  %v997_v12 = vmax.f32 %v12190_v33, 0.0  ;;  %v11138_v33 = vld [vmem:[%s11797_s23 + $0x178] sm:$0xff] }
 0x113   : > { %1032 = vst.msk [vmem:[#allocation6 + $0x20] sm:$0xff] %vm1023_vm4, %v1028_v24  ;;  %v1564_v19 = vpop.f32.mrf.mxu2  ;;  %v1877_v3 = vpop.f32.mrf.mxu3 }
 0x114   : > { %1345 = vst.msk [vmem:[#allocation6 + $0xa0] sm:$0xff] %vm1023_vm4, %v1341_v1  ;;  %v1565_v58 = vadd.f32 %v11909_v60, %v1564_v19  ;;  %v1878_v25 = vadd.f32 %v11909_v60, %v1877_v3  ;;  %v939_v26 = vpop.f32.mrf.mxu0  ;;  %v1253_v27 = vpop.f32.mrf.mxu1  ;;  %v1623_v1 = vmax.f32 %v12173_v22, 0.0  ;;  %v12216_v19 = vadd.f32 %v11909_v60, %v12073_v47  ;;  %v11106_v22 = vld [vmem:[%s11797_s23 + $0x78] sm:$0xff] }
 0x115   : > { %v940_v29 = vadd.f32 %v11909_v60, %v939_v26  ;;  %v1254_v31 = vadd.f32 %v11909_v60, %v1253_v27  ;;  %v12229_v26 = vsel %vm4065_vm13, %v12113_v18, %v15140_v45  ;;  %v12232_v47 = vadd.s32 16, %v12066_v48 }
 0x116   : > { %v1626_v37 = vmax.f32 %v1565_v58, 0.0  ;;  %v1939_v38 = vmax.f32 %v1878_v25, 0.0  ;;  %v11122_v58 = vld [vmem:[%s11797_s23 + $0xf8] sm:$0xff]  ;;  %v12223_v25 = vsel %vm4065_vm13, %v4067_v8, %v12113_v18  ;;  %15261 = vst [vmem:[#allocation26_spill] sm:$0xff] %v12229_v26  ;;  %v12236_v27 = vadd.f32 %v11909_v60, %v12075_v51 }
 0x117   : > { %v1000_v42 = vmax.f32 %v940_v29, 0.0  ;;  %v1314_v43 = vmax.f32 %v1254_v31, 0.0  ;;  %15260 = vst [vmem:[#allocation25_spill] sm:$0xff] %v12223_v25 }
 0x118   : > { %v1654_v46 = vmax.f32 %v1622_v57, %v1626_v37  ;;  %v1967_v0 = vmax.f32 %v1935_v16, %v1939_v38  ;;  %v1311_v57 = vmax.f32 %v12194_v36, 0.0  ;;  %v12212_v16 = vld [vmem:[#allocation2 + $0x8] sm:$0xff]   ;;  %15262 = vst [vmem:[#allocation27_spill] sm:$0xff] %v12232_v47  ;;  %v11154_v36 = vld [vmem:[%s11797_s23 + $0x1f8] sm:$0xff]  ;;  %v4195_v37 = vpack.c.bf16 %v4163_v40, %v12161_v13  ;;  %s11582_s23 = scalar_lea.hbm %s15128_s21, 2 }
 0x119   : > { %v1029_v20 = vmax.f32 %v996_v35, %v1000_v42  ;;  %v1342_v24 = vmax.f32 %v1310_v5, %v1314_v43  ;;  %v11477_v38 = vld [vmem:[#allocation2 + $0x8] sm:$0xff]   ;;  %v3380_v42 = vunpack.c.l.bf16 %v12212_v16  ;;  %v3381_v43 = vunpack.c.h.bf16 %v12212_v16 }
 0x11a   : > { %1658 = vst.msk [vmem:[#allocation6 + $0x120] sm:$0xff] %vm1023_vm4, %v1654_v46  ;;  %v12251_v46 = vadd.f32 %v11909_v60, %v12082_v55  ;;  %v1937_v55 = vmax.f32 %v12236_v27, 0.0  ;;  %v12275_v27 = vrot.slane %v4195_v37, 1 }
 0x11b   : > { %1971 = vst.msk [vmem:[#allocation6 + $0x1a0] sm:$0xff] %vm1023_vm4, %v1967_v0  ;;  %v1566_v5 = vpop.f32.mrf.mxu2  ;;  %v1879_v3 = vpop.f32.mrf.mxu3  ;;  %v12255_v0 = vadd.f32 %v11909_v60, %v12084_v61  ;;  %v11340_v61 = vunpack.c.h.bf16 %v11477_v38 }
 0x11c   : > { %1033 = vst.msk [vmem:[#allocation6 + $0x28] sm:$0xff] %vm1023_vm4, %v1029_v20  ;;  %v1567_v28 = vadd.f32 %v11909_v60, %v1566_v5  ;;  %v1880_v8 = vadd.f32 %v11909_v60, %v1879_v3  ;;  %v942_v29 = vpop.f32.mrf.mxu0  ;;  %v1256_v31 = vpop.f32.mrf.mxu1  ;;  %v1624_v20 = vmax.f32 %v12216_v19, 0.0  ;;  %v12260_v3 = vld [vmem:[#allocation2 + $0x8] sm:$0xff] }
 0x11d   : > { %1346 = vst.msk [vmem:[#allocation6 + $0xa8] sm:$0xff] %vm1023_vm4, %v1342_v24  ;;  %v943_v35 = vadd.f32 %v11909_v60, %v942_v29  ;;  %v1257_v51 = vadd.f32 %v11909_v60, %v1256_v31  ;;  %v11339_v29 = vunpack.c.l.bf16 %v11477_v38  ;;  %v12281_v38 = vor.u32 %v12151_v7, %v3581_v53 }
 0x11e   : > { %v1627_v13 = vmax.f32 %v1567_v28, 0.0  ;;  %v1940_v40 = vmax.f32 %v1880_v8, 0.0  ;;  %v998_v8 = vmax.f32 %v12251_v46, 0.0  ;;  %v12291_v2 = vmul.f32 %v11340_v61, %v12087_v62 }
 0x11f   : > { %v1001_v24 = vmax.f32 %v943_v35, 0.0  ;;  %v1315_v5 = vmax.f32 %v1257_v51, 0.0  ;;  %9701 = vmatmul.msk.bf16.gmra.mxu0 %vm849_vm0, %v11106_v22  ;;  %9781 = vmatmul.msk.bf16.gmra.mxu1 %vm849_vm0, %v11122_v58  ;;  %v4164_v22 = vmul.f32 %v12223_v25, %v3380_v42  ;;  %v4165_v58 = vmul.f32 %v12229_v26, %v3381_v43 }
 0x120   : > { %v1655_v31 = vmax.f32 %v1623_v1, %v1627_v13  ;;  %v1968_v4 = vmax.f32 %v1936_v10, %v1940_v40  ;;  %9861 = vmatmul.msk.bf16.gmra.mxu2 %vm849_vm0, %v11138_v33  ;;  %9941 = vmatmul.msk.bf16.gmra.mxu3 %vm849_vm0, %v11154_v36  ;;  %v1312_v1 = vmax.f32 %v12255_v0, 0.0  ;;  %v3378_v10 = vunpack.c.l.bf16 %v12106_v15 }
 0x121   : > { %v1030_v28 = vmax.f32 %v997_v12, %v1001_v24  ;;  %v1343_v19 = vmax.f32 %v1311_v57, %v1315_v5  ;;  %v3588_v35 = vshll.u32 %v12260_v3, 16  ;;  %v12285_v51 = vmul.f32 %v11339_v29, %v12200_v49 }
 0x122   : > { %1659 = vst.msk [vmem:[#allocation6 + $0x128] sm:$0xff] %vm1023_vm4, %v1655_v31  ;;  %v4196_v29 = vpack.c.bf16 %v4165_v58, %v4164_v22  ;;  %v3443_v61 = vmul.f32 %v12087_v62, %v3379_v50  ;;  %v1875_v22 = vadd.f32 %v11909_v60, %v12101_v56 }
 0x123   : > { %v1995_v12 = vld [vmem:[#allocation6 + $0x20] ss:$2 sm:$0xff]  ;;  %v2059_v57 = vld [vmem:[#allocation6 + $0x21] ss:$2 sm:$0xff]  ;;  %1972 = vst.msk [vmem:[#allocation6 + $0x1a8] sm:$0xff] %vm1023_vm4, %v1968_v4  ;;  %v1569_v33 = vpop.f32.mrf.mxu2  ;;  %v1882_v36 = vpop.f32.mrf.mxu3  ;;  %v12307_v50 = vrot.slane %v3588_v35, 1 }
 0x124   : > { %v2120_v46 = vmax.f32 %v1995_v12, %v2059_v57  ;;  %v2011_v37 = vld [vmem:[#allocation6 + $0xa0] ss:$2 sm:$0xff]  ;;  %v2075_v0 = vld [vmem:[#allocation6 + $0xa1] ss:$2 sm:$0xff]  ;;  %1034 = vst.msk [vmem:[#allocation6 + $0x30] sm:$0xff] %vm1023_vm4, %v1030_v28  ;;  %v1570_v4 = vadd.f32 %v11909_v60, %v1569_v33  ;;  %v1883_v13 = vadd.f32 %v11909_v60, %v1882_v36  ;;  %v944_v40 = vpop.f32.mrf.mxu0  ;;  %v1258_v24 = vpop.f32.mrf.mxu1  ;;  %v3442_v57 = vmul.f32 %v12200_v49, %v3378_v10 }
 0x125   : > { %v2128_v53 = vmax.f32 %v2011_v37, %v2075_v0  ;;  %1347 = vst.msk [vmem:[#allocation6 + $0xb0] sm:$0xff] %vm1023_vm4, %v1343_v19  ;;  %v945_v7 = vadd.f32 %v11909_v60, %v944_v40  ;;  %v1259_v5 = vadd.f32 %v11909_v60, %v1258_v24  ;;  %v1562_v19 = vadd.f32 %v11909_v60, %v12099_v11 }
 0x126   : > { %v2152_v31 = vpack.c.bf16 %v2120_v46, %v2120_v46  ;;  %v1628_v28 = vmax.f32 %v1570_v4, 0.0  ;;  %v1941_v12 = vmax.f32 %v1883_v13, 0.0 }
 0x127   : > { %v2160_v33 = vpack.c.bf16 %v2128_v53, %v2128_v53  ;;  %v1002_v36 = vmax.f32 %v945_v7, 0.0  ;;  %v1316_v45 = vmax.f32 %v1259_v5, 0.0  ;;  %v3474_v7 = vpack.c.bf16 %v3443_v61, %v3442_v57 }
 0x128   : > { %v2202_v37 = vshrl.u32 %v2152_v31, 16  ;;  %v1656_v0 = vmax.f32 %v1624_v20, %v1628_v28  ;;  %v1969_v40 = vmax.f32 %v1937_v55, %v1941_v12  ;;  %v2205_v53 = vshll.u32 %v2152_v31, 16 }
 0x129   : > { %v2274_v58 = vshrl.u32 %v2160_v33, 16  ;;  %v2027_v46 = vld [vmem:[#allocation6 + $0x120] ss:$2 sm:$0xff]  ;;  %v2091_v4 = vld [vmem:[#allocation6 + $0x121] ss:$2 sm:$0xff]  ;;  %v1031_v10 = vmax.f32 %v998_v8, %v1002_v36  ;;  %v1344_v13 = vmax.f32 %v1312_v1, %v1316_v45  ;;  %v2277_v20 = vshll.u32 %v2160_v33, 16 }
 0x12a   : > { %v12304_v24 = vrot.slane %v2202_v37, 7  ;;  %v2136_v15 = vmax.f32 %v2027_v46, %v2091_v4  ;;  %1660 = vst.msk [vmem:[#allocation6 + $0x130] sm:$0xff] %vm1023_vm4, %v1656_v0  ;;  %v12312_v5 = vrot.slane %v4196_v29, 1  ;;  %v1625_v8 = vmax.f32 %v1562_v19, 0.0 }
 0x12b   : > { %v12309_v11 = vrot.slane %v2274_v58, 7  ;;  %1973 = vst.msk [vmem:[#allocation6 + $0x1b0] sm:$0xff] %vm1023_vm4, %v1969_v40  ;;  %v1571_v55 = vpop.f32.mrf.mxu2  ;;  %v1884_v56 = vpop.f32.mrf.mxu3  ;;  %v1938_v12 = vmax.f32 %v1875_v22, 0.0  ;;  %v4537_v29 = vpack.c.bf16 %v12291_v2, %v12285_v51  ;;  %v2596_v57 = vand.u32 15, %v12232_v47 }
 0x12c   : > { %v2207_v45 = vor.u32 %v2205_v53, %v12304_v24  ;;  %v2168_v1 = vpack.c.bf16 %v2136_v15, %v2136_v15  ;;  %1035 = vst.msk [vmem:[#allocation6 + $0x38] sm:$0xff] %vm1023_vm4, %v1031_v10  ;;  %v1572_v31 = vadd.f32 %v11909_v60, %v1571_v55  ;;  %v12317_v35 = vpop.f32.mrf.mxu0  ;;  %v12319_v28 = vpop.f32.mrf.mxu1  ;;  %v1885_v33 = vadd.f32 %v11909_v60, %v1884_v56 }
 0x12d   : > { %1348 = vst.msk [vmem:[#allocation6 + $0xb8] sm:$0xff] %vm1023_vm4, %v1344_v13  ;;  %v3591_v37 = vsel %vm3579_vm14, %v12281_v38, %v12307_v50  ;;  %v2279_v60 = vor.u32 %v2277_v20, %v12309_v11  ;;  %v4235_v30 = vsel %vm4232_vm15, %v12275_v27, %v12312_v5  ;;  %v2340_v51 = vshll.u32 %v12169_v23, 16 }
 0x12e   : > { %v2208_v36 = vsel %vm12057_vm9, %v2200_v41, %v2207_v45  ;;  %v2346_v61 = vshrl.u32 %v2168_v1, 16  ;;  %v1629_v19 = vmax.f32 %v1572_v31, 0.0  ;;  %v1942_v0 = vmax.f32 %v1885_v33, 0.0 }
 0x12f   : > { %2508 = vst.msk [vmem:[#allocation2 + $0x10] sm:$0xf] %vm657_vm5, %v2208_v36  ;;  %10044 = vmatmul.msk.bf16.vlgmr.msrb.gmra.mxu0 %vm1023_vm4, %v3591_v37  ;;  %10064 = vmatmul.msk.bf16.vlgmr.msrb.gmra.mxu1 %vm1023_vm4, %v3474_v7  ;;  %v2339_v41 = vrot.slane %v2337_v59, 7  ;;  %v2272_v38 = vrot.slane %v12040_v32, 4  ;;  %v2349_v22 = vshll.u32 %v2168_v1, 16  ;;  %vm12349_vm1 = vcmp.ne.s32.totalorder %v2596_v57, 0 }
 0x130   : > { %v1657_v2 = vmax.f32 %v1625_v8, %v1629_v19  ;;  %10086 = vmatmul.msk.bf16.vlgmr.msrb.gmra.mxu2 %vm1023_vm4, %v4235_v30  ;;  %10108 = vmatmul.msk.bf16.vlgmr.msrb.gmra.mxu3 %vm1023_vm4, %v4537_v29  ;;  %v12346_v40 = vrot.slane %v2346_v61, 7  ;;  %v1970_v58 = vmax.f32 %v1938_v12, %v1942_v0  ;;  %v2335_v10 = vrot.slane %v12021_v14, 4 }
 0x131   : > { %v2280_v32 = vsel %vm12057_vm9, %v2272_v38, %v2279_v60  ;;  %v2342_v13 = vor.u32 %v2340_v51, %v2339_v41  ;;  %v2344_v7 = vrot.slane %v2339_v41, 4  ;;  %v12369_v1 = vsel %vm12349_vm1, 1.0, %v15142_v39 }
 0x132   : > { %1661 = vst.msk [vmem:[#allocation6 + $0x138] sm:$0xff] %vm1023_vm4, %v1657_v2  ;;  %v2351_v8 = vor.u32 %v2349_v22, %v12346_v40  ;;  %v12373_v31 = vadd.s32 40, %v12066_v48  ;;  %v3444_v29 = vmul.f32 %v12369_v1, %v3380_v42  ;;  %v3445_v19 = vmul.f32 %v12087_v62, %v3381_v43 }
 0x133   : > { %v1997_v59 = vld [vmem:[#allocation6 + $0x30] ss:$2 sm:$0xff]  ;;  %v2061_v46 = vld [vmem:[#allocation6 + $0x31] ss:$2 sm:$0xff]  ;;  %1974 = vst.msk [vmem:[#allocation6 + $0x1b8] sm:$0xff] %vm1023_vm4, %v1970_v58  ;;  %v12354_v23 = vpop.f32.mrf.mxu2  ;;  %v12356_v4 = vpop.f32.mrf.mxu3  ;;  %v2343_v37 = vsel %vm12057_vm9, %v2335_v10, %v2342_v13  ;;  %v2209_v43 = vrot.slane %v12304_v24, 4 }
 0x134   : > { %v2121_v53 = vmax.f32 %v1997_v59, %v2061_v46  ;;  %v2013_v15 = vld [vmem:[#allocation6 + $0xb0] ss:$2 sm:$0xff]  ;;  %v2077_v20 = vld [vmem:[#allocation6 + $0xb1] ss:$2 sm:$0xff]  ;;  %v12361_v55 = vpop.f32.mrf.mxu0  ;;  %v12363_v56 = vpop.f32.mrf.mxu1  ;;  %15265 = vst [vmem:[#allocation28_spill] sm:$0xff] %v12369_v1  ;;  %v2352_v60 = vsel %vm12057_vm9, %v2344_v7, %v2351_v8  ;;  %v2617_v51 = vand.u32 15, %v12373_v31 }
 0x135   : > { %v2129_v45 = vmax.f32 %v2013_v15, %v2077_v20  ;;  %2516 = vst.msk [vmem:[#allocation2 + $0x30] sm:$0xf] %vm657_vm5, %v2280_v32  ;;  %v12402_v46 = vadd.s32 32, %v12066_v48  ;;  %v3475_v32 = vpack.c.bf16 %v3445_v19, %v3444_v29  ;;  %v2281_v24 = vrot.slane %v12309_v11, 4 }
 0x136   : > { %v2153_v14 = vpack.c.bf16 %v2121_v53, %v2121_v53  ;;  %15266 = vst [vmem:[#allocation29_spill] sm:$0xff] %v12373_v31  ;;  %vm3159_vm8 = vcmp.ne.s32.totalorder %v2617_v51, 15 }
 0x137   : > { %v2161_v12 = vpack.c.bf16 %v2129_v45, %v2129_v45  ;;  %2523 = vst.msk [vmem:[#allocation2 + $0x4c] sm:$0xf] %vm657_vm5, %v2343_v37  ;;  %v2610_v7 = vand.u32 15, %v12402_v46  ;;  %v12415_v8 = vsel %vm3159_vm8, 1.0, %v15142_v39  ;;  %v2353_v45 = vrot.slane %v12346_v40, 4 }
 0x138   : > { %v2211_v33 = vshrl.u32 %v2153_v14, 16  ;;  %v2214_v30 = vshll.u32 %v2153_v14, 16  ;;  %15267 = vst [vmem:[#allocation30_spill] sm:$0xff] %v12402_v46 }
 0x139   : > { %v2283_v57 = vshrl.u32 %v2161_v12, 16  ;;  %v2029_v36 = vld [vmem:[#allocation6 + $0x130] ss:$2 sm:$0xff]  ;;  %v2093_v61 = vld [vmem:[#allocation6 + $0x131] ss:$2 sm:$0xff]  ;;  %v2286_v2 = vshll.u32 %v2161_v12, 16 }
 0x13a   : > { %v12385_v0 = vrot.slane %v2211_v33, 7  ;;  %v2137_v41 = vmax.f32 %v2029_v36, %v2093_v61  ;;  %2524 = vst.msk [vmem:[#allocation2 + $0x50] sm:$0xf] %vm657_vm5, %v2352_v60  ;;  %v3592_v36 = vshrl.u32 %v12260_v3, 16  ;;  %vm2966_vm10 = vcmp.ne.s32.totalorder %v2610_v7, 0 }
 0x13b   : > { %v12388_v42 = vrot.slane %v2283_v57, 7  ;;  %v12390_v38 = vpop.f32.mrf.mxu2  ;;  %v12392_v16 = vpop.f32.mrf.mxu3  ;;  %v15141_v61 = vrot.slane %v12415_v8, 6  ;;  %v15268_v3 = vrot.slane %v12167_v21, 6 }
 0x13c   : > { %v2216_v22 = vor.u32 %v2214_v30, %v12385_v0  ;;  %v2169_v58 = vpack.c.bf16 %v2137_v41, %v2137_v41  ;;  %v12397_v27 = vpop.f32.mrf.mxu0  ;;  %v12399_v59 = vpop.f32.mrf.mxu1  ;;  %v3594_v37 = vor.u32 %v3592_v36, %v12307_v50 }
 0x13d   : > { %v2288_v15 = vor.u32 %v2286_v2, %v12388_v42  ;;  %v12436_v2 = vsel %vm2966_vm10, 1.0, %v15142_v39 }
 0x13e   : > { %v2217_v10 = vsel %vm12057_vm9, %v2209_v43, %v2216_v22  ;;  %v2355_v13 = vshrl.u32 %v2169_v58, 16  ;;  %v2358_v53 = vshll.u32 %v2169_v58, 16  ;;  %v12442_v43 = vsel %vm4065_vm13, %v15268_v3, %v12113_v18 }
 0x13f   : > { %2509 = vst.msk [vmem:[#allocation2 + $0x14] sm:$0xf] %vm657_vm5, %v2217_v10  ;;  %10065 = vmatmul.msk.bf16.gmra.mxu1 %vm1023_vm4, %v3475_v32  ;;  %v2289_v33 = vsel %vm12057_vm9, %v2281_v24, %v2288_v15  ;;  %v12449_v32 = vsel %vm4065_vm13, %v12113_v18, %v15141_v61  ;;  %v12454_v10 = vld [vmem:[%s15243_s11] ss:$0 sm:$0xff]  ;;  %s648_s11 = sand.u32 1, %s11616_s25  }
 0x140   : > { %v12411_v20 = vrot.slane %v2355_v13, 7  ;;  %2517 = vst.msk [vmem:[#allocation2 + $0x34] sm:$0xf] %vm657_vm5, %v2289_v33  ;;  %v1262_v21 = vadd.f32 %v12454_v10, %v12319_v28  ;;  %v948_v33 = vadd.f32 %v12454_v10, %v12317_v35  ;;  %s649_s28 = scalar_lea.vmem [#allocation12], %s648_s11  ;;  %s9541_s26 = scalar_lea.sflag [#allocation13], %s648_s11 }
 0x141   : > { %15269 = vst [vmem:[#allocation31_spill] sm:$0xff] %v12442_v43  ;;  %s9551_s0 = sshll.u32 %s649_s28, 4  ;;  %s9552_s0 = int_to_ptr.vmem [resolvable:$true] %s9551_s0 }
 0x142   : > { %v2360_v14 = vor.u32 %v2358_v53, %v12411_v20  ;;  %15270 = vst [vmem:[#allocation32_spill] sm:$0xff] %v12449_v32 }
 0x143   : > { %v12419_v12 = vpop.f32.mrf.mxu2  ;;  %v12421_v11 = vpop.f32.mrf.mxu3 }
 0x144   : > { %v12425_v29 = vpop.f32.mrf.mxu0  ;;  %v12427_v57 = vpop.f32.mrf.mxu1  ;;  %v2361_v30 = vsel %vm12057_vm9, %v2353_v45, %v2360_v14 }
 0x145   : > { %2525 = vst.msk [vmem:[#allocation2 + $0x54] sm:$0xf] %vm657_vm5, %v2361_v30 }
 0x146   : > { %v11493_v40 = vld [vmem:[#allocation2 + $0x10] sm:$0xff]  }
 0x147   : > { %v11157_v19 = vld [vmem:[#allocation2 + $0x10] sm:$0xff]  ;;  %v11403_v41 = vunpack.c.l.bf16 %v11493_v40  ;;  %v11344_v51 = vunpack.c.h.bf16 %v11493_v40 }
 0x148   : > { %v3350_v60 = vld [vmem:[#allocation2 + $0x10] sm:$0xff]   ;;  %v3596_v22 = vshll.u32 %v11157_v19, 16  ;;  %v3600_v3 = vshrl.u32 %v11157_v19, 16  ;;  %v1575_v19 = vadd.f32 %v12454_v10, %v12354_v23 }
 0x149   : > { %v3382_v58 = vunpack.c.l.bf16 %v3350_v60  ;;  %v3383_v50 = vunpack.c.h.bf16 %v3350_v60  ;;  %v12459_v13 = vmul.f32 %v11403_v41, %v12200_v49  ;;  %v4507_v53 = vmul.f32 %v11403_v41, %v12369_v1 }
 0x14a   : > { %v4508_v24 = vmul.f32 %v11344_v51, %v12087_v62  ;;  %v3598_v15 = vrot.slane %v3596_v22, 1  ;;  %v1317_v22 = vmax.f32 %v1262_v21, 0.0  ;;  %v1888_v21 = vadd.f32 %v12454_v10, %v12356_v4 }
 0x14b   : > { %15271 = vst [vmem:[#allocation33_spill] sm:$0xff] %v12459_v13  ;;  %v3446_v7 = vmul.f32 %v12436_v2, %v3382_v58  ;;  %v3447_v45 = vmul.f32 %v12087_v62, %v3383_v50  ;;  %v4166_v14 = vmul.f32 %v12442_v43, %v3382_v58  ;;  %v12468_v36 = vpop.f32.mrf.mxu2  ;;  %v12470_v28 = vpop.f32.mrf.mxu3  ;;  %v4167_v40 = vmul.f32 %v12449_v32, %v3383_v50 }
 0x14c   : > { %v4538_v49 = vpack.c.bf16 %v4508_v24, %v4507_v53  ;;  %v957_v60 = vpop.f32.mrf.mxu0  ;;  %v1271_v30 = vpop.f32.mrf.mxu1  ;;  %v3599_v41 = vsel %vm3579_vm14, %v3594_v37, %v3598_v15  ;;  %v12478_v39 = vor.u32 %v3600_v3, %v3598_v15  ;;  %v1003_v53 = vmax.f32 %v948_v33, 0.0 }
 0x14d   : > { %v3476_v51 = vpack.c.bf16 %v3447_v45, %v3446_v7  ;;  %v958_v61 = vadd.f32 %v12454_v10, %v957_v60  ;;  %v1272_v58 = vadd.f32 %v12454_v10, %v1271_v30  ;;  %10045 = vmatmul.msk.bf16.gmra.mxu0 %vm1023_vm4, %v3599_v41  ;;  %v4197_v35 = vpack.c.bf16 %v4167_v40, %v4166_v14 }
 0x14e   : > { %10109 = vmatmul.msk.bf16.gmra.mxu3 %vm1023_vm4, %v4538_v49  ;;  %v1264_v7 = vadd.f32 %v12454_v10, %v12363_v56  ;;  %v950_v15 = vadd.f32 %v12454_v10, %v12361_v55  ;;  %v1630_v49 = vmax.f32 %v1575_v19, 0.0  ;;  %v1943_v4 = vmax.f32 %v1888_v21, 0.0 }
 0x14f   : > { %v1007_v50 = vmax.f32 %v958_v61, 0.0  ;;  %v1321_v24 = vmax.f32 %v1272_v58, 0.0  ;;  %10066 = vmatmul.msk.bf16.gmra.mxu1 %vm1023_vm4, %v3476_v51  ;;  %v12481_v37 = vrot.slane %v4197_v35, 1  ;;  %v1267_v21 = vadd.f32 %v12454_v10, %v12399_v59 }
 0x151   : > { %v1036_v45 = vmax.f32 %v1003_v53, %v1007_v50  ;;  %v1349_v14 = vmax.f32 %v1317_v22, %v1321_v24  ;;  %v4237_v61 = vsel %vm4232_vm15, %v12312_v5, %v12481_v37  ;;  %v1318_v5 = vmax.f32 %v1264_v7, 0.0 }
 0x152   : > { %10087 = vmatmul.msk.bf16.gmra.mxu2 %vm1023_vm4, %v4237_v61  ;;  %v1004_v22 = vmax.f32 %v950_v15, 0.0  ;;  %v1577_v53 = vadd.f32 %v12454_v10, %v12390_v38  ;;  %v1890_v50 = vadd.f32 %v12454_v10, %v12392_v16 }
 0x153   : > { %1040 = vst.msk [vmem:[#allocation6 + $0x40] sm:$0xff] %vm1023_vm4, %v1036_v45  ;;  %v1584_v23 = vpop.f32.mrf.mxu2  ;;  %v1897_v33 = vpop.f32.mrf.mxu3 }
 0x154   : > { %1353 = vst.msk [vmem:[#allocation6 + $0xc0] sm:$0xff] %vm1023_vm4, %v1349_v14  ;;  %v1585_v56 = vadd.f32 %v12454_v10, %v1584_v23  ;;  %v1898_v40 = vadd.f32 %v12454_v10, %v1897_v33  ;;  %v959_v60 = vpop.f32.mrf.mxu0  ;;  %v1273_v30 = vpop.f32.mrf.mxu1  ;;  %v953_v14 = vadd.f32 %v12454_v10, %v12397_v27  ;;  %v1631_v38 = vmax.f32 %v1577_v53, 0.0 }
 0x155   : > { %v960_v41 = vadd.f32 %v12454_v10, %v959_v60  ;;  %v1274_v51 = vadd.f32 %v12454_v10, %v1273_v30  ;;  %v1944_v23 = vmax.f32 %v1890_v50, 0.0 }
 0x156   : > { %v1634_v55 = vmax.f32 %v1585_v56, 0.0  ;;  %v1947_v3 = vmax.f32 %v1898_v40, 0.0  ;;  %v1005_v30 = vmax.f32 %v953_v14, 0.0 }
 0x157   : > { %v1008_v58 = vmax.f32 %v960_v41, 0.0  ;;  %v1322_v35 = vmax.f32 %v1274_v51, 0.0 }
 0x158   : > { %v1662_v24 = vmax.f32 %v1630_v49, %v1634_v55  ;;  %v1975_v19 = vmax.f32 %v1943_v4, %v1947_v3  ;;  %v1319_v4 = vmax.f32 %v1267_v21, 0.0  ;;  %v1893_v55 = vadd.f32 %v12454_v10, %v12421_v11 }
 0x159   : > { %v1037_v7 = vmax.f32 %v1004_v22, %v1008_v58  ;;  %v1350_v45 = vmax.f32 %v1318_v5, %v1322_v35  ;;  %v1580_v5 = vadd.f32 %v12454_v10, %v12419_v12  ;;  %v1269_v58 = vadd.f32 %v12454_v10, %v12427_v57 }
 0x15a   : > { %1666 = vst.msk [vmem:[#allocation6 + $0x140] sm:$0xff] %vm1023_vm4, %v1662_v24  ;;  %v955_v24 = vadd.f32 %v12454_v10, %v12425_v29  ;;  %v1945_v11 = vmax.f32 %v1893_v55, 0.0 }
 0x15b   : > { %1979 = vst.msk [vmem:[#allocation6 + $0x1c0] sm:$0xff] %vm1023_vm4, %v1975_v19  ;;  %v1586_v61 = vpop.f32.mrf.mxu2  ;;  %v1899_v15 = vpop.f32.mrf.mxu3  ;;  %v1632_v50 = vmax.f32 %v1580_v5, 0.0  ;;  %v1582_v5 = vadd.f32 %v12454_v10, %v12468_v36 }
 0x15c   : > { %1041 = vst.msk [vmem:[#allocation6 + $0x48] sm:$0xff] %vm1023_vm4, %v1037_v7  ;;  %v1587_v16 = vadd.f32 %v12454_v10, %v1586_v61  ;;  %v1900_v33 = vadd.f32 %v12454_v10, %v1899_v15  ;;  %v962_v59 = vpop.f32.mrf.mxu0  ;;  %v1276_v49 = vpop.f32.mrf.mxu1 }
 0x15d   : > { %1354 = vst.msk [vmem:[#allocation6 + $0xc8] sm:$0xff] %vm1023_vm4, %v1350_v45  ;;  %v963_v56 = vadd.f32 %v12454_v10, %v962_v59  ;;  %v1277_v27 = vadd.f32 %v12454_v10, %v1276_v49 }
 0x15e   : > { %v1635_v40 = vmax.f32 %v1587_v16, 0.0  ;;  %v1948_v60 = vmax.f32 %v1900_v33, 0.0  ;;  %v1320_v16 = vmax.f32 %v1269_v58, 0.0 }
 0x15f   : > { %v1009_v41 = vmax.f32 %v963_v56, 0.0  ;;  %v1323_v51 = vmax.f32 %v1277_v27, 0.0  ;;  %v1006_v27 = vmax.f32 %v955_v24, 0.0 }
 0x160   : > { %v1663_v3 = vmax.f32 %v1631_v38, %v1635_v40  ;;  %v1976_v22 = vmax.f32 %v1944_v23, %v1948_v60 }
 0x161   : > { %v1038_v35 = vmax.f32 %v1005_v30, %v1009_v41  ;;  %v1351_v53 = vmax.f32 %v1319_v4, %v1323_v51 }
 0x162   : > { %1667 = vst.msk [vmem:[#allocation6 + $0x148] sm:$0xff] %vm1023_vm4, %v1663_v3  ;;  %v1895_v3 = vadd.f32 %v12454_v10, %v12470_v28 }
 0x163   : > { %v1999_v19 = vld [vmem:[#allocation6 + $0x40] ss:$2 sm:$0xff]  ;;  %v2063_v12 = vld [vmem:[#allocation6 + $0x41] ss:$2 sm:$0xff]  ;;  %1980 = vst.msk [vmem:[#allocation6 + $0x1c8] sm:$0xff] %vm1023_vm4, %v1976_v22  ;;  %v1589_v21 = vpop.f32.mrf.mxu2  ;;  %v1902_v7 = vpop.f32.mrf.mxu3 }
 0x164   : > { %v2122_v45 = vmax.f32 %v1999_v19, %v2063_v12  ;;  %v2015_v14 = vld [vmem:[#allocation6 + $0xc0] ss:$2 sm:$0xff]  ;;  %v2079_v61 = vld [vmem:[#allocation6 + $0xc1] ss:$2 sm:$0xff]  ;;  %1042 = vst.msk [vmem:[#allocation6 + $0x50] sm:$0xff] %vm1023_vm4, %v1038_v35  ;;  %v1590_v57 = vadd.f32 %v12454_v10, %v1589_v21  ;;  %v1903_v15 = vadd.f32 %v12454_v10, %v1902_v7  ;;  %v964_v38 = vpop.f32.mrf.mxu0  ;;  %v1278_v23 = vpop.f32.mrf.mxu1  ;;  %v1633_v7 = vmax.f32 %v1582_v5, 0.0 }
 0x165   : > { %v2130_v29 = vmax.f32 %v2015_v14, %v2079_v61  ;;  %1355 = vst.msk [vmem:[#allocation6 + $0xd0] sm:$0xff] %vm1023_vm4, %v1351_v53  ;;  %v965_v33 = vadd.f32 %v12454_v10, %v964_v38  ;;  %v1279_v59 = vadd.f32 %v12454_v10, %v1278_v23  ;;  %v1946_v14 = vmax.f32 %v1895_v3, 0.0 }
 0x166   : > { %v2154_v49 = vpack.c.bf16 %v2122_v45, %v2122_v45  ;;  %v1636_v4 = vmax.f32 %v1590_v57, 0.0  ;;  %v1949_v56 = vmax.f32 %v1903_v15, 0.0  ;;  %v2218_v57 = vrot.slane %v12385_v0, 4 }
 0x167   : > { %v2162_v40 = vpack.c.bf16 %v2130_v29, %v2130_v29  ;;  %v1010_v60 = vmax.f32 %v965_v33, 0.0  ;;  %v1324_v30 = vmax.f32 %v1279_v59, 0.0 }
 0x168   : > { %v2220_v41 = vshrl.u32 %v2154_v49, 16  ;;  %v1664_v51 = vmax.f32 %v1632_v50, %v1636_v4  ;;  %v1977_v55 = vmax.f32 %v1945_v11, %v1949_v56  ;;  %v2223_v19 = vshll.u32 %v2154_v49, 16 }
 0x169   : > { %v2292_v22 = vshrl.u32 %v2162_v40, 16  ;;  %v1039_v58 = vmax.f32 %v1006_v27, %v1010_v60  ;;  %v1352_v35 = vmax.f32 %v1320_v16, %v1324_v30  ;;  %v2295_v12 = vshll.u32 %v2162_v40, 16 }
 0x16a   : > { %v12537_v53 = vrot.slane %v2220_v41, 7  ;;  %1668 = vst.msk [vmem:[#allocation6 + $0x150] sm:$0xff] %vm1023_vm4, %v1664_v51  ;;  %v2290_v16 = vrot.slane %v12388_v42, 4 }
 0x16b   : > { %v2294_v24 = vrot.slane %v2292_v22, 7  ;;  %1981 = vst.msk [vmem:[#allocation6 + $0x1d0] sm:$0xff] %vm1023_vm4, %v1977_v55  ;;  %v1591_v21 = vpop.f32.mrf.mxu2  ;;  %v1904_v36 = vpop.f32.mrf.mxu3  ;;  %v12569_v55 = vadd.s32 56, %v12066_v48 }
 0x16c   : > { %v2225_v50 = vor.u32 %v2223_v19, %v12537_v53  ;;  %1043 = vst.msk [vmem:[#allocation6 + $0x58] sm:$0xff] %vm1023_vm4, %v1039_v58  ;;  %v1592_v28 = vadd.f32 %v12454_v10, %v1591_v21  ;;  %v12544_v11 = vpop.f32.mrf.mxu0  ;;  %v12546_v45 = vpop.f32.mrf.mxu1  ;;  %v1905_v61 = vadd.f32 %v12454_v10, %v1904_v36 }
 0x16d   : > { %1356 = vst.msk [vmem:[#allocation6 + $0xd8] sm:$0xff] %vm1023_vm4, %v1352_v35  ;;  %v2297_v15 = vor.u32 %v2295_v12, %v2294_v24  ;;  %v2631_v21 = vand.u32 15, %v12569_v55 }
 0x16e   : > { %v1637_v38 = vmax.f32 %v1592_v28, 0.0  ;;  %v1950_v23 = vmax.f32 %v1905_v61, 0.0  ;;  %v2226_v33 = vsel %vm12057_vm9, %v2218_v57, %v2225_v50  ;;  %15272 = vst [vmem:[#allocation34_spill] sm:$0xff] %v12569_v55  ;;  %v2299_v28 = vrot.slane %v2294_v24, 4 }
 0x16f   : > { %2510 = vst.msk [vmem:[#allocation2 + $0x18] sm:$0xf] %vm657_vm5, %v2226_v33  ;;  %v2298_v49 = vsel %vm12057_vm9, %v2290_v16, %v2297_v15  ;;  %vm3161_vm11 = vcmp.ne.s32.totalorder %v2631_v21, 15  ;;  %v2031_v16 = vld [vmem:[#allocation6 + $0x140] ss:$2 sm:$0xff] }
 0x170   : > { %v1665_v29 = vmax.f32 %v1633_v7, %v1637_v38  ;;  %v1978_v59 = vmax.f32 %v1946_v14, %v1950_v23  ;;  %2518 = vst.msk [vmem:[#allocation2 + $0x38] sm:$0xf] %vm657_vm5, %v2298_v49  ;;  %v12587_v38 = vadd.s32 48, %v12066_v48  ;;  %v2227_v23 = vrot.slane %v12537_v53, 4 }
 0x171   : > { %v15274_v49 = vmov 0.0  }
 0x172   : > { %1669 = vst.msk [vmem:[#allocation6 + $0x158] sm:$0xff] %vm1023_vm4, %v1665_v29  ;;  %v2095_v29 = vld [vmem:[#allocation6 + $0x141] ss:$2 sm:$0xff] }
 0x173   : > { %v2001_v4 = vld [vmem:[#allocation6 + $0x50] ss:$2 sm:$0xff]  ;;  %v2065_v56 = vld [vmem:[#allocation6 + $0x51] ss:$2 sm:$0xff]  ;;  %1982 = vst.msk [vmem:[#allocation6 + $0x1d8] sm:$0xff] %vm1023_vm4, %v1978_v59  ;;  %v12559_v0 = vpop.f32.mrf.mxu2  ;;  %v12561_v27 = vpop.f32.mrf.mxu3  ;;  %v2624_v59 = vand.u32 15, %v12587_v38 }
 0x174   : > { %v2123_v42 = vmax.f32 %v2001_v4, %v2065_v56  ;;  %v2017_v40 = vld [vmem:[#allocation6 + $0xd0] ss:$2 sm:$0xff]  ;;  %v2081_v60 = vld [vmem:[#allocation6 + $0xd1] ss:$2 sm:$0xff]  ;;  %v12563_v30 = vpop.f32.mrf.mxu0  ;;  %v12565_v5 = vpop.f32.mrf.mxu1  ;;  %15273 = vst [vmem:[#allocation35_spill] sm:$0xff] %v12587_v38  ;;  %v12597_v4 = vsel %vm3161_vm11, 1.0, %v15274_v49  ;;  %v2138_v56 = vmax.f32 %v2031_v16, %v2095_v29 }
 0x175   : > { %v2131_v41 = vmax.f32 %v2017_v40, %v2081_v60  ;;  %vm2968_vm12 = vcmp.ne.s32.totalorder %v2624_v59, 0 }
 0x176   : > { %v2155_v51 = vpack.c.bf16 %v2123_v42, %v2123_v42 }
 0x177   : > { %v2163_v3 = vpack.c.bf16 %v2131_v41, %v2131_v41 }
 0x178   : > { %v2229_v22 = vshrl.u32 %v2155_v51, 16  ;;  %v2232_v12 = vshll.u32 %v2155_v51, 16 }
 0x179   : > { %v2301_v58 = vshrl.u32 %v2163_v3, 16  ;;  %v2304_v35 = vshll.u32 %v2163_v3, 16  ;;  %v2033_v53 = vld [vmem:[#allocation6 + $0x150] ss:$2 sm:$0xff]  ;;  %v2097_v42 = vld [vmem:[#allocation6 + $0x151] ss:$2 sm:$0xff] }
 0x17a   : > { %v12571_v19 = vrot.slane %v2229_v22, 7  ;;  %v15145_v3 = vrot.slane %v12597_v4, 6  ;;  %v2170_v22 = vpack.c.bf16 %v2138_v56, %v2138_v56 }
 0x17b   : > { %v12574_v36 = vrot.slane %v2301_v58, 7  ;;  %v12576_v7 = vpop.f32.mrf.mxu2  ;;  %v12578_v50 = vpop.f32.mrf.mxu3  ;;  %v2139_v58 = vmax.f32 %v2033_v53, %v2097_v42  ;;  %v968_v53 = vadd.f32 %v12454_v10, %v12544_v11 }
 0x17c   : > { %v2234_v14 = vor.u32 %v2232_v12, %v12571_v19  ;;  %v12581_v61 = vpop.f32.mrf.mxu0  ;;  %v12583_v57 = vpop.f32.mrf.mxu1  ;;  %v12612_v12 = vsel %vm2968_vm12, 1.0, %v15274_v49  ;;  %v12626_v16 = vsel %vm4065_vm13, %v12113_v18, %v15145_v3  ;;  %v2364_v59 = vshrl.u32 %v2170_v22, 16 }
 0x17d   : > { %v2306_v15 = vor.u32 %v2304_v35, %v12574_v36  ;;  %v1282_v35 = vadd.f32 %v12454_v10, %v12546_v45  ;;  %15277 = vst [vmem:[#allocation37_spill] sm:$0xff] %v12626_v16  ;;  %v12628_v56 = vpack.c.bf16 %v2139_v58, %v2139_v58  ;;  %v2367_v38 = vshll.u32 %v2170_v22, 16 }
 0x17e   : > { %v2235_v33 = vsel %vm12057_vm9, %v2227_v23, %v2234_v14  ;;  %v12646_v43 = vrot.slane %v2364_v59, 7  ;;  %v1011_v32 = vmax.f32 %v968_v53, 0.0  ;;  %v2039_v59 = vld [vmem:[#allocation6 + $0x180] ss:$2 sm:$0xff]  ;;  %v2103_v53 = vld [vmem:[#allocation6 + $0x181] ss:$2 sm:$0xff] }
 0x17f   : > { %v2307_v24 = vsel %vm12057_vm9, %v2299_v28, %v2306_v15  ;;  %2511 = vst.msk [vmem:[#allocation2 + $0x1c] sm:$0xf] %vm657_vm5, %v2235_v33  ;;  %v15275_v15 = vrot.slane %v12415_v8, 6  ;;  %v1325_v58 = vmax.f32 %v1282_v35, 0.0 }
 0x180   : > { %2519 = vst.msk [vmem:[#allocation2 + $0x3c] sm:$0xf] %vm657_vm5, %v2307_v24 }
 0x181   : > { %v12620_v23 = vsel %vm4065_vm13, %v15275_v15, %v12113_v18 }
 0x182   : > { %15276 = vst [vmem:[#allocation36_spill] sm:$0xff] %v12620_v23 }
 0x183   : > { %v12600_v40 = vpop.f32.mrf.mxu2  ;;  %v12602_v60 = vpop.f32.mrf.mxu3 }
 0x184   : > { %v12604_v41 = vpop.f32.mrf.mxu0  ;;  %v12606_v51 = vpop.f32.mrf.mxu1 }
 0x186   : > { %v3352_v21 = vld [vmem:[#allocation2 + $0x18] sm:$0xff]  }
 0x187   : > { %v11479_v28 = vld [vmem:[#allocation2 + $0x18] sm:$0xff]   ;;  %v3384_v45 = vunpack.c.l.bf16 %v3352_v21  ;;  %v3385_v29 = vunpack.c.h.bf16 %v3352_v21 }
 0x188   : > { %v12614_v14 = vld [vmem:[#allocation2 + $0x18] sm:$0xff]  ;;  %v11347_v33 = vunpack.c.l.bf16 %v11479_v28  ;;  %v11348_v24 = vunpack.c.h.bf16 %v11479_v28 }
 0x189   : > { %v3604_v8 = vshll.u32 %v12614_v14, 16  ;;  %v3448_v55 = vmul.f32 %v12612_v12, %v3384_v45  ;;  %v3449_v3 = vmul.f32 %v12087_v62, %v3385_v29  ;;  %v4168_v11 = vmul.f32 %v12620_v23, %v3384_v45 }
 0x18a   : > { %v4509_v21 = vmul.f32 %v11347_v33, %v12436_v2  ;;  %v4510_v28 = vmul.f32 %v11348_v24, %v12087_v62  ;;  %v4169_v35 = vmul.f32 %v12626_v16, %v3385_v29  ;;  %v2373_v33 = vshrl.u32 %v12628_v56, 16 }
 0x18b   : > { %v12633_v42 = vpop.f32.mrf.mxu2  ;;  %v12635_v15 = vpop.f32.mrf.mxu3  ;;  %v12641_v6 = vrot.slane %v3604_v8, 1  ;;  %v3477_v1 = vpack.c.bf16 %v3449_v3, %v3448_v55  ;;  %v1595_v45 = vadd.f32 %v12454_v10, %v12559_v0 }
 0x18c   : > { %v977_v31 = vpop.f32.mrf.mxu0  ;;  %v1291_v46 = vpop.f32.mrf.mxu1  ;;  %v4539_v13 = vpack.c.bf16 %v4510_v28, %v4509_v21  ;;  %v4198_v55 = vpack.c.bf16 %v4169_v35, %v4168_v11  ;;  %v12668_v0 = vrot.slane %v2373_v33, 7  ;;  %v2142_v11 = vmax.f32 %v2039_v59, %v2103_v53 }
 0x18d   : > { %v978_v47 = vadd.f32 %v12454_v10, %v977_v31  ;;  %v1292_v52 = vadd.f32 %v12454_v10, %v1291_v46  ;;  %v3607_v22 = vsel %vm3579_vm14, %v12478_v39, %v12641_v6  ;;  %10067 = vmatmul.msk.bf16.gmra.mxu1 %vm1023_vm4, %v3477_v1  ;;  %v1908_v46 = vadd.f32 %v12454_v10, %v12561_v27 }
 0x18e   : > { %10110 = vmatmul.msk.bf16.gmra.mxu3 %vm1023_vm4, %v4539_v13  ;;  %10046 = vmatmul.msk.bf16.gmra.mxu0 %vm1023_vm4, %v3607_v22  ;;  %v1284_v39 = vadd.f32 %v12454_v10, %v12565_v5  ;;  %v12665_v1 = vrot.slane %v4198_v55, 1  ;;  %v2369_v13 = vor.u32 %v2367_v38, %v12646_v43  ;;  %v2376_v27 = vshll.u32 %v12628_v56, 16  ;;  %v2105_v55 = vld [vmem:[#allocation6 + $0x191] ss:$2 sm:$0xff] }
 0x18f   : > { %v1015_v24 = vmax.f32 %v978_v47, 0.0  ;;  %v1329_v31 = vmax.f32 %v1292_v52, 0.0  ;;  %v2362_v47 = vrot.slane %v12411_v20, 4  ;;  %v970_v52 = vadd.f32 %v12454_v10, %v12563_v30  ;;  %v11191_v20 = vld [vmem:[%s15240_s30 + $0x20] sm:$0xff] }
 0x190   : > { %v1638_v8 = vmax.f32 %v1595_v45, 0.0  ;;  %v1951_v21 = vmax.f32 %v1908_v46, 0.0  ;;  %v4239_v30 = vsel %vm4232_vm15, %v12481_v37, %v12665_v1  ;;  %v1326_v22 = vmax.f32 %v1284_v39, 0.0  ;;  %5043 = vmatpush.bf16.msra.mxu0 %v11191_v20  ;;  %v2041_v46 = vld [vmem:[#allocation6 + $0x190] ss:$2 sm:$0xff] }
 0x191   : > { %v1044_v3 = vmax.f32 %v1011_v32, %v1015_v24  ;;  %v1357_v29 = vmax.f32 %v1325_v58, %v1329_v31  ;;  %10088 = vmatmul.msk.bf16.gmra.mxu2 %vm1023_vm4, %v4239_v30  ;;  %v2371_v45 = vrot.slane %v12646_v43, 4  ;;  %v1012_v24 = vmax.f32 %v970_v52, 0.0 }
 0x192   : > { %v2370_v39 = vsel %vm12057_vm9, %v2362_v47, %v2369_v13  ;;  %v1597_v59 = vadd.f32 %v12454_v10, %v12576_v7  ;;  %v1910_v53 = vadd.f32 %v12454_v10, %v12578_v50  ;;  %v12693_v52 = vpack.c.bf16 %v2142_v11, %v2142_v11  ;;  %v2043_v47 = vld [vmem:[#allocation6 + $0x1a0] ss:$2 sm:$0xff]  ;;  %v2107_v13 = vld [vmem:[#allocation6 + $0x1a1] ss:$2 sm:$0xff] }
 0x193   : > { %1048 = vst.msk [vmem:[#allocation6 + $0x60] sm:$0xff] %vm1023_vm4, %v1044_v3  ;;  %v1604_v32 = vpop.f32.mrf.mxu2  ;;  %v1917_v5 = vpop.f32.mrf.mxu3  ;;  %v2378_v3 = vor.u32 %v2376_v27, %v12668_v0  ;;  %v1287_v27 = vadd.f32 %v12454_v10, %v12583_v57  ;;  %v973_v7 = vadd.f32 %v12454_v10, %v12581_v61 }
 0x194   : > { %1361 = vst.msk [vmem:[#allocation6 + $0xe0] sm:$0xff] %vm1023_vm4, %v1357_v29  ;;  %v1605_v38 = vadd.f32 %v12454_v10, %v1604_v32  ;;  %v1918_v56 = vadd.f32 %v12454_v10, %v1917_v5  ;;  %v979_v28 = vpop.f32.mrf.mxu0  ;;  %v1293_v58 = vpop.f32.mrf.mxu1 }
 0x195   : > { %v980_v35 = vadd.f32 %v12454_v10, %v979_v28  ;;  %v1294_v33 = vadd.f32 %v12454_v10, %v1293_v58  ;;  %2526 = vst.msk [vmem:[#allocation2 + $0x58] sm:$0xf] %vm657_vm5, %v2370_v39  ;;  %v1952_v28 = vmax.f32 %v1910_v53, 0.0  ;;  %v1327_v61 = vmax.f32 %v1287_v27, 0.0 }
 0x196   : > { %v1642_v31 = vmax.f32 %v1605_v38, 0.0  ;;  %v1955_v37 = vmax.f32 %v1918_v56, 0.0  ;;  %v2143_v38 = vmax.f32 %v2041_v46, %v2105_v55  ;;  %v1639_v56 = vmax.f32 %v1597_v59, 0.0 }
 0x197   : > { %v1016_v29 = vmax.f32 %v980_v35, 0.0  ;;  %v1330_v32 = vmax.f32 %v1294_v33, 0.0  ;;  %v2400_v35 = vshrl.u32 %v12693_v52, 16  ;;  %v1013_v55 = vmax.f32 %v973_v7, 0.0 }
 0x198   : > { %v1670_v5 = vmax.f32 %v1638_v8, %v1642_v31  ;;  %v1983_v43 = vmax.f32 %v1951_v21, %v1955_v37  ;;  %v2379_v21 = vsel %vm12057_vm9, %v2371_v45, %v2378_v3  ;;  %v12710_v45 = vpack.c.bf16 %v2143_v38, %v2143_v38 }
 0x199   : > { %v1045_v20 = vmax.f32 %v1012_v24, %v1016_v29  ;;  %v1358_v30 = vmax.f32 %v1326_v22, %v1330_v32  ;;  %v2144_v31 = vmax.f32 %v2043_v47, %v2107_v13  ;;  %2527 = vst.msk [vmem:[#allocation2 + $0x5c] sm:$0xf] %vm657_vm5, %v2379_v21  ;;  %v1600_v3 = vadd.f32 %v12454_v10, %v12600_v40 }
 0x19a   : > { %1674 = vst.msk [vmem:[#allocation6 + $0x160] sm:$0xff] %vm1023_vm4, %v1670_v5  ;;  %v1913_v39 = vadd.f32 %v12454_v10, %v12602_v60  ;;  %v1289_v5 = vadd.f32 %v12454_v10, %v12606_v51  ;;  %v2412_v38 = vshll.u32 %v12710_v45, 16  ;;  %v975_v40 = vadd.f32 %v12454_v10, %v12604_v41 }
 0x19b   : > { %1987 = vst.msk [vmem:[#allocation6 + $0x1e0] sm:$0xff] %vm1023_vm4, %v1983_v43  ;;  %v1606_v50 = vpop.f32.mrf.mxu2  ;;  %v1919_v8 = vpop.f32.mrf.mxu3  ;;  %v12726_v47 = vpack.c.bf16 %v2144_v31, %v2144_v31  ;;  %v1640_v60 = vmax.f32 %v1600_v3, 0.0 }
 0x19c   : > { %1049 = vst.msk [vmem:[#allocation6 + $0x68] sm:$0xff] %vm1023_vm4, %v1045_v20  ;;  %v1607_v57 = vadd.f32 %v12454_v10, %v1606_v50  ;;  %v1920_v58 = vadd.f32 %v12454_v10, %v1919_v8  ;;  %v982_v11 = vpop.f32.mrf.mxu0  ;;  %v1296_v22 = vpop.f32.mrf.mxu1  ;;  %v12719_v20 = vrot.slane %v2400_v35, 7  ;;  %v1953_v8 = vmax.f32 %v1913_v39, 0.0 }
 0x19d   : > { %1362 = vst.msk [vmem:[#allocation6 + $0xe8] sm:$0xff] %vm1023_vm4, %v1358_v30  ;;  %v983_v33 = vadd.f32 %v12454_v10, %v982_v11  ;;  %v1297_v24 = vadd.f32 %v12454_v10, %v1296_v22  ;;  %v2409_v30 = vshrl.u32 %v12710_v45, 16  ;;  %v1328_v22 = vmax.f32 %v1289_v5, 0.0 }
 0x19e   : > { %v1643_v37 = vmax.f32 %v1607_v57, 0.0  ;;  %v1956_v46 = vmax.f32 %v1920_v58, 0.0  ;;  %v1915_v39 = vadd.f32 %v12454_v10, %v12635_v15 }
 0x19f   : > { %v1017_v29 = vmax.f32 %v983_v33, 0.0  ;;  %v1331_v32 = vmax.f32 %v1297_v24, 0.0  ;;  %v1014_v24 = vmax.f32 %v975_v40, 0.0  ;;  %v12739_v40 = vrot.slane %v2409_v30, 7 }
 0x1a0   : > { %v1671_v59 = vmax.f32 %v1639_v56, %v1643_v37  ;;  %v1984_v53 = vmax.f32 %v1952_v28, %v1956_v46 }
 0x1a1   : > { %v1046_v43 = vmax.f32 %v1013_v55, %v1017_v29  ;;  %v1359_v27 = vmax.f32 %v1327_v61, %v1331_v32  ;;  %v1602_v55 = vadd.f32 %v12454_v10, %v12633_v42  ;;  %v2555_v42 = vadd.s32 72, %v12066_v48 }
 0x1a2   : > { %1675 = vst.msk [vmem:[#allocation6 + $0x168] sm:$0xff] %vm1023_vm4, %v1671_v59 }
 0x1a3   : > { %v2003_v13 = vld [vmem:[#allocation6 + $0x60] ss:$2 sm:$0xff]  ;;  %v2067_v7 = vld [vmem:[#allocation6 + $0x61] ss:$2 sm:$0xff]  ;;  %1988 = vst.msk [vmem:[#allocation6 + $0x1e8] sm:$0xff] %vm1023_vm4, %v1984_v53  ;;  %v1609_v51 = vpop.f32.mrf.mxu2  ;;  %v1922_v50 = vpop.f32.mrf.mxu3  ;;  %v1641_v30 = vmax.f32 %v1602_v55, 0.0 }
 0x1a4   : > { %v2124_v21 = vmax.f32 %v2003_v13, %v2067_v7  ;;  %v2019_v56 = vld [vmem:[#allocation6 + $0xe0] ss:$2 sm:$0xff]  ;;  %v2083_v28 = vld [vmem:[#allocation6 + $0xe1] ss:$2 sm:$0xff]  ;;  %1050 = vst.msk [vmem:[#allocation6 + $0x70] sm:$0xff] %vm1023_vm4, %v1046_v43  ;;  %v1610_v57 = vadd.f32 %v12454_v10, %v1609_v51  ;;  %v1923_v41 = vadd.f32 %v12454_v10, %v1922_v50  ;;  %v984_v58 = vpop.f32.mrf.mxu0  ;;  %v1298_v11 = vpop.f32.mrf.mxu1 }
 0x1a5   : > { %v2132_v35 = vmax.f32 %v2019_v56, %v2083_v28  ;;  %1363 = vst.msk [vmem:[#allocation6 + $0xf0] sm:$0xff] %vm1023_vm4, %v1359_v27  ;;  %v985_v61 = vadd.f32 %v12454_v10, %v984_v58  ;;  %v1299_v33 = vadd.f32 %v12454_v10, %v1298_v11  ;;  %v2109_v56 = vld [vmem:[#allocation6 + $0x1b1] ss:$2 sm:$0xff]  ;;  %v2049_v55 = vld [vmem:[#allocation6 + $0x1d0] ss:$2 sm:$0xff] }
 0x1a6   : > { %v2156_v31 = vpack.c.bf16 %v2124_v21, %v2124_v21  ;;  %v1644_v37 = vmax.f32 %v1610_v57, 0.0  ;;  %v1957_v46 = vmax.f32 %v1923_v41, 0.0  ;;  %v2045_v21 = vld [vmem:[#allocation6 + $0x1b0] ss:$2 sm:$0xff]  ;;  %v2047_v57 = vld [vmem:[#allocation6 + $0x1c0] ss:$2 sm:$0xff] }
 0x1a7   : > { %v2164_v3 = vpack.c.bf16 %v2132_v35, %v2132_v35  ;;  %v1018_v29 = vmax.f32 %v985_v61, 0.0  ;;  %v1332_v32 = vmax.f32 %v1299_v33, 0.0  ;;  %v2111_v35 = vld [vmem:[#allocation6 + $0x1c1] ss:$2 sm:$0xff]  ;;  %v2236_v61 = vrot.slane %v12571_v19, 4 }
 0x1a8   : > { %v2238_v59 = vshrl.u32 %v2156_v31, 16  ;;  %v1672_v53 = vmax.f32 %v1640_v60, %v1644_v37  ;;  %v1985_v5 = vmax.f32 %v1953_v8, %v1957_v46  ;;  %v2241_v50 = vshll.u32 %v2156_v31, 16 }
 0x1a9   : > { %v2310_v43 = vshrl.u32 %v2164_v3, 16  ;;  %v2313_v27 = vshll.u32 %v2164_v3, 16  ;;  %v1047_v13 = vmax.f32 %v1014_v24, %v1018_v29  ;;  %v1360_v7 = vmax.f32 %v1328_v22, %v1332_v32  ;;  %v2113_v3 = vld [vmem:[#allocation6 + $0x1d1] ss:$2 sm:$0xff] }
 0x1aa   : > { %v12741_v51 = vrot.slane %v2238_v59, 7  ;;  %1676 = vst.msk [vmem:[#allocation6 + $0x170] sm:$0xff] %vm1023_vm4, %v1672_v53  ;;  %v2418_v8 = vshrl.u32 %v12726_v47, 16  ;;  %v1954_v33 = vmax.f32 %v1915_v39, 0.0  ;;  %v2145_v37 = vmax.f32 %v2045_v21, %v2109_v56 }
 0x1ab   : > { %v12745_v28 = vrot.slane %v2310_v43, 7  ;;  %1989 = vst.msk [vmem:[#allocation6 + $0x1f0] sm:$0xff] %vm1023_vm4, %v1985_v5  ;;  %v1611_v15 = vpop.f32.mrf.mxu2  ;;  %v1924_v60 = vpop.f32.mrf.mxu3  ;;  %v2308_v46 = vrot.slane %v12574_v36, 4  ;;  %v2407_v59 = vrot.slane %v12719_v20, 4  ;;  %v2414_v19 = vor.u32 %v2412_v38, %v12739_v40 }
 0x1ac   : > { %v2243_v41 = vor.u32 %v2241_v50, %v12741_v51  ;;  %1051 = vst.msk [vmem:[#allocation6 + $0x78] sm:$0xff] %vm1023_vm4, %v1047_v13  ;;  %v1612_v58 = vadd.f32 %v12454_v10, %v1611_v15  ;;  %v3775_v11 = vpop.f32.mrf.mxu0  ;;  %v3918_v22 = vpop.f32.mrf.mxu1  ;;  %v1925_v31 = vadd.f32 %v12454_v10, %v1924_v60  ;;  %v2146_v5 = vmax.f32 %v2047_v57, %v2111_v35 }
 0x1ad   : > { %v2315_v24 = vor.u32 %v2313_v27, %v12745_v28  ;;  %1364 = vst.msk [vmem:[#allocation6 + $0xf8] sm:$0xff] %vm1023_vm4, %v1360_v7  ;;  %v3919_v32 = vadd.f32 %v3918_v22, %v3775_v11  ;;  %v2645_v10 = vand.u32 15, %v2555_v42  ;;  %v12766_v27 = vrot.slane %v2418_v8, 7 }
 0x1ae   : > { %v1645_v29 = vmax.f32 %v1612_v58, 0.0  ;;  %v1958_v39 = vmax.f32 %v1925_v31, 0.0  ;;  %v2244_v53 = vsel %vm12057_vm9, %v2236_v61, %v2243_v41  ;;  %v2421_v13 = vshll.u32 %v12726_v47, 16 }
 0x1af   : > { %2512 = vst.msk [vmem:[#allocation2 + $0x20] sm:$0xf] %vm657_vm5, %v2244_v53  ;;  %v2316_v36 = vsel %vm12057_vm9, %v2308_v46, %v2315_v24  ;;  %v2147_v7 = vmax.f32 %v2049_v55, %v2113_v3  ;;  %v2177_v45 = vpack.c.bf16 %v2145_v37, %v2145_v37  ;;  %v2415_v42 = vsel %vm12057_vm9, %v2407_v59, %v2414_v19 }
 0x1b0   : > { %v1673_v43 = vmax.f32 %v1641_v30, %v1645_v29  ;;  %v1986_v50 = vmax.f32 %v1954_v33, %v1958_v39  ;;  %2520 = vst.msk [vmem:[#allocation2 + $0x40] sm:$0xf] %vm657_vm5, %v2316_v36  ;;  %v2416_v15 = vrot.slane %v12739_v40, 4  ;;  %v2178_v60 = vpack.c.bf16 %v2146_v5, %v2146_v5 }
 0x1b1   : > { %v2423_v41 = vor.u32 %v2421_v13, %v12766_v27  ;;  %v2179_v58 = vpack.c.bf16 %v2147_v7, %v2147_v7  ;;  %vm3163_vm1 = vcmp.ne.s32.totalorder %v2645_v10, 15  ;;  %2531 = vst.msk [vmem:[#allocation2 + $0x6c] sm:$0xf] %vm657_vm5, %v2415_v42  ;;  %v2427_v35 = vshrl.u32 %v2177_v45, 16 }
 0x1b2   : > { %1677 = vst.msk [vmem:[#allocation6 + $0x178] sm:$0xff] %vm1023_vm4, %v1673_v43  ;;  %v2436_v31 = vshrl.u32 %v2178_v60, 16  ;;  %v2554_v37 = vadd.s32 64, %v12066_v48  ;;  %v12781_v46 = vsel %vm3163_vm1, 1.0, %v15274_v49  ;;  %v2430_v19 = vshll.u32 %v2177_v45, 16 }
 0x1b3   : > { %v2005_v38 = vld [vmem:[#allocation6 + $0x70] ss:$2 sm:$0xff]  ;;  %v2069_v21 = vld [vmem:[#allocation6 + $0x71] ss:$2 sm:$0xff]  ;;  %1990 = vst.msk [vmem:[#allocation6 + $0x1f8] sm:$0xff] %vm1023_vm4, %v1986_v50  ;;  %v4329_v56 = vpop.f32.mrf.mxu2  ;;  %v4619_v22 = vpop.f32.mrf.mxu3  ;;  %v2445_v55 = vshrl.u32 %v2179_v58, 16 }
 0x1b4   : > { %v2125_v8 = vmax.f32 %v2005_v38, %v2069_v21  ;;  %v2021_v47 = vld [vmem:[#allocation6 + $0xf0] ss:$2 sm:$0xff]  ;;  %v2085_v57 = vld [vmem:[#allocation6 + $0xf1] ss:$2 sm:$0xff]  ;;  %v4409_v30 = vadd.f32 %v4329_v56, %v3919_v32  ;;  %v2424_v32 = vsel %vm12057_vm9, %v2416_v15, %v2423_v41  ;;  %v2429_v59 = vrot.slane %v2427_v35, 7 }
 0x1b5   : > { %v2133_v11 = vmax.f32 %v2021_v47, %v2085_v57  ;;  %v2425_v5 = vrot.slane %v12766_v27, 4  ;;  %v2439_v43 = vshll.u32 %v2178_v60, 16  ;;  %v2317_v10 = vrot.slane %v12745_v28, 4  ;;  %2532 = vst.msk [vmem:[#allocation2 + $0x70] sm:$0xf] %vm657_vm5, %v2424_v32 }
 0x1b6   : > { %v2157_v61 = vpack.c.bf16 %v2125_v8, %v2125_v8  ;;  %v12777_v33 = vadd.f32 %v4619_v22, %v4409_v30  ;;  %v2438_v13 = vrot.slane %v2436_v31, 7  ;;  %v2245_v7 = vrot.slane %v12741_v51, 4  ;;  %v2035_v41 = vld [vmem:[#allocation6 + $0x160] ss:$2 sm:$0xff] }
 0x1b7   : > { %v2165_v24 = vpack.c.bf16 %v2133_v11, %v2133_v11  ;;  %v12789_v21 = vrot.slane %v2445_v55, 7  ;;  %v2448_v56 = vshll.u32 %v2179_v58, 16  ;;  %v2432_v15 = vor.u32 %v2430_v19, %v2429_v59  ;;  %v2099_v58 = vld [vmem:[#allocation6 + $0x161] ss:$2 sm:$0xff]  ;;  %v12800_v11 = vpop.f32.mrf.mxu1 }
 0x1b8   : > { %15278 = vst [vmem:[#allocation38_spill] sm:$0xff] %v12777_v33  ;;  %v2247_v40 = vshrl.u32 %v2157_v61, 16  ;;  %v2250_v53 = vshll.u32 %v2157_v61, 16  ;;  %v2638_v60 = vand.u32 15, %v2554_v37  ;;  %v2557_v28 = vadd.s32 88, %v12066_v48 }
 0x1b9   : > { %v2319_v3 = vshrl.u32 %v2165_v24, 16  ;;  %v2322_v29 = vshll.u32 %v2165_v24, 16  ;;  %v2434_v8 = vrot.slane %v2429_v59, 4  ;;  %v2443_v47 = vrot.slane %v2438_v13, 4  ;;  %15279 = vst [vmem:[#allocation39_spill] sm:$0xff] %v12800_v11 }
 0x1ba   : > { %v2249_v39 = vrot.slane %v2247_v40, 7  ;;  %v2441_v30 = vor.u32 %v2439_v43, %v2438_v13  ;;  %v2450_v35 = vor.u32 %v2448_v56, %v12789_v21  ;;  %v2037_v61 = vld [vmem:[#allocation6 + $0x170] ss:$2 sm:$0xff]  ;;  %v2101_v24 = vld [vmem:[#allocation6 + $0x171] ss:$2 sm:$0xff]  ;;  %v4083_v31 = vrot.slane %v12781_v46, 6 }
 0x1bb   : > { %v2321_v36 = vrot.slane %v2319_v3, 7  ;;  %v2659_v40 = vand.u32 15, %v2557_v28  ;;  %v2433_v37 = vsel %vm12057_vm9, %v2425_v5, %v2432_v15  ;;  %vm2970_vm8 = vcmp.ne.s32.totalorder %v2638_v60, 0 }
 0x1bc   : > { %v2252_v50 = vor.u32 %v2250_v53, %v2249_v39  ;;  %v2254_v38 = vrot.slane %v2249_v39, 4  ;;  %2533 = vst.msk [vmem:[#allocation2 + $0x74] sm:$0xf] %vm657_vm5, %v2433_v37  ;;  %v2141_v55 = vmax.f32 %v2037_v61, %v2101_v24  ;;  %v2442_v3 = vsel %vm12057_vm9, %v2434_v8, %v2441_v30 }
 0x1bd   : > { %v2324_v42 = vor.u32 %v2322_v29, %v2321_v36  ;;  %v2326_v45 = vrot.slane %v2321_v36, 4  ;;  %v15281_v29 = vrot.slane %v12597_v4, 6  ;;  %v2451_v59 = vsel %vm12057_vm9, %v2443_v47, %v2450_v35  ;;  %2534 = vst.msk [vmem:[#allocation2 + $0x78] sm:$0xf] %vm657_vm5, %v2442_v3 }
 0x1be   : > { %v2253_v27 = vsel %vm12057_vm9, %v2245_v7, %v2252_v50  ;;  %v2262_v51 = vsel %vm12057_vm9, %v2254_v38, %v12013_v9  ;;  %v12808_v9 = vpop.f32.mrf.mxu0  ;;  %v12827_v19 = vsel %vm2970_vm8, 1.0, %v15274_v49  ;;  %v12835_v4 = vsel %vm4065_vm13, %v12113_v18, %v4083_v31  ;;  %2535 = vst.msk [vmem:[#allocation2 + $0x7c] sm:$0xf] %vm657_vm5, %v2451_v59 }
 0x1bf   : > { %2513 = vst.msk [vmem:[#allocation2 + $0x24] sm:$0xf] %vm657_vm5, %v2253_v27  ;;  %v2325_v57 = vsel %vm12057_vm9, %v2317_v10, %v2324_v42  ;;  %v2334_v22 = vsel %vm12057_vm9, %v2326_v45, %v12026_v17  ;;  %v2140_v17 = vmax.f32 %v2035_v41, %v2099_v58  ;;  %v12821_v32 = vsel %vm4065_vm13, %v15281_v29, %v12113_v18  ;;  %v3923_v8 = vpop.f32.mrf.mxu1 }
 0x1c0   : > { %2514 = vst.msk [vmem:[#allocation2 + $0x28] sm:$0xf] %vm657_vm5, %v2262_v51  ;;  %v2556_v43 = vadd.s32 80, %v12066_v48  ;;  %vm12838_vm10 = vcmp.ne.s32.totalorder %v2659_v40, 15  ;;  %v2173_v56 = vpack.c.bf16 %v2141_v55, %v2141_v55  ;;  %v3608_v42 = vshrl.u32 %v12614_v14, 16 }
 0x1c1   : > { %2521 = vst.msk [vmem:[#allocation2 + $0x44] sm:$0xf] %vm657_vm5, %v2325_v57  ;;  %v2172_v38 = vpack.c.bf16 %v2140_v17, %v2140_v17  ;;  %v12853_v17 = vpop.f32.mrf.mxu2  ;;  %v12860_v55 = vsel %vm12838_vm10, 1.0, %v15274_v49  ;;  %v2559_v29 = vadd.s32 104, %v12066_v48 }
 0x1c2   : > { %15280 = vst [vmem:[#allocation40_spill] sm:$0xff] %v12808_v9  ;;  %v3610_v51 = vor.u32 %v3608_v42, %v12641_v6  ;;  %v2652_v35 = vand.u32 15, %v2556_v43  ;;  %v2391_v37 = vshrl.u32 %v2173_v56, 16  ;;  %v2403_v42 = vshll.u32 %v12693_v52, 16 }
 0x1c3   : > { %2522 = vst.msk [vmem:[#allocation2 + $0x48] sm:$0xf] %vm657_vm5, %v2334_v22  ;;  %v2382_v40 = vshrl.u32 %v2172_v38, 16  ;;  %v2385_v10 = vshll.u32 %v2172_v38, 16 }
 0x1c4   : > { %15282 = vst [vmem:[#allocation41_spill] sm:$0xff] %v12821_v32  ;;  %vm2972_vm11 = vcmp.ne.s32.totalorder %v2652_v35, 0 }
 0x1c5   : > { %15283 = vst [vmem:[#allocation42_spill] sm:$0xff] %v12835_v4 }
 0x1c6   : > { %v3354_v39 = vld [vmem:[#allocation2 + $0x20] sm:$0xff]   ;;  %15286 = vst [vmem:[#allocation43_spill] sm:$0xff] %v12853_v17 }
 0x1c7   : > { %v11480_v53 = vld [vmem:[#allocation2 + $0x20] sm:$0xff]   ;;  %v3386_v36 = vunpack.c.l.bf16 %v3354_v39  ;;  %v3387_v13 = vunpack.c.h.bf16 %v3354_v39  ;;  %v3356_v6 = vld [vmem:[#allocation2 + $0x28] sm:$0xff]  }
 0x1c8   : > { %v12829_v5 = vld [vmem:[#allocation2 + $0x20] sm:$0xff]  ;;  %v11351_v7 = vunpack.c.l.bf16 %v11480_v53  ;;  %v11352_v50 = vunpack.c.h.bf16 %v11480_v53  ;;  %v3388_v39 = vunpack.c.l.bf16 %v3356_v6  ;;  %v3389_v53 = vunpack.c.h.bf16 %v3356_v6  ;;  %v11481_v43 = vld [vmem:[#allocation2 + $0x28] sm:$0xff]  }
 0x1c9   : > { %v3612_v45 = vshll.u32 %v12829_v5, 16  ;;  %v3450_v15 = vmul.f32 %v12827_v19, %v3386_v36  ;;  %v3451_v27 = vmul.f32 %v12087_v62, %v3387_v13  ;;  %v4170_v30 = vmul.f32 %v12821_v32, %v3386_v36  ;;  %v12881_v38 = vld [vmem:[#allocation2 + $0x28] sm:$0xff] }
 0x1ca   : > { %v4511_v60 = vmul.f32 %v11351_v7, %v12612_v12  ;;  %v4512_v28 = vmul.f32 %v11352_v50, %v12087_v62  ;;  %v3780_v47 = vpop.f32.mrf.mxu0  ;;  %v4171_v41 = vmul.f32 %v12835_v4, %v3387_v13  ;;  %v4087_v36 = vrot.slane %v12860_v55, 6 }
 0x1cb   : > { %v3614_v57 = vrot.slane %v3612_v45, 1  ;;  %v3924_v14 = vadd.f32 %v3923_v8, %v3780_v47  ;;  %v3478_v58 = vpack.c.bf16 %v3451_v27, %v3450_v15  ;;  %v2384_v13 = vrot.slane %v2382_v40, 7  ;;  %v2051_v45 = vld [vmem:[#allocation6 + $0x1e0] ss:$2 sm:$0xff]  ;;  %v2115_v15 = vld [vmem:[#allocation6 + $0x1e1] ss:$2 sm:$0xff] }
 0x1cc   : > { %v4540_v22 = vpack.c.bf16 %v4512_v28, %v4511_v60  ;;  %v4199_v24 = vpack.c.bf16 %v4171_v41, %v4170_v30  ;;  %v2393_v7 = vrot.slane %v2391_v37, 7  ;;  %v2394_v50 = vshll.u32 %v2173_v56, 16 }
 0x1cd   : > { %v3615_v61 = vsel %vm3579_vm14, %v3610_v51, %v3614_v57  ;;  %10068 = vmatmul.msk.bf16.gmra.mxu1 %vm1023_vm4, %v3478_v58  ;;  %v12873_v27 = vsel %vm2972_vm11, 1.0, %v15274_v49  ;;  %v11355_v60 = vunpack.c.l.bf16 %v11481_v43  ;;  %v11356_v28 = vunpack.c.h.bf16 %v11481_v43 }
 0x1ce   : > { %10111 = vmatmul.msk.bf16.gmra.mxu3 %vm1023_vm4, %v4540_v22  ;;  %10047 = vmatmul.msk.bf16.gmra.mxu0 %vm1023_vm4, %v3615_v61  ;;  %v12863_v3 = vrot.slane %v4199_v24, 1  ;;  %v12887_v52 = vsel %vm4065_vm13, %v12113_v18, %v4087_v36  ;;  %v2558_v56 = vadd.s32 96, %v12066_v48  ;;  %v2380_v8 = vrot.slane %v12668_v0, 4 }
 0x1cf   : > { %15288 = vst [vmem:[#allocation45_spill] sm:$0xff] %v12887_v52  ;;  %v4173_v46 = vmul.f32 %v12887_v52, %v3389_v53  ;;  %v2387_v51 = vor.u32 %v2385_v10, %v2384_v13  ;;  %v2389_v30 = vrot.slane %v2384_v13, 4  ;;  %v2148_v41 = vmax.f32 %v2051_v45, %v2115_v15 }
 0x1d0   : > { %v4241_v59 = vsel %vm4232_vm15, %v12665_v1, %v12863_v3  ;;  %v12879_v1 = vsel %vm4065_vm13, %v4083_v31, %v12113_v18  ;;  %v2673_v31 = vand.u32 15, %v2559_v29  ;;  %v2396_v58 = vor.u32 %v2394_v50, %v2393_v7 }
 0x1d1   : > { %10089 = vmatmul.msk.bf16.gmra.mxu2 %vm1023_vm4, %v4241_v59  ;;  %15287 = vst [vmem:[#allocation44_spill] sm:$0xff] %v12879_v1  ;;  %v4172_v47 = vmul.f32 %v12879_v1, %v3388_v39  ;;  %v2398_v35 = vrot.slane %v2393_v7, 4  ;;  %v3452_v24 = vmul.f32 %v12873_v27, %v3388_v39  ;;  %v3453_v40 = vmul.f32 %v12087_v62, %v3389_v53 }
 0x1d2   : > { %v4513_v37 = vmul.f32 %v11355_v60, %v12827_v19  ;;  %v4514_v0 = vmul.f32 %v11356_v28, %v12087_v62  ;;  %v3616_v6 = vshrl.u32 %v12829_v5, 16  ;;  %v3620_v29 = vshll.u32 %v12881_v38, 16  ;;  %v11482_v28 = vld [vmem:[#allocation2 + $0x30] sm:$0xff]  }
 0x1d3   : > { %v4200_v59 = vpack.c.bf16 %v4173_v46, %v4172_v47  ;;  %v2405_v43 = vor.u32 %v2403_v42, %v12719_v20  ;;  %vm3167_vm12 = vcmp.ne.s32.totalorder %v2673_v31, 15  ;;  %v2180_v10 = vpack.c.bf16 %v2148_v41, %v2148_v41  ;;  %v3358_v42 = vld [vmem:[#allocation2 + $0x30] sm:$0xff]  }
 0x1d4   : > { %v3618_v13 = vor.u32 %v3616_v6, %v3614_v57  ;;  %v2666_v7 = vand.u32 15, %v2558_v56  ;;  %v2388_v39 = vsel %vm12057_vm9, %v2380_v8, %v2387_v51  ;;  %v4541_v53 = vpack.c.bf16 %v4514_v0, %v4513_v37  ;;  %v2053_v51 = vld [vmem:[#allocation6 + $0x1f0] ss:$2 sm:$0xff] }
 0x1d5   : > { %v4334_v22 = vpop.f32.mrf.mxu2  ;;  %v3622_v50 = vrot.slane %v3620_v29, 1  ;;  %v2397_v45 = vsel %vm12057_vm9, %v2389_v30, %v2396_v58  ;;  %2528 = vst.msk [vmem:[#allocation2 + $0x60] sm:$0xf] %vm657_vm5, %v2388_v39  ;;  %v2406_v5 = vsel %vm12057_vm9, %v2398_v35, %v2405_v43  ;;  %v4242_v15 = vrot.slane %v4200_v59, 1  ;;  %v2117_v30 = vld [vmem:[#allocation6 + $0x1f1] ss:$2 sm:$0xff] }
 0x1d6   : > { %v12893_v61 = vadd.f32 %v4334_v22, %v3924_v14  ;;  %v3479_v14 = vpack.c.bf16 %v3453_v40, %v3452_v24  ;;  %v12910_v20 = vsel %vm3167_vm12, 1.0, %v15274_v49  ;;  %2529 = vst.msk [vmem:[#allocation2 + $0x64] sm:$0xf] %vm657_vm5, %v2397_v45  ;;  %v2454_v60 = vshrl.u32 %v2180_v10, 16  ;;  %v12926_v35 = vld [vmem:[#allocation2 + $0x30] sm:$0xff] }
 0x1d7   : > { %v3623_v57 = vsel %vm3579_vm14, %v3618_v13, %v3622_v50  ;;  %2530 = vst.msk [vmem:[#allocation2 + $0x68] sm:$0xf] %vm657_vm5, %v2406_v5  ;;  %vm2974_vm1 = vcmp.ne.s32.totalorder %v2666_v7, 0  ;;  %v4091_v56 = vrot.slane %v12910_v20, 6  ;;  %v4243_v8 = vsel %vm4232_vm15, %v12863_v3, %v4242_v15 }
 0x1d8   : > { %15289 = vst [vmem:[#allocation46_spill] sm:$0xff] %v12893_v61  ;;  %v3390_v47 = vunpack.c.l.bf16 %v3358_v42  ;;  %v3391_v46 = vunpack.c.h.bf16 %v3358_v42  ;;  %v2561_v31 = vadd.s32 120, %v12066_v48  ;;  %v12924_v41 = vsel %vm2974_vm1, 1.0, %v15274_v49 }
 0x1d9   : > { %v11359_v58 = vunpack.c.l.bf16 %v11482_v28  ;;  %v11360_v22 = vunpack.c.h.bf16 %v11482_v28  ;;  %v12928_v24 = vrot.slane %v2454_v60, 7  ;;  %v2457_v40 = vshll.u32 %v2180_v10, 16 }
 0x1da   : > { %v12934_v3 = vsel %vm4065_vm13, %v4087_v36, %v12113_v18  ;;  %v12938_v37 = vsel %vm4065_vm13, %v12113_v18, %v4091_v56  ;;  %v2149_v0 = vmax.f32 %v2053_v51, %v2117_v30  ;;  %v3454_v6 = vmul.f32 %v12924_v41, %v3390_v47 }
 0x1db   : > { %15290 = vst [vmem:[#allocation47_spill] sm:$0xff] %v12934_v3  ;;  %v3455_v29 = vmul.f32 %v12087_v62, %v3391_v46  ;;  %v2687_v59 = vand.u32 15, %v2561_v31  ;;  %v4515_v43 = vmul.f32 %v11359_v58, %v12873_v27  ;;  %v3628_v13 = vshll.u32 %v12926_v35, 16 }
 0x1dc   : > { %15291 = vst [vmem:[#allocation48_spill] sm:$0xff] %v12938_v37  ;;  %v4174_v10 = vmul.f32 %v12934_v3, %v3390_v47  ;;  %v4175_v55 = vmul.f32 %v12938_v37, %v3391_v46  ;;  %v2452_v36 = vrot.slane %v12789_v21, 4  ;;  %v4516_v7 = vmul.f32 %v11360_v22, %v12087_v62  ;;  %v3360_v47 = vld [vmem:[#allocation2 + $0x38] sm:$0xff]  }
 0x1dd   : > { %10069 = vmatmul.msk.bf16.gmra.mxu1 %vm1023_vm4, %v3479_v14  ;;  %v2459_v14 = vor.u32 %v2457_v40, %v12928_v24  ;;  %v3624_v39 = vshrl.u32 %v12881_v38, 16  ;;  %v2560_v5 = vadd.s32 112, %v12066_v48  ;;  %vm3169_vm8 = vcmp.ne.s32.totalorder %v2687_v59, 15  ;;  %v11483_v22 = vld [vmem:[#allocation2 + $0x38] sm:$0xff]  }
 0x1de   : > { %10112 = vmatmul.msk.bf16.gmra.mxu3 %vm1023_vm4, %v4541_v53  ;;  %10048 = vmatmul.msk.bf16.gmra.mxu0 %vm1023_vm4, %v3623_v57  ;;  %v2181_v53 = vpack.c.bf16 %v2149_v0, %v2149_v0  ;;  %v4201_v20 = vpack.c.bf16 %v4175_v55, %v4174_v10  ;;  %v3480_v57 = vpack.c.bf16 %v3455_v29, %v3454_v6  ;;  %v3630_v60 = vrot.slane %v3628_v13, 1  ;;  %v12967_v29 = vld [vmem:[#allocation2 + $0x38] sm:$0xff] }
 0x1df   : > { %v3626_v45 = vor.u32 %v3624_v39, %v3622_v50  ;;  %v4542_v42 = vpack.c.bf16 %v4516_v7, %v4515_v43  ;;  %v2460_v28 = vsel %vm12057_vm9, %v2452_v36, %v2459_v14  ;;  %v12954_v21 = vsel %vm3169_vm8, 1.0, %v15274_v49 }
 0x1e0   : > { %2536 = vst.msk [vmem:[#allocation2 + $0x80] sm:$0xf] %vm657_vm5, %v2460_v28  ;;  %v2680_v50 = vand.u32 15, %v2560_v5  ;;  %v4244_v46 = vrot.slane %v4201_v20, 1  ;;  %v4095_v31 = vrot.slane %v12954_v21, 6  ;;  %v3392_v30 = vunpack.c.l.bf16 %v3360_v47 }
 0x1e1   : > { %10090 = vmatmul.msk.bf16.gmra.mxu2 %vm1023_vm4, %v4243_v8  ;;  %v2463_v8 = vshrl.u32 %v2181_v53, 16  ;;  %v3631_v38 = vsel %vm3579_vm14, %v3626_v45, %v3630_v60  ;;  %v3393_v58 = vunpack.c.h.bf16 %v3360_v47  ;;  %v2563_v40 = vadd.s32 136, %v12066_v48 }
 0x1e2   : > { %v4245_v51 = vsel %vm4232_vm15, %v4242_v15, %v4244_v46  ;;  %v2466_v6 = vshll.u32 %v2181_v53, 16  ;;  %vm2976_vm10 = vcmp.ne.s32.totalorder %v2680_v50, 0  ;;  %v12971_v59 = vsel %vm4065_vm13, %v4091_v56, %v12113_v18 }
 0x1e3   : > { %v12964_v0 = vrot.slane %v2463_v8, 7  ;;  %15292 = vst [vmem:[#allocation49_spill] sm:$0xff] %v12971_v59  ;;  %v11363_v43 = vunpack.c.l.bf16 %v11483_v22  ;;  %v11364_v13 = vunpack.c.h.bf16 %v11483_v22  ;;  %v12975_v15 = vsel %vm4065_vm13, %v12113_v18, %v4095_v31 }
 0x1e4   : > { %15293 = vst [vmem:[#allocation50_spill] sm:$0xff] %v12975_v15  ;;  %v12978_v10 = vsel %vm2976_vm10, 1.0, %v15274_v49  ;;  %v4176_v55 = vmul.f32 %v12971_v59, %v3392_v30  ;;  %v4177_v36 = vmul.f32 %v12975_v15, %v3393_v58  ;;  %v2461_v14 = vrot.slane %v12928_v24, 4 }
 0x1e5   : > { %v2468_v7 = vor.u32 %v2466_v6, %v12964_v0  ;;  %v3636_v56 = vshll.u32 %v12967_v29, 16  ;;  %v2701_v39 = vand.u32 15, %v2563_v40  ;;  %v3456_v53 = vmul.f32 %v12978_v10, %v3392_v30  ;;  %v3362_v30 = vld [vmem:[#allocation2 + $0x40] sm:$0xff]  }
 0x1e6   : > { %v3457_v45 = vmul.f32 %v12087_v62, %v3393_v58  ;;  %v4517_v5 = vmul.f32 %v11363_v43, %v12924_v41  ;;  %v4518_v20 = vmul.f32 %v11364_v13, %v12087_v62  ;;  %v2562_v21 = vadd.s32 128, %v12066_v48  ;;  %v11484_v43 = vld [vmem:[#allocation2 + $0x40] sm:$0xff]  }
 0x1e7   : > { %v3638_v28 = vrot.slane %v3636_v56, 1  ;;  %vm3171_vm11 = vcmp.ne.s32.totalorder %v2701_v39, 15  ;;  %v2469_v24 = vsel %vm12057_vm9, %v2461_v14, %v2468_v7  ;;  %v3394_v6 = vunpack.c.l.bf16 %v3362_v30  ;;  %v13004_v13 = vld [vmem:[#allocation2 + $0x40] sm:$0xff] }
 0x1e8   : > { %2537 = vst.msk [vmem:[#allocation2 + $0x84] sm:$0xf] %vm657_vm5, %v2469_v24  ;;  %v3481_v8 = vpack.c.bf16 %v3457_v45, %v3456_v53  ;;  %v2694_v58 = vand.u32 15, %v2562_v21  ;;  %v11367_v14 = vunpack.c.l.bf16 %v11484_v43  ;;  %v11368_v7 = vunpack.c.h.bf16 %v11484_v43  ;;  %v13019_v45 = vpop.f32.mrf.mxu0 }
 0x1e9   : > { %v13011_v56 = vsel %vm4065_vm13, %v4095_v31, %v12113_v18  ;;  %15297 = vst [vmem:[#allocation54_spill] sm:$0xff] %v13019_v45 }
 0x1ea   : > { %vm2978_vm5 = vcmp.ne.s32.totalorder %v2694_v58, 0  ;;  %15295 = vst [vmem:[#allocation52_spill] sm:$0xff] %v13011_v56  ;;  %v4178_v39 = vmul.f32 %v13011_v56, %v3394_v6  ;;  %v4519_v24 = vmul.f32 %v11367_v14, %v12978_v10  ;;  %v4520_v21 = vmul.f32 %v11368_v7, %v12087_v62 }
 0x1ed   : > { %10070 = vmatmul.msk.bf16.gmra.mxu1 %vm1023_vm4, %v3480_v57  ;;  %v4202_v57 = vpack.c.bf16 %v4177_v36, %v4176_v55  ;;  %v2565_v55 = vadd.s32 152, %v12066_v48  ;;  %v13007_v36 = vpop.f32.mrf.mxu1 }
 0x1ee   : > { %10113 = vmatmul.msk.bf16.gmra.mxu3 %vm1023_vm4, %v4542_v42  ;;  %10049 = vmatmul.msk.bf16.gmra.mxu0 %vm1023_vm4, %v3631_v38  ;;  %v3632_v42 = vshrl.u32 %v12926_v35, 16  ;;  %v4543_v38 = vpack.c.bf16 %v4518_v20, %v4517_v5  ;;  %15294 = vst [vmem:[#allocation51_spill] sm:$0xff] %v13007_v36  ;;  %v3644_v5 = vshll.u32 %v13004_v13, 16  ;;  %v13023_v20 = vsel %vm2978_vm5, 1.0, %v15274_v49 }
 0x1ef   : > { %v4246_v47 = vrot.slane %v4202_v57, 1  ;;  %15298 = vst [vmem:[#allocation55_spill] sm:$0xff] %v13023_v20  ;;  %v2715_v57 = vand.u32 15, %v2565_v55 }
 0x1f0   : > { %v3634_v50 = vor.u32 %v3632_v42, %v3630_v60  ;;  %v3395_v60 = vunpack.c.h.bf16 %v3362_v30  ;;  %v3458_v42 = vmul.f32 %v13023_v20, %v3394_v6  ;;  %v4544_v30 = vpack.c.bf16 %v4520_v21, %v4519_v24 }
 0x1f1   : > { %10091 = vmatmul.msk.bf16.gmra.mxu2 %vm1023_vm4, %v4245_v51  ;;  %v12995_v51 = vsel %vm3171_vm11, 1.0, %v15274_v49  ;;  %v4247_v40 = vsel %vm4232_vm15, %v4244_v46, %v4246_v47  ;;  %vm3173_vm12 = vcmp.ne.s32.totalorder %v2715_v57, 15  ;;  %v11485_v57 = vld [vmem:[#allocation2 + $0x48] sm:$0xff]  }
 0x1f2   : > { %v3639_v35 = vsel %vm3579_vm14, %v3634_v50, %v3638_v28  ;;  %v4099_v22 = vrot.slane %v12995_v51, 6  ;;  %v3459_v31 = vmul.f32 %v12087_v62, %v3395_v60  ;;  %v3646_v50 = vrot.slane %v3644_v5, 1 }
 0x1f3   : > { %v2564_v51 = vadd.s32 144, %v12066_v48  ;;  %v9967_v7 = vsel %vm3173_vm12, 1.0, %v15274_v49  ;;  %v11371_v24 = vunpack.c.l.bf16 %v11485_v57  ;;  %v11372_v21 = vunpack.c.h.bf16 %v11485_v57 }
 0x1f4   : > { %v13015_v46 = vsel %vm4065_vm13, %v12113_v18, %v4099_v22 }
 0x1f5   : > { %15296 = vst [vmem:[#allocation53_spill] sm:$0xff] %v13015_v46  ;;  %v4179_v53 = vmul.f32 %v13015_v46, %v3395_v60  ;;  %v3928_v43 = vpop.f32.mrf.mxu1  ;;  %v3364_v60 = vld [vmem:[#allocation2 + $0x48] sm:$0xff]  }
 0x1f6   : > { %v3397_v5 = vunpack.c.h.bf16 %v3364_v60 }
 0x1fd   : > { %10071 = vmatmul.msk.bf16.gmra.mxu1 %vm1023_vm4, %v3481_v8  ;;  %v4203_v8 = vpack.c.bf16 %v4179_v53, %v4178_v39  ;;  %v13036_v39 = vpop.f32.mrf.mxu2  ;;  %v3396_v53 = vunpack.c.l.bf16 %v3364_v60  ;;  %v4522_v60 = vmul.f32 %v11372_v21, %v12087_v62  ;;  %v2569_v21 = vadd.s32 184, %v12066_v48 }
 0x1fe   : > { %10114 = vmatmul.msk.bf16.gmra.mxu3 %vm1023_vm4, %v4543_v38  ;;  %10050 = vmatmul.msk.bf16.gmra.mxu0 %vm1023_vm4, %v3639_v35  ;;  %v3640_v38 = vshrl.u32 %v12967_v29, 16  ;;  %v3482_v35 = vpack.c.bf16 %v3459_v31, %v3458_v42  ;;  %v2708_v29 = vand.u32 15, %v2564_v51  ;;  %15299 = vst [vmem:[#allocation56_spill] sm:$0xff] %v13036_v39  ;;  %v4103_v42 = vrot.slane %v9967_v7, 6 }
 0x1ff   : > { %v2567_v31 = vadd.s32 168, %v12066_v48 }
 0x200   : > { %v3642_v58 = vor.u32 %v3640_v38, %v3638_v28  ;;  %vm2980_vm1 = vcmp.ne.s32.totalorder %v2708_v29, 0  ;;  %v13043_v38 = vsel %vm4065_vm13, %v4099_v22, %v12113_v18  ;;  %v13047_v51 = vsel %vm4065_vm13, %v12113_v18, %v4103_v42 }
 0x201   : > { %10092 = vmatmul.msk.bf16.gmra.mxu2 %vm1023_vm4, %v4247_v40  ;;  %v4248_v40 = vrot.slane %v4203_v8, 1  ;;  %v11164_v8 = vld [vmem:[#allocation2 + $0x48] sm:$0xff]  ;;  %15300 = vst [vmem:[#allocation57_spill] sm:$0xff] %v13043_v38  ;;  %v4521_v22 = vmul.f32 %v11371_v24, %v13023_v20  ;;  %v3648_v29 = vshrl.u32 %v13004_v13, 16  ;;  %v3366_v24 = vld [vmem:[#allocation2 + $0x50] sm:$0xff]  }
 0x202   : > { %v3647_v6 = vsel %vm3579_vm14, %v3642_v58, %v3646_v50  ;;  %15301 = vst [vmem:[#allocation58_spill] sm:$0xff] %v13047_v51  ;;  %v2729_v58 = vand.u32 15, %v2567_v31  ;;  %v3652_v7 = vshll.u32 %v11164_v8, 16 }
 0x203   : > { %v4249_v28 = vsel %vm4232_vm15, %v4246_v47, %v4248_v40  ;;  %v4180_v47 = vmul.f32 %v13043_v38, %v3396_v53  ;;  %v3650_v39 = vor.u32 %v3648_v29, %v3646_v50  ;;  %v4545_v36 = vpack.c.bf16 %v4522_v60, %v4521_v22 }
 0x204   : > { %vm3175_vm8 = vcmp.ne.s32.totalorder %v2729_v58, 15 }
 0x205   : > { %v9968_v61 = vsel %vm3175_vm8, 1.0, %v15274_v49 }
 0x206   : > { %v4107_v50 = vrot.slane %v9968_v61, 6 }
 0x208   : > { %v13079_v61 = vsel %vm4065_vm13, %v12113_v18, %v4107_v50 }
 0x209   : > { %15306 = vst [vmem:[#allocation63_spill] sm:$0xff] %v13079_v61 }
 0x20b   : > { %v3785_v55 = vpop.f32.mrf.mxu0 }
 0x20c   : > { %v3929_v14 = vadd.f32 %v3928_v43, %v3785_v55  ;;  %v3461_v55 = vmul.f32 %v12087_v62, %v3397_v5 }
 0x20d   : > { %10072 = vmatmul.msk.bf16.gmra.mxu1 %vm1023_vm4, %v3482_v35  ;;  %v4181_v35 = vmul.f32 %v13047_v51, %v3397_v5 }
 0x20e   : > { %10115 = vmatmul.msk.bf16.gmra.mxu3 %vm1023_vm4, %v4544_v30  ;;  %10051 = vmatmul.msk.bf16.gmra.mxu0 %vm1023_vm4, %v3647_v6  ;;  %v13052_v30 = vsel %vm2980_vm1, 1.0, %v15274_v49  ;;  %v2566_v6 = vadd.s32 160, %v12066_v48 }
 0x20f   : > { %15302 = vst [vmem:[#allocation59_spill] sm:$0xff] %v13052_v30  ;;  %v3460_v43 = vmul.f32 %v13052_v30, %v3396_v53  ;;  %v4204_v57 = vpack.c.bf16 %v4181_v35, %v4180_v47  ;;  %v3654_v53 = vrot.slane %v3652_v7, 1  ;;  %v3398_v35 = vunpack.c.l.bf16 %v3366_v24 }
 0x210   : > { %v2722_v45 = vand.u32 15, %v2566_v6  ;;  %v13075_v6 = vsel %vm4065_vm13, %v4103_v42, %v12113_v18 }
 0x211   : > { %10093 = vmatmul.msk.bf16.gmra.mxu2 %vm1023_vm4, %v4249_v28  ;;  %v3483_v31 = vpack.c.bf16 %v3461_v55, %v3460_v43  ;;  %v4250_v5 = vrot.slane %v4204_v57, 1  ;;  %v3655_v13 = vsel %vm3579_vm14, %v3650_v39, %v3654_v53  ;;  %v3399_v43 = vunpack.c.h.bf16 %v3366_v24  ;;  %v11165_v39 = vld [vmem:[#allocation2 + $0x50] sm:$0xff]  ;;  %15305 = vst [vmem:[#allocation62_spill] sm:$0xff] %v13075_v6 }
 0x212   : > { %vm2982_vm10 = vcmp.ne.s32.totalorder %v2722_v45, 0  ;;  %v2743_v45 = vand.u32 15, %v2569_v21  ;;  %v4182_v7 = vmul.f32 %v13075_v6, %v3398_v35  ;;  %v3656_v57 = vshrl.u32 %v11164_v8, 16 }
 0x213   : > { %v4251_v47 = vsel %vm4232_vm15, %v4248_v40, %v4250_v5  ;;  %v13071_v58 = vsel %vm2982_vm10, 1.0, %v15274_v49  ;;  %v13081_v40 = vpop.f32.mrf.mxu3  ;;  %v3463_v60 = vmul.f32 %v12087_v62, %v3399_v43  ;;  %v2568_v24 = vadd.s32 176, %v12066_v48 }
 0x214   : > { %v4339_v28 = vpop.f32.mrf.mxu2  ;;  %15304 = vst [vmem:[#allocation61_spill] sm:$0xff] %v13071_v58  ;;  %v3462_v22 = vmul.f32 %v13071_v58, %v3398_v35  ;;  %vm3177_vm11 = vcmp.ne.s32.totalorder %v2743_v45, 15  ;;  %v13100_v45 = vpop.f32.mrf.mxu1 }
 0x215   : > { %v13060_v44 = vadd.f32 %v4339_v28, %v3929_v14  ;;  %v11486_v14 = vld [vmem:[#allocation2 + $0x50] sm:$0xff]   ;;  %15307 = vst [vmem:[#allocation64_spill] sm:$0xff] %v13081_v40  ;;  %v4183_v28 = vmul.f32 %v13079_v61, %v3399_v43  ;;  %v13091_v21 = vsel %vm3177_vm11, 1.0, %v15274_v49  ;;  %v2736_v35 = vand.u32 15, %v2568_v24  ;;  %v3368_v43 = vld [vmem:[#allocation2 + $0x58] sm:$0xff]  }
 0x216   : > { %v11376_v55 = vunpack.c.h.bf16 %v11486_v14  ;;  %15309 = vst [vmem:[#allocation66_spill] sm:$0xff] %v13100_v45 }
 0x217   : > { %15303 = vst [vmem:[#allocation60_spill] sm:$0xff] %v13060_v44  ;;  %vm2984_vm5 = vcmp.ne.s32.totalorder %v2736_v35, 0 }
 0x218   : > { %v4524_v42 = vmul.f32 %v11376_v55, %v12087_v62 }
 0x21c   : > { %v3933_v45 = vpop.f32.mrf.mxu1  ;;  %v13167_v11 = vpop.f32.mrf.mxu2 }
 0x21d   : > { %10073 = vmatmul.msk.bf16.gmra.mxu1 %vm1023_vm4, %v3483_v31  ;;  %v3660_v31 = vshll.u32 %v11165_v39, 16  ;;  %15320 = vst [vmem:[#allocation77_spill] sm:$0xff] %v13167_v11 }
 0x21e   : > { %10116 = vmatmul.msk.bf16.gmra.mxu3 %vm1023_vm4, %v4545_v36  ;;  %10052 = vmatmul.msk.bf16.gmra.mxu0 %vm1023_vm4, %v3655_v13  ;;  %v11375_v36 = vunpack.c.l.bf16 %v11486_v14  ;;  %v3658_v13 = vor.u32 %v3656_v57, %v3654_v53  ;;  %v4205_v14 = vpack.c.bf16 %v4183_v28, %v4182_v7  ;;  %v4111_v53 = vrot.slane %v13091_v21, 6  ;;  %v11487_v7 = vld [vmem:[#allocation2 + $0x58] sm:$0xff]  }
 0x21f   : > { %v3662_v40 = vrot.slane %v3660_v31, 1  ;;  %v13108_v28 = vsel %vm4065_vm13, %v4107_v50, %v12113_v18  ;;  %v2571_v57 = vadd.s32 200, %v12066_v48  ;;  %v11379_v31 = vunpack.c.l.bf16 %v11487_v7 }
 0x220   : > { %v4523_v29 = vmul.f32 %v11375_v36, %v13052_v30  ;;  %v13093_v36 = vpop.f32.mrf.mxu3  ;;  %v4252_v55 = vrot.slane %v4205_v14, 1  ;;  %15310 = vst [vmem:[#allocation67_spill] sm:$0xff] %v13108_v28 }
 0x221   : > { %10094 = vmatmul.msk.bf16.gmra.mxu2 %vm1023_vm4, %v4251_v47  ;;  %v3484_v47 = vpack.c.bf16 %v3463_v60, %v3462_v22  ;;  %15308 = vst [vmem:[#allocation65_spill] sm:$0xff] %v13093_v36  ;;  %v3663_v8 = vsel %vm3579_vm14, %v3658_v13, %v3662_v40  ;;  %v3400_v60 = vunpack.c.l.bf16 %v3368_v43  ;;  %v13116_v13 = vsel %vm2984_vm5, 1.0, %v15274_v49 }
 0x222   : > { %v4546_v44 = vpack.c.bf16 %v4524_v42, %v4523_v29  ;;  %v4253_v22 = vsel %vm4232_vm15, %v4250_v5, %v4252_v55  ;;  %v3401_v29 = vunpack.c.h.bf16 %v3368_v43  ;;  %v13112_v42 = vsel %vm4065_vm13, %v12113_v18, %v4111_v53  ;;  %15312 = vst [vmem:[#allocation69_spill] sm:$0xff] %v13116_v13 }
 0x223   : > { %15311 = vst [vmem:[#allocation68_spill] sm:$0xff] %v13112_v42  ;;  %v11380_v5 = vunpack.c.h.bf16 %v11487_v7  ;;  %v4184_v24 = vmul.f32 %v13108_v28, %v3400_v60  ;;  %v3464_v35 = vmul.f32 %v13116_v13, %v3400_v60 }
 0x224   : > { %v4185_v14 = vmul.f32 %v13112_v42, %v3401_v29  ;;  %v3465_v43 = vmul.f32 %v12087_v62, %v3401_v29  ;;  %v3370_v29 = vld [vmem:[#allocation2 + $0x60] sm:$0xff]  }
 0x225   : > { %v4526_v7 = vmul.f32 %v11380_v5, %v12087_v62 }
 0x226   : > { %v4206_v30 = vpack.c.bf16 %v4185_v14, %v4184_v24  ;;  %v3485_v28 = vpack.c.bf16 %v3465_v43, %v3464_v35  ;;  %v3403_v14 = vunpack.c.h.bf16 %v3370_v29 }
 0x228   : > { %v13121_v50 = vpop.f32.mrf.mxu3  ;;  %v4254_v33 = vrot.slane %v4206_v30, 1  ;;  %v3402_v30 = vunpack.c.l.bf16 %v3370_v29 }
 0x229   : > { %15313 = vst [vmem:[#allocation70_spill] sm:$0xff] %v13121_v50 }
 0x22a   : > { %v4255_v24 = vsel %vm4232_vm15, %v4252_v55, %v4254_v33 }
 0x22d   : > { %10074 = vmatmul.msk.bf16.gmra.mxu1 %vm1023_vm4, %v3484_v47  ;;  %v2757_v47 = vand.u32 15, %v2571_v57  ;;  %v2570_v57 = vadd.s32 192, %v12066_v48 }
 0x22e   : > { %10117 = vmatmul.msk.bf16.gmra.mxu3 %vm1023_vm4, %v4546_v44  ;;  %10053 = vmatmul.msk.bf16.gmra.mxu0 %vm1023_vm4, %v3663_v8  ;;  %v13104_v44 = vld [vmem:[#allocation2 + $0x58] sm:$0xff]  ;;  %v3664_v8 = vshrl.u32 %v11165_v39, 16 }
 0x22f   : > { %v3668_v21 = vshll.u32 %v13104_v44, 16  ;;  %vm3179_vm12 = vcmp.ne.s32.totalorder %v2757_v47, 15  ;;  %v2750_v5 = vand.u32 15, %v2570_v57  ;;  %v13145_v47 = vsel %vm4065_vm13, %v4111_v53, %v12113_v18 }
 0x230   : > { %v3666_v17 = vor.u32 %v3664_v8, %v3662_v40  ;;  %v13129_v39 = vsel %vm3179_vm12, 1.0, %v15274_v49  ;;  %15315 = vst [vmem:[#allocation72_spill] sm:$0xff] %v13145_v47  ;;  %v13147_v8 = vpop.f32.mrf.mxu0  ;;  %v3672_v53 = vshrl.u32 %v13104_v44, 16 }
 0x231   : > { %10095 = vmatmul.msk.bf16.gmra.mxu2 %vm1023_vm4, %v4253_v22  ;;  %v4525_v22 = vmul.f32 %v11379_v31, %v13071_v58  ;;  %v3670_v36 = vrot.slane %v3668_v21, 1  ;;  %v13134_v31 = vpop.f32.mrf.mxu3  ;;  %v4115_v40 = vrot.slane %v13129_v39, 6  ;;  %v11488_v21 = vld [vmem:[#allocation2 + $0x60] sm:$0xff]   ;;  %15316 = vst [vmem:[#allocation73_spill] sm:$0xff] %v13147_v8  ;;  %vm2986_vm1 = vcmp.ne.s32.totalorder %v2750_v5, 0 }
 0x232   : > { %15314 = vst [vmem:[#allocation71_spill] sm:$0xff] %v13134_v31  ;;  %v11383_v35 = vunpack.c.l.bf16 %v11488_v21  ;;  %v11384_v43 = vunpack.c.h.bf16 %v11488_v21  ;;  %v3467_v5 = vmul.f32 %v12087_v62, %v3403_v14 }
 0x233   : > { %v4547_v42 = vpack.c.bf16 %v4526_v7, %v4525_v22  ;;  %v3671_v60 = vsel %vm3579_vm14, %v3666_v17, %v3670_v36  ;;  %v3935_v17 = vpop.f32.mrf.mxu1  ;;  %v13151_v55 = vsel %vm4065_vm13, %v12113_v18, %v4115_v40  ;;  %v4186_v22 = vmul.f32 %v13145_v47, %v3402_v30 }
 0x234   : > { %15317 = vst [vmem:[#allocation74_spill] sm:$0xff] %v13151_v55  ;;  %v4187_v7 = vmul.f32 %v13151_v55, %v3403_v14  ;;  %v4528_v21 = vmul.f32 %v11384_v43, %v12087_v62  ;;  %v3674_v44 = vor.u32 %v3672_v53, %v3670_v36 }
 0x236   : > { %v4207_v58 = vpack.c.bf16 %v4187_v7, %v4186_v22  ;;  %v3372_v22 = vld [vmem:[#allocation2 + $0x68] sm:$0xff]  }
 0x238   : > { %v4256_v14 = vrot.slane %v4207_v58, 1  ;;  %v3404_v58 = vunpack.c.l.bf16 %v3372_v22 }
 0x239   : > { %v13164_v8 = vpop.f32.mrf.mxu3 }
 0x23a   : > { %15319 = vst [vmem:[#allocation76_spill] sm:$0xff] %v13164_v8  ;;  %v4257_v36 = vsel %vm4232_vm15, %v4254_v33, %v4256_v14 }
 0x23d   : > { %10075 = vmatmul.msk.bf16.gmra.mxu1 %vm1023_vm4, %v3485_v28  ;;  %v13140_v28 = vld [vmem:[#allocation2 + $0x60] sm:$0xff] }
 0x23e   : > { %10118 = vmatmul.msk.bf16.gmra.mxu3 %vm1023_vm4, %v4547_v42  ;;  %10054 = vmatmul.msk.bf16.gmra.mxu0 %vm1023_vm4, %v3671_v60  ;;  %v2573_v42 = vadd.s32 216, %v12066_v48  ;;  %v3676_v57 = vshll.u32 %v13140_v28, 16  ;;  %v13157_v60 = vsel %vm2986_vm1, 1.0, %v15274_v49 }
 0x23f   : > { %15318 = vst [vmem:[#allocation75_spill] sm:$0xff] %v13157_v60  ;;  %v3466_v29 = vmul.f32 %v13157_v60, %v3402_v30 }
 0x240   : > { %v2771_v39 = vand.u32 15, %v2573_v42  ;;  %v3678_v31 = vrot.slane %v3676_v57, 1  ;;  %v2572_v42 = vadd.s32 208, %v12066_v48 }
 0x241   : > { %10096 = vmatmul.msk.bf16.gmra.mxu2 %vm1023_vm4, %v4255_v24  ;;  %v4527_v24 = vmul.f32 %v11383_v35, %v13116_v13  ;;  %v3486_v47 = vpack.c.bf16 %v3467_v5, %v3466_v29 }
 0x242   : > { %vm3181_vm8 = vcmp.ne.s32.totalorder %v2771_v39, 15  ;;  %v3679_v43 = vsel %vm3579_vm14, %v3674_v44, %v3678_v31  ;;  %v2764_v7 = vand.u32 15, %v2572_v42 }
 0x243   : > { %v4548_v20 = vpack.c.bf16 %v4528_v21, %v4527_v24  ;;  %v13170_v35 = vsel %vm3181_vm8, 1.0, %v15274_v49  ;;  %v13182_v24 = vld [vmem:[#allocation2 + $0x68] sm:$0xff]  ;;  %v13186_v21 = vsel %vm4065_vm13, %v4115_v40, %v12113_v18  ;;  %v3680_v40 = vshrl.u32 %v13140_v28, 16 }
 0x244   : > { %v15172_v57 = vrot.slane %v13170_v35, 6  ;;  %vm2988_vm10 = vcmp.ne.s32.totalorder %v2764_v7, 0  ;;  %15322 = vst [vmem:[#allocation79_spill] sm:$0xff] %v13186_v21 }
 0x246   : > { %v13192_v33 = vsel %vm4065_vm13, %v12113_v18, %v15172_v57 }
 0x247   : > { %15323 = vst [vmem:[#allocation80_spill] sm:$0xff] %v13192_v33 }
 0x24a   : > { %v3938_v55 = vpop.f32.mrf.mxu1 }
 0x24b   : > { %v3790_v50 = vpop.f32.mrf.mxu0 }
 0x24c   : > { %v3934_v30 = vadd.f32 %v3933_v45, %v3790_v50  ;;  %v3405_v45 = vunpack.c.h.bf16 %v3372_v22  ;;  %v11489_v50 = vld [vmem:[#allocation2 + $0x68] sm:$0xff]  }
 0x24d   : > { %10076 = vmatmul.msk.bf16.gmra.mxu1 %vm1023_vm4, %v3486_v47  ;;  %v2575_v47 = vadd.s32 232, %v12066_v48  ;;  %v11387_v29 = vunpack.c.l.bf16 %v11489_v50  ;;  %v11388_v5 = vunpack.c.h.bf16 %v11489_v50 }
 0x24e   : > { %10119 = vmatmul.msk.bf16.gmra.mxu3 %vm1023_vm4, %v4548_v20  ;;  %10055 = vmatmul.msk.bf16.gmra.mxu0 %vm1023_vm4, %v3679_v43  ;;  %v4188_v43 = vmul.f32 %v13186_v21, %v3404_v58  ;;  %v4189_v22 = vmul.f32 %v13192_v33, %v3405_v45 }
 0x24f   : > { %v2785_v50 = vand.u32 15, %v2575_v47  ;;  %v4529_v57 = vmul.f32 %v11387_v29, %v13157_v60 }
 0x251   : > { %v13178_v39 = vpop.f32.mrf.mxu3  ;;  %10097 = vmatmul.msk.bf16.gmra.mxu2 %vm1023_vm4, %v4257_v36  ;;  %v13199_v36 = vsel %vm2988_vm10, 1.0, %v15274_v49  ;;  %vm3183_vm11 = vcmp.ne.s32.totalorder %v2785_v50, 15 }
 0x252   : > { %15321 = vst [vmem:[#allocation78_spill] sm:$0xff] %v13178_v39  ;;  %v3940_v20 = vpop.f32.mrf.mxu1  ;;  %v3468_v13 = vmul.f32 %v13199_v36, %v3404_v58  ;;  %v3469_v39 = vmul.f32 %v12087_v62, %v3405_v45  ;;  %v13213_v29 = vsel %vm3183_vm11, 1.0, %v15274_v49 }
 0x253   : > { %v3792_v53 = vpop.f32.mrf.mxu0  ;;  %15325 = vst [vmem:[#allocation82_spill] sm:$0xff] %v13199_v36 }
 0x254   : > { %v3936_v42 = vadd.f32 %v3935_v17, %v3792_v53  ;;  %v4344_v44 = vpop.f32.mrf.mxu2  ;;  %v4530_v17 = vmul.f32 %v11388_v5, %v12087_v62  ;;  %v3684_v53 = vshll.u32 %v13182_v24, 16  ;;  %v3487_v47 = vpack.c.bf16 %v3469_v39, %v3468_v13  ;;  %v3374_v13 = vld [vmem:[#allocation2 + $0x70] sm:$0xff]  }
 0x255   : > { %v13196_v7 = vadd.f32 %v4344_v44, %v3934_v30  ;;  %v4208_v30 = vpack.c.bf16 %v4189_v22, %v4188_v43  ;;  %v3682_v44 = vor.u32 %v3680_v40, %v3678_v31  ;;  %v2577_v39 = vadd.s32 248, %v12066_v48 }
 0x256   : > { %v4549_v8 = vpack.c.bf16 %v4530_v17, %v4529_v57  ;;  %v3686_v58 = vrot.slane %v3684_v53, 1  ;;  %v11490_v57 = vld [vmem:[#allocation2 + $0x70] sm:$0xff]   ;;  %v3406_v50 = vunpack.c.l.bf16 %v3374_v13 }
 0x257   : > { %15324 = vst [vmem:[#allocation81_spill] sm:$0xff] %v13196_v7  ;;  %v2574_v7 = vadd.s32 224, %v12066_v48  ;;  %v13210_v9 = vrot.slane %v4208_v30, 1  ;;  %v13228_v17 = vld [vmem:[#allocation2 + $0x70] sm:$0xff]  ;;  %v11392_v30 = vunpack.c.h.bf16 %v11490_v57 }
 0x258   : > { %v3687_v31 = vsel %vm3579_vm14, %v3682_v44, %v3686_v58  ;;  %v15329_v44 = vrot.slane %v13170_v35, 6  ;;  %v3692_v35 = vshll.u32 %v13228_v17, 16 }
 0x259   : > { %v13207_v21 = vpop.f32.mrf.mxu3  ;;  %v2778_v43 = vand.u32 15, %v2574_v7  ;;  %v4259_v22 = vsel %vm4232_vm15, %v4256_v14, %v13210_v9  ;;  %v11391_v7 = vunpack.c.l.bf16 %v11490_v57 }
 0x25a   : > { %15326 = vst [vmem:[#allocation83_spill] sm:$0xff] %v13207_v21  ;;  %v3943_v33 = vpop.f32.mrf.mxu1 }
 0x25b   : > { %v3795_v28 = vpop.f32.mrf.mxu0  ;;  %vm2990_vm5 = vcmp.ne.s32.totalorder %v2778_v43, 0  ;;  %v4531_v57 = vmul.f32 %v11391_v7, %v13199_v36 }
 0x25c   : > { %v3939_v11 = vadd.f32 %v3938_v55, %v3795_v28  ;;  %v4346_v45 = vpop.f32.mrf.mxu2  ;;  %v4123_v55 = vrot.slane %v13213_v29, 6  ;;  %v13234_v28 = vsel %vm4065_vm13, %v15329_v44, %v12113_v18 }
 0x25d   : > { %v13215_v5 = vadd.f32 %v4346_v45, %v3936_v42  ;;  %10077 = vmatmul.msk.bf16.gmra.mxu1 %vm1023_vm4, %v3487_v47  ;;  %15330 = vst [vmem:[#allocation86_spill] sm:$0xff] %v13234_v28  ;;  %v2799_v47 = vand.u32 15, %v2577_v39  ;;  %v3688_v39 = vshrl.u32 %v13182_v24, 16 }
 0x25e   : > { %10120 = vmatmul.msk.bf16.gmra.mxu3 %vm1023_vm4, %v4549_v8  ;;  %10056 = vmatmul.msk.bf16.gmra.mxu0 %vm1023_vm4, %v3687_v31  ;;  %v3407_v8 = vunpack.c.h.bf16 %v3374_v13  ;;  %v13238_v14 = vsel %vm4065_vm13, %v12113_v18, %v4123_v55  ;;  %v13241_v31 = vsel %vm2990_vm5, 1.0, %v15274_v49 }
 0x25f   : > { %15327 = vst [vmem:[#allocation84_spill] sm:$0xff] %v13215_v5  ;;  %v3470_v60 = vmul.f32 %v13241_v31, %v3406_v50  ;;  %vm3185_vm12 = vcmp.ne.s32.totalorder %v2799_v47, 15 }
 0x260   : > { %15331 = vst [vmem:[#allocation87_spill] sm:$0xff] %v13238_v14  ;;  %v3471_v13 = vmul.f32 %v12087_v62, %v3407_v8  ;;  %v4191_v44 = vmul.f32 %v13238_v14, %v3407_v8  ;;  %v9973_v36 = vsel %vm3185_vm12, 1.0, %v15274_v49  ;;  %v11192_v8 = vld [vmem:[%s15240_s30 + $0x28] sm:$0xff] }
 0x261   : > { %v13225_v42 = vpop.f32.mrf.mxu3  ;;  %10098 = vmatmul.msk.bf16.gmra.mxu2 %vm1023_vm4, %v4259_v22  ;;  %15332 = vst [vmem:[#allocation88_spill] sm:$0xff] %v13241_v31  ;;  %v4190_v22 = vmul.f32 %v13234_v28, %v3406_v50  ;;  %5355 = vmatpush.bf16.msra.mxu1 %v11192_v8 }
 0x262   : > { %15328 = vst [vmem:[#allocation85_spill] sm:$0xff] %v13225_v42  ;;  %v3945_v40 = vpop.f32.mrf.mxu1  ;;  %v3488_v50 = vpack.c.bf16 %v3471_v13, %v3470_v60 }
 0x263   : > { %v3797_v53 = vpop.f32.mrf.mxu0  ;;  %v4209_v7 = vpack.c.bf16 %v4191_v44, %v4190_v22  ;;  %v3376_v22 = vld [vmem:[#allocation2 + $0x78] sm:$0xff]   ;;  %v13265_v44 = vrot.slane %v9973_v36, 6  ;;  %v13277_v36 = vsel %vm4065_vm13, %v4123_v55, %v12113_v18 }
 0x264   : > { %v3941_v45 = vadd.f32 %v3940_v20, %v3797_v53  ;;  %v4349_v29 = vpop.f32.mrf.mxu2  ;;  %v4532_v20 = vmul.f32 %v11392_v30, %v12087_v62  ;;  %v3694_v30 = vrot.slane %v3692_v35, 1  ;;  %v3409_v13 = vunpack.c.h.bf16 %v3376_v22  ;;  %15337 = vst [vmem:[#allocation93_spill] sm:$0xff] %v13277_v36 }
 0x265   : > { %v13243_v43 = vadd.f32 %v4349_v29, %v3939_v11  ;;  %v2576_v11 = vadd.s32 240, %v12066_v48  ;;  %v3690_v29 = vor.u32 %v3688_v39, %v3686_v58  ;;  %v4260_v60 = vrot.slane %v4209_v7, 1 }
 0x266   : > { %v4550_v21 = vpack.c.bf16 %v4532_v20, %v4531_v57  ;;  %v11491_v57 = vld [vmem:[#allocation2 + $0x78] sm:$0xff]   ;;  %v13282_v35 = vsel %vm4065_vm13, %v12113_v18, %v13265_v44 }
 0x267   : > { %15333 = vst [vmem:[#allocation89_spill] sm:$0xff] %v13243_v43  ;;  %v2792_v47 = vand.u32 15, %v2576_v11  ;;  %v3695_v58 = vsel %vm3579_vm14, %v3690_v29, %v3694_v30  ;;  %v11395_v11 = vunpack.c.l.bf16 %v11491_v57  ;;  %v11396_v29 = vunpack.c.h.bf16 %v11491_v57 }
 0x268   : > { %15338 = vst [vmem:[#allocation94_spill] sm:$0xff] %v13282_v35  ;;  %v4193_v55 = vmul.f32 %v13282_v35, %v3409_v13  ;;  %v3473_v57 = vmul.f32 %v12087_v62, %v3409_v13  ;;  %v4732_v13 = vld [vmem:[#allocation2 + $0xc] sm:$0xff]  }
 0x269   : > { %v13253_v53 = vpop.f32.mrf.mxu3  ;;  %vm2992_vm1 = vcmp.ne.s32.totalorder %v2792_v47, 0  ;;  %v3696_v47 = vshrl.u32 %v13228_v17, 16 }
 0x26a   : > { %15334 = vst [vmem:[#allocation90_spill] sm:$0xff] %v13253_v53  ;;  %v3948_v42 = vpop.f32.mrf.mxu1  ;;  %v13287_v39 = vsel %vm2992_vm1, 1.0, %v15274_v49 }
 0x26b   : > { %v3800_v43 = vpop.f32.mrf.mxu0  ;;  %15339 = vst [vmem:[#allocation95_spill] sm:$0xff] %v13287_v39  ;;  %v3698_v49 = vor.u32 %v3696_v47, %v3694_v30  ;;  %v5159_v47 = vunpack.c.l.bf16 %v4732_v13 }
 0x26c   : > { %v3944_v5 = vadd.f32 %v3943_v33, %v3800_v43  ;;  %v4351_v24 = vpop.f32.mrf.mxu2  ;;  %v4261_v33 = vsel %vm4232_vm15, %v13210_v9, %v4260_v60 }
 0x26d   : > { %v13260_v53 = vadd.f32 %v4351_v24, %v3941_v45  ;;  %10078 = vmatmul.msk.bf16.gmra.mxu1 %vm1023_vm4, %v3488_v50  ;;  %v3408_v45 = vunpack.c.l.bf16 %v3376_v22  ;;  %v11193_v22 = vld [vmem:[%s15240_s30 + $0x30] sm:$0xff] }
 0x26e   : > { %10121 = vmatmul.msk.bf16.gmra.mxu3 %vm1023_vm4, %v4550_v21  ;;  %10057 = vmatmul.msk.bf16.gmra.mxu0 %vm1023_vm4, %v3695_v58  ;;  %v13273_v21 = vld [vmem:[#allocation2 + $0x78] sm:$0xff] }
 0x26f   : > { %15335 = vst [vmem:[#allocation91_spill] sm:$0xff] %v13260_v53  ;;  %v4192_v50 = vmul.f32 %v13277_v36, %v3408_v45  ;;  %v3700_v58 = vshll.u32 %v13273_v21, 16  ;;  %5645 = vmatpush.bf16.msra.mxu2 %v11193_v22  ;;  %v3492_v53 = vld [vmem:[#allocation2 + $0x80] sm:$0x1]  ;;  %v3704_v63 = vshrl.u32 %v13273_v21, 16 }
 0x271   : > { %v13270_v43 = vpop.f32.mrf.mxu3  ;;  %10099 = vmatmul.msk.bf16.gmra.mxu2 %vm1023_vm4, %v4261_v33  ;;  %v11210_v33 = vld [vmem:[%s15240_s30 + $0x38] sm:$0xff]  ;;  %v3702_v48 = vrot.slane %v3700_v58, 1  ;;  %v5160_v58 = vunpack.c.h.bf16 %v4732_v13 }
 0x272   : > { %15336 = vst [vmem:[#allocation92_spill] sm:$0xff] %v13270_v43  ;;  %v13284_v9 = vpop.f32.mrf.mxu1  ;;  %6071 = vmatpush.bf16.msra.mxu3 %v11210_v33  ;;  %v13307_v43 = vld [vmem:[#allocation2 + $0x14] sm:$0xff]  }
 0x273   : > { %v3802_v20 = vpop.f32.mrf.mxu0  ;;  %v3703_v30 = vsel %vm3579_vm14, %v3698_v49, %v3702_v48  ;;  %v5193_v13 = vmul.f32 %v5160_v58, %v12223_v25 }
 0x274   : > { %v3946_v7 = vadd.f32 %v3945_v40, %v3802_v20  ;;  %v4354_v8 = vpop.f32.mrf.mxu2  ;;  %v3472_v40 = vmul.f32 %v13287_v39, %v3408_v45  ;;  %v4533_v20 = vmul.f32 %v11395_v11, %v13241_v31 }
 0x275   : > { %v13291_v24 = vadd.f32 %v4354_v8, %v3944_v5  ;;  %v4534_v5 = vmul.f32 %v11396_v29, %v12087_v62  ;;  %v4210_v8 = vpack.c.bf16 %v4193_v55, %v4192_v50  ;;  %v5161_v29 = vunpack.c.l.bf16 %v13307_v43  ;;  %v5157_v50 = vld [vmem:[#allocation2 + $0x8] sm:$0xe] }
 0x276   : > { %v3489_v45 = vpack.c.bf16 %v3473_v57, %v3472_v40  ;;  %v3561_v55 = vunpack.c.l.b16 %v3492_v53  ;;  %v11492_v40 = vld [vmem:[#allocation2 + $0x80] sm:$0xff]   ;;  %v4000_v57 = vunpack.c.l.bf16 %v3492_v53 }
 0x277   : > { %15340 = vst [vmem:[#allocation96_spill] sm:$0xff] %v13291_v24  ;;  %v4551_v36 = vpack.c.bf16 %v4534_v5, %v4533_v20  ;;  %v13311_v31 = vrot.slane %v4210_v8, 1  ;;  %v5194_v49 = vmul.f32 %v5161_v29, %v12229_v26  ;;  %v4738_v26 = vld [vmem:[#allocation2 + $0x24] sm:$0xff]  }
 0x278   : > { %v3578_v20 = vpack.c.b16 %v3561_v55, %v3561_v55  ;;  %v4194_v55 = vmul.f32 %v13265_v44, %v4000_v57 }
 0x279   : > { %v13305_v17 = vpop.f32.mrf.mxu3 }
 0x27a   : > { %v13309_v24 = vpop.f32.mrf.mxu1 }
 0x27b   : > { %v3805_v35 = vpop.f32.mrf.mxu0 }
 0x27c   : > { %v3949_v14 = vadd.f32 %v3948_v42, %v3805_v35  ;;  %v4356_v11 = vpop.f32.mrf.mxu2  ;;  %v11211_v42 = vld [vmem:[%s15240_s30 + $0x40] sm:$0xff]  ;;  %v669_v35 = vld [vmem:[#allocation2 + $0x88] sm:$0xf] }
 0x27d   : > { %v13314_v22 = vadd.f32 %v4356_v11, %v3946_v7  ;;  %10079 = vmatmul.msk.bf16.gmra.mxu1 %vm1023_vm4, %v3489_v45  ;;  %v4263_v7 = vsel %vm4232_vm15, %v4260_v60, %v13311_v31  ;;  %6383 = vmatpush.bf16.msrb.mxu0 %v11211_v42  ;;  %v670_v5 = vsel %vm11991_vm7, 0, %v669_v35  ;;  %v5192_v45 = vmul.f32 %v5159_v47, %v12186_v34 }
 0x27e   : > { %10122 = vmatmul.msk.bf16.gmra.mxu3 %vm1023_vm4, %v4551_v36  ;;  %10058 = vmatmul.msk.bf16.gmra.mxu0 %vm1023_vm4, %v3703_v30  ;;  %v5158_v36 = vunpack.c.l.bf16 %v5157_v50  ;;  %671 = vst [vmem:[#allocation2 + $0x88] sm:$0xf] %v670_v5  ;;  %v11399_v11 = vunpack.c.l.bf16 %v11492_v40  ;;  %v11400_v30 = vunpack.c.h.bf16 %v11492_v40  ;;  %v5225_v42 = vpack.c.bf16 %v5194_v49, %v5193_v13  ;;  %v13344_v13 = vld [vmem:[#allocation2 + $0x1c] sm:$0xff]  }
 0x27f   : > { %v3708_v35 = vshll.u32 %v3578_v20, 16  ;;  %v2470_v47 = vrot.slane %v12964_v0, 4  ;;  %vm677_vm7 = vcmask 253952  }
 0x280   : > { %v5191_v53 = vmul.f32 %v5158_v36, %v12113_v18  ;;  %v4535_v5 = vmul.f32 %v11399_v11, %v13287_v39  ;;  %v4536_v40 = vmul.f32 %v11400_v30, %v12087_v62  ;;  %v5262_v25 = vrot.slane %v5225_v42, 1  ;;  %vm13891_vm8 = vmand %vm677_vm7, %vm661_vm2 }
 0x281   : > { %v13325_v33 = vpop.f32.mrf.mxu3  ;;  %10100 = vmatmul.msk.bf16.gmra.mxu2 %vm1023_vm4, %v4263_v7  ;;  %v3706_v36 = vor.u32 %v3704_v63, %v3702_v48  ;;  %v3710_v49 = vrot.slane %v3708_v35, 1  ;;  %v5163_v48 = vunpack.c.l.bf16 %v13344_v13  ;;  %v11194_v63 = vld [vmem:[#allocation2 + $0x10] sm:$0xff] }
 0x282   : > { %v3955_v8 = vpop.f32.mrf.mxu1  ;;  %v5224_v58 = vpack.c.bf16 %v5192_v45, %v5191_v53  ;;  %v4552_v20 = vpack.c.bf16 %v4536_v40, %v4535_v5  ;;  %v13361_v5 = vld [vmem:[#allocation2 + $0x18] sm:$0xff] }
 0x283   : > { %v3807_v60 = vpop.f32.mrf.mxu0  ;;  %v3711_v54 = vsel %vm3579_vm14, %v3706_v36, %v3710_v49  ;;  %v5881_v49 = vshll.u32 %v11194_v63, 16 }
 0x284   : > { %v3951_v50 = vadd.f32 %v13284_v9, %v3807_v60  ;;  %v4359_v29 = vpop.f32.mrf.mxu2  ;;  %v4211_v9 = vpack.c.bf16 %v4194_v55, %v4194_v55  ;;  %v5162_v55 = vunpack.c.h.bf16 %v13307_v43 }
 0x285   : > { %v13336_v7 = vadd.f32 %v4359_v29, %v3949_v14  ;;  %v2538_v14 = vld [vmem:[#allocation2 + $0x88] sm:$0x1]  ;;  %v5261_v29 = vrot.slane %v5224_v58, 1 }
 0x286   : > { %v2539_v21 = vsel %vm11888_vm3, %v2470_v47, %v2538_v14  ;;  %v4264_v53 = vrot.slane %v4211_v9, 1  ;;  %v15341_v47 = vld [vmem:[#allocation32_spill] sm:$0xff]  ;;  %v15342_v9 = vld [vmem:[#allocation31_spill] sm:$0xff]  ;;  %vm675_vm3 = vcmask 257024  }
 0x287   : > { %2540 = vst [vmem:[#allocation2 + $0x88] sm:$0x1] %v2539_v21  ;;  %v5263_v30 = vsel %vm4232_vm15, %v5261_v29, %v5262_v25  ;;  %v5196_v58 = vmul.f32 %v5163_v48, %v15341_v47  ;;  %v5195_v36 = vmul.f32 %v5162_v55, %v15342_v9  ;;  %v5879_v55 = vshrl.u32 %v11194_v63, 16  ;;  %vm13965_vm10 = vmand %vm675_vm3, %vm667_vm6 }
 0x288   : > { %v4265_v35 = vsel %vm4232_vm15, %v13311_v31, %v4264_v53  ;;  %v5886_v31 = vshll.u32 %v13361_v5, 16  ;;  %v5883_v53 = vrot.slane %v5881_v49, 1 }
 0x289   : > { %v13342_v60 = vpop.f32.mrf.mxu3 }
 0x28a   : > { %v3958_v57 = vpop.f32.mrf.mxu1  ;;  %v5888_v9 = vrot.slane %v5886_v31, 1  ;;  %v11196_v31 = vld [vmem:[#allocation2 + $0x20] sm:$0xff] }
 0x28b   : > { %v3810_v0 = vpop.f32.mrf.mxu0 }
 0x28c   : > { %v3954_v45 = vadd.f32 %v13309_v24, %v3810_v0  ;;  %v4361_v11 = vpop.f32.mrf.mxu2  ;;  %v11175_v24 = vld [vmem:[#allocation2 + $0x8] sm:$0xff] }
 0x28d   : > { %v13351_v42 = vadd.f32 %v4361_v11, %v3951_v50  ;;  %10216 = vmatmul.msk.bf16.vlgmr.msra.gmra.mxu1 %vm1023_vm4, %v5263_v30  ;;  %v13364_v50 = vld [vmem:[#allocation2 + $0x10] sm:$0xff]  ;;  %v4853_v29 = vshll.u32 %v11175_v24, 16  ;;  %v4851_v18 = vshrl.u32 %v11175_v24, 16 }
 0x28e   : > { %10123 = vmatmul.msk.bf16.gmra.mxu3 %vm1023_vm4, %v4552_v20  ;;  %10059 = vmatmul.msk.bf16.gmra.mxu0 %vm1023_vm4, %v3711_v54  ;;  %v5226_v20 = vpack.c.bf16 %v5196_v58, %v5195_v36  ;;  %v4858_v30 = vshll.u32 %v13364_v50, 16  ;;  %v11560_v54 = vld [vmem:[#allocation2 + $0x10] sm:$0xff]  }
 0x28f   : > { %v4855_v48 = vrot.slane %v4853_v29, 1  ;;  %v5165_v29 = vunpack.c.l.bf16 %v4738_v26 }
 0x290   : > { %v5264_v47 = vrot.slane %v5226_v20, 1  ;;  %v4860_v34 = vrot.slane %v4858_v30, 1  ;;  %v13388_v30 = vld [vmem:[#allocation2 + $0x18] sm:$0xff] }
 0x291   : > { %10101 = vmatmul.msk.bf16.gmra.mxu2 %vm1023_vm4, %v4265_v35  ;;  %v13367_v14 = vpop.f32.mrf.mxu3  ;;  %v11404_v35 = vunpack.c.h.bf16 %v11560_v54  ;;  %v4856_v58 = vor.u32 %v4855_v48, %v4851_v18  ;;  %v5164_v18 = vunpack.c.h.bf16 %v13344_v13  ;;  %v4866_v13 = vshll.u32 %v13388_v30, 16 }
 0x292   : > { %v3960_v40 = vpop.f32.mrf.mxu1  ;;  %15343 = vst [vmem:[#allocation97_spill] sm:$0xff] %v13367_v14  ;;  %v5265_v14 = vsel %vm4232_vm15, %v5262_v25, %v5264_v47  ;;  %v5198_v25 = vmul.f32 %v5165_v29, %v12626_v16  ;;  %v15347_v16 = vld [vmem:[#allocation28_spill] sm:$0xff] }
 0x293   : > { %v3812_v43 = vpop.f32.mrf.mxu0  ;;  %v5534_v36 = vmul.f32 %v11404_v35, %v12087_v62  ;;  %v4861_v24 = vsel %vm3579_vm14, %v4856_v58, %v4860_v34 }
 0x294   : > { %v3956_v21 = vadd.f32 %v3955_v8, %v3812_v43  ;;  %v4364_v0 = vpop.f32.mrf.mxu2  ;;  %v5884_v8 = vor.u32 %v5883_v53, %v5879_v55 }
 0x295   : > { %v13370_v11 = vadd.f32 %v4364_v0, %v3954_v45 }
 0x296   : > { %v5889_v49 = vsel %vm3579_vm14, %v5884_v8, %v5888_v9  ;;  %v5894_v8 = vshll.u32 %v11196_v31, 16 }
 0x299   : > { %v13376_v54 = vpop.f32.mrf.mxu3 }
 0x29a   : > { %v3963_v39 = vpop.f32.mrf.mxu1 }
 0x29b   : > { %v3815_v43 = vpop.f32.mrf.mxu0 }
 0x29c   : > { %v3959_v45 = vadd.f32 %v3958_v57, %v3815_v43  ;;  %v4366_v0 = vpop.f32.mrf.mxu2  ;;  %v15344_v57 = vld [vmem:[#allocation33_spill] sm:$0xff] }
 0x29d   : > { %v13378_v63 = vadd.f32 %v4366_v0, %v3956_v21  ;;  %10217 = vmatmul.msk.bf16.gmra.mxu1 %vm1023_vm4, %v5265_v14  ;;  %v5565_v20 = vpack.c.bf16 %v5534_v36, %v15344_v57  ;;  %v5197_v14 = vmul.f32 %v5164_v18, %v12620_v23  ;;  %v11494_v43 = vld [vmem:[#allocation2 + $0x18] sm:$0xff]   ;;  %v5896_v57 = vrot.slane %v5894_v8, 1  ;;  %v13400_v23 = vld [vmem:[#allocation2 + $0x2c] sm:$0xff]  }
 0x29e   : > { %10324 = vmatmul.msk.bf16.vlgmr.msra.gmra.mxu3 %vm1023_vm4, %v5889_v49  ;;  %10194 = vmatmul.msk.bf16.vlgmr.msra.gmra.mxu0 %vm1023_vm4, %v4861_v24  ;;  %v11407_v0 = vunpack.c.l.bf16 %v11494_v43  ;;  %v11408_v49 = vunpack.c.h.bf16 %v11494_v43  ;;  %v5890_v24 = vshrl.u32 %v13361_v5, 16  ;;  %v4862_v18 = vshrl.u32 %v13364_v50, 16 }
 0x29f   : > { %v5227_v55 = vpack.c.bf16 %v5198_v25, %v5197_v14  ;;  %v5166_v8 = vunpack.c.h.bf16 %v4738_v26  ;;  %v11178_v26 = vld [vmem:[#allocation2 + $0x20] sm:$0xff] }
 0x2a0   : > { %v4864_v14 = vor.u32 %v4862_v18, %v4860_v34  ;;  %v11495_v18 = vld [vmem:[#allocation2 + $0x20] sm:$0xff]  }
 0x2a1   : > { %10238 = vmatmul.msk.bf16.vlgmr.msra.gmra.mxu2 %vm1023_vm4, %v5565_v20  ;;  %v13394_v36 = vpop.f32.mrf.mxu3  ;;  %v5266_v29 = vrot.slane %v5227_v55, 1  ;;  %v4868_v20 = vrot.slane %v4866_v13, 1 }
 0x2a2   : > { %v3965_v21 = vpop.f32.mrf.mxu1  ;;  %15346 = vst [vmem:[#allocation98_spill] sm:$0xff] %v13394_v36 }
 0x2a3   : > { %v3817_v53 = vpop.f32.mrf.mxu0  ;;  %v5267_v55 = vsel %vm4232_vm15, %v5264_v47, %v5266_v29  ;;  %v4869_v34 = vsel %vm3579_vm14, %v4864_v14, %v4868_v20  ;;  %v5898_v14 = vshrl.u32 %v11196_v31, 16 }
 0x2a4   : > { %v3961_v48 = vadd.f32 %v3960_v40, %v3817_v53  ;;  %v4369_v35 = vpop.f32.mrf.mxu2  ;;  %v5892_v53 = vor.u32 %v5890_v24, %v5888_v9 }
 0x2a5   : > { %v13391_v58 = vadd.f32 %v4369_v35, %v3959_v45  ;;  %v5535_v45 = vmul.f32 %v11407_v0, %v15347_v16  ;;  %v5536_v35 = vmul.f32 %v11408_v49, %v12087_v62  ;;  %v5167_v16 = vunpack.c.l.bf16 %v13400_v23 }
 0x2a6   : > { %v5897_v5 = vsel %vm3579_vm14, %v5892_v53, %v5896_v57 }
 0x2a7   : > { %15345 = vst [vmem:[#allocation33_spill] sm:$0xff] %v13391_v58  ;;  %v5566_v50 = vpack.c.bf16 %v5536_v35, %v5535_v45  ;;  %v11411_v35 = vunpack.c.l.bf16 %v11495_v18 }
 0x2a9   : > { %v13412_v9 = vpop.f32.mrf.mxu3 }
 0x2aa   : > { %v3968_v40 = vpop.f32.mrf.mxu1 }
 0x2ab   : > { %v3820_v25 = vpop.f32.mrf.mxu0 }
 0x2ac   : > { %v3964_v36 = vadd.f32 %v3963_v39, %v3820_v25  ;;  %v4371_v58 = vpop.f32.mrf.mxu2  ;;  %v5199_v39 = vmul.f32 %v5166_v8, %v12821_v32  ;;  %v4874_v25 = vshll.u32 %v11178_v26, 16  ;;  %v5900_v8 = vor.u32 %v5898_v14, %v5896_v57  ;;  %v13434_v14 = vld [vmem:[#allocation2 + $0x30] sm:$0xff] }
 0x2ad   : > { %v13404_v43 = vadd.f32 %v4371_v58, %v3961_v48  ;;  %10218 = vmatmul.msk.bf16.gmra.mxu1 %vm1023_vm4, %v5267_v55  ;;  %v5200_v48 = vmul.f32 %v5167_v16, %v12835_v4  ;;  %v11197_v58 = vld [vmem:[#allocation2 + $0x28] sm:$0xff]  ;;  %v11412_v55 = vunpack.c.h.bf16 %v11495_v18 }
 0x2ae   : > { %10325 = vmatmul.msk.bf16.gmra.mxu3 %vm1023_vm4, %v5897_v5  ;;  %10195 = vmatmul.msk.bf16.gmra.mxu0 %vm1023_vm4, %v4869_v34  ;;  %v5902_v45 = vshll.u32 %v11197_v58, 16  ;;  %v4870_v34 = vshrl.u32 %v13388_v30, 16 }
 0x2af   : > { %v5228_v24 = vpack.c.bf16 %v5200_v48, %v5199_v39  ;;  %v5537_v39 = vmul.f32 %v11411_v35, %v12436_v2  ;;  %v4742_v48 = vld [vmem:[#allocation2 + $0x34] sm:$0xff]  }
 0x2b0   : > { %v5904_v16 = vrot.slane %v5902_v45, 1  ;;  %v5169_v2 = vunpack.c.l.bf16 %v4742_v48  ;;  %v11179_v45 = vld [vmem:[#allocation2 + $0x28] sm:$0xff] }
 0x2b1   : > { %10239 = vmatmul.msk.bf16.gmra.mxu2 %vm1023_vm4, %v5566_v50  ;;  %v5268_v5 = vrot.slane %v5228_v24, 1  ;;  %v4876_v50 = vrot.slane %v4874_v25, 1  ;;  %v13419_v4 = vpop.f32.mrf.mxu3  ;;  %v5168_v25 = vunpack.c.h.bf16 %v13400_v23  ;;  %v5906_v23 = vshrl.u32 %v11197_v58, 16 }
 0x2b2   : > { %v3970_v47 = vpop.f32.mrf.mxu1  ;;  %v5905_v57 = vsel %vm3579_vm14, %v5900_v8, %v5904_v16 }
 0x2b3   : > { %v3822_v13 = vpop.f32.mrf.mxu0  ;;  %v5269_v18 = vsel %vm4232_vm15, %v5266_v29, %v5268_v5  ;;  %v5202_v29 = vmul.f32 %v5169_v2, %v12887_v52  ;;  %v5201_v8 = vmul.f32 %v5168_v25, %v12879_v1  ;;  %v5908_v2 = vor.u32 %v5906_v23, %v5904_v16  ;;  %v13442_v52 = vld [vmem:[#allocation2 + $0x3c] sm:$0xff]  }
 0x2b4   : > { %v3966_v0 = vadd.f32 %v3965_v21, %v3822_v13  ;;  %v4374_v49 = vpop.f32.mrf.mxu2  ;;  %v4872_v13 = vor.u32 %v4870_v34, %v4868_v20  ;;  %v11496_v34 = vld [vmem:[#allocation2 + $0x28] sm:$0xff]   ;;  %v5171_v16 = vunpack.c.l.bf16 %v13442_v52 }
 0x2b5   : > { %v13416_v53 = vadd.f32 %v4374_v49, %v3964_v36  ;;  %v5538_v36 = vmul.f32 %v11412_v55, %v12087_v62 }
 0x2b6   : > { %v4877_v30 = vsel %vm3579_vm14, %v4872_v13, %v4876_v50 }
 0x2b7   : > { %v5567_v20 = vpack.c.bf16 %v5538_v36, %v5537_v39  ;;  %v5229_v39 = vpack.c.bf16 %v5202_v29, %v5201_v8  ;;  %v5910_v36 = vshll.u32 %v13434_v14, 16 }
 0x2b9   : > { %v5912_v25 = vrot.slane %v5910_v36, 1 }
 0x2ba   : > { %v3973_v32 = vpop.f32.mrf.mxu1 }
 0x2bb   : > { %v3825_v21 = vpop.f32.mrf.mxu0  ;;  %v5913_v8 = vsel %vm3579_vm14, %v5908_v2, %v5912_v25 }
 0x2bc   : > { %v3969_v31 = vadd.f32 %v3968_v40, %v3825_v21  ;;  %v4376_v49 = vpop.f32.mrf.mxu2  ;;  %v13437_v21 = vpop.f32.mrf.mxu3 }
 0x2bd   : > { %v13425_v24 = vadd.f32 %v4376_v49, %v3966_v0  ;;  %10219 = vmatmul.msk.bf16.gmra.mxu1 %vm1023_vm4, %v5269_v18  ;;  %v4878_v49 = vshrl.u32 %v11178_v26, 16  ;;  %v4882_v18 = vshll.u32 %v11179_v45, 16 }
 0x2be   : > { %10326 = vmatmul.msk.bf16.gmra.mxu3 %vm1023_vm4, %v5905_v57  ;;  %10196 = vmatmul.msk.bf16.gmra.mxu0 %vm1023_vm4, %v4877_v30  ;;  %v11415_v57 = vunpack.c.l.bf16 %v11496_v34  ;;  %v11416_v30 = vunpack.c.h.bf16 %v11496_v34 }
 0x2bf   : > { %15348 = vst [vmem:[#allocation28_spill] sm:$0xff] %v13425_v24  ;;  %v4884_v24 = vrot.slane %v4882_v18, 1 }
 0x2c0   : > { %v5540_v29 = vmul.f32 %v11416_v30, %v12087_v62 }
 0x2c1   : > { %10240 = vmatmul.msk.bf16.gmra.mxu2 %vm1023_vm4, %v5567_v20  ;;  %v4880_v20 = vor.u32 %v4878_v49, %v4876_v50  ;;  %v11180_v49 = vld [vmem:[#allocation2 + $0x30] sm:$0xff] }
 0x2c2   : > { %v3975_v40 = vpop.f32.mrf.mxu1 }
 0x2c3   : > { %v3827_v0 = vpop.f32.mrf.mxu0  ;;  %v4885_v34 = vsel %vm3579_vm14, %v4880_v20, %v4884_v24 }
 0x2c4   : > { %v3971_v35 = vadd.f32 %v3970_v47, %v3827_v0  ;;  %v4379_v55 = vpop.f32.mrf.mxu2  ;;  %v5270_v0 = vrot.slane %v5229_v39, 1  ;;  %v13455_v39 = vpop.f32.mrf.mxu3 }
 0x2c5   : > { %v13439_v13 = vadd.f32 %v4379_v55, %v3969_v31  ;;  %v5539_v31 = vmul.f32 %v11415_v57, %v12612_v12  ;;  %v5170_v12 = vunpack.c.h.bf16 %v4742_v48  ;;  %v11497_v48 = vld [vmem:[#allocation2 + $0x30] sm:$0xff]  }
 0x2c6   : > { %v5271_v26 = vsel %vm4232_vm15, %v5268_v5, %v5270_v0  ;;  %v13458_v5 = vld [vmem:[#allocation2 + $0x38] sm:$0xff] }
 0x2c7   : > { %v5203_v23 = vmul.f32 %v5170_v12, %v12934_v3  ;;  %v5918_v2 = vshll.u32 %v13458_v5, 16  ;;  %v4746_v3 = vld [vmem:[#allocation2 + $0x44] sm:$0xff]  }
 0x2ca   : > { %v3978_v47 = vpop.f32.mrf.mxu1 }
 0x2cb   : > { %v3830_v1 = vpop.f32.mrf.mxu0 }
 0x2cc   : > { %v3974_v58 = vadd.f32 %v3973_v32, %v3830_v1  ;;  %v4381_v55 = vpop.f32.mrf.mxu2  ;;  %v5568_v32 = vpack.c.bf16 %v5540_v29, %v5539_v31  ;;  %v5204_v1 = vmul.f32 %v5171_v16, %v12938_v37  ;;  %v4886_v31 = vshrl.u32 %v11179_v45, 16 }
 0x2cd   : > { %v13449_v50 = vadd.f32 %v4381_v55, %v3971_v35  ;;  %10220 = vmatmul.msk.bf16.gmra.mxu1 %vm1023_vm4, %v5271_v26  ;;  %v4890_v29 = vshll.u32 %v11180_v49, 16  ;;  %v11419_v55 = vunpack.c.l.bf16 %v11497_v48  ;;  %v11420_v26 = vunpack.c.h.bf16 %v11497_v48 }
 0x2ce   : > { %10327 = vmatmul.msk.bf16.gmra.mxu3 %vm1023_vm4, %v5913_v8  ;;  %10197 = vmatmul.msk.bf16.gmra.mxu0 %vm1023_vm4, %v4885_v34  ;;  %v5230_v30 = vpack.c.bf16 %v5204_v1, %v5203_v23  ;;  %v5914_v16 = vshrl.u32 %v13434_v14, 16  ;;  %v5920_v34 = vrot.slane %v5918_v2, 1  ;;  %v4888_v12 = vor.u32 %v4886_v31, %v4884_v24  ;;  %v11200_v31 = vld [vmem:[#allocation2 + $0x40] sm:$0xff] }
 0x2cf   : > { %v4892_v23 = vrot.slane %v4890_v29, 1  ;;  %v5541_v37 = vmul.f32 %v11419_v55, %v12827_v19  ;;  %v5173_v14 = vunpack.c.l.bf16 %v4746_v3  ;;  %v5172_v19 = vunpack.c.h.bf16 %v13442_v52 }
 0x2d0   : > { %v5272_v8 = vrot.slane %v5230_v30, 1 }
 0x2d1   : > { %10241 = vmatmul.msk.bf16.gmra.mxu2 %vm1023_vm4, %v5568_v32  ;;  %v13466_v32 = vpop.f32.mrf.mxu3  ;;  %v4893_v24 = vsel %vm3579_vm14, %v4888_v12, %v4892_v23  ;;  %v5205_v29 = vmul.f32 %v5172_v19, %v12971_v59 }
 0x2d2   : > { %v3980_v35 = vpop.f32.mrf.mxu1  ;;  %v5273_v48 = vsel %vm4232_vm15, %v5270_v0, %v5272_v8  ;;  %v13481_v0 = vld [vmem:[#allocation2 + $0x38] sm:$0xff] }
 0x2d3   : > { %v3832_v36 = vpop.f32.mrf.mxu0 }
 0x2d4   : > { %v3976_v18 = vadd.f32 %v3975_v40, %v3832_v36  ;;  %v4384_v57 = vpop.f32.mrf.mxu2  ;;  %v5916_v36 = vor.u32 %v5914_v16, %v5912_v25 }
 0x2d5   : > { %v13463_v20 = vadd.f32 %v4384_v57, %v3974_v58  ;;  %v5542_v58 = vmul.f32 %v11420_v26, %v12087_v62 }
 0x2d6   : > { %v5921_v30 = vsel %vm3579_vm14, %v5916_v36, %v5920_v34 }
 0x2d7   : > { %v5569_v25 = vpack.c.bf16 %v5542_v58, %v5541_v37  ;;  %v4898_v37 = vshll.u32 %v13481_v0, 16 }
 0x2d9   : > { %v13484_v55 = vpop.f32.mrf.mxu3  ;;  %v4900_v19 = vrot.slane %v4898_v37, 1 }
 0x2da   : > { %v3983_v40 = vpop.f32.mrf.mxu1 }
 0x2db   : > { %v3835_v1 = vpop.f32.mrf.mxu0 }
 0x2dc   : > { %v3979_v45 = vadd.f32 %v3978_v47, %v3835_v1  ;;  %v4386_v57 = vpop.f32.mrf.mxu2  ;;  %v5206_v47 = vmul.f32 %v5173_v14, %v12975_v15  ;;  %v5926_v1 = vshll.u32 %v11200_v31, 16  ;;  %v5922_v14 = vshrl.u32 %v13458_v5, 16 }
 0x2dd   : > { %v13472_v2 = vadd.f32 %v4386_v57, %v3976_v18  ;;  %10221 = vmatmul.msk.bf16.gmra.mxu1 %vm1023_vm4, %v5273_v48  ;;  %v11498_v57 = vld [vmem:[#allocation2 + $0x38] sm:$0xff]   ;;  %v5174_v5 = vunpack.c.h.bf16 %v4746_v3  ;;  %v11182_v3 = vld [vmem:[#allocation2 + $0x40] sm:$0xff] }
 0x2de   : > { %10328 = vmatmul.msk.bf16.gmra.mxu3 %vm1023_vm4, %v5921_v30  ;;  %10198 = vmatmul.msk.bf16.gmra.mxu0 %vm1023_vm4, %v4893_v24  ;;  %v5231_v36 = vpack.c.bf16 %v5206_v47, %v5205_v29  ;;  %v11423_v58 = vunpack.c.l.bf16 %v11498_v57  ;;  %v11424_v48 = vunpack.c.h.bf16 %v11498_v57  ;;  %v5928_v24 = vrot.slane %v5926_v1, 1 }
 0x2df   : > { %15349 = vst [vmem:[#allocation99_spill] sm:$0xff] %v13472_v2  ;;  %v5924_v59 = vor.u32 %v5922_v14, %v5920_v34  ;;  %v11499_v14 = vld [vmem:[#allocation2 + $0x40] sm:$0xff]  }
 0x2e0   : > { %v5274_v30 = vrot.slane %v5231_v36, 1  ;;  %v5543_v47 = vmul.f32 %v11423_v58, %v12873_v27  ;;  %v5544_v29 = vmul.f32 %v11424_v48, %v12087_v62 }
 0x2e1   : > { %10242 = vmatmul.msk.bf16.gmra.mxu2 %vm1023_vm4, %v5569_v25  ;;  %v4894_v25 = vshrl.u32 %v11180_v49, 16  ;;  %v5929_v36 = vsel %vm3579_vm14, %v5924_v59, %v5928_v24  ;;  %v13496_v1 = vpop.f32.mrf.mxu3 }
 0x2e2   : > { %v3985_v18 = vpop.f32.mrf.mxu1  ;;  %v5275_v57 = vsel %vm4232_vm15, %v5272_v8, %v5274_v30  ;;  %v5207_v8 = vmul.f32 %v5174_v5, %v13011_v56 }
 0x2e3   : > { %v3837_v26 = vpop.f32.mrf.mxu0 }
 0x2e4   : > { %v3981_v16 = vadd.f32 %v3980_v35, %v3837_v26  ;;  %v4389_v12 = vpop.f32.mrf.mxu2  ;;  %v4896_v35 = vor.u32 %v4894_v25, %v4892_v23 }
 0x2e5   : > { %v13486_v52 = vadd.f32 %v4389_v12, %v3979_v45  ;;  %v13492_v45 = vld [vmem:[#allocation2 + $0x4c] sm:$0xff]  }
 0x2e6   : > { %v4901_v27 = vsel %vm3579_vm14, %v4896_v35, %v4900_v19  ;;  %v5175_v34 = vunpack.c.l.bf16 %v13492_v45  ;;  %v4906_v35 = vshll.u32 %v11182_v3, 16 }
 0x2e8   : > { %v5208_v23 = vmul.f32 %v5175_v34, %v13015_v46  ;;  %v4908_v34 = vrot.slane %v4906_v35, 1 }
 0x2ea   : > { %v3988_v15 = vpop.f32.mrf.mxu1  ;;  %v5232_v48 = vpack.c.bf16 %v5208_v23, %v5207_v8  ;;  %v4750_v23 = vld [vmem:[#allocation2 + $0x54] sm:$0xff]  }
 0x2eb   : > { %v3840_v2 = vpop.f32.mrf.mxu0 }
 0x2ec   : > { %v3984_v26 = vadd.f32 %v3983_v40, %v3840_v2  ;;  %v4391_v12 = vpop.f32.mrf.mxu2  ;;  %v5570_v40 = vpack.c.bf16 %v5544_v29, %v5543_v47  ;;  %v11201_v2 = vld [vmem:[#allocation2 + $0x48] sm:$0xff]  ;;  %v13510_v47 = vpop.f32.mrf.mxu3  ;;  %v11427_v29 = vunpack.c.l.bf16 %v11499_v14  ;;  %v5276_v5 = vrot.slane %v5232_v48, 1 }
 0x2ed   : > { %v13498_v49 = vadd.f32 %v4391_v12, %v3981_v16  ;;  %10222 = vmatmul.msk.bf16.gmra.mxu1 %vm1023_vm4, %v5275_v57  ;;  %v5930_v12 = vshrl.u32 %v11200_v31, 16  ;;  %v5934_v57 = vshll.u32 %v11201_v2, 16 }
 0x2ee   : > { %10329 = vmatmul.msk.bf16.gmra.mxu3 %vm1023_vm4, %v5929_v36  ;;  %10199 = vmatmul.msk.bf16.gmra.mxu0 %vm1023_vm4, %v4901_v27  ;;  %v11428_v36 = vunpack.c.h.bf16 %v11499_v14  ;;  %v5545_v8 = vmul.f32 %v11427_v29, %v12924_v41  ;;  %v5177_v41 = vunpack.c.l.bf16 %v4750_v23 }
 0x2ef   : > { %v5932_v27 = vor.u32 %v5930_v12, %v5928_v24  ;;  %v5936_v56 = vrot.slane %v5934_v57, 1  ;;  %v11183_v12 = vld [vmem:[#allocation2 + $0x48] sm:$0xff] }
 0x2f1   : > { %10243 = vmatmul.msk.bf16.gmra.mxu2 %vm1023_vm4, %v5570_v40  ;;  %v4902_v40 = vshrl.u32 %v13481_v0, 16  ;;  %v5937_v14 = vsel %vm3579_vm14, %v5932_v27, %v5936_v56 }
 0x2f2   : > { %v3990_v59 = vpop.f32.mrf.mxu1 }
 0x2f3   : > { %v3842_v16 = vpop.f32.mrf.mxu0 }
 0x2f4   : > { %v3986_v37 = vadd.f32 %v3985_v18, %v3842_v16  ;;  %v4394_v58 = vpop.f32.mrf.mxu2  ;;  %v4904_v16 = vor.u32 %v4902_v40, %v4900_v19  ;;  %v5176_v19 = vunpack.c.h.bf16 %v13492_v45 }
 0x2f5   : > { %v13508_v25 = vadd.f32 %v4394_v58, %v3984_v26  ;;  %v5546_v26 = vmul.f32 %v11428_v36, %v12087_v62  ;;  %v11500_v36 = vld [vmem:[#allocation2 + $0x48] sm:$0xff]  }
 0x2f6   : > { %v4909_v0 = vsel %vm3579_vm14, %v4904_v16, %v4908_v34  ;;  %v5209_v29 = vmul.f32 %v5176_v19, %v13043_v38  ;;  %v5938_v16 = vshrl.u32 %v11201_v2, 16 }
 0x2f7   : > { %15350 = vst [vmem:[#allocation100_spill] sm:$0xff] %v13508_v25  ;;  %v5277_v25 = vsel %vm4232_vm15, %v5274_v30, %v5276_v5  ;;  %v5571_v24 = vpack.c.bf16 %v5546_v26, %v5545_v8  ;;  %v5210_v30 = vmul.f32 %v5177_v41, %v13047_v51  ;;  %v4910_v8 = vshrl.u32 %v11182_v3, 16 }
 0x2f8   : > { %v4914_v26 = vshll.u32 %v11183_v12, 16 }
 0x2f9   : > { %v4912_v41 = vor.u32 %v4910_v8, %v4908_v34 }
 0x2fa   : > { %v3993_v46 = vpop.f32.mrf.mxu1  ;;  %v4916_v38 = vrot.slane %v4914_v26, 1 }
 0x2fb   : > { %v3845_v18 = vpop.f32.mrf.mxu0 }
 0x2fc   : > { %v3989_v31 = vadd.f32 %v3988_v15, %v3845_v18  ;;  %v4396_v58 = vpop.f32.mrf.mxu2  ;;  %v13524_v15 = vpop.f32.mrf.mxu3  ;;  %v5233_v18 = vpack.c.bf16 %v5210_v30, %v5209_v29 }
 0x2fd   : > { %v13517_v48 = vadd.f32 %v4396_v58, %v3986_v37  ;;  %10223 = vmatmul.msk.bf16.gmra.mxu1 %vm1023_vm4, %v5277_v25  ;;  %v11202_v37 = vld [vmem:[#allocation2 + $0x50] sm:$0xff]  ;;  %v11431_v58 = vunpack.c.l.bf16 %v11500_v36 }
 0x2fe   : > { %10330 = vmatmul.msk.bf16.gmra.mxu3 %vm1023_vm4, %v5937_v14  ;;  %10200 = vmatmul.msk.bf16.gmra.mxu0 %vm1023_vm4, %v4909_v0  ;;  %v5942_v45 = vshll.u32 %v11202_v37, 16  ;;  %v11432_v14 = vunpack.c.h.bf16 %v11500_v36  ;;  %v5940_v0 = vor.u32 %v5938_v16, %v5936_v56  ;;  %v5278_v51 = vrot.slane %v5233_v18, 1  ;;  %v13546_v16 = vld [vmem:[#allocation2 + $0x58] sm:$0xff] }
 0x2ff   : > { %v4917_v36 = vsel %vm3579_vm14, %v4912_v41, %v4916_v38  ;;  %v5950_v26 = vshll.u32 %v13546_v16, 16  ;;  %v11501_v41 = vld [vmem:[#allocation2 + $0x50] sm:$0xff]  }
 0x300   : > { %v5548_v30 = vmul.f32 %v11432_v14, %v12087_v62  ;;  %v5279_v3 = vsel %vm4232_vm15, %v5276_v5, %v5278_v51 }
 0x301   : > { %10244 = vmatmul.msk.bf16.gmra.mxu2 %vm1023_vm4, %v5571_v24  ;;  %v13531_v24 = vld [vmem:[#allocation2 + $0x5c] sm:$0xff]  }
 0x302   : > { %v3995_v27 = vpop.f32.mrf.mxu1  ;;  %v5179_v56 = vunpack.c.l.bf16 %v13531_v24 }
 0x303   : > { %v3847_v35 = vpop.f32.mrf.mxu0 }
 0x304   : > { %v3991_v25 = vadd.f32 %v3990_v59, %v3847_v35  ;;  %v4399_v57 = vpop.f32.mrf.mxu2  ;;  %v5944_v59 = vrot.slane %v5942_v45, 1  ;;  %v13533_v35 = vpop.f32.mrf.mxu3  ;;  %v5212_v5 = vmul.f32 %v5179_v56, %v13079_v61  ;;  %v13551_v45 = vld [vmem:[#allocation2 + $0x50] sm:$0xff]  ;;  %v11436_v56 = vunpack.c.h.bf16 %v11501_v41 }
 0x305   : > { %v13529_v40 = vadd.f32 %v4399_v57, %v3989_v31  ;;  %v5547_v31 = vmul.f32 %v11431_v58, %v12978_v10  ;;  %v5178_v10 = vunpack.c.h.bf16 %v4750_v23 }
 0x306   : > { %v5945_v29 = vsel %vm3579_vm14, %v5940_v0, %v5944_v59 }
 0x307   : > { %15351 = vst [vmem:[#allocation101_spill] sm:$0xff] %v13529_v40  ;;  %v13601_v40 = vld [vmem:[#allocation2 + $0x6c] sm:$0xff]  }
 0x30a   : > { %v5357_v18 = vpop.f32.mrf.mxu1 }
 0x30b   : > { %v3850_v19 = vpop.f32.mrf.mxu0 }
 0x30c   : > { %v3994_v2 = vadd.f32 %v3993_v46, %v3850_v19  ;;  %v4401_v57 = vpop.f32.mrf.mxu2  ;;  %v5572_v46 = vpack.c.bf16 %v5548_v30, %v5547_v31  ;;  %v13554_v23 = vpop.f32.mrf.mxu3  ;;  %v5946_v31 = vshrl.u32 %v11202_v37, 16  ;;  %v4922_v30 = vshll.u32 %v13551_v45, 16  ;;  %v15356_v37 = vld [vmem:[#allocation55_spill] sm:$0xff] }
 0x30d   : > { %v13540_v34 = vadd.f32 %v4401_v57, %v3991_v25  ;;  %10224 = vmatmul.msk.bf16.gmra.mxu1 %vm1023_vm4, %v5279_v3  ;;  %v5211_v25 = vmul.f32 %v5178_v10, %v13075_v6  ;;  %v5952_v57 = vrot.slane %v5950_v26, 1  ;;  %v4918_v3 = vshrl.u32 %v11183_v12, 16  ;;  %v13559_v6 = vld [vmem:[#allocation2 + $0x64] sm:$0xff]  }
 0x30e   : > { %10331 = vmatmul.msk.bf16.gmra.mxu3 %vm1023_vm4, %v5945_v29  ;;  %10201 = vmatmul.msk.bf16.gmra.mxu0 %vm1023_vm4, %v4917_v36  ;;  %v11435_v29 = vunpack.c.l.bf16 %v11501_v41  ;;  %v5550_v26 = vmul.f32 %v11436_v56, %v12087_v62 }
 0x30f   : > { %15352 = vst [vmem:[#allocation102_spill] sm:$0xff] %v13540_v34  ;;  %v5234_v0 = vpack.c.bf16 %v5212_v5, %v5211_v25  ;;  %v4920_v61 = vor.u32 %v4918_v3, %v4916_v38  ;;  %v15355_v5 = vld [vmem:[#allocation39_spill] sm:$0xff]  ;;  %v15357_v34 = vld [vmem:[#allocation38_spill] sm:$0xff]  ;;  %v5180_v38 = vunpack.c.h.bf16 %v13531_v24 }
 0x310   : > { %v15359_v3 = vld [vmem:[#allocation43_spill] sm:$0xff] }
 0x311   : > { %10245 = vmatmul.msk.bf16.gmra.mxu2 %vm1023_vm4, %v5572_v46  ;;  %v5280_v36 = vrot.slane %v5234_v0, 1  ;;  %v5948_v46 = vor.u32 %v5946_v31, %v5944_v59  ;;  %v5181_v59 = vunpack.c.l.bf16 %v13559_v6 }
 0x312   : > { %v5359_v10 = vpop.f32.mrf.mxu1 }
 0x313   : > { %v3852_v8 = vpop.f32.mrf.mxu0  ;;  %v5281_v0 = vsel %vm4232_vm15, %v5278_v51, %v5280_v36 }
 0x314   : > { %v3996_v58 = vadd.f32 %v3995_v27, %v3852_v8  ;;  %v4404_v14 = vpop.f32.mrf.mxu2  ;;  %v15354_v27 = vld [vmem:[#allocation40_spill] sm:$0xff] }
 0x315   : > { %v13556_v19 = vadd.f32 %v4404_v14, %v3994_v2  ;;  %v3921_v25 = vadd.f32 %v15355_v5, %v15354_v27  ;;  %v5953_v2 = vsel %vm3579_vm14, %v5948_v46, %v5952_v57  ;;  %v4924_v14 = vrot.slane %v4922_v30, 1  ;;  %v15361_v46 = vld [vmem:[#allocation67_spill] sm:$0xff]  ;;  %v15362_v27 = vld [vmem:[#allocation68_spill] sm:$0xff] }
 0x316   : > { %v5213_v24 = vmul.f32 %v5180_v38, %v15361_v46  ;;  %v5214_v5 = vmul.f32 %v5181_v59, %v15362_v27 }
 0x317   : > { %15353 = vst [vmem:[#allocation103_spill] sm:$0xff] %v13556_v19  ;;  %v5549_v19 = vmul.f32 %v11435_v29, %v15356_v37  ;;  %v4925_v30 = vsel %vm3579_vm14, %v4920_v61, %v4924_v14  ;;  %v4410_v29 = vadd.f32 %v15359_v3, %v3921_v25  ;;  %v4926_v3 = vshrl.u32 %v13551_v45, 16 }
 0x319   : > { %v5573_v51 = vpack.c.bf16 %v5550_v26, %v5549_v19  ;;  %v11502_v19 = vld [vmem:[#allocation2 + $0x58] sm:$0xff]  }
 0x31a   : > { %v5362_v37 = vpop.f32.mrf.mxu1  ;;  %v11440_v27 = vunpack.c.h.bf16 %v11502_v19 }
 0x31b   : > { %v5045_v8 = vpop.f32.mrf.mxu0 }
 0x31c   : > { %v4406_v12 = vpop.f32.mrf.mxu2  ;;  %v5125_v41 = vadd.f32 %v5045_v8, %v15357_v34  ;;  %v13577_v34 = vpop.f32.mrf.mxu3  ;;  %v13584_v8 = vld [vmem:[#allocation2 + $0x58] sm:$0xff]  ;;  %v5552_v45 = vmul.f32 %v11440_v27, %v12087_v62  ;;  %v15372_v27 = vld [vmem:[#allocation56_spill] sm:$0xff] }
 0x31d   : > { %v13570_v31 = vadd.f32 %v4406_v12, %v3996_v58  ;;  %10225 = vmatmul.msk.bf16.gmra.mxu1 %vm1023_vm4, %v5281_v0  ;;  %15360 = vst [vmem:[#allocation39_spill] sm:$0xff] %v13577_v34  ;;  %v13581_v58 = vld [vmem:[#allocation2 + $0x60] sm:$0xff]  ;;  %v4930_v38 = vshll.u32 %v13584_v8, 16 }
 0x31e   : > { %10332 = vmatmul.msk.bf16.gmra.mxu3 %vm1023_vm4, %v5953_v2  ;;  %10202 = vmatmul.msk.bf16.gmra.mxu0 %vm1023_vm4, %v4925_v30  ;;  %v5437_v56 = vadd.f32 %v5357_v18, %v5125_v41  ;;  %v15363_v2 = vld [vmem:[#allocation64_spill] sm:$0xff]  ;;  %v5235_v18 = vpack.c.bf16 %v5214_v5, %v5213_v24  ;;  %v5958_v41 = vshll.u32 %v13581_v58, 16  ;;  %v5954_v30 = vshrl.u32 %v13546_v16, 16  ;;  %v15366_v24 = vld [vmem:[#allocation46_spill] sm:$0xff]  ;;  %v15367_v5 = vld [vmem:[#allocation65_spill] sm:$0xff] }
 0x31f   : > { %15358 = vst [vmem:[#allocation40_spill] sm:$0xff] %v13570_v31  ;;  %v4700_v61 = vadd.f32 %v15363_v2, %v4410_v29 }
 0x320   : > { %v5282_v29 = vrot.slane %v5235_v18, 1  ;;  %v5960_v2 = vrot.slane %v5958_v41, 1  ;;  %v5956_v31 = vor.u32 %v5954_v30, %v5952_v57 }
 0x321   : > { %10246 = vmatmul.msk.bf16.gmra.mxu2 %vm1023_vm4, %v5573_v51  ;;  %v11439_v51 = vunpack.c.l.bf16 %v11502_v19 }
 0x322   : > { %v5283_v19 = vsel %vm4232_vm15, %v5280_v36, %v5282_v29  ;;  %v5364_v57 = vpop.f32.mrf.mxu1  ;;  %v5183_v36 = vunpack.c.l.bf16 %v13601_v40 }
 0x323   : > { %v5047_v25 = vpop.f32.mrf.mxu0 }
 0x324   : > { %v5126_v12 = vadd.f32 %v5047_v25, %v4700_v61  ;;  %v5647_v0 = vpop.f32.mrf.mxu2  ;;  %v13593_v46 = vpop.f32.mrf.mxu3  ;;  %v4932_v61 = vrot.slane %v4930_v38, 1  ;;  %v4701_v25 = vadd.f32 %v15367_v5, %v15366_v24  ;;  %v5961_v38 = vsel %vm3579_vm14, %v5956_v31, %v5960_v2  ;;  %v15373_v31 = vld [vmem:[#allocation72_spill] sm:$0xff] }
 0x325   : > { %v13588_v26 = vadd.f32 %v5647_v0, %v5437_v56  ;;  %15365 = vst [vmem:[#allocation38_spill] sm:$0xff] %v13593_v46  ;;  %v15368_v56 = vld [vmem:[#allocation54_spill] sm:$0xff]  ;;  %v15369_v0 = vld [vmem:[#allocation51_spill] sm:$0xff]  ;;  %v5182_v24 = vunpack.c.h.bf16 %v13559_v6 }
 0x326   : > { %v5438_v59 = vadd.f32 %v5359_v10, %v5126_v12  ;;  %v4928_v10 = vor.u32 %v4926_v3, %v4924_v14  ;;  %v15370_v12 = vld [vmem:[#allocation59_spill] sm:$0xff] }
 0x327   : > { %15364 = vst [vmem:[#allocation55_spill] sm:$0xff] %v13588_v26  ;;  %v3926_v26 = vadd.f32 %v15369_v0, %v15368_v56  ;;  %v5551_v16 = vmul.f32 %v11439_v51, %v15370_v12  ;;  %v5215_v5 = vmul.f32 %v5182_v24, %v15373_v31  ;;  %v13616_v6 = vld [vmem:[#allocation2 + $0x60] sm:$0xff]  ;;  %v13620_v12 = vld [vmem:[#allocation2 + $0x68] sm:$0xff] }
 0x328   : > { %v4933_v14 = vsel %vm3579_vm14, %v4928_v10, %v4932_v61  ;;  %v15375_v56 = vld [vmem:[#allocation74_spill] sm:$0xff] }
 0x329   : > { %v4412_v3 = vadd.f32 %v15372_v27, %v3926_v26  ;;  %v5574_v51 = vpack.c.bf16 %v5552_v45, %v5551_v16  ;;  %v5216_v0 = vmul.f32 %v5183_v36, %v15375_v56  ;;  %v5962_v16 = vshrl.u32 %v13581_v58, 16  ;;  %v11503_v45 = vld [vmem:[#allocation2 + $0x60] sm:$0xff]  }
 0x32a   : > { %v5367_v27 = vpop.f32.mrf.mxu1  ;;  %v11443_v36 = vunpack.c.l.bf16 %v11503_v45 }
 0x32b   : > { %v5050_v34 = vpop.f32.mrf.mxu0  ;;  %v5964_v56 = vor.u32 %v5962_v16, %v5960_v2 }
 0x32c   : > { %v5127_v18 = vadd.f32 %v5050_v34, %v4701_v25  ;;  %v5649_v41 = vpop.f32.mrf.mxu2  ;;  %v13622_v10 = vpop.f32.mrf.mxu3 }
 0x32d   : > { %v13606_v30 = vadd.f32 %v5649_v41, %v5438_v59  ;;  %10226 = vmatmul.msk.bf16.gmra.mxu1 %vm1023_vm4, %v5283_v19  ;;  %v15374_v59 = vld [vmem:[#allocation70_spill] sm:$0xff]  ;;  %15376 = vst [vmem:[#allocation64_spill] sm:$0xff] %v13622_v10 }
 0x32e   : > { %10333 = vmatmul.msk.bf16.gmra.mxu3 %vm1023_vm4, %v5961_v38  ;;  %10203 = vmatmul.msk.bf16.gmra.mxu0 %vm1023_vm4, %v4933_v14  ;;  %v5439_v34 = vadd.f32 %v5362_v37, %v5127_v18  ;;  %v4702_v25 = vadd.f32 %v15374_v59, %v4412_v3  ;;  %v5236_v18 = vpack.c.bf16 %v5216_v0, %v5215_v5  ;;  %v4938_v38 = vshll.u32 %v13616_v6, 16  ;;  %v15379_v5 = vld [vmem:[#allocation71_spill] sm:$0xff]  ;;  %v15382_v10 = vld [vmem:[#allocation66_spill] sm:$0xff] }
 0x32f   : > { %15371 = vst [vmem:[#allocation43_spill] sm:$0xff] %v13606_v30  ;;  %v5966_v14 = vshll.u32 %v13620_v12, 16  ;;  %v4934_v3 = vshrl.u32 %v13584_v8, 16 }
 0x330   : > { %v5284_v59 = vrot.slane %v5236_v18, 1 }
 0x331   : > { %10247 = vmatmul.msk.bf16.gmra.mxu2 %vm1023_vm4, %v5574_v51  ;;  %v11444_v51 = vunpack.c.h.bf16 %v11503_v45  ;;  %v5968_v58 = vrot.slane %v5966_v14, 1  ;;  %v15384_v14 = vld [vmem:[#allocation77_spill] sm:$0xff] }
 0x332   : > { %v5285_v2 = vsel %vm4232_vm15, %v5282_v29, %v5284_v59 }
 0x333   : > { %v5052_v26 = vpop.f32.mrf.mxu0  ;;  %v5969_v18 = vsel %vm3579_vm14, %v5964_v56, %v5968_v58 }
 0x334   : > { %v5128_v41 = vadd.f32 %v5052_v26, %v4702_v25  ;;  %v5652_v37 = vpop.f32.mrf.mxu2  ;;  %v4940_v25 = vrot.slane %v4938_v38, 1  ;;  %v15378_v26 = vld [vmem:[#allocation60_spill] sm:$0xff]  ;;  %v13640_v16 = vpop.f32.mrf.mxu3 }
 0x335   : > { %v13625_v19 = vadd.f32 %v5652_v37, %v5439_v34  ;;  %v4703_v0 = vadd.f32 %v15379_v5, %v15378_v26  ;;  %v4936_v34 = vor.u32 %v4934_v3, %v4932_v61  ;;  %v15380_v37 = vld [vmem:[#allocation61_spill] sm:$0xff]  ;;  %v15387_v5 = vld [vmem:[#allocation80_spill] sm:$0xff] }
 0x336   : > { %v5440_v24 = vadd.f32 %v5364_v57, %v5128_v41  ;;  %v5553_v30 = vmul.f32 %v11443_v36, %v15380_v37  ;;  %v5554_v57 = vmul.f32 %v11444_v51, %v12087_v62  ;;  %v13634_v41 = vld [vmem:[#allocation2 + $0x74] sm:$0xff]   ;;  %v15386_v51 = vld [vmem:[#allocation79_spill] sm:$0xff] }
 0x337   : > { %15377 = vst [vmem:[#allocation46_spill] sm:$0xff] %v13625_v19  ;;  %v15381_v19 = vld [vmem:[#allocation73_spill] sm:$0xff]  ;;  %v4941_v61 = vsel %vm3579_vm14, %v4936_v34, %v4940_v25  ;;  %v5185_v29 = vunpack.c.l.bf16 %v13634_v41 }
 0x338   : > { %v3931_v8 = vadd.f32 %v15382_v10, %v15381_v19  ;;  %v5184_v10 = vunpack.c.h.bf16 %v13601_v40  ;;  %v5575_v56 = vpack.c.bf16 %v5554_v57, %v5553_v30  ;;  %v5369_v19 = vpop.f32.mrf.mxu1  ;;  %v11206_v34 = vld [vmem:[#allocation2 + $0x70] sm:$0xff]  ;;  %v4942_v30 = vshrl.u32 %v13616_v6, 16 }
 0x33a   : > { %v4414_v3 = vadd.f32 %v15384_v14, %v3931_v8  ;;  %v5217_v26 = vmul.f32 %v5184_v10, %v15386_v51  ;;  %v13655_v8 = vld [vmem:[#allocation2 + $0x68] sm:$0xff] }
 0x33b   : > { %v5055_v31 = vpop.f32.mrf.mxu0 }
 0x33c   : > { %v5129_v46 = vadd.f32 %v5055_v31, %v4703_v0  ;;  %v5654_v45 = vpop.f32.mrf.mxu2  ;;  %v5218_v0 = vmul.f32 %v5185_v29, %v15387_v5  ;;  %v13661_v14 = vpop.f32.mrf.mxu3 }
 0x33d   : > { %v13642_v38 = vadd.f32 %v5654_v45, %v5440_v24  ;;  %10227 = vmatmul.msk.bf16.gmra.mxu1 %vm1023_vm4, %v5285_v2  ;;  %v15385_v24 = vld [vmem:[#allocation76_spill] sm:$0xff]  ;;  %15389 = vst [vmem:[#allocation51_spill] sm:$0xff] %v13661_v14 }
 0x33e   : > { %10334 = vmatmul.msk.bf16.gmra.mxu3 %vm1023_vm4, %v5969_v18  ;;  %10204 = vmatmul.msk.bf16.gmra.mxu0 %vm1023_vm4, %v4941_v61  ;;  %v5441_v31 = vadd.f32 %v5367_v27, %v5129_v46  ;;  %v4704_v36 = vadd.f32 %v15385_v24, %v4414_v3  ;;  %v11504_v27 = vld [vmem:[#allocation2 + $0x68] sm:$0xff]   ;;  %v5237_v2 = vpack.c.bf16 %v5218_v0, %v5217_v26  ;;  %v5970_v18 = vshrl.u32 %v13620_v12, 16  ;;  %v15392_v12 = vld [vmem:[#allocation69_spill] sm:$0xff] }
 0x33f   : > { %15383 = vst [vmem:[#allocation65_spill] sm:$0xff] %v13642_v38  ;;  %v5974_v61 = vshll.u32 %v11206_v34, 16  ;;  %v4946_v3 = vshll.u32 %v13655_v8, 16  ;;  %v11447_v10 = vunpack.c.l.bf16 %v11504_v27  ;;  %v11448_v29 = vunpack.c.h.bf16 %v11504_v27 }
 0x340   : > { %v4944_v24 = vor.u32 %v4942_v30, %v4940_v25  ;;  %v5286_v5 = vrot.slane %v5237_v2, 1 }
 0x341   : > { %10248 = vmatmul.msk.bf16.gmra.mxu2 %vm1023_vm4, %v5575_v56  ;;  %v5972_v56 = vor.u32 %v5970_v18, %v5968_v58  ;;  %v5976_v6 = vrot.slane %v5974_v61, 1  ;;  %v4948_v0 = vrot.slane %v4946_v3, 1  ;;  %v5556_v51 = vmul.f32 %v11448_v29, %v12087_v62  ;;  %v13680_v3 = vld [vmem:[#allocation2 + $0x78] sm:$0xff] }
 0x342   : > { %v5287_v25 = vsel %vm4232_vm15, %v5284_v59, %v5286_v5 }
 0x343   : > { %v5057_v37 = vpop.f32.mrf.mxu0  ;;  %v5977_v58 = vsel %vm3579_vm14, %v5972_v56, %v5976_v6  ;;  %v4949_v2 = vsel %vm3579_vm14, %v4944_v24, %v4948_v0  ;;  %v5978_v24 = vshrl.u32 %v11206_v34, 16  ;;  %v4762_v34 = vld [vmem:[#allocation2 + $0x84] sm:$0xf] }
 0x344   : > { %v5130_v45 = vadd.f32 %v5057_v37, %v4704_v36  ;;  %v5657_v46 = vpop.f32.mrf.mxu2  ;;  %v13664_v36 = vld [vmem:[#allocation2 + $0x7c] sm:$0xff]   ;;  %v13684_v56 = vpop.f32.mrf.mxu3 }
 0x345   : > { %v13657_v40 = vadd.f32 %v5657_v46, %v5441_v31  ;;  %v15390_v37 = vld [vmem:[#allocation81_spill] sm:$0xff]  ;;  %v15391_v31 = vld [vmem:[#allocation78_spill] sm:$0xff]  ;;  %v5187_v30 = vunpack.c.l.bf16 %v13664_v36  ;;  %15395 = vst [vmem:[#allocation56_spill] sm:$0xff] %v13684_v56 }
 0x346   : > { %v5442_v57 = vadd.f32 %v5369_v19, %v5130_v45  ;;  %v4705_v46 = vadd.f32 %v15391_v31, %v15390_v37  ;;  %v5372_v19 = vpop.f32.mrf.mxu1  ;;  %v5555_v45 = vmul.f32 %v11447_v10, %v15392_v12  ;;  %v15394_v10 = vld [vmem:[#allocation87_spill] sm:$0xff]  ;;  %v5982_v12 = vshll.u32 %v13680_v3, 16  ;;  %v15399_v56 = vld [vmem:[#allocation85_spill] sm:$0xff] }
 0x347   : > { %15388 = vst [vmem:[#allocation54_spill] sm:$0xff] %v13657_v40  ;;  %v5186_v40 = vunpack.c.h.bf16 %v13634_v41  ;;  %v5220_v29 = vmul.f32 %v5187_v30, %v15394_v10  ;;  %v15397_v37 = vld [vmem:[#allocation83_spill] sm:$0xff]  ;;  %v4950_v10 = vshrl.u32 %v13655_v8, 16 }
 0x348   : > { %v5576_v41 = vpack.c.bf16 %v5556_v51, %v5555_v45 }
 0x349   : > { %v5219_v59 = vmul.f32 %v5186_v40, %v13234_v28  ;;  %v4952_v28 = vor.u32 %v4950_v10, %v4948_v0  ;;  %v5188_v0 = vunpack.c.h.bf16 %v13664_v36  ;;  %v5189_v10 = vunpack.c.l.bf16 %v4762_v34  ;;  %v15403_v36 = vld [vmem:[#allocation91_spill] sm:$0xff] }
 0x34b   : > { %v5060_v26 = vpop.f32.mrf.mxu0  ;;  %v5238_v45 = vpack.c.bf16 %v5220_v29, %v5219_v59 }
 0x34c   : > { %v5131_v38 = vadd.f32 %v5060_v26, %v4705_v46  ;;  %v5659_v27 = vpop.f32.mrf.mxu2  ;;  %v11188_v46 = vld [vmem:[#allocation2 + $0x70] sm:$0xff] }
 0x34d   : > { %v13674_v18 = vadd.f32 %v5659_v27, %v5442_v57  ;;  %10228 = vmatmul.msk.bf16.gmra.mxu1 %vm1023_vm4, %v5287_v25  ;;  %v15396_v57 = vld [vmem:[#allocation84_spill] sm:$0xff] }
 0x34e   : > { %10335 = vmatmul.msk.bf16.gmra.mxu3 %vm1023_vm4, %v5977_v58  ;;  %10205 = vmatmul.msk.bf16.gmra.mxu0 %vm1023_vm4, %v4949_v2  ;;  %v5443_v61 = vadd.f32 %v5372_v19, %v5131_v38  ;;  %v4706_v31 = vadd.f32 %v15397_v37, %v15396_v57  ;;  %v11505_v38 = vld [vmem:[#allocation2 + $0x70] sm:$0xff]   ;;  %v5374_v27 = vpop.f32.mrf.mxu1  ;;  %v4954_v58 = vshll.u32 %v11188_v46, 16  ;;  %v5980_v2 = vor.u32 %v5978_v24, %v5976_v6 }
 0x34f   : > { %15393 = vst [vmem:[#allocation59_spill] sm:$0xff] %v13674_v18  ;;  %v11451_v30 = vunpack.c.l.bf16 %v11505_v38  ;;  %v11452_v57 = vunpack.c.h.bf16 %v11505_v38  ;;  %v5288_v37 = vrot.slane %v5238_v45, 1  ;;  %v15398_v18 = vld [vmem:[#allocation89_spill] sm:$0xff]  ;;  %v15402_v45 = vld [vmem:[#allocation94_spill] sm:$0xff] }
 0x350   : > { %v4707_v14 = vadd.f32 %v15399_v56, %v15398_v18  ;;  %v4956_v29 = vrot.slane %v4954_v58, 1  ;;  %v11208_v58 = vld [vmem:[#allocation2 + $0x80] sm:$0xff] }
 0x351   : > { %10249 = vmatmul.msk.bf16.gmra.mxu2 %vm1023_vm4, %v5576_v41  ;;  %v5984_v41 = vrot.slane %v5982_v12, 1  ;;  %v5558_v6 = vmul.f32 %v11452_v57, %v12087_v62  ;;  %v5289_v12 = vsel %vm4232_vm15, %v5286_v5, %v5288_v37  ;;  %v11189_v5 = vld [vmem:[#allocation2 + $0x78] sm:$0xff] }
 0x352   : > { %v4957_v18 = vsel %vm3579_vm14, %v4952_v28, %v4956_v29  ;;  %v5986_v28 = vshrl.u32 %v13680_v3, 16 }
 0x353   : > { %v5062_v26 = vpop.f32.mrf.mxu0 }
 0x354   : > { %v5132_v51 = vadd.f32 %v5062_v26, %v4706_v31  ;;  %v5662_v19 = vpop.f32.mrf.mxu2  ;;  %v13695_v31 = vpop.f32.mrf.mxu3  ;;  %v15400_v26 = vld [vmem:[#allocation75_spill] sm:$0xff] }
 0x355   : > { %v13690_v40 = vadd.f32 %v5662_v19, %v5443_v61  ;;  %v5985_v61 = vsel %vm3579_vm14, %v5980_v2, %v5984_v41  ;;  %v15401_v19 = vld [vmem:[#allocation93_spill] sm:$0xff] }
 0x356   : > { %v5444_v25 = vadd.f32 %v5374_v27, %v5132_v51  ;;  %v5557_v51 = vmul.f32 %v11451_v30, %v15400_v26  ;;  %v5222_v27 = vmul.f32 %v5189_v10, %v15402_v45  ;;  %v5988_v10 = vor.u32 %v5986_v28, %v5984_v41 }
 0x358   : > { %v5577_v56 = vpack.c.bf16 %v5558_v6, %v5557_v51  ;;  %v4958_v51 = vshrl.u32 %v11188_v46, 16  ;;  %v4962_v6 = vshll.u32 %v11189_v5, 16 }
 0x35a   : > { %v4964_v45 = vrot.slane %v4962_v6, 1  ;;  %v4710_v6 = vadd.f32 %v13305_v17, %v13314_v22  ;;  %v4711_v17 = vadd.f32 %v13325_v33, %v13336_v7 }
 0x35b   : > { %v5065_v59 = vpop.f32.mrf.mxu0 }
 0x35c   : > { %v13700_v24 = vadd.f32 %v5065_v59, %v4707_v14  ;;  %v5664_v8 = vpop.f32.mrf.mxu2  ;;  %v5221_v14 = vmul.f32 %v5188_v0, %v15401_v19  ;;  %v5990_v59 = vshll.u32 %v11208_v58, 16  ;;  %v13718_v26 = vpop.f32.mrf.mxu3 }
 0x35d   : > { %v13704_v38 = vadd.f32 %v5664_v8, %v5444_v25  ;;  %10229 = vmatmul.msk.bf16.gmra.mxu1 %vm1023_vm4, %v5289_v12  ;;  %v15404_v25 = vld [vmem:[#allocation90_spill] sm:$0xff] }
 0x35e   : > { %10336 = vmatmul.msk.bf16.gmra.mxu3 %vm1023_vm4, %v5985_v61  ;;  %10206 = vmatmul.msk.bf16.gmra.mxu0 %vm1023_vm4, %v4957_v18  ;;  %v4708_v30 = vadd.f32 %v15404_v25, %v15403_v36  ;;  %v5239_v34 = vpack.c.bf16 %v5222_v27, %v5221_v14  ;;  %v11506_v61 = vld [vmem:[#allocation2 + $0x78] sm:$0xff]   ;;  %v5992_v18 = vrot.slane %v5990_v59, 1  ;;  %v4763_v36 = vld [vmem:[#allocation2 + $0x88] sm:$0x1]  ;;  %v15406_v25 = vld [vmem:[#allocation96_spill] sm:$0xff] }
 0x35f   : > { %v11455_v8 = vunpack.c.l.bf16 %v11506_v61  ;;  %v11456_v12 = vunpack.c.h.bf16 %v11506_v61  ;;  %v15408_v27 = vld [vmem:[#allocation82_spill] sm:$0xff]  ;;  %v4832_v7 = vunpack.c.l.b16 %v4763_v36 }
 0x360   : > { %v5290_v0 = vrot.slane %v5239_v34, 1  ;;  %v5993_v61 = vsel %vm3579_vm14, %v5988_v10, %v5992_v18  ;;  %v5190_v34 = vunpack.c.l.bf16 %v4763_v36 }
 0x361   : > { %10250 = vmatmul.msk.bf16.gmra.mxu2 %vm1023_vm4, %v5577_v56  ;;  %v4960_v56 = vor.u32 %v4958_v51, %v4956_v29  ;;  %v5559_v3 = vmul.f32 %v11455_v8, %v15408_v27  ;;  %v5560_v19 = vmul.f32 %v11456_v12, %v12087_v62  ;;  %v11209_v51 = vld [vmem:[#allocation2 + $0x88] sm:$0xff] }
 0x362   : > { %v5291_v46 = vsel %vm4232_vm15, %v5288_v37, %v5290_v0  ;;  %v5223_v59 = vmul.f32 %v5190_v34, %v13265_v44  ;;  %v11190_v37 = vld [vmem:[#allocation2 + $0x80] sm:$0xff] }
 0x363   : > { %v5067_v2 = vpop.f32.mrf.mxu0  ;;  %v4965_v41 = vsel %vm3579_vm14, %v4960_v56, %v4964_v45  ;;  %v5578_v28 = vpack.c.bf16 %v5560_v19, %v5559_v3  ;;  %v5998_v56 = vshll.u32 %v11209_v51, 16 }
 0x364   : > { %v13715_v57 = vadd.f32 %v5067_v2, %v4708_v30  ;;  %v15407_v30 = vld [vmem:[#allocation92_spill] sm:$0xff]  ;;  %v13732_v29 = vpop.f32.mrf.mxu3  ;;  %v5240_v10 = vpack.c.bf16 %v5223_v59, %v5223_v59 }
 0x365   : > { %v4709_v2 = vadd.f32 %v15407_v30, %v15406_v25  ;;  %v5994_v25 = vshrl.u32 %v11208_v58, 16  ;;  %v11507_v30 = vld [vmem:[#allocation2 + $0x80] sm:$0xff]  }
 0x366   : > { %15405 = vst [vmem:[#allocation70_spill] sm:$0xff] %v13715_v57  ;;  %v11459_v27 = vunpack.c.l.bf16 %v11507_v30  ;;  %v11460_v19 = vunpack.c.h.bf16 %v11507_v30  ;;  %v5292_v3 = vrot.slane %v5240_v10, 1  ;;  %v4849_v30 = vpack.c.b16 %v4832_v7, %v4832_v7 }
 0x368   : > { %v5562_v58 = vmul.f32 %v11460_v19, %v12087_v62  ;;  %v5293_v10 = vsel %vm4232_vm15, %v5290_v0, %v5292_v3  ;;  %v4712_v0 = vadd.f32 %v13342_v60, %v13351_v42  ;;  %v6002_v19 = vshrl.u32 %v11209_v51, 16  ;;  %v5762_v60 = vld [vmem:[#allocation2 + $0x1c] sm:$0xff]  }
 0x369   : > { %v4978_v36 = vshll.u32 %v4849_v30, 16 }
 0x36b   : > { %v5070_v14 = vpop.f32.mrf.mxu0 }
 0x36c   : > { %v13724_v57 = vadd.f32 %v5070_v14, %v4709_v2  ;;  %v4966_v2 = vshrl.u32 %v11189_v5, 16  ;;  %v4970_v14 = vshll.u32 %v11190_v37, 16  ;;  %v13740_v34 = vpop.f32.mrf.mxu3 }
 0x36d   : > { %10230 = vmatmul.msk.bf16.gmra.mxu1 %vm1023_vm4, %v5291_v46  ;;  %v5996_v46 = vor.u32 %v5994_v25, %v5992_v18 }
 0x36e   : > { %10337 = vmatmul.msk.bf16.gmra.mxu3 %vm1023_vm4, %v5993_v61  ;;  %10207 = vmatmul.msk.bf16.gmra.mxu0 %vm1023_vm4, %v4965_v41  ;;  %v6000_v61 = vrot.slane %v5998_v56, 1  ;;  %v4968_v41 = vor.u32 %v4966_v2, %v4964_v45 }
 0x370   : > { %v6001_v18 = vsel %vm3579_vm14, %v5996_v46, %v6000_v61  ;;  %v11508_v46 = vld [vmem:[#allocation2 + $0x88] sm:$0xff]  }
 0x371   : > { %10251 = vmatmul.msk.bf16.gmra.mxu2 %vm1023_vm4, %v5578_v28  ;;  %v4972_v28 = vrot.slane %v4970_v14, 1 }
 0x373   : > { %v5072_v8 = vpop.f32.mrf.mxu0  ;;  %v4973_v33 = vsel %vm3579_vm14, %v4968_v41, %v4972_v28  ;;  %v4974_v41 = vshrl.u32 %v11190_v37, 16 }
 0x374   : > { %v13738_v12 = vadd.f32 %v5072_v8, %v4710_v6  ;;  %v15409_v6 = vld [vmem:[#allocation88_spill] sm:$0xff]  ;;  %v13760_v2 = vpop.f32.mrf.mxu3 }
 0x375   : > { %v5561_v59 = vmul.f32 %v11459_v27, %v15409_v6  ;;  %v13746_v8 = vld [vmem:[#allocation2 + $0x90] sm:$0x1]  ;;  %v6004_v6 = vor.u32 %v6002_v19, %v6000_v61 }
 0x376   : > { %v5860_v25 = vunpack.c.l.b16 %v13746_v8 }
 0x377   : > { %v5579_v45 = vpack.c.bf16 %v5562_v58, %v5561_v59  ;;  %v4976_v58 = vor.u32 %v4974_v41, %v4972_v28  ;;  %v6189_v28 = vunpack.c.l.bf16 %v5762_v60  ;;  %v4714_v41 = vadd.f32 %v13376_v54, %v13378_v63 }
 0x378   : > { %v5877_v56 = vpack.c.b16 %v5860_v25, %v5860_v25 }
 0x37a   : > { %v6006_v3 = vshll.u32 %v5877_v56, 16  ;;  %v5760_v56 = vld [vmem:[#allocation2 + $0x14] sm:$0xff]  }
 0x37b   : > { %v5075_v22 = vpop.f32.mrf.mxu0  ;;  %v6188_v19 = vunpack.c.h.bf16 %v5760_v56 }
 0x37c   : > { %v13748_v5 = vadd.f32 %v5075_v22, %v4711_v17  ;;  %v11463_v17 = vunpack.c.l.bf16 %v11508_v46  ;;  %v11464_v22 = vunpack.c.h.bf16 %v11508_v46  ;;  %v6008_v59 = vrot.slane %v6006_v3, 1  ;;  %v13771_v30 = vpop.f32.mrf.mxu3  ;;  %v15412_v3 = vld [vmem:[#allocation26_spill] sm:$0xff] }
 0x37d   : > { %10231 = vmatmul.msk.bf16.gmra.mxu1 %vm1023_vm4, %v5293_v10  ;;  %v4980_v10 = vrot.slane %v4978_v36, 1  ;;  %v6222_v46 = vmul.f32 %v6189_v28, %v15412_v3 }
 0x37e   : > { %10338 = vmatmul.msk.bf16.gmra.mxu3 %vm1023_vm4, %v6001_v18  ;;  %10208 = vmatmul.msk.bf16.gmra.mxu0 %vm1023_vm4, %v4973_v33  ;;  %v15410_v18 = vld [vmem:[#allocation97_spill] sm:$0xff]  ;;  %v15411_v33 = vld [vmem:[#allocation95_spill] sm:$0xff]  ;;  %v6009_v37 = vsel %vm3579_vm14, %v6004_v6, %v6008_v59 }
 0x37f   : > { %v4713_v25 = vadd.f32 %v15410_v18, %v13370_v11  ;;  %v5563_v7 = vmul.f32 %v11463_v17, %v15411_v33  ;;  %v4981_v61 = vsel %vm3579_vm14, %v4976_v58, %v4980_v10  ;;  %v6185_v11 = vld [vmem:[#allocation2 + $0x10] sm:$0xe]  ;;  %v15414_v6 = vld [vmem:[#allocation25_spill] sm:$0xff]  ;;  %v15415_v10 = vld [vmem:[#allocation23_spill] sm:$0xff] }
 0x380   : > { %v15413_v17 = vld [vmem:[#allocation24_spill] sm:$0xff]  ;;  %v6221_v59 = vmul.f32 %v6188_v19, %v15414_v6  ;;  %v4717_v6 = vadd.f32 %v13419_v4, %v13416_v53 }
 0x381   : > { %10252 = vmatmul.msk.bf16.gmra.mxu2 %vm1023_vm4, %v5579_v45  ;;  %v5564_v45 = vmul.f32 %v11464_v22, %v12087_v62  ;;  %v6186_v62 = vunpack.c.l.bf16 %v6185_v11 }
 0x383   : > { %v5077_v14 = vpop.f32.mrf.mxu0  ;;  %v6219_v18 = vmul.f32 %v6186_v62, %v15415_v10  ;;  %v4716_v62 = vadd.f32 %v13412_v9, %v13404_v43  ;;  %v15420_v9 = vld [vmem:[#allocation36_spill] sm:$0xff] }
 0x384   : > { %v13762_v27 = vadd.f32 %v5077_v14, %v4712_v0  ;;  %v5580_v0 = vpack.c.bf16 %v5564_v45, %v5563_v7  ;;  %v6187_v14 = vunpack.c.l.bf16 %v5760_v56  ;;  %v15416_v7 = vld [vmem:[#allocation33_spill] sm:$0xff]  ;;  %v15417_v45 = vld [vmem:[#allocation98_spill] sm:$0xff] }
 0x385   : > { %v5764_v56 = vld [vmem:[#allocation2 + $0x24] sm:$0xff]  }
 0x386   : > { %v6220_v22 = vmul.f32 %v6187_v14, %v15413_v17  ;;  %v6191_v63 = vunpack.c.l.bf16 %v5764_v56  ;;  %v15418_v14 = vld [vmem:[#allocation32_spill] sm:$0xff] }
 0x388   : > { %v6224_v19 = vmul.f32 %v6191_v63, %v15418_v14  ;;  %v4719_v63 = vadd.f32 %v13455_v39, %v13439_v13 }
 0x38b   : > { %v5080_v42 = vpop.f32.mrf.mxu0 }
 0x38c   : > { %v13768_v51 = vadd.f32 %v5080_v42, %v4713_v25  ;;  %v6253_v25 = vpack.c.bf16 %v6222_v46, %v6221_v59  ;;  %v6252_v42 = vpack.c.bf16 %v6220_v22, %v6219_v18  ;;  %v15419_v46 = vld [vmem:[#allocation31_spill] sm:$0xff] }
 0x38d   : > { %v5766_v18 = vld [vmem:[#allocation2 + $0x2c] sm:$0xff]  }
 0x38e   : > { %10339 = vmatmul.msk.bf16.gmra.mxu3 %vm1023_vm4, %v6009_v37  ;;  %10209 = vmatmul.msk.bf16.gmra.mxu0 %vm1023_vm4, %v4981_v61  ;;  %v6290_v33 = vrot.slane %v6253_v25, 1  ;;  %v4715_v37 = vadd.f32 %v15417_v45, %v15416_v7  ;;  %v6289_v28 = vrot.slane %v6252_v42, 1  ;;  %v6192_v25 = vunpack.c.h.bf16 %v5764_v56  ;;  %v15421_v7 = vld [vmem:[#allocation28_spill] sm:$0xff] }
 0x38f   : > { %v6193_v43 = vunpack.c.l.bf16 %v5766_v18  ;;  %v4718_v45 = vadd.f32 %v13437_v21, %v15421_v7  ;;  %v6194_v21 = vunpack.c.h.bf16 %v5766_v18  ;;  %v15426_v7 = vld [vmem:[#allocation99_spill] sm:$0xff] }
 0x390   : > { %v6291_v54 = vsel %vm4232_vm15, %v6289_v28, %v6290_v33  ;;  %v6225_v42 = vmul.f32 %v6192_v25, %v15420_v9 }
 0x391   : > { %10253 = vmatmul.msk.bf16.gmra.mxu2 %vm1023_vm4, %v5580_v0  ;;  %v6190_v0 = vunpack.c.h.bf16 %v5762_v60 }
 0x393   : > { %v5082_v36 = vpop.f32.mrf.mxu0 }
 0x394   : > { %v13782_v58 = vadd.f32 %v5082_v36, %v4714_v41  ;;  %v6223_v41 = vmul.f32 %v6190_v0, %v15419_v46  ;;  %v5768_v0 = vld [vmem:[#allocation2 + $0x34] sm:$0xff]   ;;  %v15423_v46 = vld [vmem:[#allocation42_spill] sm:$0xff] }
 0x396   : > { %v6254_v17 = vpack.c.bf16 %v6224_v19, %v6223_v41  ;;  %v6195_v19 = vunpack.c.l.bf16 %v5768_v0 }
 0x398   : > { %v6292_v22 = vrot.slane %v6254_v17, 1  ;;  %v6228_v41 = vmul.f32 %v6195_v19, %v15423_v46 }
 0x39a   : > { %v6293_v60 = vsel %vm4232_vm15, %v6290_v33, %v6292_v22 }
 0x39b   : > { %v5085_v61 = vpop.f32.mrf.mxu0 }
 0x39c   : > { %v13787_v11 = vadd.f32 %v5085_v61, %v4715_v37  ;;  %v15422_v61 = vld [vmem:[#allocation37_spill] sm:$0xff] }
 0x39d   : > { %v6226_v28 = vmul.f32 %v6193_v43, %v15422_v61  ;;  %v15427_v61 = vld [vmem:[#allocation44_spill] sm:$0xff] }
 0x39e   : > { %10346 = vmatmul.msk.bf16.vlgmr.msrb.gmra.mxu0 %vm1023_vm4, %v6291_v54 }
 0x39f   : > { %v6255_v4 = vpack.c.bf16 %v6226_v28, %v6225_v42 }
 0x3a1   : > { %v6294_v53 = vrot.slane %v6255_v4, 1 }
 0x3a3   : > { %v5087_v3 = vpop.f32.mrf.mxu0  ;;  %v6295_v14 = vsel %vm4232_vm15, %v6292_v22, %v6294_v53 }
 0x3a4   : > { %v13795_v36 = vadd.f32 %v5087_v3, %v4716_v62  ;;  %v4720_v62 = vadd.f32 %v13466_v32, %v13449_v50  ;;  %v6196_v50 = vunpack.c.h.bf16 %v5768_v0  ;;  %v15425_v32 = vld [vmem:[#allocation45_spill] sm:$0xff] }
 0x3a6   : > { %v6229_v28 = vmul.f32 %v6196_v50, %v15427_v61  ;;  %v11221_v50 = vld [vmem:[%s15431_s29 + $0x28] sm:$0xff] }
 0x3a7   : > { %7246 = vmatpush.bf16.msrb.mxu3 %v11221_v50  ;;  %v5778_v50 = vld [vmem:[#allocation2 + $0x5c] sm:$0xff]  }
 0x3ab   : > { %v5090_v59 = vpop.f32.mrf.mxu0 }
 0x3ac   : > { %v13799_v10 = vadd.f32 %v5090_v59, %v4717_v6  ;;  %v15424_v6 = vld [vmem:[#allocation41_spill] sm:$0xff]  ;;  %v4721_v59 = vadd.f32 %v13484_v55, %v13463_v20 }
 0x3ad   : > { %v6227_v13 = vmul.f32 %v6194_v21, %v15424_v6  ;;  %v15428_v21 = vld [vmem:[#allocation48_spill] sm:$0xff] }
 0x3ae   : > { %10347 = vmatmul.msk.bf16.gmra.mxu0 %vm1023_vm4, %v6293_v60  ;;  %v5770_v60 = vld [vmem:[#allocation2 + $0x3c] sm:$0xff]  }
 0x3af   : > { %v6256_v39 = vpack.c.bf16 %v6228_v41, %v6227_v13  ;;  %v6197_v9 = vunpack.c.l.bf16 %v5770_v60  ;;  %v15429_v41 = vld [vmem:[#allocation47_spill] sm:$0xff] }
 0x3b1   : > { %v6296_v25 = vrot.slane %v6256_v39, 1  ;;  %v6230_v42 = vmul.f32 %v6197_v9, %v15425_v32  ;;  %v15430_v39 = vld [vmem:[#allocation100_spill] sm:$0xff]  ;;  %v15432_v32 = vld [vmem:[#allocation49_spill] sm:$0xff] }
 0x3b3   : > { %v5092_v37 = vpop.f32.mrf.mxu0  ;;  %v6297_v18 = vsel %vm4232_vm15, %v6294_v53, %v6296_v25  ;;  %v6257_v55 = vpack.c.bf16 %v6230_v42, %v6229_v28  ;;  %v5772_v53 = vld [vmem:[#allocation2 + $0x44] sm:$0xff]  }
 0x3b4   : > { %v13807_v54 = vadd.f32 %v5092_v37, %v4718_v45  ;;  %v4722_v45 = vadd.f32 %v13496_v1, %v15426_v7  ;;  %v6199_v19 = vunpack.c.l.bf16 %v5772_v53  ;;  %v6198_v1 = vunpack.c.h.bf16 %v5770_v60 }
 0x3b5   : > { %v6298_v4 = vrot.slane %v6257_v55, 1  ;;  %v6200_v9 = vunpack.c.h.bf16 %v5772_v53  ;;  %v4726_v7 = vadd.f32 %v13554_v23, %v13517_v48  ;;  %v15436_v53 = vld [vmem:[#allocation39_spill] sm:$0xff] }
 0x3b6   : > { %v6231_v6 = vmul.f32 %v6198_v1, %v15429_v41  ;;  %v5776_v1 = vld [vmem:[#allocation2 + $0x54] sm:$0xff]  }
 0x3b7   : > { %v6299_v0 = vsel %vm4232_vm15, %v6296_v25, %v6298_v4  ;;  %v6233_v42 = vmul.f32 %v6200_v9, %v15432_v32  ;;  %v6203_v48 = vunpack.c.l.bf16 %v5776_v1  ;;  %v15443_v9 = vld [vmem:[#allocation103_spill] sm:$0xff] }
 0x3bb   : > { %v5095_v33 = vpop.f32.mrf.mxu0 }
 0x3bc   : > { %v13811_v56 = vadd.f32 %v5095_v33, %v4719_v63  ;;  %v4723_v63 = vadd.f32 %v13510_v47, %v13486_v52 }
 0x3be   : > { %10348 = vmatmul.msk.bf16.gmra.mxu0 %vm1023_vm4, %v6295_v14 }
 0x3c3   : > { %v5097_v3 = vpop.f32.mrf.mxu0 }
 0x3c4   : > { %v13818_v17 = vadd.f32 %v5097_v3, %v4720_v62  ;;  %v6232_v62 = vmul.f32 %v6199_v19, %v15428_v21  ;;  %v4724_v3 = vadd.f32 %v13524_v15, %v13498_v49  ;;  %v11217_v49 = vld [vmem:[%s15431_s29 + $0x8] sm:$0xff] }
 0x3c5   : > { %7117 = vmatpush.bf16.msrb.mxu2 %v11217_v49  ;;  %v15444_v49 = vld [vmem:[#allocation64_spill] sm:$0xff] }
 0x3c6   : > { %v6258_v52 = vpack.c.bf16 %v6232_v62, %v6231_v6  ;;  %v15438_v62 = vld [vmem:[#allocation102_spill] sm:$0xff]  ;;  %v15440_v6 = vld [vmem:[#allocation53_spill] sm:$0xff] }
 0x3c8   : > { %v6300_v47 = vrot.slane %v6258_v52, 1  ;;  %v6236_v52 = vmul.f32 %v6203_v48, %v15440_v6 }
 0x3ca   : > { %v6301_v60 = vsel %vm4232_vm15, %v6298_v4, %v6300_v47 }
 0x3cb   : > { %v5100_v22 = vpop.f32.mrf.mxu0 }
 0x3cc   : > { %v13823_v43 = vadd.f32 %v5100_v22, %v4721_v59  ;;  %v4725_v59 = vadd.f32 %v13533_v35, %v15430_v39  ;;  %v11219_v35 = vld [vmem:[%s15431_s29 + $0x18] sm:$0xff] }
 0x3cd   : > { %7064 = vmatpush.bf16.msrb.mxu1 %v11219_v35 }
 0x3ce   : > { %10349 = vmatmul.msk.bf16.gmra.mxu0 %vm1023_vm4, %v6297_v18  ;;  %v5774_v18 = vld [vmem:[#allocation2 + $0x4c] sm:$0xff]  }
 0x3cf   : > { %v6201_v15 = vunpack.c.l.bf16 %v5774_v18  ;;  %v6202_v23 = vunpack.c.h.bf16 %v5774_v18 }
 0x3d3   : > { %v5102_v37 = vpop.f32.mrf.mxu0 }
 0x3d4   : > { %v13831_v20 = vadd.f32 %v5102_v37, %v4722_v45  ;;  %v15433_v37 = vld [vmem:[#allocation50_spill] sm:$0xff] }
 0x3d5   : > { %v6234_v61 = vmul.f32 %v6201_v15, %v15433_v37  ;;  %v4729_v15 = vadd.f32 %v15444_v49, %v15443_v9  ;;  %v13904_v49 = vpop.f32.mrf.mxu1 }
 0x3d7   : > { %v6259_v55 = vpack.c.bf16 %v6234_v61, %v6233_v42  ;;  %v6205_v42 = vunpack.c.l.bf16 %v5778_v50  ;;  %v15447_v61 = vld [vmem:[#allocation40_spill] sm:$0xff] }
 0x3d9   : > { %v6302_v4 = vrot.slane %v6259_v55, 1  ;;  %v4730_v55 = vadd.f32 %v13640_v16, %v15447_v61  ;;  %v15459_v61 = vld [vmem:[#allocation46_spill] sm:$0xff] }
 0x3db   : > { %v5105_v33 = vpop.f32.mrf.mxu0  ;;  %v6303_v21 = vsel %vm4232_vm15, %v6300_v47, %v6302_v4 }
 0x3dc   : > { %v13835_v14 = vadd.f32 %v5105_v33, %v4723_v63  ;;  %v15435_v63 = vld [vmem:[#allocation101_spill] sm:$0xff] }
 0x3dd   : > { %v4727_v33 = vadd.f32 %v15436_v53, %v15435_v63  ;;  %v15448_v53 = vld [vmem:[#allocation57_spill] sm:$0xff] }
 0x3de   : > { %10350 = vmatmul.msk.bf16.gmra.mxu0 %vm1023_vm4, %v6299_v0 }
 0x3e3   : > { %v5107_v46 = vpop.f32.mrf.mxu0 }
 0x3e4   : > { %v13843_v13 = vadd.f32 %v5107_v46, %v4724_v3  ;;  %v15439_v3 = vld [vmem:[#allocation38_spill] sm:$0xff] }
 0x3e5   : > { %v4728_v46 = vadd.f32 %v15439_v3, %v15438_v62  ;;  %v5780_v62 = vld [vmem:[#allocation2 + $0x64] sm:$0xff]  }
 0x3e6   : > { %v6207_v6 = vunpack.c.l.bf16 %v5780_v62 }
 0x3eb   : > { %v5110_v22 = vpop.f32.mrf.mxu0 }
 0x3ec   : > { %v13847_v25 = vadd.f32 %v5110_v22, %v4725_v59  ;;  %v15442_v59 = vld [vmem:[#allocation52_spill] sm:$0xff] }
 0x3ed   : > { %v6235_v22 = vmul.f32 %v6202_v23, %v15442_v59 }
 0x3ee   : > { %10351 = vmatmul.msk.bf16.gmra.mxu0 %vm1023_vm4, %v6301_v60 }
 0x3ef   : > { %v6260_v60 = vpack.c.bf16 %v6236_v52, %v6235_v22  ;;  %v15454_v52 = vld [vmem:[#allocation62_spill] sm:$0xff]  ;;  %v15455_v22 = vld [vmem:[#allocation63_spill] sm:$0xff] }
 0x3f1   : > { %v6304_v35 = vrot.slane %v6260_v60, 1  ;;  %v6240_v60 = vmul.f32 %v6207_v6, %v15455_v22  ;;  %v15460_v6 = vld [vmem:[#allocation43_spill] sm:$0xff] }
 0x3f3   : > { %v5112_v45 = vpop.f32.mrf.mxu0  ;;  %v6305_v18 = vsel %vm4232_vm15, %v6302_v4, %v6304_v35  ;;  %v15450_v4 = vmov 0 }
 0x3f4   : > { %v13864_v28 = vadd.f32 %v5112_v45, %v4726_v7  ;;  %v6204_v7 = vunpack.c.h.bf16 %v5776_v1  ;;  %v15446_v45 = vld [vmem:[#allocation58_spill] sm:$0xff]  ;;  %v15451_v4 = vsel %vm13891_vm8, 4294967295, %v15450_v4  ;;  %v15453_v1 = vmov 0  }
 0x3f5   : > { %v6238_v37 = vmul.f32 %v6205_v42, %v15446_v45  ;;  %15452 = vst [vmem:[#allocation77_spill] sm:$0xff] %v15451_v4  ;;  %v15457_v42 = vld [vmem:[#allocation51_spill] sm:$0xff] }
 0x3f6   : > { %15434 = vst [vmem:[#allocation60_spill] sm:$0xff] %v13864_v28 }
 0x3f7   : > { %676 = vst.msk [vmem:[#allocation3] sm:$0xf] %vm675_vm3, %v15453_v1 }
 0x3f8   : > { %688 = vst.msk [vmem:[#allocation3 + $0x28] sm:$0x1] %vm677_vm7, %v15453_v1 }
 0x3fb   : > { %v5115_v0 = vpop.f32.mrf.mxu0 }
 0x3fc   : > { %v13868_v19 = vadd.f32 %v5115_v0, %v4727_v33  ;;  %v6237_v33 = vmul.f32 %v6204_v7, %v15448_v53 }
 0x3fe   : > { %15437 = vst [vmem:[#allocation71_spill] sm:$0xff] %v13868_v19  ;;  %10352 = vmatmul.msk.bf16.gmra.mxu0 %vm1023_vm4, %v6303_v21  ;;  %v679_v21 = vld [vmem:[#allocation3 + $0x4] sm:$0x1]  ;;  %v6261_v48 = vpack.c.bf16 %v6238_v37, %v6237_v33  ;;  %v13915_v37 = vpop.f32.mrf.mxu3  ;;  %v15474_v19 = vld [vmem:[#allocation79_spill] sm:$0xff] }
 0x3ff   : > { %v680_v16 = vsel %vm13891_vm8, 0, %v679_v21  ;;  %v5782_v21 = vld [vmem:[#allocation2 + $0x6c] sm:$0xff]  }
 0x400   : > { %681 = vst [vmem:[#allocation3 + $0x4] sm:$0x1] %v680_v16  ;;  %v6306_v23 = vrot.slane %v6261_v48, 1  ;;  %v6208_v16 = vunpack.c.h.bf16 %v5780_v62 }
 0x403   : > { %v5117_v41 = vpop.f32.mrf.mxu0 }
 0x404   : > { %v13875_v39 = vadd.f32 %v5117_v41, %v4728_v46  ;;  %v6307_v46 = vsel %vm4232_vm15, %v6304_v35, %v6306_v23  ;;  %v6206_v41 = vunpack.c.h.bf16 %v5778_v50  ;;  %v13913_v50 = vld [vmem:[%s15458_s12] ss:$0 sm:$0xff] }
 0x406   : > { %15441 = vst [vmem:[#allocation61_spill] sm:$0xff] %v13875_v39  ;;  %v6239_v59 = vmul.f32 %v6206_v41, %v15454_v52  ;;  %v6159_v39 = vadd.f32 %v13760_v2, %v13690_v40  ;;  %v11216_v2 = vld [vmem:[%s15431_s29] sm:$0xff] }
 0x407   : > { %7118 = vmatpush.bf16.msrb.mxu2 %v11216_v2 }
 0x40b   : > { %v5120_v47 = vpop.f32.mrf.mxu0 }
 0x40c   : > { %v13880_v32 = vadd.f32 %v5120_v47, %v4729_v15  ;;  %v13906_v15 = vpop.f32.mrf.mxu2  ;;  %v6262_v47 = vpack.c.bf16 %v6240_v60, %v6239_v59 }
 0x40e   : > { %15445 = vst [vmem:[#allocation73_spill] sm:$0xff] %v13880_v32  ;;  %10353 = vmatmul.msk.bf16.gmra.mxu0 %vm1023_vm4, %v6305_v18  ;;  %v15456_v18 = vld [vmem:[#allocation55_spill] sm:$0xff]  ;;  %v6308_v45 = vrot.slane %v6262_v47, 1  ;;  %v13961_v32 = vld [vmem:[#allocation2 + $0x7c] sm:$0xff]  }
 0x40f   : > { %v6153_v7 = vadd.f32 %v15457_v42, %v15456_v18  ;;  %v15462_v18 = vld [vmem:[#allocation67_spill] sm:$0xff] }
 0x410   : > { %v6309_v48 = vsel %vm4232_vm15, %v6306_v23, %v6308_v45  ;;  %v6241_v42 = vmul.f32 %v6208_v16, %v15462_v18  ;;  %v15463_v23 = vld [vmem:[#allocation65_spill] sm:$0xff]  ;;  %v6210_v18 = vunpack.c.h.bf16 %v5782_v21 }
 0x411   : > { %v6156_v62 = vadd.f32 %v13718_v26, %v15463_v23 }
 0x413   : > { %v5122_v63 = vpop.f32.mrf.mxu0 }
 0x414   : > { %v13888_v0 = vadd.f32 %v5122_v63, %v4730_v55  ;;  %v6155_v55 = vadd.f32 %v13695_v31, %v15459_v61  ;;  %v13923_v41 = vpop.f32.mrf.mxu2  ;;  %v6209_v31 = vunpack.c.l.bf16 %v5782_v21  ;;  %v15464_v61 = vld [vmem:[#allocation68_spill] sm:$0xff] }
 0x416   : > { %15449 = vst [vmem:[#allocation66_spill] sm:$0xff] %v13888_v0 }
 0x41b   : > { %v6385_v3 = vpop.f32.mrf.mxu0 }
 0x41c   : > { %v6465_v35 = vadd.f32 %v6385_v3, %v6153_v7  ;;  %v15461_v3 = vld [vmem:[#allocation56_spill] sm:$0xff]  ;;  %v13940_v16 = vpop.f32.mrf.mxu2 }
 0x41d   : > { %v6154_v52 = vadd.f32 %v15461_v3, %v15460_v6 }
 0x41e   : > { %10354 = vmatmul.msk.bf16.gmra.mxu0 %vm1023_vm4, %v6307_v46  ;;  %v6497_v53 = vadd.f32 %v13913_v50, %v6465_v35  ;;  %v13921_v46 = vpop.f32.mrf.mxu1 }
 0x420   : > { %v6529_v22 = vmax.f32 %v6497_v53, 0.0 }
 0x423   : > { %v6387_v9 = vpop.f32.mrf.mxu0 }
 0x424   : > { %v6466_v60 = vadd.f32 %v6387_v9, %v6154_v52  ;;  %v13949_v23 = vpop.f32.mrf.mxu2 }
 0x426   : > { %v6498_v6 = vadd.f32 %v13913_v50, %v6466_v60  ;;  %v13938_v53 = vpop.f32.mrf.mxu1 }
 0x428   : > { %v6530_v3 = vmax.f32 %v6498_v6, 0.0 }
 0x42b   : > { %v6390_v63 = vpop.f32.mrf.mxu0 }
 0x42c   : > { %v6467_v33 = vadd.f32 %v6390_v63, %v6155_v55  ;;  %v6242_v55 = vmul.f32 %v6209_v31, %v15464_v61  ;;  %v13933_v63 = vpop.f32.mrf.mxu3  ;;  %v5784_v31 = vld [vmem:[#allocation2 + $0x74] sm:$0xff]  }
 0x42e   : > { %v6499_v59 = vadd.f32 %v13913_v50, %v6467_v33  ;;  %10355 = vmatmul.msk.bf16.gmra.mxu0 %vm1023_vm4, %v6309_v48  ;;  %v6263_v48 = vpack.c.bf16 %v6242_v55, %v6241_v42  ;;  %v6211_v42 = vunpack.c.l.bf16 %v5784_v31  ;;  %v15465_v55 = vld [vmem:[#allocation72_spill] sm:$0xff] }
 0x42f   : > { %v6243_v6 = vmul.f32 %v6210_v18, %v15465_v55  ;;  %v15468_v18 = vmov 0 }
 0x430   : > { %v6531_v47 = vmax.f32 %v6499_v59, 0.0  ;;  %v6310_v26 = vrot.slane %v6263_v48, 1  ;;  %v15469_v18 = vsel %vm13965_vm10, 4294967295, %v15468_v18 }
 0x431   : > { %15470 = vst [vmem:[#allocation76_spill] sm:$0xff] %v15469_v18  ;;  %v15475_v18 = vld [vmem:[#allocation80_spill] sm:$0xff] }
 0x432   : > { %v6561_v7 = vmax.f32 %v6529_v22, %v6531_v47  ;;  %v6311_v60 = vsel %vm4232_vm15, %v6308_v45, %v6310_v26  ;;  %v15467_v45 = vld [vmem:[#allocation54_spill] sm:$0xff] }
 0x433   : > { %v6392_v35 = vpop.f32.mrf.mxu0 }
 0x434   : > { %6563 = vst.msk [vmem:[#allocation7] sm:$0xff] %vm849_vm0, %v6561_v7  ;;  %v6468_v33 = vadd.f32 %v6392_v35, %v6156_v62  ;;  %v13944_v47 = vpop.f32.mrf.mxu3  ;;  %v13947_v7 = vpop.f32.mrf.mxu1 }
 0x436   : > { %v6500_v9 = vadd.f32 %v13913_v50, %v6468_v33  ;;  %v15466_v33 = vld [vmem:[#allocation74_spill] sm:$0xff] }
 0x437   : > { %v6244_v48 = vmul.f32 %v6211_v42, %v15466_v33 }
 0x438   : > { %v6532_v52 = vmax.f32 %v6500_v9, 0.0 }
 0x43a   : > { %v6562_v59 = vmax.f32 %v6530_v3, %v6532_v52  ;;  %v6157_v52 = vadd.f32 %v13732_v29, %v15467_v45  ;;  %v6720_v29 = vld [vmem:[#allocation3 + $0x4] sm:$0xf]  ;;  %v15471_v45 = vld [vmem:[#allocation59_spill] sm:$0xff] }
 0x43b   : > { %v6395_v22 = vpop.f32.mrf.mxu0 }
 0x43c   : > { %6564 = vst.msk [vmem:[#allocation7 + $0x8] sm:$0xff] %vm849_vm0, %v6562_v59  ;;  %v6264_v59 = vpack.c.bf16 %v6244_v48, %v6243_v6  ;;  %v6469_v1 = vadd.f32 %v6395_v22, %v6157_v52  ;;  %v13971_v22 = vpop.f32.mrf.mxu2  ;;  %v6212_v48 = vunpack.c.h.bf16 %v5784_v31  ;;  %v6158_v52 = vadd.f32 %v13740_v34, %v15471_v45  ;;  %v15473_v31 = vld [vmem:[#allocation21_spill] sm:$0xff] }
 0x43e   : > { %10356 = vmatmul.msk.bf16.gmra.mxu0 %vm1023_vm4, %v6311_v60  ;;  %v13955_v60 = vpop.f32.mrf.mxu3  ;;  %v6501_v6 = vadd.f32 %v13913_v50, %v6469_v1  ;;  %v6245_v28 = vmul.f32 %v6212_v48, %v15474_v19 }
 0x443   : > { %v6593_v62 = vld [vmem:[#allocation7] ss:$2 sm:$0xff]  ;;  %v6609_v35 = vld [vmem:[#allocation7 + $0x1] ss:$2 sm:$0xff]  ;;  %v6397_v61 = vpop.f32.mrf.mxu0 }
 0x444   : > { %v6624_v9 = vmax.f32 %v6593_v62, %v6609_v35  ;;  %v6312_v62 = vrot.slane %v6264_v59, 1  ;;  %v13969_v35 = vpop.f32.mrf.mxu1  ;;  %v6470_v1 = vadd.f32 %v6397_v61, %v6158_v52  ;;  %v14002_v2 = vpop.f32.mrf.mxu2 }
 0x446   : > { %v6632_v3 = vpack.c.bf16 %v6624_v9, %v6624_v9  ;;  %v6313_v33 = vsel %vm4232_vm15, %v6310_v26, %v6312_v62  ;;  %v6213_v9 = vunpack.c.l.bf16 %v13961_v32  ;;  %v6502_v61 = vadd.f32 %v13913_v50, %v6470_v1 }
 0x448   : > { %v6641_v21 = vshrl.u32 %v6632_v3, 16  ;;  %v6644_v0 = vshll.u32 %v6632_v3, 16 }
 0x44a   : > { %v13957_v4 = vrot.slane %v6641_v21, 7  ;;  %v15472_v21 = vld [vmem:[#allocation20_spill] sm:$0xff] }
 0x44b   : > { %v6400_v42 = vpop.f32.mrf.mxu0  ;;  %v15215_v26 = vand.u32 7, %v15472_v21 }
 0x44c   : > { %v6646_v55 = vor.u32 %v6644_v0, %v13957_v4  ;;  %v6471_v40 = vadd.f32 %v6400_v42, %v6159_v39  ;;  %v6533_v39 = vmax.f32 %v6501_v6, 0.0  ;;  %v15214_v42 = vand.u32 7, %v15473_v31 }
 0x44d   : > { %vm6833_vm6 = vcmp.ne.s32.totalorder %v15215_v26, 0 }
 0x44e   : > { %v6721_v3 = vsel %vm13965_vm10, %v6646_v55, %v6720_v29  ;;  %v6503_v0 = vadd.f32 %v13913_v50, %v6471_v40  ;;  %10357 = vmatmul.msk.bf16.gmra.mxu0 %vm1023_vm4, %v6313_v33  ;;  %v6246_v29 = vmul.f32 %v6213_v9, %v15475_v18  ;;  %v13990_v55 = vpop.f32.mrf.mxu3  ;;  %v6160_v40 = vadd.f32 %v13771_v30, %v13704_v38  ;;  %v14000_v18 = vpop.f32.mrf.mxu1 }
 0x44f   : > { %6722 = vst [vmem:[#allocation3 + $0x4] sm:$0xf] %v6721_v3  ;;  %vm6834_vm11 = vcmp.ne.s32.totalorder %v15214_v42, 0  ;;  %v15476_v38 = vmov 0.0  }
 0x450   : > { %v6535_v59 = vmax.f32 %v6503_v0, 0.0  ;;  %v6265_v6 = vpack.c.bf16 %v6246_v29, %v6245_v28  ;;  %v14006_v30 = vsel %vm6833_vm6, 1.0, %v15476_v38  ;;  %v14009_v9 = vsel %vm6834_vm11, 1.0, %v15476_v38 }
 0x451   : > { %15477 = vst [vmem:[#allocation81_spill] sm:$0xff] %v14006_v30  ;;  %v6534_v0 = vmax.f32 %v6502_v61, 0.0  ;;  %v6214_v61 = vunpack.c.h.bf16 %v13961_v32  ;;  %v5447_v32 = vadd.f32 %v13938_v53, %v13724_v57  ;;  %v5790_v53 = vld [vmem:[#allocation2 + $0x8c] sm:$0xf] }
 0x452   : > { %v6565_v34 = vmax.f32 %v6533_v39, %v6535_v59  ;;  %15478 = vst [vmem:[#allocation78_spill] sm:$0xff] %v14009_v9  ;;  %v6314_v59 = vrot.slane %v6265_v6, 1  ;;  %v5445_v6 = vadd.f32 %v13904_v49, %v13700_v24  ;;  %v15481_v49 = vld [vmem:[#allocation70_spill] sm:$0xff] }
 0x453   : > { %v6402_v33 = vpop.f32.mrf.mxu0 }
 0x454   : > { %6567 = vst.msk [vmem:[#allocation7 + $0x10] sm:$0xff] %vm849_vm0, %v6565_v34  ;;  %v6472_v19 = vadd.f32 %v6402_v33, %v6160_v40  ;;  %v5788_v34 = vld [vmem:[#allocation2 + $0x84] sm:$0xff]  }
 0x456   : > { %v6504_v48 = vadd.f32 %v13913_v50, %v6472_v19  ;;  %v6929_v3 = vld [vmem:[#allocation3] sm:$0xff]   ;;  %v14016_v19 = vpop.f32.mrf.mxu3 }
 0x457   : > { %v6937_v45 = vunpack.c.l.bf16 %v6929_v3  ;;  %v14011_v52 = vunpack.c.h.bf16 %v6929_v3  ;;  %v6315_v3 = vsel %vm4232_vm15, %v6312_v62, %v6314_v59 }
 0x458   : > { %v6536_v39 = vmax.f32 %v6504_v48, 0.0  ;;  %v6215_v48 = vunpack.c.l.bf16 %v5788_v34 }
 0x459   : > { %v6953_v28 = vmul.f32 %v14006_v30, %v6937_v45  ;;  %v6954_v1 = vmul.f32 %v14009_v9, %v14011_v52  ;;  %v14025_v45 = vpop.f32.mrf.mxu1  ;;  %v5446_v30 = vadd.f32 %v13921_v46, %v15481_v49 }
 0x45a   : > { %v6566_v29 = vmax.f32 %v6534_v0, %v6536_v39  ;;  %v14027_v0 = vpop.f32.mrf.mxu2  ;;  %v15479_v39 = vld [vmem:[#allocation86_spill] sm:$0xff] }
 0x45b   : > { %v6405_v40 = vpop.f32.mrf.mxu0  ;;  %v6961_v33 = vpack.c.bf16 %v6954_v1, %v6953_v28  ;;  %v6247_v28 = vmul.f32 %v6214_v61, %v15479_v39  ;;  %v15480_v1 = vld [vmem:[#allocation87_spill] sm:$0xff] }
 0x45c   : > { %6568 = vst.msk [vmem:[#allocation7 + $0x18] sm:$0xff] %vm849_vm0, %v6566_v29  ;;  %v6248_v29 = vmul.f32 %v6215_v48, %v15480_v1  ;;  %v5736_v48 = vadd.f32 %v13923_v41, %v5446_v30  ;;  %v6217_v1 = vunpack.c.l.bf16 %v5790_v53 }
 0x45d   : > { %10418 = vmatmul.msk.bf16.vlgmr.msrb.gmra.mxu2 %vm849_vm0, %v6961_v33  ;;  %v5735_v33 = vadd.f32 %v13906_v15, %v5445_v6 }
 0x45e   : > { %10358 = vmatmul.msk.bf16.gmra.mxu0 %vm1023_vm4, %v6315_v3  ;;  %v6266_v62 = vpack.c.bf16 %v6248_v29, %v6247_v28  ;;  %v5737_v3 = vadd.f32 %v13940_v16, %v5447_v32  ;;  %v14035_v26 = vpop.f32.mrf.mxu3  ;;  %v5448_v16 = vadd.f32 %v13947_v7, %v13738_v12  ;;  %v6162_v30 = vadd.f32 %v13933_v63, %v5736_v48  ;;  %v15482_v7 = vld [vmem:[#allocation93_spill] sm:$0xff] }
 0x45f   : > { %v6161_v24 = vadd.f32 %v13915_v37, %v5735_v33 }
 0x460   : > { %v6316_v61 = vrot.slane %v6266_v62, 1  ;;  %v6163_v57 = vadd.f32 %v13944_v47, %v5737_v3  ;;  %v5738_v41 = vadd.f32 %v13949_v23, %v5448_v16  ;;  %v15483_v62 = vld [vmem:[#allocation94_spill] sm:$0xff] }
 0x461   : > { %v6473_v9 = vadd.f32 %v6405_v40, %v6161_v24  ;;  %v14041_v39 = vpop.f32.mrf.mxu1  ;;  %v6216_v40 = vunpack.c.h.bf16 %v5788_v34  ;;  %v6250_v3 = vmul.f32 %v6217_v1, %v15483_v62 }
 0x462   : > { %v14043_v15 = vpop.f32.mrf.mxu2  ;;  %v6317_v46 = vsel %vm4232_vm15, %v6314_v59, %v6316_v61  ;;  %v6164_v34 = vadd.f32 %v13955_v60, %v5738_v41 }
 0x463   : > { %v6407_v42 = vpop.f32.mrf.mxu0  ;;  %v6505_v37 = vadd.f32 %v13913_v50, %v6473_v9  ;;  %v6249_v9 = vmul.f32 %v6216_v40, %v15482_v7  ;;  %v6595_v53 = vld [vmem:[#allocation7 + $0x10] ss:$2 sm:$0xff]  ;;  %v6611_v60 = vld [vmem:[#allocation7 + $0x11] ss:$2 sm:$0xff] }
 0x464   : > { %v6474_v32 = vadd.f32 %v6407_v42, %v6162_v30  ;;  %v11220_v42 = vld [vmem:[%s15431_s29 + $0x20] sm:$0xff] }
 0x465   : > { %v6537_v33 = vmax.f32 %v6505_v37, 0.0  ;;  %7247 = vmatpush.bf16.msrb.mxu3 %v11220_v42  ;;  %v6625_v37 = vmax.f32 %v6595_v53, %v6611_v60 }
 0x466   : > { %v14054_v47 = vpop.f32.mrf.mxu3  ;;  %v6506_v49 = vadd.f32 %v13913_v50, %v6474_v32  ;;  %v6218_v32 = vunpack.c.l.bf16 %v13746_v8  ;;  %v5451_v8 = vadd.f32 %v14025_v45, %v13768_v51 }
 0x469   : > { %v14059_v23 = vpop.f32.mrf.mxu1 }
 0x46a   : > { %v14061_v63 = vpop.f32.mrf.mxu2 }
 0x46b   : > { %v6410_v6 = vpop.f32.mrf.mxu0 }
 0x46c   : > { %v6475_v28 = vadd.f32 %v6410_v6, %v6163_v57  ;;  %v11218_v57 = vld [vmem:[%s15431_s29 + $0x10] sm:$0xff]  ;;  %v6267_v6 = vpack.c.bf16 %v6250_v3, %v6249_v9  ;;  %v5449_v9 = vadd.f32 %v13969_v35, %v13748_v5  ;;  %v5741_v5 = vadd.f32 %v14027_v0, %v5451_v8 }
 0x46d   : > { %7065 = vmatpush.bf16.msrb.mxu1 %v11218_v57 }
 0x46e   : > { %v6507_v29 = vadd.f32 %v13913_v50, %v6475_v28  ;;  %10359 = vmatmul.msk.bf16.gmra.mxu0 %vm1023_vm4, %v6317_v46  ;;  %v6538_v28 = vmax.f32 %v6506_v49, 0.0  ;;  %v6318_v40 = vrot.slane %v6267_v6, 1  ;;  %v14072_v1 = vpop.f32.mrf.mxu3  ;;  %v5739_v3 = vadd.f32 %v13971_v22, %v5449_v9  ;;  %v11212_v9 = vld [vmem:[#allocation3] sm:$0xff] }
 0x46f   : > { %v5452_v22 = vadd.f32 %v14041_v39, %v13782_v58 }
 0x470   : > { %v6539_v12 = vmax.f32 %v6507_v29, 0.0  ;;  %v6633_v29 = vpack.c.bf16 %v6625_v37, %v6625_v37  ;;  %v6165_v57 = vadd.f32 %v13990_v55, %v5739_v3 }
 0x472   : > { %v6569_v59 = vmax.f32 %v6537_v33, %v6539_v12  ;;  %v6319_v33 = vsel %vm4232_vm15, %v6316_v61, %v6318_v40  ;;  %v14077_v12 = vpop.f32.mrf.mxu1  ;;  %v14079_v7 = vpop.f32.mrf.mxu2  ;;  %v6649_v62 = vshrl.u32 %v6633_v29, 16  ;;  %v6652_v35 = vshll.u32 %v6633_v29, 16 }
 0x473   : > { %v6412_v24 = vpop.f32.mrf.mxu0 }
 0x474   : > { %6571 = vst.msk [vmem:[#allocation7 + $0x20] sm:$0xff] %vm849_vm0, %v6569_v59  ;;  %v6476_v48 = vadd.f32 %v6412_v24, %v6164_v34  ;;  %v6251_v59 = vmul.f32 %v6218_v32, %v13265_v44  ;;  %v5450_v44 = vadd.f32 %v14000_v18, %v13762_v27  ;;  %v6167_v18 = vadd.f32 %v14035_v26, %v5741_v5  ;;  %v15486_v26 = vld [vmem:[#allocation22_spill] sm:$0xff] }
 0x476   : > { %v6508_v16 = vadd.f32 %v13913_v50, %v6476_v48  ;;  %v14088_v61 = vpop.f32.mrf.mxu3  ;;  %v6651_v48 = vrot.slane %v6649_v62, 7  ;;  %v6268_v53 = vpack.c.bf16 %v6251_v59, %v6251_v59  ;;  %v5740_v55 = vadd.f32 %v14002_v2, %v5450_v44  ;;  %v15485_v62 = vld [vmem:[#allocation27_spill] sm:$0xff] }
 0x477   : > { %v6755_v3 = vand.u32 7, %v15485_v62  ;;  %v6762_v59 = vand.u32 7, %v15486_v26 }
 0x478   : > { %v6540_v46 = vmax.f32 %v6508_v16, 0.0  ;;  %v6654_v45 = vor.u32 %v6652_v35, %v6651_v48  ;;  %v6320_v0 = vrot.slane %v6268_v53, 1 }
 0x479   : > { %vm6883_vm12 = vcmp.ne.s32.totalorder %v6755_v3, 7  ;;  %vm6884_vm1 = vcmp.ne.s32.totalorder %v6762_v59, 7  ;;  %vm14132_vm6 = vcmp.ne.s32.totalorder %v6762_v59, 0 }
 0x47a   : > { %v6570_v41 = vmax.f32 %v6538_v28, %v6540_v46  ;;  %v14096_v16 = vpop.f32.mrf.mxu1  ;;  %v14098_v51 = vpop.f32.mrf.mxu2  ;;  %v5742_v28 = vadd.f32 %v14043_v15, %v5452_v22  ;;  %v6647_v46 = vrot.slane %v13957_v4, 4  ;;  %v6166_v15 = vadd.f32 %v14016_v19, %v5740_v55 }
 0x47b   : > { %v6415_v30 = vpop.f32.mrf.mxu0  ;;  %v6321_v4 = vsel %vm4232_vm15, %v6318_v40, %v6320_v0  ;;  %v15487_v19 = vand.u32 7, %v15472_v21  ;;  %v7140_v40 = vld [vmem:[#allocation3] sm:$0xe]  ;;  %v10372_v35 = vsel %vm6883_vm12, 1.0, %v15476_v38  ;;  %v14137_v22 = vsel %vm6884_vm1, 1.0, %v15476_v38 }
 0x47c   : > { %6572 = vst.msk [vmem:[#allocation7 + $0x28] sm:$0xff] %vm849_vm0, %v6570_v41  ;;  %v6477_v6 = vadd.f32 %v6415_v30, %v6165_v57  ;;  %v6656_v30 = vrot.slane %v6651_v48, 4  ;;  %v6655_v2 = vsel %vm12057_vm9, %v6647_v46, %v6654_v45  ;;  %v6168_v8 = vadd.f32 %v14054_v47, %v5742_v28 }
 0x47d   : > { %6723 = vst.msk [vmem:[#allocation3 + $0x8] sm:$0xf] %vm675_vm3, %v6655_v2  ;;  %vm6881_vm5 = vcmp.ne.s32.totalorder %v15487_v19, 7  ;;  %v15488_v57 = vand.u32 7, %v15473_v31  ;;  %v7001_v47 = vshll.u32 %v11212_v9, 16  ;;  %v7162_v55 = vrot.slane %v10372_v35, 6 }
 0x47e   : > { %10360 = vmatmul.msk.bf16.gmra.mxu0 %vm1023_vm4, %v6319_v33  ;;  %v6509_v58 = vadd.f32 %v13913_v50, %v6477_v6  ;;  %v10370_v6 = vsel %vm6881_vm5, 1.0, %v15476_v38  ;;  %v7141_v0 = vunpack.c.l.bf16 %v7140_v40  ;;  %v6999_v19 = vshrl.u32 %v11212_v9, 16 }
 0x47f   : > { %vm6882_vm7 = vcmp.ne.s32.totalorder %v15488_v57, 7  ;;  %v7003_v2 = vrot.slane %v7001_v47, 1 }
 0x480   : > { %v10371_v28 = vsel %vm6882_vm7, 1.0, %v15476_v38 }
 0x482   : > { %v14140_v45 = vpop.f32.mrf.mxu1 }
 0x483   : > { %v6597_v34 = vld [vmem:[#allocation7 + $0x20] ss:$2 sm:$0xff]  ;;  %v6613_v24 = vld [vmem:[#allocation7 + $0x21] ss:$2 sm:$0xff]  ;;  %v6417_v49 = vpop.f32.mrf.mxu0 }
 0x484   : > { %v6626_v42 = vmax.f32 %v6597_v34, %v6613_v24  ;;  %v14115_v34 = vpop.f32.mrf.mxu3  ;;  %v6478_v53 = vadd.f32 %v6417_v49, %v6166_v15  ;;  %v14142_v49 = vpop.f32.mrf.mxu2 }
 0x486   : > { %v6634_v60 = vpack.c.bf16 %v6626_v42, %v6626_v42  ;;  %v6541_v42 = vmax.f32 %v6509_v58, 0.0  ;;  %v7160_v58 = vrot.slane %v10371_v28, 6 }
 0x488   : > { %v6658_v37 = vshrl.u32 %v6634_v60, 16  ;;  %v6661_v27 = vshll.u32 %v6634_v60, 16  ;;  %v14168_v26 = vsel %vm4065_vm13, %v7160_v58, %v7162_v55  ;;  %v7004_v60 = vor.u32 %v7003_v2, %v6999_v19 }
 0x48a   : > { %v14103_v41 = vrot.slane %v6658_v37, 7 }
 0x48b   : > { %v6420_v39 = vpop.f32.mrf.mxu0 }
 0x48c   : > { %v6663_v29 = vor.u32 %v6661_v27, %v14103_v41  ;;  %v6479_v33 = vadd.f32 %v6420_v39, %v6167_v18  ;;  %v7164_v27 = vrot.slane %v14137_v22, 6  ;;  %v14146_v18 = vrot.slane %v10370_v6, 6 }
 0x48d   : > { %v6510_v39 = vadd.f32 %v13913_v50, %v6478_v53 }
 0x48e   : > { %v6511_v24 = vadd.f32 %v13913_v50, %v6479_v33  ;;  %10361 = vmatmul.msk.bf16.gmra.mxu0 %vm1023_vm4, %v6321_v4  ;;  %v6664_v48 = vsel %vm12057_vm9, %v6656_v30, %v6663_v29  ;;  %vm14128_vm4 = vcmp.ne.s32.totalorder %v6755_v3, 0  ;;  %v14158_v33 = vsel %vm14132_vm6, 1.0, %v15476_v38 }
 0x48f   : > { %6724 = vst.msk [vmem:[#allocation3 + $0xc] sm:$0xf] %vm675_vm3, %v6664_v48  ;;  %v14153_v29 = vsel %vm14128_vm4, 1.0, %v15476_v38  ;;  %v14162_v15 = vsel %vm4065_vm13, %v14146_v18, %v7160_v58  ;;  %v7183_v59 = vmul.f32 %v14146_v18, %v7141_v0  ;;  %v14180_v40 = vsel %vm4065_vm13, %v7162_v55, %v7164_v27  ;;  %v5697_v58 = vpop.f32.mrf.mxu2 }
 0x490   : > { %v6543_v5 = vmax.f32 %v6511_v24, 0.0  ;;  %v7184_v24 = vmul.f32 %v14162_v15, %v14011_v52  ;;  %v6542_v57 = vmax.f32 %v6510_v39, 0.0 }
 0x492   : > { %v6573_v37 = vmax.f32 %v6541_v42, %v6543_v5  ;;  %v6120_v42 = vpop.f32.mrf.mxu3  ;;  %v7192_v55 = vpack.c.bf16 %v7184_v24, %v7183_v59 }
 0x493   : > { %v6422_v46 = vpop.f32.mrf.mxu0 }
 0x494   : > { %6575 = vst.msk [vmem:[#allocation7 + $0x30] sm:$0xff] %vm849_vm0, %v6573_v37  ;;  %v6480_v30 = vadd.f32 %v6422_v46, %v6168_v8  ;;  %v5407_v46 = vpop.f32.mrf.mxu1  ;;  %v7207_v2 = vrot.slane %v7192_v55, 1 }
 0x496   : > { %v6512_v4 = vadd.f32 %v13913_v50, %v6480_v30  ;;  %v6931_v62 = vld [vmem:[#allocation3 + $0x8] sm:$0xff]  }
 0x497   : > { %v14165_v3 = vld [vmem:[#allocation3 + $0x8] sm:$0xff]  ;;  %v14173_v8 = vunpack.c.l.bf16 %v6931_v62  ;;  %v14175_v48 = vunpack.c.h.bf16 %v6931_v62  ;;  %v5453_v62 = vadd.f32 %v14059_v23, %v13787_v11  ;;  %v5454_v11 = vadd.f32 %v14077_v12, %v13795_v36 }
 0x498   : > { %v6544_v53 = vmax.f32 %v6512_v4, 0.0  ;;  %v7006_v5 = vshll.u32 %v14165_v3, 16 }
 0x499   : > { %v6955_v35 = vmul.f32 %v14153_v29, %v14173_v8  ;;  %v6956_v47 = vmul.f32 %v14158_v33, %v14175_v48  ;;  %v7185_v9 = vmul.f32 %v14168_v26, %v14173_v8  ;;  %v7186_v37 = vmul.f32 %v14180_v40, %v14175_v48 }
 0x49a   : > { %v6574_v44 = vmax.f32 %v6542_v57, %v6544_v53  ;;  %v14189_v6 = vrot.slane %v7006_v5, 1  ;;  %v5743_v24 = vadd.f32 %v14061_v63, %v5453_v62  ;;  %v6123_v19 = vpop.f32.mrf.mxu3  ;;  %v5455_v53 = vadd.f32 %v14096_v16, %v13799_v10 }
 0x49b   : > { %v6425_v28 = vpop.f32.mrf.mxu0  ;;  %v6962_v0 = vpack.c.bf16 %v6956_v47, %v6955_v35  ;;  %v7193_v30 = vpack.c.bf16 %v7186_v37, %v7185_v9  ;;  %v5699_v47 = vpop.f32.mrf.mxu2  ;;  %v5744_v9 = vadd.f32 %v14079_v7, %v5454_v11  ;;  %v5456_v37 = vadd.f32 %v14140_v45, %v13807_v54 }
 0x49c   : > { %6576 = vst.msk [vmem:[#allocation7 + $0x38] sm:$0xff] %vm849_vm0, %v6574_v44  ;;  %v7009_v39 = vsel %vm3579_vm14, %v7004_v60, %v14189_v6  ;;  %v5409_v5 = vpop.f32.mrf.mxu1  ;;  %v5745_v35 = vadd.f32 %v14098_v51, %v5455_v53  ;;  %v6169_v60 = vadd.f32 %v14072_v1, %v5743_v24 }
 0x49d   : > { %10419 = vmatmul.msk.bf16.gmra.mxu2 %vm849_vm0, %v6962_v0  ;;  %10406 = vmatmul.msk.bf16.vlgmr.msrb.gmra.mxu1 %vm849_vm0, %v7009_v39  ;;  %v14198_v4 = vrot.slane %v7193_v30, 1  ;;  %v5746_v51 = vadd.f32 %v14142_v49, %v5456_v37  ;;  %v6170_v1 = vadd.f32 %v14088_v61, %v5744_v9 }
 0x49e   : > { %v6481_v23 = vadd.f32 %v6425_v28, %v6169_v60  ;;  %v6171_v44 = vadd.f32 %v14115_v34, %v5745_v35 }
 0x49f   : > { %v7209_v59 = vsel %vm4232_vm15, %v7207_v2, %v14198_v4  ;;  %v6172_v30 = vadd.f32 %v6120_v42, %v5746_v51  ;;  %v5457_v42 = vadd.f32 %v5407_v46, %v13811_v56  ;;  %v5458_v56 = vadd.f32 %v5409_v5, %v13818_v17 }
 0x4a0   : > { %10434 = vmatmul.msk.bf16.vlgmr.msrb.gmra.mxu3 %vm849_vm0, %v7209_v59  ;;  %v6513_v10 = vadd.f32 %v13913_v50, %v6481_v23 }
 0x4a1   : > { %v5747_v37 = vadd.f32 %v5697_v58, %v5457_v42 }
 0x4a2   : > { %v14216_v55 = vpop.f32.mrf.mxu3  ;;  %v6545_v7 = vmax.f32 %v6513_v10, 0.0 }
 0x4a3   : > { %v6427_v57 = vpop.f32.mrf.mxu0  ;;  %v5702_v28 = vpop.f32.mrf.mxu2  ;;  %v6599_v62 = vld [vmem:[#allocation7 + $0x30] ss:$2 sm:$0xff]  ;;  %v6615_v59 = vld [vmem:[#allocation7 + $0x31] ss:$2 sm:$0xff] }
 0x4a4   : > { %v5412_v12 = vpop.f32.mrf.mxu1  ;;  %v6482_v0 = vadd.f32 %v6427_v57, %v6170_v1  ;;  %v6627_v24 = vmax.f32 %v6599_v62, %v6615_v59  ;;  %v5748_v62 = vadd.f32 %v5699_v47, %v5458_v56 }
 0x4a6   : > { %v6514_v54 = vadd.f32 %v13913_v50, %v6482_v0  ;;  %v6635_v9 = vpack.c.bf16 %v6627_v24, %v6627_v24 }
 0x4a8   : > { %v6546_v53 = vmax.f32 %v6514_v54, 0.0  ;;  %v6173_v54 = vadd.f32 %v6123_v19, %v5747_v37 }
 0x4aa   : > { %v6128_v49 = vpop.f32.mrf.mxu3 }
 0x4ab   : > { %v6430_v63 = vpop.f32.mrf.mxu0  ;;  %v5704_v11 = vpop.f32.mrf.mxu2 }
 0x4ac   : > { %v6483_v16 = vadd.f32 %v6430_v63, %v6171_v44  ;;  %v5414_v60 = vpop.f32.mrf.mxu1  ;;  %v6667_v63 = vshrl.u32 %v6635_v9, 16 }
 0x4ae   : > { %v6515_v36 = vadd.f32 %v13913_v50, %v6483_v16  ;;  %v6669_v0 = vrot.slane %v6667_v63, 7 }
 0x4b0   : > { %v6547_v34 = vmax.f32 %v6515_v36, 0.0  ;;  %v5459_v36 = vadd.f32 %v5412_v12, %v13823_v43 }
 0x4b2   : > { %v6577_v39 = vmax.f32 %v6545_v7, %v6547_v34  ;;  %v6130_v44 = vpop.f32.mrf.mxu3 }
 0x4b3   : > { %v6432_v2 = vpop.f32.mrf.mxu0  ;;  %v14230_v7 = vpop.f32.mrf.mxu2 }
 0x4b4   : > { %6579 = vst.msk [vmem:[#allocation7 + $0x40] sm:$0xff] %vm849_vm0, %v6577_v39  ;;  %v6484_v45 = vadd.f32 %v6432_v2, %v6172_v30  ;;  %v14227_v1 = vpop.f32.mrf.mxu1  ;;  %v5749_v39 = vadd.f32 %v5702_v28, %v5459_v36  ;;  %v6670_v30 = vshll.u32 %v6635_v9, 16  ;;  %v6674_v28 = vrot.slane %v6669_v0, 4  ;;  %v15494_v9 = vld [vmem:[#allocation29_spill] sm:$0xff] }
 0x4b5   : > { %v6776_v42 = vand.u32 7, %v15494_v9 }
 0x4b6   : > { %v6516_v61 = vadd.f32 %v13913_v50, %v6484_v45  ;;  %v6672_v46 = vor.u32 %v6670_v30, %v6669_v0  ;;  %v6175_v12 = vadd.f32 %v6128_v49, %v5749_v39 }
 0x4b7   : > { %vm6886_vm5 = vcmp.ne.s32.totalorder %v6776_v42, 7  ;;  %vm6838_vm1 = vcmp.ne.s32.totalorder %v6776_v42, 0 }
 0x4b8   : > { %v6548_v35 = vmax.f32 %v6516_v61, 0.0  ;;  %v6665_v61 = vrot.slane %v14103_v41, 4  ;;  %v15493_v41 = vld [vmem:[#allocation30_spill] sm:$0xff] }
 0x4ba   : > { %v6578_v57 = vmax.f32 %v6546_v53, %v6548_v35  ;;  %v14233_v59 = vpop.f32.mrf.mxu3  ;;  %v5460_v53 = vadd.f32 %v5414_v60, %v13831_v20  ;;  %v6673_v47 = vsel %vm12057_vm9, %v6665_v61, %v6672_v46  ;;  %v6174_v60 = vadd.f32 %v14216_v55, %v5748_v62 }
 0x4bb   : > { %v6435_v23 = vpop.f32.mrf.mxu0  ;;  %6725 = vst.msk [vmem:[#allocation3 + $0x10] sm:$0xf] %vm675_vm3, %v6673_v47  ;;  %v14248_v20 = vpop.f32.mrf.mxu2 }
 0x4bc   : > { %6580 = vst.msk [vmem:[#allocation7 + $0x48] sm:$0xff] %vm849_vm0, %v6578_v57  ;;  %v6485_v58 = vadd.f32 %v6435_v23, %v6173_v54  ;;  %v5750_v57 = vadd.f32 %v5704_v11, %v5460_v53  ;;  %v6769_v23 = vand.u32 7, %v15493_v41  ;;  %v14246_v49 = vpop.f32.mrf.mxu1 }
 0x4be   : > { %v6517_v17 = vadd.f32 %v13913_v50, %v6485_v58  ;;  %vm6885_vm11 = vcmp.ne.s32.totalorder %v6769_v23, 7  ;;  %v6176_v36 = vadd.f32 %v6130_v44, %v5750_v57  ;;  %vm6837_vm12 = vcmp.ne.s32.totalorder %v6769_v23, 0 }
 0x4bf   : > { %v10374_v0 = vsel %vm6885_vm11, 1.0, %v15476_v38  ;;  %v14263_v44 = vsel %vm6837_vm12, 1.0, %v15476_v38 }
 0x4c0   : > { %v6549_v11 = vmax.f32 %v6517_v17, 0.0  ;;  %v7166_v55 = vrot.slane %v10374_v0, 6 }
 0x4c2   : > { %v6135_v54 = vpop.f32.mrf.mxu3  ;;  %v14274_v61 = vsel %vm4065_vm13, %v7164_v27, %v7166_v55 }
 0x4c3   : > { %v6601_v10 = vld [vmem:[#allocation7 + $0x40] ss:$2 sm:$0xff]  ;;  %v6617_v16 = vld [vmem:[#allocation7 + $0x41] ss:$2 sm:$0xff]  ;;  %v6437_v51 = vpop.f32.mrf.mxu0 }
 0x4c4   : > { %v6628_v34 = vmax.f32 %v6601_v10, %v6617_v16  ;;  %v6486_v10 = vadd.f32 %v6437_v51, %v6174_v60 }
 0x4c6   : > { %v6636_v2 = vpack.c.bf16 %v6628_v34, %v6628_v34  ;;  %v14257_v34 = vsel %vm6886_vm5, 1.0, %v15476_v38  ;;  %v6518_v56 = vadd.f32 %v13913_v50, %v6486_v10  ;;  %vm696_vm5 = vsmask.f32 7946 }
 0x4c7   : > { %v7168_v30 = vrot.slane %v14257_v34, 6 }
 0x4c8   : > { %v6676_v45 = vshrl.u32 %v6636_v2, 16  ;;  %v6679_v43 = vshll.u32 %v6636_v2, 16 }
 0x4ca   : > { %v14236_v24 = vrot.slane %v6676_v45, 7  ;;  %v14267_v45 = vsel %vm6838_vm1, 1.0, %v15476_v38  ;;  %v6138_v10 = vpop.f32.mrf.mxu3  ;;  %vm7949_vm1 = vsmask.f32 6416 }
 0x4cb   : > { %v6440_v35 = vpop.f32.mrf.mxu0 }
 0x4cc   : > { %v6681_v19 = vor.u32 %v6679_v43, %v14236_v24  ;;  %v6487_v5 = vadd.f32 %v6440_v35, %v6175_v12  ;;  %v14279_v43 = vsel %vm4065_vm13, %v7166_v55, %v7168_v30  ;;  %v5712_v35 = vpop.f32.mrf.mxu2 }
 0x4ce   : > { %v6519_v63 = vadd.f32 %v13913_v50, %v6487_v5  ;;  %v6682_v37 = vsel %vm12057_vm9, %v6674_v28, %v6681_v19  ;;  %v5422_v28 = vpop.f32.mrf.mxu1  ;;  %v6550_v19 = vmax.f32 %v6518_v56, 0.0  ;;  %v7010_v5 = vshrl.u32 %v14165_v3, 16 }
 0x4cf   : > { %6726 = vst.msk [vmem:[#allocation3 + $0x14] sm:$0xf] %vm675_vm3, %v6682_v37 }
 0x4d0   : > { %v6551_v16 = vmax.f32 %v6519_v63, 0.0  ;;  %v7012_v9 = vor.u32 %v7010_v5, %v14189_v6  ;;  %v15495_v5 = vld [vmem:[#allocation60_spill] sm:$0xff] }
 0x4d2   : > { %v6581_v39 = vmax.f32 %v6549_v11, %v6551_v16  ;;  %v5461_v16 = vadd.f32 %v14227_v1, %v13835_v14 }
 0x4d3   : > { %v6442_v2 = vpop.f32.mrf.mxu0 }
 0x4d4   : > { %6583 = vst.msk [vmem:[#allocation7 + $0x50] sm:$0xff] %vm849_vm0, %v6581_v39  ;;  %v6488_v51 = vadd.f32 %v6442_v2, %v6176_v36  ;;  %v5751_v0 = vadd.f32 %v14230_v7, %v5461_v16  ;;  %v5714_v39 = vpop.f32.mrf.mxu2  ;;  %v5463_v2 = vadd.f32 %v5422_v28, %v13847_v25 }
 0x4d6   : > { %v6520_v46 = vadd.f32 %v13913_v50, %v6488_v51  ;;  %v6933_v58 = vld [vmem:[#allocation3 + $0x10] sm:$0xff]   ;;  %v5424_v36 = vpop.f32.mrf.mxu1  ;;  %v5753_v56 = vadd.f32 %v5712_v35, %v5463_v2  ;;  %v6177_v51 = vadd.f32 %v14233_v59, %v5751_v0 }
 0x4d7   : > { %v14269_v62 = vld [vmem:[#allocation3 + $0x10] sm:$0xff]  ;;  %v14281_v12 = vunpack.c.l.bf16 %v6933_v58  ;;  %v14283_v53 = vunpack.c.h.bf16 %v6933_v58  ;;  %v6140_v58 = vpop.f32.mrf.mxu3 }
 0x4d8   : > { %v6552_v17 = vmax.f32 %v6520_v46, 0.0  ;;  %v7014_v22 = vshll.u32 %v14269_v62, 16  ;;  %v5462_v46 = vadd.f32 %v14246_v49, %v13843_v13  ;;  %v6179_v14 = vadd.f32 %v6138_v10, %v5753_v56 }
 0x4d9   : > { %v6957_v27 = vmul.f32 %v14263_v44, %v14281_v12  ;;  %v6958_v47 = vmul.f32 %v14267_v45, %v14283_v53  ;;  %v7187_v57 = vmul.f32 %v14274_v61, %v14281_v12  ;;  %v7188_v41 = vmul.f32 %v14279_v43, %v14283_v53 }
 0x4da   : > { %v6582_v23 = vmax.f32 %v6550_v19, %v6552_v17  ;;  %v14296_v42 = vrot.slane %v7014_v22, 1  ;;  %v5752_v19 = vadd.f32 %v14248_v20, %v5462_v46  ;;  %v5464_v22 = vadd.f32 %v5424_v36, %v15495_v5 }
 0x4db   : > { %v6445_v3 = vpop.f32.mrf.mxu0  ;;  %v6963_v60 = vpack.c.bf16 %v6958_v47, %v6957_v27  ;;  %v7194_v63 = vpack.c.bf16 %v7188_v41, %v7187_v57 }
 0x4dc   : > { %6584 = vst.msk [vmem:[#allocation7 + $0x58] sm:$0xff] %vm849_vm0, %v6582_v23  ;;  %v7017_v37 = vsel %vm3579_vm14, %v7012_v9, %v14296_v42  ;;  %v5717_v7 = vpop.f32.mrf.mxu2  ;;  %v5754_v25 = vadd.f32 %v5714_v39, %v5464_v22  ;;  %v6178_v28 = vadd.f32 %v6135_v54, %v5752_v19  ;;  %v11231_v54 = vld [vmem:[%s15431_s29 + $0x58] sm:$0xff] }
 0x4dd   : > { %10420 = vmatmul.msk.bf16.gmra.mxu2 %vm849_vm0, %v6963_v60  ;;  %10407 = vmatmul.msk.bf16.gmra.mxu1 %vm849_vm0, %v7017_v37  ;;  %v14303_v11 = vrot.slane %v7194_v63, 1  ;;  %v11229_v60 = vld [vmem:[%s15431_s29 + $0x48] sm:$0xff]  ;;  %v11223_v63 = vld [vmem:[%s15431_s29 + $0x38] sm:$0xff] }
 0x4de   : > { %v5427_v17 = vpop.f32.mrf.mxu1  ;;  %v6180_v23 = vadd.f32 %v6140_v58, %v5754_v25  ;;  %7460 = vmatpush.bf16.msra.mxu2 %v11229_v60  ;;  %7564 = vmatpush.bf16.msra.mxu3 %v11231_v54 }
 0x4df   : > { %v7211_v6 = vsel %vm4232_vm15, %v14198_v4, %v14303_v11  ;;  %v6489_v4 = vadd.f32 %v6445_v3, %v6177_v51  ;;  %v6143_v49 = vpop.f32.mrf.mxu3  ;;  %7326 = vmatpush.bf16.msra.mxu1 %v11223_v63 }
 0x4e0   : > { %10435 = vmatmul.msk.bf16.gmra.mxu3 %vm849_vm0, %v7211_v6 }
 0x4e1   : > { %v6521_v27 = vadd.f32 %v13913_v50, %v6489_v4  ;;  %v15496_v4 = vld [vmem:[#allocation71_spill] sm:$0xff] }
 0x4e2   : > { %v5465_v19 = vadd.f32 %v5427_v17, %v15496_v4 }
 0x4e3   : > { %v6447_v55 = vpop.f32.mrf.mxu0  ;;  %v6553_v35 = vmax.f32 %v6521_v27, 0.0  ;;  %v6603_v37 = vld [vmem:[#allocation7 + $0x50] ss:$2 sm:$0xff]  ;;  %v6619_v10 = vld [vmem:[#allocation7 + $0x51] ss:$2 sm:$0xff] }
 0x4e4   : > { %v6490_v57 = vadd.f32 %v6447_v55, %v6178_v28  ;;  %v5719_v16 = vpop.f32.mrf.mxu2  ;;  %v6629_v0 = vmax.f32 %v6603_v37, %v6619_v10  ;;  %v5755_v5 = vadd.f32 %v5717_v7, %v5465_v19  ;;  %v6683_v37 = vrot.slane %v14236_v24, 4  ;;  %v11228_v24 = vld [vmem:[%s15431_s29 + $0x40] sm:$0xff] }
 0x4e5   : > { %v15500_v19 = vld [vmem:[#allocation35_spill] sm:$0xff]  ;;  %7461 = vmatpush.bf16.msra.mxu2 %v11228_v24 }
 0x4e6   : > { %v6522_v9 = vadd.f32 %v13913_v50, %v6490_v57  ;;  %v5429_v6 = vpop.f32.mrf.mxu1  ;;  %v6637_v46 = vpack.c.bf16 %v6629_v0, %v6629_v0 }
 0x4e7   : > { %v6145_v51 = vpop.f32.mrf.mxu3 }
 0x4e8   : > { %v6554_v39 = vmax.f32 %v6522_v9, 0.0 }
 0x4eb   : > { %v6450_v1 = vpop.f32.mrf.mxu0 }
 0x4ec   : > { %v6491_v47 = vadd.f32 %v6450_v1, %v6179_v14  ;;  %v5722_v14 = vpop.f32.mrf.mxu2  ;;  %v6685_v1 = vshrl.u32 %v6637_v46, 16 }
 0x4ee   : > { %v6523_v59 = vadd.f32 %v13913_v50, %v6491_v47  ;;  %v5432_v58 = vpop.f32.mrf.mxu1  ;;  %v15497_v47 = vld [vmem:[#allocation73_spill] sm:$0xff]  ;;  %v6687_v28 = vrot.slane %v6685_v1, 7  ;;  %v15501_v1 = vld [vmem:[#allocation34_spill] sm:$0xff] }
 0x4ef   : > { %v5467_v25 = vadd.f32 %v5432_v58, %v15497_v47 }
 0x4f0   : > { %v6555_v13 = vmax.f32 %v6523_v59, 0.0 }
 0x4f1   : > { %v5757_v57 = vadd.f32 %v5722_v14, %v5467_v25  ;;  %v6783_v14 = vand.u32 7, %v15500_v19  ;;  %v11230_v25 = vld [vmem:[%s15431_s29 + $0x50] sm:$0xff] }
 0x4f2   : > { %v6585_v41 = vmax.f32 %v6553_v35, %v6555_v13  ;;  %v6148_v35 = vpop.f32.mrf.mxu3  ;;  %v6688_v13 = vshll.u32 %v6637_v46, 16  ;;  %7565 = vmatpush.bf16.msra.mxu3 %v11230_v25  ;;  %v11224_v25 = vld [vmem:[#allocation3 + $0x4] sm:$0xff] }
 0x4f3   : > { %v6452_v20 = vpop.f32.mrf.mxu0  ;;  %v6183_v0 = vadd.f32 %v6148_v35, %v5757_v57  ;;  %vm6887_vm7 = vcmp.ne.s32.totalorder %v6783_v14, 7  ;;  %vm6839_vm6 = vcmp.ne.s32.totalorder %v6783_v14, 0 }
 0x4f4   : > { %6587 = vst.msk [vmem:[#allocation7 + $0x60] sm:$0xff] %vm849_vm0, %v6585_v41  ;;  %v6492_v3 = vadd.f32 %v6452_v20, %v6180_v23  ;;  %v6181_v23 = vadd.f32 %v6143_v49, %v5755_v5  ;;  %v15498_v20 = vld [vmem:[#allocation61_spill] sm:$0xff]  ;;  %v5724_v7 = vpop.f32.mrf.mxu2  ;;  %v6790_v5 = vand.u32 7, %v15501_v1 }
 0x4f5   : > { %v5466_v9 = vadd.f32 %v5429_v6, %v15498_v20  ;;  %v11561_v6 = vld [vmem:[%s15458_s12] ss:$0 sm:$0xff] }
 0x4f6   : > { %v6524_v36 = vadd.f32 %v13913_v50, %v6492_v3  ;;  %v6690_v3 = vor.u32 %v6688_v13, %v6687_v28  ;;  %v5434_v63 = vpop.f32.mrf.mxu1  ;;  %vm6888_vm4 = vcmp.ne.s32.totalorder %v6790_v5, 7  ;;  %vm6840_vm11 = vcmp.ne.s32.totalorder %v6790_v5, 0 }
 0x4f7   : > { %v5756_v54 = vadd.f32 %v5719_v16, %v5466_v9  ;;  %v10377_v13 = vsel %vm6888_vm4, 1.0, %v15476_v38  ;;  %vm7976_vm4 = vcmask 388096  }
 0x4f8   : > { %v6556_v55 = vmax.f32 %v6524_v36, 0.0  ;;  %v6691_v58 = vsel %vm12057_vm9, %v6683_v37, %v6690_v3  ;;  %v14363_v9 = vrot.slane %v10377_v13, 6 }
 0x4f9   : > { %6727 = vst.msk [vmem:[#allocation3 + $0x18] sm:$0xf] %vm675_vm3, %v6691_v58 }
 0x4fa   : > { %v6586_v2 = vmax.f32 %v6554_v39, %v6556_v55  ;;  %v15499_v39 = vld [vmem:[#allocation66_spill] sm:$0xff] }
 0x4fb   : > { %v6455_v56 = vpop.f32.mrf.mxu0  ;;  %v5468_v55 = vadd.f32 %v5434_v63, %v15499_v39 }
 0x4fc   : > { %6588 = vst.msk [vmem:[#allocation7 + $0x68] sm:$0xff] %vm849_vm0, %v6586_v2  ;;  %v6493_v17 = vadd.f32 %v6455_v56, %v6181_v23  ;;  %v6692_v2 = vrot.slane %v6687_v28, 4  ;;  %v11222_v28 = vld [vmem:[%s15431_s29 + $0x30] sm:$0xff]  ;;  %v10376_v23 = vsel %vm6887_vm7, 1.0, %v15476_v38  ;;  %v7120_v24 = vpop.f32.mrf.mxu2 }
 0x4fd   : > { %v5758_v4 = vadd.f32 %v5724_v7, %v5468_v55  ;;  %7327 = vmatpush.bf16.msra.mxu1 %v11222_v28  ;;  %v7170_v3 = vrot.slane %v10376_v23, 6  ;;  %v14370_v7 = vsel %vm6840_vm11, 1.0, %v15476_v38 }
 0x4fe   : > { %v6525_v56 = vadd.f32 %v11561_v6, %v6493_v17 }
 0x4ff   : > { %v14381_v39 = vsel %vm4065_vm13, %v7170_v3, %v14363_v9 }
 0x500   : > { %v6557_v35 = vmax.f32 %v6525_v56, 0.0 }
 0x503   : > { %v6605_v22 = vld [vmem:[#allocation7 + $0x60] ss:$2 sm:$0xff]  ;;  %v6621_v50 = vld [vmem:[#allocation7 + $0x61] ss:$2 sm:$0xff]  ;;  %v6457_v27 = vpop.f32.mrf.mxu0 }
 0x504   : > { %v6630_v59 = vmax.f32 %v6605_v22, %v6621_v50  ;;  %v6182_v22 = vadd.f32 %v6145_v51, %v5756_v54 }
 0x506   : > { %v6638_v41 = vpack.c.bf16 %v6630_v59, %v6630_v59  ;;  %v6150_v59 = vpop.f32.mrf.mxu3  ;;  %v6494_v51 = vadd.f32 %v6457_v27, %v6182_v22  ;;  %v14367_v27 = vsel %vm6839_vm6, 1.0, %v15476_v38  ;;  %vm701_vm6 = vcmask 385024  }
 0x508   : > { %v6694_v60 = vshrl.u32 %v6638_v41, 16  ;;  %v6697_v36 = vshll.u32 %v6638_v41, 16  ;;  %v6184_v41 = vadd.f32 %v6150_v59, %v5758_v4  ;;  %v6526_v17 = vadd.f32 %v11561_v6, %v6494_v51 }
 0x509   : > { %v7397_v59 = vshll.u32 %v11224_v25, 16 }
 0x50a   : > { %v14337_v10 = vrot.slane %v6694_v60, 7 }
 0x50b   : > { %v6460_v46 = vpop.f32.mrf.mxu0 }
 0x50c   : > { %v6699_v49 = vor.u32 %v6697_v36, %v14337_v10  ;;  %v6495_v16 = vadd.f32 %v6460_v46, %v6183_v0  ;;  %v14377_v0 = vsel %vm4065_vm13, %v7168_v30, %v7170_v3  ;;  %v6558_v46 = vmax.f32 %v6526_v17, 0.0 }
 0x50d   : > { %v7399_v3 = vrot.slane %v7397_v59, 1  ;;  %v7395_v17 = vshrl.u32 %v11224_v25, 16  ;;  %v684_v59 = vld [vmem:[#allocation3 + $0x24] sm:$0xf] }
 0x50e   : > { %v6527_v50 = vadd.f32 %v11561_v6, %v6495_v16  ;;  %v6700_v47 = vsel %vm12057_vm9, %v6692_v2, %v6699_v49 }
 0x50f   : > { %6728 = vst.msk [vmem:[#allocation3 + $0x1c] sm:$0xf] %vm675_vm3, %v6700_v47 }
 0x510   : > { %v6559_v57 = vmax.f32 %v6527_v50, 0.0 }
 0x512   : > { %v6589_v20 = vmax.f32 %v6557_v35, %v6559_v57 }
 0x513   : > { %v6462_v60 = vpop.f32.mrf.mxu0 }
 0x514   : > { %6591 = vst.msk [vmem:[#allocation7 + $0x70] sm:$0xff] %vm849_vm0, %v6589_v20  ;;  %v6496_v54 = vadd.f32 %v6462_v60, %v6184_v41 }
 0x516   : > { %v6528_v63 = vadd.f32 %v11561_v6, %v6496_v54  ;;  %v6935_v37 = vld [vmem:[#allocation3 + $0x18] sm:$0xff]   ;;  %v7018_v6 = vshrl.u32 %v14269_v62, 16 }
 0x517   : > { %v14372_v36 = vld [vmem:[#allocation3 + $0x18] sm:$0xff]  ;;  %v14383_v55 = vunpack.c.l.bf16 %v6935_v37  ;;  %v14385_v2 = vunpack.c.h.bf16 %v6935_v37 }
 0x518   : > { %v6560_v49 = vmax.f32 %v6528_v63, 0.0  ;;  %v7022_v56 = vshll.u32 %v14372_v36, 16  ;;  %v7020_v14 = vor.u32 %v7018_v6, %v14296_v42  ;;  %v11225_v42 = vld [vmem:[#allocation3 + $0xc] sm:$0xff] }
 0x519   : > { %v6959_v34 = vmul.f32 %v14367_v27, %v14383_v55  ;;  %v6960_v30 = vmul.f32 %v14370_v7, %v14385_v2  ;;  %v7189_v16 = vmul.f32 %v14377_v0, %v14383_v55  ;;  %v7190_v58 = vmul.f32 %v14381_v39, %v14385_v2 }
 0x51a   : > { %v6590_v4 = vmax.f32 %v6558_v46, %v6560_v49  ;;  %v7067_v19 = vpop.f32.mrf.mxu1  ;;  %v7024_v62 = vrot.slane %v7022_v56, 1  ;;  %v7402_v41 = vshll.u32 %v11225_v42, 16  ;;  %v7400_v46 = vor.u32 %v7399_v3, %v7395_v17  ;;  %v11239_v56 = vld [vmem:[%s15431_s29 + $0x78] sm:$0xff] }
 0x51b   : > { %v7121_v1 = vadd.f32 %v7120_v24, %v7067_v19  ;;  %v6964_v5 = vpack.c.bf16 %v6960_v30, %v6959_v34  ;;  %v7195_v22 = vpack.c.bf16 %v7190_v58, %v7189_v16  ;;  %7778 = vmatpush.bf16.msrb.mxu2 %v11239_v56  ;;  %v11226_v30 = vld [vmem:[#allocation3 + $0x14] sm:$0xff]  ;;  %v7406_v32 = vshrl.u32 %v11225_v42, 16  ;;  %v11509_v3 = vld [vmem:[#allocation3 + $0x8] sm:$0xff]  }
 0x51c   : > { %6592 = vst.msk [vmem:[#allocation7 + $0x78] sm:$0xff] %vm849_vm0, %v6590_v4  ;;  %v7025_v50 = vsel %vm3579_vm14, %v7020_v14, %v7024_v62  ;;  %v7404_v54 = vrot.slane %v7402_v41, 1  ;;  %v11233_v16 = vld [vmem:[%s15431_s29 + $0x68] sm:$0xff]  ;;  %v7410_v58 = vshll.u32 %v11226_v30, 16 }
 0x51d   : > { %10421 = vmatmul.msk.bf16.gmra.mxu2 %vm849_vm0, %v6964_v5  ;;  %10408 = vmatmul.msk.bf16.gmra.mxu1 %vm849_vm0, %v7025_v50  ;;  %v7212_v47 = vrot.slane %v7195_v22, 1  ;;  %v7026_v50 = vshrl.u32 %v14372_v36, 16 }
 0x51e   : > { %v7405_v6 = vsel %vm3579_vm14, %v7400_v46, %v7404_v54  ;;  %7644 = vmatpush.bf16.msrb.mxu1 %v11233_v16  ;;  %v7412_v14 = vrot.slane %v7410_v58, 1  ;;  %v7408_v22 = vor.u32 %v7406_v32, %v7404_v54  ;;  %v11238_v32 = vld [vmem:[%s15431_s29 + $0x70] sm:$0xff] }
 0x51f   : > { %v7213_v28 = vsel %vm4232_vm15, %v14303_v11, %v7212_v47  ;;  %v6701_v11 = vrot.slane %v14337_v10, 4  ;;  %v11241_v10 = vld [vmem:[%s15431_s29 + $0x88] sm:$0xff]  ;;  %v7028_v42 = vor.u32 %v7026_v50, %v7024_v62  ;;  %7779 = vmatpush.bf16.msrb.mxu2 %v11238_v32 }
 0x520   : > { %10436 = vmatmul.msk.bf16.gmra.mxu3 %vm849_vm0, %v7213_v28 }
 0x521   : > { %7882 = vmatpush.bf16.msrb.mxu3 %v11241_v10 }
 0x523   : > { %v6607_v35 = vld [vmem:[#allocation7 + $0x70] ss:$2 sm:$0xff]  ;;  %v6623_v51 = vld [vmem:[#allocation7 + $0x71] ss:$2 sm:$0xff]  ;;  %v7249_v13 = vpop.f32.mrf.mxu3 }
 0x524   : > { %v6631_v57 = vmax.f32 %v6607_v35, %v6623_v51  ;;  %v14405_v23 = vadd.f32 %v7249_v13, %v7121_v1  ;;  %v7413_v35 = vsel %vm3579_vm14, %v7408_v22, %v7412_v14  ;;  %v14425_v51 = vld [vmem:[#allocation3 + $0x10] sm:$0xff]   ;;  %v685_v13 = vsel %vm13965_vm10, 0, %v684_v59  ;;  %v15505_v59 = vld [vmem:[#allocation81_spill] sm:$0xff] }
 0x525   : > { %686 = vst [vmem:[#allocation3 + $0x24] sm:$0xf] %v685_v13  ;;  %v11471_v17 = vunpack.c.l.bf16 %v14425_v51  ;;  %vm695_vm10 = vcmask 388098  }
 0x526   : > { %v6639_v20 = vpack.c.bf16 %v6631_v57, %v6631_v57  ;;  %v14451_v57 = vld [vmem:[#allocation3 + $0x18] sm:$0xff]   ;;  %vm14661_vm12 = vmand %vm695_vm10, %vm696_vm5  ;;  %vm8295_vm10 = vsmask.f32 5376  ;;  %vm8219_vm5 = vcmask 1043456  }
 0x528   : > { %v6703_v60 = vshrl.u32 %v6639_v20, 16  ;;  %v6706_v37 = vshll.u32 %v6639_v20, 16 }
 0x52a   : > { %v6705_v63 = vrot.slane %v6703_v60, 7 }
 0x52c   : > { %v6708_v49 = vor.u32 %v6706_v37, %v6705_v63  ;;  %v7491_v37 = vld [vmem:[#allocation3 + $0x4] sm:$0xe]  ;;  %v6710_v46 = vrot.slane %v6705_v63, 4 }
 0x52d   : > { %10482 = vmatmul.msk.bf16.vlgmr.msra.gmra.mxu2 %vm849_vm0, %v7405_v6  ;;  %v7492_v62 = vunpack.c.l.bf16 %v7491_v37  ;;  %v7504_v6 = vmul.f32 %v11471_v17, %v14180_v40  ;;  %v11472_v37 = vunpack.c.h.bf16 %v14425_v51 }
 0x52e   : > { %v6709_v34 = vsel %vm12057_vm9, %v6701_v11, %v6708_v49  ;;  %v11467_v11 = vunpack.c.l.bf16 %v11509_v3  ;;  %v11468_v49 = vunpack.c.h.bf16 %v11509_v3  ;;  %vm690_vm9 = vsmask.f32 2304 }
 0x52f   : > { %6729 = vst.msk [vmem:[#allocation3 + $0x20] sm:$0xf] %vm675_vm3, %v6709_v34  ;;  %v6730_v34 = vld [vmem:[#allocation3 + $0x24] sm:$0x1]  ;;  %vm7950_vm7 = vmor %vm690_vm9, %vm7949_vm1  ;;  %vm704_vm1 = vsmask.f32 1280 }
 0x530   : > { %v7503_v10 = vmul.f32 %v11468_v49, %v14168_v26  ;;  %v6731_v58 = vsel %vm13891_vm8, %v6710_v46, %v6730_v34  ;;  %vm7930_vm8 = vcmask 392192  }
 0x531   : > { %6732 = vst [vmem:[#allocation3 + $0x24] sm:$0x1] %v6731_v58 }
 0x532   : > { %v7511_v63 = vpack.c.bf16 %v7504_v6, %v7503_v10 }
 0x536   : > { %v6969_v24 = vld [vmem:[#allocation3 + $0x20] sm:$0x1] }
 0x537   : > { %v6992_v4 = vunpack.c.l.b16 %v6969_v24  ;;  %v7142_v19 = vunpack.c.l.bf16 %v6969_v24  ;;  %v11227_v54 = vld [vmem:[#allocation3 + $0x1c] sm:$0xff]  ;;  %v7501_v24 = vmul.f32 %v7492_v62, %v14146_v18 }
 0x538   : > { %v7418_v56 = vshll.u32 %v11227_v54, 16  ;;  %v14454_v13 = vld [vmem:[#allocation3 + $0x24] sm:$0x1]  ;;  %v7422_v34 = vshrl.u32 %v11227_v54, 16 }
 0x539   : > { %v6997_v1 = vpack.c.b16 %v6992_v4, %v6992_v4  ;;  %v7191_v5 = vmul.f32 %v14363_v9, %v7142_v19  ;;  %v7414_v4 = vshrl.u32 %v11226_v30, 16 }
 0x53a   : > { %v7420_v19 = vrot.slane %v7418_v56, 1  ;;  %v7505_v56 = vmul.f32 %v11472_v37, %v14274_v61 }
 0x53b   : > { %v7030_v25 = vshll.u32 %v6997_v1, 16  ;;  %v7196_v28 = vpack.c.bf16 %v7191_v5, %v7191_v5  ;;  %v15504_v5 = vld [vmem:[#allocation78_spill] sm:$0xff]  ;;  %v7416_v50 = vor.u32 %v7414_v4, %v7412_v14  ;;  %v11475_v14 = vunpack.c.l.bf16 %v14451_v57  ;;  %v14488_v4 = vpop.f32.mrf.mxu3 }
 0x53c   : > { %v7280_v22 = vmul.f32 %v15504_v5, %v14173_v8  ;;  %v14463_v3 = vmul.f32 %v11468_v49, %v15504_v5  ;;  %v14478_v49 = vpop.f32.mrf.mxu1  ;;  %v7424_v10 = vor.u32 %v7422_v34, %v7420_v19 }
 0x53d   : > { %10483 = vmatmul.msk.bf16.gmra.mxu2 %vm849_vm0, %v7413_v35  ;;  %v7032_v41 = vrot.slane %v7030_v25, 1  ;;  %v7214_v20 = vrot.slane %v7196_v28, 1  ;;  %v7526_v25 = vrot.slane %v7511_v63, 1  ;;  %v7421_v28 = vsel %vm3579_vm14, %v7416_v50, %v7420_v19  ;;  %v14493_v50 = vld [vmem:[#allocation3 + $0x20] sm:$0xff]   ;;  %v11234_v19 = vld [vmem:[#allocation3 + $0x8] sm:$0xff] }
 0x53e   : > { %v7279_v35 = vmul.f32 %v15505_v59, %v14011_v52  ;;  %v7506_v62 = vmul.f32 %v11475_v14, %v14279_v43  ;;  %v7282_v63 = vmul.f32 %v14158_v33, %v14281_v12  ;;  %v11235_v12 = vld [vmem:[#allocation3 + $0x10] sm:$0xff] }
 0x53f   : > { %v7033_v60 = vsel %vm3579_vm14, %v7028_v42, %v7032_v41  ;;  %v7215_v36 = vsel %vm4232_vm15, %v7212_v47, %v7214_v20  ;;  %v7502_v47 = vmul.f32 %v11467_v11, %v14162_v15  ;;  %v7388_v41 = vunpack.c.l.b16 %v14454_v13 }
 0x540   : > { %10409 = vmatmul.msk.bf16.gmra.mxu1 %vm849_vm0, %v7033_v60  ;;  %10437 = vmatmul.msk.bf16.gmra.mxu3 %vm849_vm0, %v7215_v36  ;;  %v7287_v42 = vpack.c.bf16 %v7280_v22, %v7279_v35  ;;  %v14460_v20 = vmul.f32 %v11467_v11, %v15505_v59  ;;  %v11240_v60 = vld [vmem:[%s15431_s29 + $0x80] sm:$0xff]  ;;  %v14476_v11 = vpop.f32.mrf.mxu2  ;;  %v7281_v22 = vmul.f32 %v14153_v29, %v14175_v48  ;;  %v7499_v59 = vunpack.c.l.bf16 %v14493_v50 }
 0x541   : > { %v7510_v1 = vpack.c.bf16 %v7502_v47, %v7501_v24  ;;  %v7393_v52 = vpack.c.b16 %v7388_v41, %v7388_v41  ;;  %v11232_v36 = vld [vmem:[%s15431_s29 + $0x60] sm:$0xff]  ;;  %7883 = vmatpush.bf16.msrb.mxu3 %v11240_v60  ;;  %v7512_v47 = vpack.c.bf16 %v7506_v62, %v7505_v56  ;;  %v11476_v35 = vunpack.c.h.bf16 %v14451_v57  ;;  %s9549_s29 = scalar_lea.hbm %s15128_s21, %s11760_s3 }
 0x542   : > { %v7605_v46 = vpack.c.bf16 %v14463_v3, %v14460_v20  ;;  %7645 = vmatpush.bf16.msrb.mxu1 %v11232_v36  ;;  %v7288_v54 = vpack.c.bf16 %v7282_v63, %v7281_v22  ;;  %v7508_v48 = vmul.f32 %v7499_v59, %v14381_v39  ;;  %v7713_v36 = vshrl.u32 %v11234_v19, 16  ;;  %v11236_v63 = vld [vmem:[#allocation3 + $0x18] sm:$0xff]  ;;  %s9553_s4 = sshll.u32 %s9549_s29, 4  ;;  %s9554_s4 = int_to_ptr.hbm [resolvable:$true] %s9553_s4 }
 0x543   : > { %v7525_v30 = vrot.slane %v7510_v1, 1  ;;  %v7426_v6 = vshll.u32 %v7393_v52, 16  ;;  %v7528_v1 = vrot.slane %v7512_v47, 1  ;;  %v7284_v56 = vmul.f32 %v14267_v45, %v14383_v55 }
 0x544   : > { %v7599_v3 = vmul.f32 %v11471_v17, %v14153_v29 }
 0x545   : > { %v7527_v8 = vsel %vm4232_vm15, %v7525_v30, %v7526_v25  ;;  %v7428_v16 = vrot.slane %v7426_v6, 1  ;;  %v7715_v30 = vshll.u32 %v11234_v19, 16 }
 0x547   : > { %v7429_v5 = vsel %vm3579_vm14, %v7424_v10, %v7428_v16  ;;  %v7717_v52 = vrot.slane %v7715_v30, 1  ;;  %v7283_v10 = vmul.f32 %v14263_v44, %v14283_v53 }
 0x548   : > { %v7125_v58 = vpop.f32.mrf.mxu2 }
 0x549   : > { %v7718_v6 = vor.u32 %v7717_v52, %v7713_v36  ;;  %v7289_v16 = vpack.c.bf16 %v7284_v56, %v7283_v10  ;;  %v7809_v36 = vld [vmem:[#allocation3 + $0x8] sm:$0xe] }
 0x54a   : > { %v7810_v56 = vunpack.c.l.bf16 %v7809_v36 }
 0x54d   : > { %10484 = vmatmul.msk.bf16.gmra.mxu2 %vm849_vm0, %v7421_v28  ;;  %v7529_v28 = vsel %vm4232_vm15, %v7526_v25, %v7528_v1  ;;  %v7507_v25 = vmul.f32 %v11476_v35, %v14377_v0 }
 0x54f   : > { %v7513_v60 = vpack.c.bf16 %v7508_v48, %v7507_v25  ;;  %v7678_v48 = vld [vmem:[#allocation3 + $0x14] sm:$0xff]   ;;  %v7676_v25 = vld [vmem:[#allocation3 + $0xc] sm:$0xff]  }
 0x550   : > { %10450 = vmatmul.msk.bf16.vlgmr.msra.gmra.mxu1 %vm849_vm0, %v7287_v42  ;;  %10498 = vmatmul.msk.bf16.vlgmr.msra.gmra.mxu3 %vm849_vm0, %v7527_v8  ;;  %v7720_v8 = vshll.u32 %v11235_v12, 16 }
 0x551   : > { %v7530_v34 = vrot.slane %v7513_v60, 1  ;;  %v7813_v60 = vunpack.c.l.bf16 %v7678_v48 }
 0x552   : > { %v7722_v62 = vrot.slane %v7720_v8, 1 }
 0x554   : > { %v7723_v47 = vsel %vm3579_vm14, %v7718_v6, %v7722_v62  ;;  %v7812_v6 = vunpack.c.h.bf16 %v7676_v25 }
 0x55a   : > { %v7072_v24 = vpop.f32.mrf.mxu1 }
 0x55b   : > { %v7126_v32 = vadd.f32 %v7125_v58, %v7072_v24  ;;  %v7531_v58 = vsel %vm4232_vm15, %v7528_v1, %v7530_v34  ;;  %v7500_v24 = vunpack.c.l.bf16 %v14454_v13 }
 0x55d   : > { %10485 = vmatmul.msk.bf16.gmra.mxu2 %vm849_vm0, %v7429_v5  ;;  %v7509_v55 = vmul.f32 %v7500_v24, %v14363_v9  ;;  %v7728_v5 = vshll.u32 %v11236_v63, 16 }
 0x55f   : > { %v7514_v53 = vpack.c.bf16 %v7509_v55, %v7509_v55  ;;  %v7730_v19 = vrot.slane %v7728_v5, 1  ;;  %v7732_v55 = vshrl.u32 %v11236_v63, 16  ;;  %v7814_v63 = vunpack.c.h.bf16 %v7678_v48 }
 0x560   : > { %10451 = vmatmul.msk.bf16.gmra.mxu1 %vm849_vm0, %v7288_v54  ;;  %10499 = vmatmul.msk.bf16.gmra.mxu3 %vm849_vm0, %v7529_v28  ;;  %v7724_v54 = vshrl.u32 %v11235_v12, 16  ;;  %v11237_v12 = vld [vmem:[#allocation3 + $0x20] sm:$0xff] }
 0x561   : > { %v7532_v30 = vrot.slane %v7514_v53, 1  ;;  %v7683_v53 = vld [vmem:[#allocation3 + $0x28] sm:$0x1] }
 0x562   : > { %v7726_v28 = vor.u32 %v7724_v54, %v7722_v62  ;;  %v7811_v62 = vunpack.c.l.bf16 %v7676_v25  ;;  %v7734_v54 = vor.u32 %v7732_v55, %v7730_v19  ;;  %v7601_v55 = vmul.f32 %v11475_v14, %v14263_v44 }
 0x563   : > { %v7254_v42 = vpop.f32.mrf.mxu3  ;;  %v7533_v52 = vsel %vm4232_vm15, %v7530_v34, %v7532_v30  ;;  %v7819_v34 = vmul.f32 %v7810_v56, %v14146_v18  ;;  %v7706_v30 = vunpack.c.l.b16 %v7683_v53 }
 0x564   : > { %v14504_v41 = vadd.f32 %v7254_v42, %v7126_v32  ;;  %v14519_v32 = vld [vmem:[#allocation3 + $0x20] sm:$0xff]   ;;  %v7731_v13 = vsel %vm3579_vm14, %v7726_v28, %v7730_v19  ;;  %v7285_v42 = vmul.f32 %v14367_v27, %v14385_v2  ;;  %v7736_v2 = vshll.u32 %v11237_v12, 16  ;;  %v14545_v19 = vpop.f32.mrf.mxu1 }
 0x565   : > { %v7278_v22 = vunpack.c.l.bf16 %v14519_v32  ;;  %v7820_v10 = vmul.f32 %v7811_v62, %v14162_v15  ;;  %v7711_v18 = vpack.c.b16 %v7706_v30, %v7706_v30  ;;  %v7596_v44 = vunpack.c.h.bf16 %v14519_v32 }
 0x566   : > { %v7738_v5 = vrot.slane %v7736_v2, 1 }
 0x567   : > { %v7286_v1 = vmul.f32 %v14370_v7, %v7278_v22  ;;  %v7828_v22 = vpack.c.bf16 %v7820_v10, %v7819_v34  ;;  %v7744_v25 = vshll.u32 %v7711_v18, 16  ;;  %v7604_v57 = vmul.f32 %v14370_v7, %v7596_v44 }
 0x569   : > { %v7290_v8 = vpack.c.bf16 %v7286_v1, %v7285_v42  ;;  %v7739_v1 = vsel %vm3579_vm14, %v7734_v54, %v7738_v5  ;;  %v7843_v15 = vrot.slane %v7828_v22, 1  ;;  %v7746_v56 = vrot.slane %v7744_v25, 1 }
 0x56b   : > { %v14557_v48 = vpop.f32.mrf.mxu3 }
 0x56d   : > { %10546 = vmatmul.msk.bf16.vlgmr.msrb.gmra.mxu2 %vm849_vm0, %v7723_v47  ;;  %v7822_v47 = vmul.f32 %v7813_v60, %v14180_v40  ;;  %v7680_v40 = vld [vmem:[#allocation3 + $0x1c] sm:$0xff]   ;;  %v7740_v60 = vshrl.u32 %v11237_v12, 16 }
 0x56e   : > { %v7815_v42 = vunpack.c.l.bf16 %v7680_v40  ;;  %v7816_v10 = vunpack.c.h.bf16 %v7680_v40 }
 0x570   : > { %10452 = vmatmul.msk.bf16.gmra.mxu1 %vm849_vm0, %v7289_v16  ;;  %10500 = vmatmul.msk.bf16.gmra.mxu3 %vm849_vm0, %v7531_v58  ;;  %v7821_v16 = vmul.f32 %v7812_v6, %v14168_v26  ;;  %v14534_v58 = vpop.f32.mrf.mxu2  ;;  %v7742_v6 = vor.u32 %v7740_v60, %v7738_v5  ;;  %v7602_v5 = vmul.f32 %v11476_v35, %v14267_v45 }
 0x571   : > { %v7603_v45 = vmul.f32 %v14367_v27, %v7499_v59 }
 0x572   : > { %v7829_v24 = vpack.c.bf16 %v7822_v47, %v7821_v16  ;;  %v7817_v16 = vunpack.c.h.bf16 %v14493_v50  ;;  %v7607_v54 = vpack.c.bf16 %v7602_v5, %v7601_v55 }
 0x574   : > { %v7844_v28 = vrot.slane %v7829_v24, 1  ;;  %v7826_v51 = vmul.f32 %v7817_v16, %v14381_v39 }
 0x576   : > { %v7845_v26 = vsel %vm4232_vm15, %v7843_v15, %v7844_v28 }
 0x57d   : > { %10547 = vmatmul.msk.bf16.gmra.mxu2 %vm849_vm0, %v7731_v13  ;;  %v7130_v13 = vpop.f32.mrf.mxu2 }
 0x580   : > { %10453 = vmatmul.msk.bf16.gmra.mxu1 %vm849_vm0, %v7290_v8  ;;  %10501 = vmatmul.msk.bf16.gmra.mxu3 %vm849_vm0, %v7533_v52  ;;  %v7824_v8 = vmul.f32 %v7815_v42, %v14279_v43  ;;  %v7823_v52 = vmul.f32 %v7814_v63, %v14274_v61  ;;  %v7747_v61 = vsel %vm3579_vm14, %v7742_v6, %v7746_v56 }
 0x582   : > { %v7830_v36 = vpack.c.bf16 %v7824_v8, %v7823_v52 }
 0x584   : > { %v7846_v47 = vrot.slane %v7830_v36, 1 }
 0x585   : > { %v14549_v62 = vpop.f32.mrf.mxu2 }
 0x586   : > { %v7847_v2 = vsel %vm4232_vm15, %v7844_v28, %v7846_v47 }
 0x58d   : > { %10548 = vmatmul.msk.bf16.gmra.mxu2 %vm849_vm0, %v7739_v1  ;;  %v7818_v1 = vunpack.c.l.bf16 %v7683_v53 }
 0x58f   : > { %v7827_v39 = vmul.f32 %v7818_v1, %v14363_v9 }
 0x590   : > { %10514 = vmatmul.msk.bf16.vlgmr.msrb.gmra.mxu1 %vm849_vm0, %v7605_v46  ;;  %10562 = vmatmul.msk.bf16.vlgmr.msrb.gmra.mxu3 %vm849_vm0, %v7845_v26  ;;  %v7600_v46 = vmul.f32 %v11472_v37, %v14158_v33  ;;  %v7825_v33 = vmul.f32 %v7816_v10, %v14377_v0  ;;  %v7608_v26 = vpack.c.bf16 %v7604_v57, %v7603_v45 }
 0x591   : > { %v7832_v14 = vpack.c.bf16 %v7827_v39, %v7827_v39  ;;  %v7123_v39 = vadd.f32 %v14476_v11, %v14478_v49  ;;  %v14628_v11 = vld [vmem:[%s15508_s13] ss:$0 sm:$0xff]  ;;  %s15512_s13 = sld [smem:[#allocation109_spill]] }
 0x592   : > { %v7606_v12 = vpack.c.bf16 %v7600_v46, %v7599_v3  ;;  %v7831_v37 = vpack.c.bf16 %v7826_v51, %v7825_v33 }
 0x593   : > { %v7850_v53 = vrot.slane %v7832_v14, 1  ;;  %v7270_v45 = vadd.f32 %v14488_v4, %v7123_v39  ;;  %v7128_v4 = vadd.f32 %v14534_v58, %v14545_v19 }
 0x594   : > { %v7848_v22 = vrot.slane %v7831_v37, 1 }
 0x596   : > { %v7849_v28 = vsel %vm4232_vm15, %v7846_v47, %v7848_v22  ;;  %v7851_v9 = vsel %vm4232_vm15, %v7848_v22, %v7850_v53 }
 0x59a   : > { %v7077_v20 = vpop.f32.mrf.mxu1 }
 0x59b   : > { %v7131_v43 = vadd.f32 %v7130_v13, %v7077_v20 }
 0x59d   : > { %10549 = vmatmul.msk.bf16.gmra.mxu2 %vm849_vm0, %v7747_v61 }
 0x5a0   : > { %v7135_v34 = vpop.f32.mrf.mxu2  ;;  %10515 = vmatmul.msk.bf16.gmra.mxu1 %vm849_vm0, %v7606_v12  ;;  %10563 = vmatmul.msk.bf16.gmra.mxu3 %vm849_vm0, %v7847_v2 }
 0x5a2   : > { %v14579_v30 = vpop.f32.mrf.mxu1 }
 0x5a3   : > { %v7259_v29 = vpop.f32.mrf.mxu3 }
 0x5a4   : > { %v7273_v17 = vadd.f32 %v7259_v29, %v7131_v43 }
 0x5a8   : > { %v14567_v24 = vpop.f32.mrf.mxu2 }
 0x5ab   : > { %v14586_v35 = vpop.f32.mrf.mxu3 }
 0x5b0   : > { %10516 = vmatmul.msk.bf16.gmra.mxu1 %vm849_vm0, %v7607_v54  ;;  %10564 = vmatmul.msk.bf16.gmra.mxu3 %vm849_vm0, %v7849_v28  ;;  %v7463_v0 = vpop.f32.mrf.mxu2 }
 0x5b8   : > { %v7465_v40 = vpop.f32.mrf.mxu2 }
 0x5bd   : > { %v7082_v15 = vpop.f32.mrf.mxu1 }
 0x5be   : > { %v7136_v13 = vadd.f32 %v7135_v34, %v7082_v15 }
 0x5c0   : > { %10517 = vmatmul.msk.bf16.gmra.mxu1 %vm849_vm0, %v7608_v26  ;;  %10565 = vmatmul.msk.bf16.gmra.mxu3 %vm849_vm0, %v7851_v9  ;;  %v7468_v27 = vpop.f32.mrf.mxu2  ;;  %vm689_vm0 = vcmask 387072  }
 0x5c1   : > { %vm14614_vm3 = vmand %vm689_vm0, %vm690_vm9 }
 0x5c3   : > { %v7264_v32 = vpop.f32.mrf.mxu3 }
 0x5c4   : > { %v7275_v42 = vadd.f32 %v7264_v32, %v7136_v13 }
 0x5c5   : > { %v14591_v50 = vpop.f32.mrf.mxu1 }
 0x5c8   : > { %v14596_v8 = vpop.f32.mrf.mxu2 }
 0x5cb   : > { %v14593_v59 = vpop.f32.mrf.mxu3 }
 0x5cd   : > { %v7329_v7 = vpop.f32.mrf.mxu1 }
 0x5ce   : > { %v7349_v18 = vadd.f32 %v7329_v7, %v14405_v23 }
 0x5d0   : > { %v7483_v63 = vadd.f32 %v7463_v0, %v7349_v18  ;;  %v7473_v36 = vpop.f32.mrf.mxu2 }
 0x5d3   : > { %v7567_v25 = vpop.f32.mrf.mxu3 }
 0x5d4   : > { %v7587_v52 = vadd.f32 %v7567_v25, %v7483_v63 }
 0x5d5   : > { %v7331_v60 = vpop.f32.mrf.mxu1 }
 0x5d6   : > { %v7350_v15 = vadd.f32 %v7331_v60, %v7270_v45 }
 0x5d8   : > { %v14599_v47 = vpop.f32.mrf.mxu2  ;;  %v7484_v13 = vadd.f32 %v7465_v40, %v7350_v15  ;;  %v7272_v40 = vadd.f32 %v14557_v48, %v7128_v4 }
 0x5db   : > { %v7569_v6 = vpop.f32.mrf.mxu3 }
 0x5dc   : > { %v7588_v32 = vadd.f32 %v7569_v6, %v7484_v13 }
 0x5dd   : > { %v7334_v56 = vpop.f32.mrf.mxu1 }
 0x5de   : > { %v7351_v20 = vadd.f32 %v7334_v56, %v14504_v41 }
 0x5e0   : > { %v7485_v3 = vadd.f32 %v7468_v27, %v7351_v20  ;;  %v7478_v10 = vpop.f32.mrf.mxu2 }
 0x5e3   : > { %v7572_v46 = vpop.f32.mrf.mxu3 }
 0x5e4   : > { %v7589_v43 = vadd.f32 %v7572_v46, %v7485_v3 }
 0x5e5   : > { %v7336_v61 = vpop.f32.mrf.mxu1 }
 0x5e6   : > { %v7352_v6 = vadd.f32 %v7336_v61, %v7272_v40  ;;  %v11244_v61 = vld [vmem:[%s15509_s22 + $0x10] sm:$0xff] }
 0x5e7   : > { %8137 = vmatpush.bf16.msra.mxu3 %v11244_v61  ;;  %v11246_v61 = vld [vmem:[%s15509_s22 + $0x20] sm:$0xff] }
 0x5e8   : > { %v14605_v51 = vpop.f32.mrf.mxu2 }
 0x5eb   : > { %v7574_v12 = vpop.f32.mrf.mxu3 }
 0x5ed   : > { %v7339_v2 = vpop.f32.mrf.mxu1 }
 0x5ee   : > { %v7353_v23 = vadd.f32 %v7339_v2, %v7273_v17  ;;  %v692_v17 = vld [vmem:[#allocation4] sm:$0x7]  ;;  %v7486_v2 = vadd.f32 %v14596_v8, %v7352_v6  ;;  %v7133_v8 = vadd.f32 %v14549_v62, %v14579_v30 }
 0x5ef   : > { %v693_v44 = vsel %vm14614_vm3, 0, %v692_v17 }
 0x5f0   : > { %v7487_v16 = vadd.f32 %v7473_v36, %v7353_v23  ;;  %v7781_v22 = vpop.f32.mrf.mxu2  ;;  %694 = vst [vmem:[#allocation4] sm:$0x7] %v693_v44  ;;  %v7590_v19 = vadd.f32 %v7574_v12, %v7486_v2 }
 0x5f3   : > { %v7577_v34 = vpop.f32.mrf.mxu3 }
 0x5f4   : > { %v14601_v29 = vadd.f32 %v7577_v34, %v7487_v16 }
 0x5f5   : > { %v14603_v33 = vpop.f32.mrf.mxu1 }
 0x5f8   : > { %v7783_v57 = vpop.f32.mrf.mxu2 }
 0x5fb   : > { %v14607_v37 = vpop.f32.mrf.mxu3 }
 0x5fd   : > { %v7344_v41 = vpop.f32.mrf.mxu1 }
 0x5fe   : > { %v7355_v55 = vadd.f32 %v7344_v41, %v7275_v42 }
 0x600   : > { %v7489_v5 = vadd.f32 %v7478_v10, %v7355_v55  ;;  %v7786_v18 = vpop.f32.mrf.mxu2  ;;  %v11247_v55 = vld [vmem:[%s15509_s22 + $0x28] sm:$0xff] }
 0x601   : > { %8102 = vmatpush.bf16.msra.mxu1 %v11247_v55  ;;  %v11285_v55 = vld [vmem:[%s15512_s13 + $0x78] sm:$0xff] }
 0x602   : > { %8873 = vmatpush.bf16.msra.mxu0 %v11285_v55  ;;  %v11259_v55 = vld [vmem:[%s15509_s22 + $0x88] sm:$0xff] }
 0x603   : > { %v7582_v54 = vpop.f32.mrf.mxu3 }
 0x604   : > { %v14609_v28 = vadd.f32 %v7582_v54, %v7489_v5 }
 0x605   : > { %v14611_v1 = vpop.f32.mrf.mxu1  ;;  %8103 = vmatpush.bf16.msra.mxu1 %v11246_v61 }
 0x608   : > { %v7788_v46 = vpop.f32.mrf.mxu2 }
 0x60b   : > { %v14622_v14 = vpop.f32.mrf.mxu3 }
 0x60d   : > { %v7647_v53 = vpop.f32.mrf.mxu1 }
 0x60e   : > { %v7667_v26 = vadd.f32 %v7647_v53, %v7587_v52 }
 0x610   : > { %v7801_v27 = vadd.f32 %v7781_v22, %v7667_v26  ;;  %v7791_v12 = vpop.f32.mrf.mxu2  ;;  %v7274_v22 = vadd.f32 %v14586_v35, %v7133_v8 }
 0x612   : > { %v7354_v44 = vadd.f32 %v14603_v33, %v7274_v22  ;;  %v7138_v33 = vadd.f32 %v14567_v24, %v14591_v50  ;;  %v11245_v22 = vld [vmem:[%s15509_s22 + $0x18] sm:$0xff] }
 0x613   : > { %v7885_v9 = vpop.f32.mrf.mxu3  ;;  %8104 = vmatpush.bf16.msra.mxu1 %v11245_v22 }
 0x614   : > { %v7905_v49 = vadd.f32 %v7885_v9, %v7801_v27  ;;  %v7488_v15 = vadd.f32 %v14599_v47, %v7354_v44 }
 0x615   : > { %v7649_v42 = vpop.f32.mrf.mxu1 }
 0x616   : > { %v7668_v7 = vadd.f32 %v7649_v42, %v7588_v32  ;;  %v7913_v52 = vadd.f32 %v14628_v11, %v7905_v49  ;;  %v7592_v26 = vadd.f32 %v14607_v37, %v7488_v15  ;;  %v11250_v15 = vld [vmem:[%s15509_s22 + $0x40] sm:$0xff] }
 0x618   : > { %v7802_v63 = vadd.f32 %v7783_v57, %v7668_v7  ;;  %v7921_v20 = vmax.f32 %v7913_v52, 0.0  ;;  %v7793_v35 = vpop.f32.mrf.mxu2 }
 0x61b   : > { %v7887_v25 = vpop.f32.mrf.mxu3 }
 0x61c   : > { %v7906_v60 = vadd.f32 %v7887_v25, %v7802_v63 }
 0x61d   : > { %v7652_v36 = vpop.f32.mrf.mxu1 }
 0x61e   : > { %v7914_v56 = vadd.f32 %v14628_v11, %v7906_v60  ;;  %v7669_v10 = vadd.f32 %v7652_v36, %v7589_v43 }
 0x620   : > { %v7922_v3 = vmax.f32 %v7914_v56, 0.0  ;;  %v7803_v16 = vadd.f32 %v7786_v18, %v7669_v10  ;;  %v7276_v18 = vadd.f32 %v14593_v59, %v7138_v33  ;;  %v7796_v36 = vpop.f32.mrf.mxu2 }
 0x622   : > { %v7929_v23 = vmax.f32 %v7921_v20, %v7922_v3  ;;  %v7356_v25 = vadd.f32 %v14611_v1, %v7276_v18 }
 0x623   : > { %v7890_v58 = vpop.f32.mrf.mxu3 }
 0x624   : > { %7931 = vst.msk [vmem:[#allocation8] sm:$0xff] %vm7930_vm8, %v7929_v23  ;;  %v7907_v41 = vadd.f32 %v7890_v58, %v7803_v16  ;;  %v7490_v56 = vadd.f32 %v14605_v51, %v7356_v25  ;;  %v7973_v23 = vld [vmem:[#allocation4] sm:$0xc]  ;;  %v11265_v25 = vld [vmem:[%s15509_s22 + $0xb0] sm:$0xff] }
 0x625   : > { %v7654_v48 = vpop.f32.mrf.mxu1 }
 0x626   : > { %v7670_v34 = vadd.f32 %v7654_v48, %v7590_v19  ;;  %v7915_v54 = vadd.f32 %v14628_v11, %v7907_v41  ;;  %v7594_v58 = vadd.f32 %v14622_v14, %v7490_v56  ;;  %v11256_v14 = vld [vmem:[%s15509_s22 + $0x70] sm:$0xff]  ;;  %v15513_v56 = vmov 0  }
 0x627   : > { %8339 = vmatpush.bf16.msra.mxu2 %v11256_v14  ;;  %702 = vst.msk [vmem:[#allocation4 + $0xc] sm:$0x1] %vm701_vm6, %v15513_v56  ;;  %vm8597_vm6 = vcmask 519168  }
 0x628   : > { %v7804_v43 = vadd.f32 %v7788_v46, %v7670_v34  ;;  %v7923_v57 = vmax.f32 %v7915_v54, 0.0  ;;  %v7798_v8 = vpop.f32.mrf.mxu2 }
 0x62b   : > { %v7892_v5 = vpop.f32.mrf.mxu3 }
 0x62c   : > { %v7908_v17 = vadd.f32 %v7892_v5, %v7804_v43  ;;  %v11242_v43 = vld [vmem:[%s15509_s22] sm:$0xff] }
 0x62d   : > { %v7657_v39 = vpop.f32.mrf.mxu1 }
 0x62e   : > { %v7916_v45 = vadd.f32 %v14628_v11, %v7908_v17  ;;  %v7671_v62 = vadd.f32 %v7657_v39, %v14601_v29 }
 0x630   : > { %v7924_v53 = vmax.f32 %v7916_v45, 0.0  ;;  %v7805_v32 = vadd.f32 %v7791_v12, %v7671_v62  ;;  %v11255_v12 = vld [vmem:[%s15509_s22 + $0x68] sm:$0xff] }
 0x631   : > { %8340 = vmatpush.bf16.msra.mxu2 %v11255_v12  ;;  %v698_v62 = vld [vmem:[#allocation4 + $0x8] sm:$0xc] }
 0x632   : > { %v7932_v13 = vmax.f32 %v7923_v57, %v7924_v53 }
 0x633   : > { %v7895_v30 = vpop.f32.mrf.mxu3 }
 0x634   : > { %7933 = vst.msk [vmem:[#allocation8 + $0x8] sm:$0xff] %vm7930_vm8, %v7932_v13  ;;  %v7909_v27 = vadd.f32 %v7895_v30, %v7805_v32  ;;  %v11254_v13 = vld [vmem:[%s15509_s22 + $0x60] sm:$0xff]  ;;  %v699_v30 = vsel %vm14661_vm12, 0, %v698_v62  ;;  %v11253_v32 = vld [vmem:[%s15509_s22 + $0x58] sm:$0xff] }
 0x635   : > { %v7659_v9 = vpop.f32.mrf.mxu1  ;;  %8341 = vmatpush.bf16.msra.mxu2 %v11254_v13  ;;  %700 = vst [vmem:[#allocation4 + $0x8] sm:$0xc] %v699_v30  ;;  %8270 = vmatpush.bf16.msrb.mxu1 %v11253_v32  ;;  %v11258_v13 = vld [vmem:[%s15509_s22 + $0x80] sm:$0xff] }
 0x636   : > { %v7672_v42 = vadd.f32 %v7659_v9, %v7592_v26  ;;  %v7917_v63 = vadd.f32 %v14628_v11, %v7909_v27  ;;  %v11266_v27 = vld [vmem:[%s15509_s22 + $0xb8] sm:$0xff] }
 0x638   : > { %v7806_v7 = vadd.f32 %v7793_v35, %v7672_v42  ;;  %v7925_v6 = vmax.f32 %v7917_v63, 0.0  ;;  %v11248_v42 = vld [vmem:[%s15509_s22 + $0x30] sm:$0xff] }
 0x639   : > { %8520 = vmatpush.bf16.msrb.mxu2 %v11266_v27 }
 0x63b   : > { %v7938_v47 = vld [vmem:[#allocation8] ss:$2 sm:$0xff]  ;;  %v7942_v49 = vld [vmem:[#allocation8 + $0x1] ss:$2 sm:$0xff]  ;;  %v7897_v4 = vpop.f32.mrf.mxu3 }
 0x63c   : > { %v7945_v29 = vmax.f32 %v7938_v47, %v7942_v49  ;;  %v7910_v37 = vadd.f32 %v7897_v4, %v7806_v7  ;;  %v11252_v7 = vld [vmem:[%s15509_s22 + $0x50] sm:$0xff] }
 0x63d   : > { %v7662_v40 = vpop.f32.mrf.mxu1  ;;  %8271 = vmatpush.bf16.msrb.mxu1 %v11252_v7  ;;  %8521 = vmatpush.bf16.msrb.mxu2 %v11265_v25 }
 0x63e   : > { %v7947_v52 = vpack.c.bf16 %v7945_v29, %v7945_v29  ;;  %v7918_v60 = vadd.f32 %v14628_v11, %v7910_v37  ;;  %v7673_v2 = vadd.f32 %v7662_v40, %v14609_v28  ;;  %v11243_v28 = vld [vmem:[%s15509_s22 + $0x8] sm:$0xff] }
 0x63f   : > { %8138 = vmatpush.bf16.msra.mxu3 %v11243_v28  ;;  %v7978_v37 = vld [vmem:[#allocation4 + $0x8] sm:$0x7] }
 0x640   : > { %v7952_v24 = vshrl.u32 %v7947_v52, 16  ;;  %v7955_v50 = vshll.u32 %v7947_v52, 16  ;;  %v7926_v59 = vmax.f32 %v7918_v60, 0.0  ;;  %v7807_v16 = vadd.f32 %v7796_v36, %v7673_v2  ;;  %v11251_v40 = vld [vmem:[%s15509_s22 + $0x48] sm:$0xff] }
 0x641   : > { %v7989_v36 = vand.u32 3, %v15472_v21  ;;  %8272 = vmatpush.bf16.msrb.mxu1 %v11251_v40 }
 0x642   : > { %v7954_v20 = vrot.slane %v7952_v24, 5  ;;  %v7957_v3 = vrot.slane %v7955_v50, 6  ;;  %v7934_v46 = vmax.f32 %v7925_v6, %v7926_v59  ;;  %v11264_v24 = vld [vmem:[%s15509_s22 + $0xa8] sm:$0xff]  ;;  %v7996_v6 = vand.u32 3, %v15473_v31 }
 0x643   : > { %v7900_v10 = vpop.f32.mrf.mxu3  ;;  %8139 = vmatpush.bf16.msra.mxu3 %v11242_v43  ;;  %vm8009_vm11 = vcmp.ne.s32.totalorder %v7989_v36, 0  ;;  %8522 = vmatpush.bf16.msrb.mxu2 %v11264_v24  ;;  %v11261_v24 = vld [vmem:[%s15509_s22 + $0x98] sm:$0xff] }
 0x644   : > { %v14666_v19 = vor.u32 %v7957_v3, %v7954_v20  ;;  %7935 = vst.msk [vmem:[#allocation8 + $0x10] sm:$0xff] %vm7930_vm8, %v7934_v46  ;;  %v7911_v41 = vadd.f32 %v7900_v10, %v7807_v16  ;;  %vm8010_vm0 = vcmp.ne.s32.totalorder %v7996_v6, 0  ;;  %vm8022_vm9 = vcmp.ne.s32.totalorder %v7996_v6, 3 }
 0x645   : > { %v7664_v48 = vpop.f32.mrf.mxu1  ;;  %v14738_v46 = vsel %vm8009_vm11, 1.0, %v15476_v38  ;;  %vm8618_vm11 = vcmask 519169  }
 0x646   : > { %v7974_v51 = vsel %vm14661_vm12, %v14666_v19, %v7973_v23  ;;  %v7674_v34 = vadd.f32 %v7664_v48, %v7594_v58  ;;  %v7919_v17 = vadd.f32 %v14628_v11, %v7911_v41  ;;  %v7959_v29 = vrot.slane %v14666_v19, 4 }
 0x647   : > { %7975 = vst [vmem:[#allocation4] sm:$0xc] %v7974_v51  ;;  %8202 = vmatpush.bf16.msrb.mxu3 %v11250_v15  ;;  %v14743_v23 = vsel %vm8010_vm0, 1.0, %v15476_v38  ;;  %v14750_v51 = vsel %vm8022_vm9, 1.0, %v15476_v38  ;;  %vm8374_vm12 = vcmask 1044480  }
 0x648   : > { %v7808_v5 = vadd.f32 %v7798_v8, %v7674_v34  ;;  %v7927_v45 = vmax.f32 %v7919_v17, 0.0  ;;  %vm8619_vm0 = vsmask.f32 3334 }
 0x649   : > { %vm8620_vm9 = vmand %vm8618_vm11, %vm8619_vm0 }
 0x64b   : > { %v7902_v54 = vpop.f32.mrf.mxu3 }
 0x64c   : > { %v7912_v39 = vadd.f32 %v7902_v54, %v7808_v5  ;;  %v14762_v5 = vrot.slane %v14750_v51, 6 }
 0x64e   : > { %v7920_v44 = vadd.f32 %v14628_v11, %v7912_v39  ;;  %v11249_v11 = vld [vmem:[%s15509_s22 + $0x38] sm:$0xff]  ;;  %v8033_v59 = vld [vmem:[#allocation4] sm:$0xf] }
 0x64f   : > { %8203 = vmatpush.bf16.msrb.mxu3 %v11249_v11  ;;  %v8035_v20 = vunpack.c.l.bf16 %v8033_v59  ;;  %v14735_v3 = vld [vmem:[#allocation4] sm:$0xc]  ;;  %v8059_v1 = vunpack.c.l.b16 %v8033_v59 }
 0x650   : > { %v7928_v57 = vmax.f32 %v7920_v44, 0.0  ;;  %v8291_v48 = vunpack.c.l.b16 %v14735_v3  ;;  %v8146_v39 = vld [vmem:[#allocation4] sm:$0xe] }
 0x651   : > { %v8039_v10 = vmul.f32 %v14738_v46, %v8035_v20 }
 0x652   : > { %v7936_v53 = vmax.f32 %v7927_v45, %v7928_v57 }
 0x653   : > { %8204 = vmatpush.bf16.msrb.mxu3 %v11248_v42  ;;  %v8147_v42 = vunpack.c.l.bf16 %v8146_v39 }
 0x654   : > { %7937 = vst.msk [vmem:[#allocation8 + $0x18] sm:$0xff] %vm7930_vm8, %v7936_v53 }
 0x65b   : > { %v7940_v26 = vld [vmem:[#allocation8 + $0x10] ss:$2 sm:$0xff]  ;;  %v7944_v35 = vld [vmem:[#allocation8 + $0x11] ss:$2 sm:$0xff] }
 0x65c   : > { %v7946_v9 = vmax.f32 %v7940_v26, %v7944_v35 }
 0x65e   : > { %v7948_v33 = vpack.c.bf16 %v7946_v9, %v7946_v9 }
 0x660   : > { %v7961_v18 = vshrl.u32 %v7948_v33, 16  ;;  %v7964_v47 = vshll.u32 %v7948_v33, 16  ;;  %v11262_v33 = vld [vmem:[%s15509_s22 + $0xa0] sm:$0xff] }
 0x662   : > { %v7963_v49 = vrot.slane %v7961_v18, 5  ;;  %v7966_v4 = vrot.slane %v7964_v47, 6 }
 0x664   : > { %v7967_v63 = vor.u32 %v7966_v4, %v7963_v49  ;;  %v8221_v49 = vrot.slane %v14743_v23, 4 }
 0x666   : > { %v7968_v52 = vsel %vm7950_vm7, %v7959_v29, %v7967_v63  ;;  %v7969_v60 = vrot.slane %v7967_v63, 4  ;;  %v14782_v63 = vld [vmem:[#allocation4 + $0xc] sm:$0x1] }
 0x667   : > { %7977 = vst.msk [vmem:[#allocation4 + $0x4] sm:$0xf] %vm7976_vm4, %v7968_v52  ;;  %v8220_v52 = vrot.slane %v14738_v46, 4  ;;  %vm710_vm4 = vsmask.f32 7950 }
 0x668   : > { %v7979_v50 = vsel %vm14614_vm3, %v7969_v60, %v7978_v37  ;;  %vm8021_vm3 = vcmp.ne.s32.totalorder %v7989_v36, 3  ;;  %v11257_v60 = vld [vmem:[%s15509_s22 + $0x78] sm:$0xff] }
 0x669   : > { %7980 = vst [vmem:[#allocation4 + $0x8] sm:$0x7] %v7979_v50  ;;  %v14756_v41 = vsel %vm8021_vm3, 1.0, %v15476_v38  ;;  %v8222_v59 = vsel %vm8219_vm5, %v8220_v52, %v8221_v49  ;;  %vm715_vm5 = vcmask 516096  }
 0x66a   : > { %v14766_v15 = vrot.slane %v14756_v41, 6  ;;  %716 = vst.msk [vmem:[#allocation5 + $0x4] sm:$0x1] %vm715_vm5, %v15513_v56 }
 0x66c   : > { %v14774_v27 = vsel %vm4065_vm13, %v14766_v15, %v14762_v5  ;;  %v8159_v36 = vmul.f32 %v14766_v15, %v8147_v42  ;;  %vm8240_vm13 = vcmask 1045504  }
 0x66e   : > { %v8034_v2 = vld [vmem:[#allocation4 + $0x4] sm:$0xf] }
 0x66f   : > { %v14740_v0 = vunpack.c.l.bf16 %v8034_v2  ;;  %v8060_v31 = vunpack.c.l.b16 %v8034_v2  ;;  %v8479_v2 = vunpack.c.l.b16 %v14782_v63 }
 0x670   : > { %v8048_v58 = vld [vmem:[#allocation4 + $0x8] sm:$0x1] }
 0x671   : > { %v14746_v19 = vld [vmem:[#allocation4 + $0x8] sm:$0x7]  ;;  %v8040_v16 = vmul.f32 %v14743_v23, %v14740_v0  ;;  %v8061_v34 = vunpack.c.l.b16 %v8048_v58  ;;  %v8062_v28 = vpack.c.b16 %v8060_v31, %v8059_v1  ;;  %v8293_v61 = vpack.c.b16 %v8060_v31, %v8291_v48  ;;  %v11260_v48 = vld [vmem:[%s15509_s22 + $0x90] sm:$0xff] }
 0x672   : > { %v8292_v14 = vunpack.c.l.b16 %v14746_v19  ;;  %v8148_v44 = vunpack.c.l.bf16 %v8048_v58  ;;  %v8214_v35 = vld [vmem:[#allocation4 + $0x8] sm:$0x3]  ;;  %v8160_v40 = vmul.f32 %v14774_v27, %v14740_v0  ;;  %v8215_v1 = vunpack.c.l.bf16 %v14735_v3  ;;  %v11269_v3 = vld [vmem:[%s15509_s22 + $0xd0] sm:$0xff] }
 0x673   : > { %v8041_v8 = vpack.c.bf16 %v8040_v16, %v8039_v10  ;;  %v8063_v43 = vpack.c.b16 %v8061_v34, %v8061_v34  ;;  %v8067_v12 = vshll.u32 %v8062_v28, 16  ;;  %v8297_v54 = vshrl.u32 %v8293_v61, 16  ;;  %v11263_v20 = vld [vmem:[#allocation4 + $0x4] sm:$0xff] }
 0x674   : > { %v8294_v22 = vpack.c.b16 %v8292_v14, %v8292_v14  ;;  %v8300_v17 = vshll.u32 %v8293_v61, 16  ;;  %v8065_v45 = vshrl.u32 %v8062_v28, 16  ;;  %v8161_v47 = vmul.f32 %v14762_v5, %v8148_v44 }
 0x675   : > { %10601 = vmatmul.msk.bf16.vlgmr.msra.gmra.mxu3 %vm7930_vm8, %v8041_v8  ;;  %v8069_v57 = vrot.slane %v8067_v12, 1  ;;  %v8072_v53 = vshll.u32 %v8063_v43, 16  ;;  %v8299_v62 = vrot.slane %v8297_v54, 2  ;;  %v8216_v29 = vunpack.c.l.bf16 %v8214_v35 }
 0x676   : > { %v8302_v30 = vrot.slane %v8300_v17, 3  ;;  %v8305_v11 = vshrl.u32 %v8294_v22, 16  ;;  %v8308_v26 = vshll.u32 %v8294_v22, 16  ;;  %8404 = vmatpush.bf16.msra.mxu3 %v11259_v55  ;;  %v8163_v6 = vpack.c.bf16 %v8161_v47, %v8161_v47 }
 0x677   : > { %v8070_v9 = vor.u32 %v8069_v57, %v8065_v45  ;;  %v8074_v32 = vrot.slane %v8072_v53, 1  ;;  %v8228_v31 = vmul.f32 %v8221_v49, %v8216_v29  ;;  %v8162_v10 = vpack.c.bf16 %v8160_v40, %v8159_v36  ;;  %v8350_v45 = vld [vmem:[#allocation4] sm:$0x8]  ;;  %v11284_v57 = vld [vmem:[%s15512_s13 + $0x70] sm:$0xff]  ;;  %v8465_v29 = vld [vmem:[#allocation4 + $0x8] sm:$0xf] }
 0x678   : > { %v8307_v7 = vrot.slane %v8305_v11, 2  ;;  %v8310_v18 = vrot.slane %v8308_v26, 3  ;;  %v8303_v37 = vor.u32 %v8302_v30, %v8299_v62  ;;  %v8227_v58 = vmul.f32 %v8222_v59, %v14740_v0  ;;  %8874 = vmatpush.bf16.msra.mxu0 %v11284_v57 }
 0x679   : > { %v8075_v4 = vsel %vm3579_vm14, %v8070_v9, %v8074_v32  ;;  %v8174_v16 = vrot.slane %v8163_v6, 1  ;;  %v8481_v34 = vpack.c.b16 %v8479_v2, %v8479_v2  ;;  %v8485_v28 = vshll.u32 %v11263_v20, 16  ;;  %v11267_v32 = vld [vmem:[%s15509_s22 + $0xc0] sm:$0xff] }
 0x67a   : > { %10588 = vmatmul.msk.bf16.vlgmr.msra.gmra.mxu1 %vm7930_vm8, %v8075_v4  ;;  %v8311_v25 = vor.u32 %v8310_v18, %v8307_v7  ;;  %8405 = vmatpush.bf16.msra.mxu3 %v11258_v13  ;;  %v8226_v14 = vmul.f32 %v8220_v52, %v8215_v1  ;;  %v8230_v61 = vpack.c.bf16 %v8228_v31, %v8228_v31  ;;  %v8173_v55 = vrot.slane %v8162_v10, 1  ;;  %v8415_v18 = vld [vmem:[#allocation4 + $0x8] sm:$0xf] }
 0x67b   : > { %8453 = vmatpush.bf16.msra.mxu1 %v11262_v33  ;;  %v8355_v43 = vrot.slane %v14750_v51, 2  ;;  %v8487_v22 = vrot.slane %v8485_v28, 1  ;;  %v8490_v54 = vshll.u32 %v8481_v34, 16  ;;  %v8352_v17 = vunpack.c.l.bf16 %v14746_v19  ;;  %v11268_v51 = vld [vmem:[%s15509_s22 + $0xc8] sm:$0xff] }
 0x67c   : > { %v8312_v50 = vsel %vm8295_vm10, %v8303_v37, %v8311_v25  ;;  %v8229_v8 = vpack.c.bf16 %v8227_v58, %v8226_v14  ;;  %v8175_v12 = vsel %vm4232_vm15, %v8173_v55, %v8174_v16  ;;  %v8242_v39 = vrot.slane %v8230_v61, 2  ;;  %v11283_v19 = vld [vmem:[%s15512_s13 + $0x68] sm:$0xff]  ;;  %v8531_v25 = vld [vmem:[#allocation4 + $0x4] sm:$0xe]  ;;  %v706_v14 = vld [vmem:[#allocation5] sm:$0x3] }
 0x67d   : > { %10658 = vmatmul.msk.bf16.vlgmr.msra.gmra.mxu2 %vm7930_vm8, %v8312_v50  ;;  %v8354_v44 = vrot.slane %v14756_v41, 2  ;;  %v8483_v53 = vshrl.u32 %v11263_v20, 16  ;;  %v8492_v30 = vrot.slane %v8490_v54, 1  ;;  %v8351_v11 = vunpack.c.l.bf16 %v8350_v45  ;;  %8875 = vmatpush.bf16.msra.mxu0 %v11283_v19  ;;  %v712_v61 = vld [vmem:[#allocation5] sm:$0x8] }
 0x67e   : > { %8406 = vmatpush.bf16.msra.mxu3 %v11257_v60  ;;  %v8241_v13 = vrot.slane %v8229_v8, 2  ;;  %v8362_v26 = vmul.f32 %v8355_v43, %v8352_v17  ;;  %v8416_v4 = vunpack.c.l.bf16 %v8415_v18  ;;  %v8533_v60 = vunpack.c.l.bf16 %v8465_v29  ;;  %v11273_v18 = vld [vmem:[%s15512_s13 + $0x18] sm:$0xff] }
 0x67f   : > { %8454 = vmatpush.bf16.msra.mxu1 %v11261_v24  ;;  %v8356_v62 = vsel %vm8240_vm13, %v8354_v44, %v8355_v43  ;;  %v8488_v41 = vor.u32 %v8487_v22, %v8483_v53  ;;  %v8360_v33 = vmul.f32 %v8354_v44, %v8351_v11  ;;  %v8534_v36 = vunpack.c.l.bf16 %v14782_v63  ;;  %8757 = vmatpush.bf16.msra.mxu2 %v11273_v18 }
 0x680   : > { %v8243_v35 = vsel %vm8240_vm13, %v8241_v13, %v8242_v39  ;;  %v8361_v9 = vmul.f32 %v8356_v62, %v14740_v0  ;;  %v8364_v7 = vpack.c.bf16 %v8362_v26, %v8362_v26  ;;  %v8418_v52 = vmul.f32 %v14743_v23, %v8416_v4 }
 0x681   : > { %v8493_v42 = vsel %vm3579_vm14, %v8488_v41, %v8492_v30  ;;  %v8417_v24 = vmul.f32 %v14738_v46, %v14740_v0  ;;  %v8532_v50 = vunpack.c.l.bf16 %v8531_v25  ;;  %v8536_v59 = vmul.f32 %v8533_v60, %v14774_v27  ;;  %v11557_v30 = vld [vmem:[%s15121_s14] ss:$0 sm:$0xff]  ;;  %v11272_v25 = vld [vmem:[%s15512_s13 + $0x10] sm:$0xff] }
 0x682   : > { %v8363_v47 = vpack.c.bf16 %v8361_v9, %v8360_v33  ;;  %v8376_v49 = vrot.slane %v8364_v7, 3  ;;  %v8537_v20 = vmul.f32 %v8534_v36, %v14762_v5  ;;  %vm703_vm14 = vcmask 517120   ;;  %v11276_v36 = vld [vmem:[%s15512_s13 + $0x30] sm:$0xff] }
 0x683   : > { %8455 = vmatpush.bf16.msra.mxu1 %v11260_v48  ;;  %v8419_v6 = vpack.c.bf16 %v8418_v52, %v8417_v24  ;;  %v8535_v2 = vmul.f32 %v8532_v50, %v14766_v15  ;;  %v11282_v15 = vld [vmem:[%s15512_s13 + $0x60] sm:$0xff]  ;;  %vm705_vm7 = vmand %vm703_vm14, %vm704_vm1  ;;  %8758 = vmatpush.bf16.msra.mxu2 %v11272_v25  ;;  %v11271_v50 = vld [vmem:[%s15512_s13 + $0x8] sm:$0xff]  ;;  %vm8709_vm13 = vcmask 523264   ;;  %vm9197_vm14 = vcmask 778240  }
 0x684   : > { %v8375_v37 = vrot.slane %v8363_v47, 3  ;;  %v8539_v23 = vpack.c.bf16 %v8537_v20, %v8537_v20  ;;  %8876 = vmatpush.bf16.msra.mxu0 %v11282_v15  ;;  %v11281_v47 = vld [vmem:[%s15512_s13 + $0x58] sm:$0xff]  ;;  %v11275_v20 = vld [vmem:[%s15512_s13 + $0x28] sm:$0xff]  ;;  %v11288_v15 = vld [vmem:[%s15512_s13 + $0x90] sm:$0xff] }
 0x685   : > { %10620 = vmatmul.msk.bf16.vlgmr.msrb.gmra.mxu3 %vm7930_vm8, %v8175_v12  ;;  %v8538_v1 = vpack.c.bf16 %v8536_v59, %v8535_v2  ;;  %vm9198_vm1 = vmand %vm9197_vm14, %vm661_vm2  ;;  %vm9538_vm2 = vcmask 73728  }
 0x686   : > { %8578 = vmatpush.bf16.msrb.mxu3 %v11269_v3  ;;  %v8377_v40 = vsel %vm8374_vm12, %v8375_v37, %v8376_v49  ;;  %v8550_v10 = vrot.slane %v8539_v23, 1  ;;  %v707_v3 = vsel %vm705_vm7, 0, %v706_v14  ;;  %v11277_v49 = vld [vmem:[%s15512_s13 + $0x38] sm:$0xff]  ;;  %v11278_v23 = vld [vmem:[%s15512_s13 + $0x40] sm:$0xff]  ;;  %v11291_v14 = vld [vmem:[%s15512_s13 + $0xa8] sm:$0xff]  ;;  %vm9190_vm12 = vcmask 779264  }
 0x687   : > { %v8549_v31 = vrot.slane %v8538_v1, 1  ;;  %708 = vst [vmem:[#allocation5] sm:$0x3] %v707_v3  ;;  %8759 = vmatpush.bf16.msra.mxu2 %v11271_v50  ;;  %v11270_v1 = vld [vmem:[%s15512_s13] sm:$0xff]  ;;  %v11300_v3 = vld [vmem:[%s15512_s13 + $0xe8] sm:$0xff]  ;;  %vm9252_vm7 = vcmask 785408  }
 0x689   : > { %v8551_v63 = vsel %vm4232_vm15, %v8549_v31, %v8550_v10  ;;  %vm709_vm15 = vcmask 519171   ;;  %v11274_v10 = vld [vmem:[%s15512_s13 + $0x20] sm:$0xff] }
 0x68a   : > { %10639 = vmatmul.msk.bf16.vlgmr.msrb.gmra.mxu1 %vm7930_vm8, %v8243_v35  ;;  %8579 = vmatpush.bf16.msrb.mxu3 %v11268_v51 }
 0x68b   : > { %8717 = vmatpush.bf16.msrb.mxu1 %v11277_v49  ;;  %8760 = vmatpush.bf16.msra.mxu2 %v11270_v1 }
 0x68d   : > { %10719 = vmatmul.msk.bf16.vlgmr.msrb.gmra.mxu2 %vm7930_vm8, %v8493_v42 }
 0x68e   : > { %8580 = vmatpush.bf16.msrb.mxu3 %v11267_v32 }
 0x68f   : > { %8718 = vmatpush.bf16.msrb.mxu1 %v11276_v36  ;;  %v11298_v36 = vld [vmem:[#allocation5] sm:$0x10] }
 0x693   : > { %8719 = vmatpush.bf16.msrb.mxu1 %v11275_v20 }
 0x695   : > { %10677 = vmatmul.msk.bf16.vlgmr.msra.gmra.mxu3 %vm7930_vm8, %v8377_v40  ;;  %v11280_v40 = vld [vmem:[%s15512_s13 + $0x50] sm:$0xff] }
 0x696   : > { %8816 = vmatpush.bf16.msra.mxu3 %v11281_v47 }
 0x697   : > { %8720 = vmatpush.bf16.msrb.mxu1 %v11274_v10 }
 0x69a   : > { %10696 = vmatmul.msk.bf16.vlgmr.msra.gmra.mxu1 %vm7930_vm8, %v8419_v6  ;;  %8817 = vmatpush.bf16.msra.mxu3 %v11280_v40  ;;  %v11279_v6 = vld [vmem:[%s15512_s13 + $0x48] sm:$0xff] }
 0x69e   : > { %8818 = vmatpush.bf16.msra.mxu3 %v11279_v6  ;;  %v11306_v6 = vld [vmem:[%s15512_s13 + $0x118] sm:$0xff] }
 0x6a2   : > { %8819 = vmatpush.bf16.msra.mxu3 %v11278_v23 }
 0x6a5   : > { %10738 = vmatmul.msk.bf16.vlgmr.msrb.gmra.mxu3 %vm7930_vm8, %v8551_v63  ;;  %vm711_vm8 = vmand %vm709_vm15, %vm710_vm4  ;;  %v11293_v63 = vld [vmem:[%s15512_s13 + $0xb8] sm:$0xff] }
 0x6a6   : > { %v713_v43 = vsel %vm711_vm8, 0, %v712_v61  ;;  %8993 = vmatpush.bf16.msrb.mxu2 %v11293_v63  ;;  %v11295_v61 = vld [vmem:[%s15512_s13 + $0xc8] sm:$0xff] }
 0x6a7   : > { %714 = vst [vmem:[#allocation5] sm:$0x8] %v713_v43 }
 0x6f7   : > { %v8106_v58 = vpop.f32.mrf.mxu1 }
 0x6f8   : > { %v8141_v46 = vpop.f32.mrf.mxu3 }
 0x6f9   : > { %v8142_v28 = vadd.f32 %v8141_v46, %v8106_v58  ;;  %v11297_v58 = vld [vmem:[%s15512_s13 + $0xd8] sm:$0xff] }
 0x6fa   : > { %v11302_v46 = vld [vmem:[%s15512_s13 + $0xf8] sm:$0xff]  ;;  %9049 = vmatpush.bf16.msrb.mxu3 %v11297_v58 }
 0x6fb   : > { %9114 = vmatpush.bf16.msrb.mxu0 %v11302_v46 }
 0x6ff   : > { %v8108_v48 = vpop.f32.mrf.mxu1 }
 0x700   : > { %v8143_v0 = vpop.f32.mrf.mxu3  ;;  %v8343_v34 = vpop.f32.mrf.mxu2 }
 0x701   : > { %v8144_v17 = vadd.f32 %v8143_v0, %v8108_v48  ;;  %v11289_v0 = vld [vmem:[%s15512_s13 + $0x98] sm:$0xff]  ;;  %v11292_v48 = vld [vmem:[%s15512_s13 + $0xb0] sm:$0xff] }
 0x702   : > { %8935 = vmatpush.bf16.msra.mxu1 %v11289_v0  ;;  %8994 = vmatpush.bf16.msrb.mxu2 %v11292_v48  ;;  %v11304_v48 = vld [vmem:[%s15512_s13 + $0x108] sm:$0xff] }
 0x706   : > { %8936 = vmatpush.bf16.msra.mxu1 %v11288_v15  ;;  %8995 = vmatpush.bf16.msrb.mxu2 %v11291_v14 }
 0x707   : > { %v8274_v27 = vpop.f32.mrf.mxu1 }
 0x708   : > { %v8206_v16 = vpop.f32.mrf.mxu3  ;;  %v8345_v54 = vpop.f32.mrf.mxu2 }
 0x709   : > { %v8211_v55 = vadd.f32 %v8206_v16, %v8142_v28  ;;  %v11296_v16 = vld [vmem:[%s15512_s13 + $0xd0] sm:$0xff] }
 0x70a   : > { %v11301_v28 = vld [vmem:[%s15512_s13 + $0xf0] sm:$0xff]  ;;  %9050 = vmatpush.bf16.msrb.mxu3 %v11296_v16 }
 0x70b   : > { %v8279_v22 = vadd.f32 %v8274_v27, %v8211_v55  ;;  %9115 = vmatpush.bf16.msrb.mxu0 %v11301_v28 }
 0x70d   : > { %v8348_v44 = vadd.f32 %v8343_v34, %v8279_v22  ;;  %v11290_v22 = vld [vmem:[%s15512_s13 + $0xa0] sm:$0xff] }
 0x70e   : > { %9051 = vmatpush.bf16.msrb.mxu3 %v11295_v61  ;;  %8996 = vmatpush.bf16.msrb.mxu2 %v11290_v22 }
 0x70f   : > { %v8276_v8 = vpop.f32.mrf.mxu1  ;;  %9116 = vmatpush.bf16.msrb.mxu0 %v11300_v3 }
 0x710   : > { %v8208_v5 = vpop.f32.mrf.mxu3  ;;  %v8524_v62 = vpop.f32.mrf.mxu2 }
 0x711   : > { %v8212_v39 = vadd.f32 %v8208_v5, %v8144_v17 }
 0x713   : > { %v8280_v51 = vadd.f32 %v8276_v8, %v8212_v39 }
 0x715   : > { %v8349_v19 = vadd.f32 %v8345_v54, %v8280_v51  ;;  %v11294_v54 = vld [vmem:[%s15512_s13 + $0xc0] sm:$0xff] }
 0x716   : > { %v11286_v51 = vld [vmem:[%s15512_s13 + $0x80] sm:$0xff]  ;;  %9052 = vmatpush.bf16.msrb.mxu3 %v11294_v54 }
 0x717   : > { %v8457_v57 = vpop.f32.mrf.mxu1 }
 0x718   : > { %v8408_v12 = vpop.f32.mrf.mxu3  ;;  %v8526_v7 = vpop.f32.mrf.mxu2 }
 0x719   : > { %v8413_v45 = vadd.f32 %v8408_v12, %v8348_v44  ;;  %v11287_v12 = vld [vmem:[%s15512_s13 + $0x88] sm:$0xff]  ;;  %v11299_v44 = vld [vmem:[%s15512_s13 + $0xe0] sm:$0xff] }
 0x71a   : > { %8937 = vmatpush.bf16.msra.mxu1 %v11287_v12  ;;  %9117 = vmatpush.bf16.msrb.mxu0 %v11299_v44  ;;  %v9060_v12 = vld [vmem:[#allocation5 + $0x4] sm:$0x1] }
 0x71b   : > { %v8462_v13 = vadd.f32 %v8457_v57, %v8413_v45  ;;  %v8621_v45 = vld [vmem:[#allocation5] sm:$0xe]  ;;  %v8632_v57 = vand.u32 1, %v15472_v21 }
 0x71d   : > { %v8529_v11 = vadd.f32 %v8524_v62, %v8462_v13  ;;  %vm8640_vm3 = vcmp.ne.s32.totalorder %v8632_v57, 0  ;;  %vm8646_vm10 = vcmp.ne.s32.totalorder %v8632_v57, 1 }
 0x71e   : > { %8938 = vmatpush.bf16.msra.mxu1 %v11286_v51  ;;  %v10739_v62 = vsel %vm8640_vm3, 1.0, %v15476_v38  ;;  %v14935_v21 = vsel %vm8646_vm10, 1.0, %v15476_v38 }
 0x71f   : > { %v8459_v9 = vpop.f32.mrf.mxu1  ;;  %v8947_v50 = vrot.slane %v14935_v21, 4 }
 0x720   : > { %v8410_v53 = vpop.f32.mrf.mxu3 }
 0x721   : > { %v8414_v41 = vadd.f32 %v8410_v53, %v8349_v19  ;;  %v8770_v19 = vrot.slane %v14935_v21, 6 }
 0x723   : > { %v8463_v32 = vadd.f32 %v8459_v9, %v8414_v41  ;;  %v8827_v41 = vrot.slane %v10739_v62, 6 }
 0x725   : > { %v8530_v29 = vadd.f32 %v8526_v7, %v8463_v32 }
 0x728   : > { %v8582_v26 = vpop.f32.mrf.mxu3 }
 0x729   : > { %v8587_v35 = vadd.f32 %v8582_v26, %v8529_v11 }
 0x72b   : > { %v8589_v42 = vadd.f32 %v11557_v30, %v8587_v35 }
 0x72d   : > { %v8591_v33 = vmax.f32 %v8589_v42, 0.0 }
 0x72f   : > { %v8594_v4 = vrot.slane %v8591_v33, 4 }
 0x730   : > { %v8584_v37 = vpop.f32.mrf.mxu3 }
 0x731   : > { %v8596_v52 = vmax.f32 %v8591_v33, %v8594_v4  ;;  %v8588_v60 = vadd.f32 %v8584_v37, %v8530_v29 }
 0x733   : > { %8598 = vst.msk [vmem:[#allocation9] sm:$0xf] %vm8597_vm6, %v8596_v52  ;;  %v8590_v24 = vadd.f32 %v11557_v30, %v8588_v60 }
 0x735   : > { %v8592_v59 = vmax.f32 %v8590_v24, 0.0 }
 0x737   : > { %v8600_v2 = vrot.slane %v8592_v59, 4 }
 0x739   : > { %v8602_v31 = vmax.f32 %v8592_v59, %v8600_v2  ;;  %v9003_v2 = vrot.slane %v10739_v62, 4 }
 0x73b   : > { %8603 = vst.msk [vmem:[#allocation9 + $0x4] sm:$0xf] %vm8597_vm6, %v8602_v31  ;;  %v11305_v31 = vld [vmem:[%s15512_s13 + $0x110] sm:$0xff] }
 0x742   : > { %v8604_v27 = vld [vmem:[#allocation9] ss:$2 sm:$0xf]  ;;  %v8606_v34 = vld [vmem:[#allocation9 + $0x1] ss:$2 sm:$0xf] }
 0x743   : > { %v8607_v5 = vmax.f32 %v8604_v27, %v8606_v34 }
 0x745   : > { %v8608_v55 = vpack.c.bf16 %v8607_v5, %v8607_v5 }
 0x747   : > { %v8610_v8 = vshrl.u32 %v8608_v55, 16  ;;  %v8613_v43 = vshll.u32 %v8608_v55, 16  ;;  %v11303_v55 = vld [vmem:[%s15512_s13 + $0x100] sm:$0xff] }
 0x749   : > { %v8612_v17 = vrot.slane %v8610_v8, 6  ;;  %v8615_v39 = vrot.slane %v8613_v43, 7 }
 0x74b   : > { %v8616_v53 = vor.u32 %v8615_v39, %v8612_v17  ;;  %v9126_v17 = vunpack.c.l.bf16 %v9060_v12  ;;  %v9127_v39 = vrot.slane %v14935_v21, 2 }
 0x74d   : > { %v8622_v13 = vsel %vm8620_vm9, %v8616_v53, %v8621_v45  ;;  %v9130_v45 = vmul.f32 %v9127_v39, %v9126_v17 }
 0x74e   : > { %8623 = vst [vmem:[#allocation5] sm:$0xe] %v8622_v13 }
 0x755   : > { %v8652_v30 = vld [vmem:[#allocation5] sm:$0x3]  ;;  %v8945_v38 = vld [vmem:[#allocation5] sm:$0xc] }
 0x756   : > { %v8766_v11 = vld [vmem:[#allocation5] sm:$0x6]  ;;  %v8653_v35 = vunpack.c.l.bf16 %v8652_v30  ;;  %v8946_v24 = vunpack.c.l.bf16 %v8945_v38  ;;  %v9124_v22 = vld [vmem:[#allocation5] sm:$0x8] }
 0x757   : > { %v8665_v26 = vld [vmem:[#allocation5] sm:$0x7]  ;;  %v8767_v9 = vunpack.c.l.bf16 %v8766_v11  ;;  %v9125_v54 = vunpack.c.l.bf16 %v9124_v22 }
 0x758   : > { %v8676_v32 = vunpack.c.l.b16 %v8665_v26  ;;  %v8655_v42 = vmul.f32 %v10739_v62, %v8653_v35  ;;  %v8883_v25 = vld [vmem:[#allocation5] sm:$0xe]  ;;  %v8949_v23 = vmul.f32 %v8947_v50, %v8946_v24  ;;  %v9005_v63 = vmul.f32 %v9003_v2, %v8946_v24  ;;  %v11318_v50 = vld [vmem:[%s15114_s7 + $0x28] sm:$0xff] }
 0x759   : > { %v8772_v33 = vmul.f32 %v8770_v19, %v8767_v9  ;;  %v8829_v7 = vmul.f32 %v8827_v41, %v8767_v9  ;;  %v10918_v60 = vld [vmem:[#allocation5] sm:$0xc]  ;;  %v8894_v20 = vunpack.c.l.b16 %v8883_v25  ;;  %v9129_v44 = vmul.f32 %v9127_v39, %v9125_v54  ;;  %v11308_v2 = vld [vmem:[%s15514_s6 + $0x8] sm:$0xff] }
 0x75a   : > { %v8677_v18 = vpack.c.b16 %v8676_v32, %v8676_v32  ;;  %v8656_v56 = vpack.c.bf16 %v8655_v42, %v8655_v42  ;;  %v10919_v1 = vor.u32 %v11298_v36, %v10918_v60  ;;  %v8950_v0 = vpack.c.bf16 %v8949_v23, %v8949_v23  ;;  %v11309_v36 = vld [vmem:[%s15514_s6 + $0x10] sm:$0xff]  ;;  %v11316_v23 = vld [vmem:[%s15114_s7 + $0x18] sm:$0xff] }
 0x75b   : > { %v8773_v47 = vpack.c.bf16 %v8772_v33, %v8772_v33  ;;  %v8830_v49 = vpack.c.bf16 %v8829_v7, %v8829_v7  ;;  %v8895_v10 = vpack.c.b16 %v8894_v20, %v8894_v20  ;;  %v9006_v34 = vpack.c.bf16 %v9005_v63, %v9005_v63 }
 0x75c   : > { %v8681_v4 = vshll.u32 %v8677_v18, 16  ;;  %10782 = vmatmul.msk.bf16.vlgmr.msra.gmra.mxu2 %vm8709_vm13, %v8656_v56  ;;  %v8679_v40 = vshrl.u32 %v8677_v18, 16  ;;  %v9076_v58 = vshrl.u32 %v10919_v1, 16  ;;  %v9079_v46 = vshll.u32 %v10919_v1, 16 }
 0x75d   : > { %v8784_v29 = vrot.slane %v8773_v47, 1  ;;  %v8841_v37 = vrot.slane %v8830_v49, 1  ;;  %v8897_v16 = vshrl.u32 %v8895_v10, 16  ;;  %v8900_v27 = vshll.u32 %v8895_v10, 16  ;;  %v11312_v47 = vld [vmem:[%s15514_s6 + $0x28] sm:$0xff]  ;;  %v11307_v10 = vld [vmem:[%s15514_s6] sm:$0xff] }
 0x75e   : > { %v8683_v52 = vrot.slane %v8681_v4, 1  ;;  %v9078_v5 = vrot.slane %v9076_v58, 2  ;;  %v9081_v28 = vrot.slane %v9079_v46, 3  ;;  %v8961_v15 = vrot.slane %v8950_v0, 2  ;;  %9258 = vmatpush.bf16.msra.mxu2 %v11312_v47  ;;  %v11311_v4 = vld [vmem:[%s15514_s6 + $0x20] sm:$0xff]  ;;  %v11315_v46 = vld [vmem:[%s15114_s7 + $0x10] sm:$0xff] }
 0x75f   : > { %10807 = vmatmul.msk.bf16.vlgmr.msra.gmra.mxu3 %vm8709_vm13, %v8784_v29  ;;  %10832 = vmatmul.msk.bf16.vlgmr.msra.gmra.mxu0 %vm8709_vm13, %v8841_v37  ;;  %v8899_v14 = vrot.slane %v8897_v16, 1  ;;  %v8902_v61 = vrot.slane %v8900_v27, 2  ;;  %v9017_v3 = vrot.slane %v9006_v34, 2  ;;  %v9131_v57 = vpack.c.bf16 %v9130_v45, %v9129_v44  ;;  %v9199_v27 = vld [vmem:[#allocation11] sm:$0x1]  ;;  %v11320_v44 = vld [vmem:[%s15115_s8 + $0x8] sm:$0xff] }
 0x760   : > { %v8684_v59 = vor.u32 %v8683_v52, %v8679_v40  ;;  %v9082_v8 = vor.u32 %v9081_v28, %v9078_v5  ;;  %v11310_v40 = vld [vmem:[%s15514_s6 + $0x18] sm:$0xff]  ;;  %v11558_v52 = vld [vmem:[%s15122_s15] ss:$0 sm:$0xff]  ;;  %9325 = vmatpush.bf16.msra.mxu3 %v11318_v50  ;;  %s11576_s6 = sshra.s32 %s9554_s4, 4  ;;  %s11577_s6 = int_to_ptr.hbm [resolvable:$true] %s11576_s6 }
 0x761   : > { %v8903_v43 = vor.u32 %v8902_v61, %v8899_v14  ;;  %v9142_v53 = vrot.slane %v9131_v57, 3  ;;  %v11313_v14 = vld [vmem:[%s15114_s7] sm:$0xff]  ;;  %v11324_v61 = vld [vmem:[%s15115_s8 + $0x28] sm:$0xff]  ;;  %s11578_s12 = scalar_lea.hbm %s11577_s6, 1  ;;  %p11583_p0 = scmp.lt.s32.totalorder %s11577_s6, %s15128_s21 }
 0x762   : > { %10765 = vmatmul.msk.bf16.vlgmr.msrb.gmra.mxu1 %vm8709_vm13, %v8684_v59  ;;  %9259 = vmatpush.bf16.msra.mxu2 %v11311_v4  ;;  %v11317_v59 = vld [vmem:[%s15114_s7 + $0x20] sm:$0xff]  ;;  %v11330_v57 = vld [vmem:[%s15116_s9 + $0x28] sm:$0xff]  ;;  %p11579_p11 = scmp.ne.s32.totalorder %s11577_s6, %s11578_s12  ;;  %p11584_p1 = scmp.lt.s32.totalorder %s11582_s23, %s11578_s12 }
 0x763   : > { %9174 = vmatpush.bf16.msrb.mxu1 %v11306_v6  ;;  %9392 = vmatpush.bf16.msra.mxu0 %v11324_v61  ;;  %v11319_v45 = vld [vmem:[%s15115_s8] sm:$0xff] }
 0x764   : > { %9326 = vmatpush.bf16.msra.mxu3 %v11317_v59  ;;  %p11580_p12 = pnand %p11579_p11, %p11777_p5  ;;  %p11585_p2 = por %p11584_p1, %p11583_p0 }
 0x766   : > { %9260 = vmatpush.bf16.msra.mxu2 %v11310_v40  ;;  %p11581_p13 = pneg %p11580_p12 }
 0x767   : > { %9175 = vmatpush.bf16.msrb.mxu1 %v11305_v31 }
 0x768   : > { %9327 = vmatpush.bf16.msra.mxu3 %v11316_v23  ;;  %p11586_p3 = pnand %p11585_p2, %p11581_p13 }
 0x76a   : > { %9261 = vmatpush.bf16.msra.mxu2 %v11309_v36 }
 0x76b   : > { %9176 = vmatpush.bf16.msrb.mxu1 %v11304_v48 }
 0x76c   : > { %10882 = vmatmul.msk.bf16.vlgmr.msrb.gmra.mxu2 %vm8709_vm13, %v8961_v15  ;;  %9328 = vmatpush.bf16.msra.mxu3 %v11315_v46  ;;  %v11314_v15 = vld [vmem:[%s15114_s7 + $0x8] sm:$0xff] }
 0x76e   : > { %9262 = vmatpush.bf16.msra.mxu2 %v11308_v2 }
 0x76f   : > { %10907 = vmatmul.msk.bf16.vlgmr.msrb.gmra.mxu3 %vm8709_vm13, %v9017_v3  ;;  %10936 = vmatmul.msk.bf16.vlgmr.msrb.gmra.mxu0 %vm8709_vm13, %v9082_v8  ;;  %v11322_v3 = vld [vmem:[%s15115_s8 + $0x18] sm:$0xff]  ;;  %v11321_v8 = vld [vmem:[%s15115_s8 + $0x10] sm:$0xff] }
 0x770   : > { %9177 = vmatpush.bf16.msrb.mxu1 %v11303_v55  ;;  %9329 = vmatpush.bf16.msra.mxu3 %v11314_v15  ;;  %v11323_v55 = vld [vmem:[%s15115_s8 + $0x20] sm:$0xff] }
 0x771   : > { %9393 = vmatpush.bf16.msra.mxu0 %v11323_v55 }
 0x772   : > { %10857 = vmatmul.msk.bf16.vlgmr.msra.gmra.mxu1 %vm8709_vm13, %v8903_v43  ;;  %9263 = vmatpush.bf16.msra.mxu2 %v11307_v10  ;;  %v9215_v43 = vld [vmem:[%s15123_s16] sm:$0x1] }
 0x774   : > { %9330 = vmatpush.bf16.msra.mxu3 %v11313_v14  ;;  %9459 = vmatpush.bf16.msra.mxu1 %v11330_v57 }
 0x775   : > { %9394 = vmatpush.bf16.msra.mxu0 %v11322_v3 }
 0x779   : > { %9395 = vmatpush.bf16.msra.mxu0 %v11321_v8 }
 0x77d   : > { %9396 = vmatpush.bf16.msra.mxu0 %v11320_v44 }
 0x781   : > { %9397 = vmatpush.bf16.msra.mxu0 %v11319_v45 }
 0x782   : > { %10961 = vmatmul.msk.bf16.vlgmr.msrb.gmra.mxu1 %vm8709_vm13, %v9142_v53  ;;  %v11329_v53 = vld [vmem:[%s15116_s9 + $0x20] sm:$0xff] }
 0x783   : > { %9460 = vmatpush.bf16.msra.mxu1 %v11329_v53 }
 0x7dc   : > { %v8878_v51 = vpop.f32.mrf.mxu0 }
 0x7df   : > { %v8722_v13 = vpop.f32.mrf.mxu1  ;;  %v8762_v62 = vpop.f32.mrf.mxu2 }
 0x7e0   : > { %v8763_v11 = vadd.f32 %v8762_v62, %v8722_v13  ;;  %v11327_v13 = vld [vmem:[%s15116_s9 + $0x10] sm:$0xff]  ;;  %v9283_v62 = vld [vmem:[%s15124_s17] sm:$0x1] }
 0x7e2   : > { %v8821_v19 = vpop.f32.mrf.mxu3 }
 0x7e3   : > { %v8825_v9 = vadd.f32 %v8821_v19, %v8763_v11 }
 0x7e4   : > { %v8880_v41 = vpop.f32.mrf.mxu0 }
 0x7e5   : > { %v8882_v33 = vadd.f32 %v8878_v51, %v8825_v9  ;;  %v11328_v51 = vld [vmem:[%s15116_s9 + $0x18] sm:$0xff]  ;;  %v11325_v9 = vld [vmem:[%s15116_s9] sm:$0xff] }
 0x7e6   : > { %9461 = vmatpush.bf16.msra.mxu1 %v11328_v51 }
 0x7e7   : > { %v8724_v30 = vpop.f32.mrf.mxu1  ;;  %v8764_v26 = vpop.f32.mrf.mxu2 }
 0x7ea   : > { %v8823_v35 = vpop.f32.mrf.mxu3  ;;  %9462 = vmatpush.bf16.msra.mxu1 %v11327_v13 }
 0x7eb   : > { %v11326_v35 = vld [vmem:[%s15116_s9 + $0x8] sm:$0xff] }
 0x7ec   : > { %v9119_v32 = vpop.f32.mrf.mxu0 }
 0x7ee   : > { %9463 = vmatpush.bf16.msra.mxu1 %v11326_v35 }
 0x7ef   : > { %v8940_v42 = vpop.f32.mrf.mxu1  ;;  %v8998_v21 = vpop.f32.mrf.mxu2 }
 0x7f0   : > { %v8944_v7 = vadd.f32 %v8940_v42, %v8882_v33  ;;  %v11335_v42 = vld [vmem:[%s15117_s10 + $0x20] sm:$0xff]  ;;  %v11334_v33 = vld [vmem:[%s15117_s10 + $0x18] sm:$0xff] }
 0x7f2   : > { %v9054_v18 = vpop.f32.mrf.mxu3  ;;  %v9002_v49 = vadd.f32 %v8998_v21, %v8944_v7  ;;  %9464 = vmatpush.bf16.msra.mxu1 %v11325_v9  ;;  %v11333_v21 = vld [vmem:[%s15117_s10 + $0x10] sm:$0xff]  ;;  %v9350_v7 = vld [vmem:[%s15125_s18] sm:$0x1] }
 0x7f4   : > { %v9121_v56 = vpop.f32.mrf.mxu0  ;;  %v9058_v37 = vadd.f32 %v9054_v18, %v9002_v49 }
 0x7f6   : > { %v9123_v60 = vadd.f32 %v9119_v32, %v9058_v37  ;;  %v11336_v32 = vld [vmem:[%s15117_s10 + $0x28] sm:$0xff]  ;;  %v9417_v37 = vld [vmem:[%s15126_s19] sm:$0x1] }
 0x7f7   : > { %v8942_v38 = vpop.f32.mrf.mxu1  ;;  %v9000_v29 = vpop.f32.mrf.mxu2  ;;  %9526 = vmatpush.bf16.msrb.mxu2 %v11336_v32 }
 0x7f8   : > { %v11332_v38 = vld [vmem:[%s15117_s10 + $0x8] sm:$0xff]  ;;  %v11331_v29 = vld [vmem:[%s15117_s10] sm:$0xff] }
 0x7fa   : > { %v9056_v25 = vpop.f32.mrf.mxu3 }
 0x7fb   : > { %9527 = vmatpush.bf16.msrb.mxu2 %v11335_v42 }
 0x7ff   : > { %v9179_v24 = vpop.f32.mrf.mxu1  ;;  %9528 = vmatpush.bf16.msrb.mxu2 %v11334_v33 }
 0x800   : > { %v9183_v6 = vadd.f32 %v9179_v24, %v9123_v60  ;;  %v9484_v24 = vld [vmem:[%s15127_s20] sm:$0x1] }
 0x802   : > { %v9184_v20 = vadd.f32 %v11558_v52, %v9183_v6 }
 0x803   : > { %9529 = vmatpush.bf16.msrb.mxu2 %v11333_v21 }
 0x804   : > { %v9185_v1 = vmax.f32 %v9184_v20, 0.0 }
 0x806   : > { %v9187_v31 = vrot.slane %v9185_v1, 2 }
 0x807   : > { %v9181_v63 = vpop.f32.mrf.mxu1  ;;  %9530 = vmatpush.bf16.msrb.mxu2 %v11332_v38 }
 0x808   : > { %v9189_v58 = vmax.f32 %v9185_v1, %v9187_v31 }
 0x80a   : > { %9191 = vst.msk [vmem:[#allocation10] sm:$0x3] %vm9190_vm12, %v9189_v58 }
 0x80b   : > { %9531 = vmatpush.bf16.msrb.mxu2 %v11331_v29 }
 0x811   : > { %v9192_v0 = vld [vmem:[#allocation10] ss:$2 sm:$0x1]  ;;  %v9194_v48 = vld [vmem:[#allocation10 + $0x1] ss:$2 sm:$0x1] }
 0x812   : > { %v9195_v16 = vmax.f32 %v9192_v0, %v9194_v48 }
 0x814   : > { %v9196_v34 = vpack.c.bf16 %v9195_v16, %v9195_v16 }
 0x816   : > { %v9200_v5 = vsel %vm9198_vm1, %v9196_v34, %v9199_v27 }
 0x817   : > { %9201 = vst [vmem:[#allocation11] sm:$0x1] %v9200_v5 }
 0x81e   : > { %v9202_v28 = vld [vmem:[#allocation11] sm:$0x1] }
 0x81f   : > { %10986 = vmatmul.msk.bf16.vlgmr.msra.gmra.mxu2 %vm9252_vm7, %v9202_v28 }
 0x8a2   : > { %v9265_v12 = vpop.f32.mrf.mxu2 }
 0x8a3   : > { %v9266_v22 = vadd.f32 %v9265_v12, %v9215_v43 }
 0x8a5   : > { %v9269_v54 = vmax.f32 %v9266_v22, 0.0 }
 0x8a7   : > { %v9270_v17 = vpack.c.bf16 %v9269_v54, %v9269_v54 }
 0x8a9   : > { %11011 = vmatmul.msk.bf16.vlgmr.msra.gmra.mxu3 %vm9252_vm7, %v9270_v17 }
 0x8aa   : > { %v9267_v39 = vpop.f32.mrf.mxu2 }
 0x92c   : > { %v9332_v19 = vpop.f32.mrf.mxu3 }
 0x92d   : > { %v9333_v41 = vadd.f32 %v9332_v19, %v9283_v62 }
 0x92f   : > { %v9336_v30 = vmax.f32 %v9333_v41, 0.0 }
 0x931   : > { %v9337_v11 = vpack.c.bf16 %v9336_v30, %v9336_v30 }
 0x933   : > { %11036 = vmatmul.msk.bf16.vlgmr.msra.gmra.mxu0 %vm9252_vm7, %v9337_v11 }
 0x934   : > { %v9334_v26 = vpop.f32.mrf.mxu3 }
 0x9b0   : > { %v9399_v18 = vpop.f32.mrf.mxu0 }
 0x9b1   : > { %v9400_v56 = vadd.f32 %v9399_v18, %v9350_v7 }
 0x9b3   : > { %v9403_v47 = vmax.f32 %v9400_v56, 0.0 }
 0x9b5   : > { %v9404_v49 = vpack.c.bf16 %v9403_v47, %v9403_v47 }
 0x9b7   : > { %11061 = vmatmul.msk.bf16.vlgmr.msra.gmra.mxu1 %vm9252_vm7, %v9404_v49 }
 0x9b8   : > { %v9401_v4 = vpop.f32.mrf.mxu0 }
 0xa34   : > { %v9466_v25 = vpop.f32.mrf.mxu1 }
 0xa35   : > { %v9467_v40 = vadd.f32 %v9466_v25, %v9417_v37 }
 0xa37   : > { %v9470_v52 = vmax.f32 %v9467_v40, 0.0 }
 0xa39   : > { %v9471_v60 = vpack.c.bf16 %v9470_v52, %v9470_v52 }
 0xa3b   : > { %11086 = vmatmul.msk.bf16.vlgmr.msrb.gmra.mxu2 %vm9252_vm7, %v9471_v60 }
 0xa3c   : > { %v9468_v36 = vpop.f32.mrf.mxu1 }
 0xabe   : > { %v9533_v50 = vpop.f32.mrf.mxu2 }
 0xabf   : > { %v9534_v6 = vadd.f32 %v9533_v50, %v9484_v24 }
 0xac1   : > { %v9537_v59 = vmax.f32 %v9534_v6, 0.0 }
 0xac3   : > { %9539 = vst.msk [vmem:[%s649_s28] sm:$0x1] %vm9538_vm2, %v9537_v59 }
 0xac4   : > { %11589 = shalt.err (!%p11586_p3)
}
 0xac5   : > { %11512 = dma.vmem_to_hbm [thread:$0]  (%p11777_p5), %s9552_s0, 16, %s9554_s4, %s9541_s26  }
 0xac6   : > { %v9535_v20 = vpop.f32.mrf.mxu2 }
 0xac7 PF: > { %p11518_p4 = scmp.ge.s32.totalorder %s11624_s27, 2  ;;  %s9565_s28 = sand.u32 1, %s11612_s2  }
 0xac8   : > { %s9566_s3 = scalar_lea.sflag [#allocation13], %s9565_s28 }
 0xac9   : > { %p11515_p7 = pnand %p11518_p4, %p11781_p6 }
 0xacb   : > { %p11516_p8 = pneg %p11515_p7 }
 0xacd   : > { %11607 = dma.done.wait (%p11516_p8), %s9566_s3, 16  }
 0xace   : > { %11609 = vsyncadd (%p11516_p8), %s9566_s3, 4294967280  ;;  %s15516_s27 = sld [smem:[#allocation16_spill]]  ;;  %s15519_s2 = smov %s11616_s25 }
 0xacf   : > { %s15517_s6 = sld [smem:[#allocation15_spill]] }
 0xad0   : > { %s15518_s26 = sld [smem:[#allocation17_spill]] }
 0xad4   : > { %p31_p9 = scmp.ge.s32.totalorder %s15516_s27, 4  }
 0xad5   : > { %s15520_s25 = smov %s15517_s6 }
 0xad6   :  { %33 = sbr.rel (!%p31_p9) target bundleno = 14 (0xe), region = 254 }
 0xadb   :  { %9571 = vsyncpa [#allocation13], 1 }
 0xadc   :  { %9573 = vsyncpa [#allocation13 + $0x1], 1 }

</bundles_post_ra>
